<compile_context>
chip_gen: v5e
topology: v5e:2x2
jax: 0.10.0
libtpu: 0.0.40
codegen_flags: <defaults>
</compile_context>

<pallas_src>
import functools

import jax
import jax.numpy as jnp
from jax.experimental import pallas as pl
from jax.experimental.pallas import tpu as pltpu


# ----------------------------------------------------------------------------
# Pallas kernels
# ----------------------------------------------------------------------------
def _gemm_bias_act_kernel(w_ref, p_ref, b_ref, o_ref, *, act):
    # out(N, M) = act(W(N, K) @ P(K, M) + b(N, 1)); M (large) is the lane dim.
    acc = jnp.dot(w_ref[...], p_ref[...], preferred_element_type=jnp.float32)
    acc = acc + b_ref[...]                       # (N, 1) broadcasts over lanes
    if act == "relu":
        acc = jnp.maximum(acc, 0.0)
    o_ref[...] = acc.astype(o_ref.dtype)


def gemm_nt(w, p, b, act=None, out_dtype=jnp.bfloat16):
    """act(w @ p + b): w (N, K) bf16, p (K, M) bf16, b (N, 1) f32 -> (N, M)."""
    N, K = w.shape
    K2, M = p.shape
    assert K == K2
    # Everything fits comfortably in VMEM -> one grid step per GEMM.  Split the
    # lane dim only when it divides cleanly (final deconv, M = 2048) so both
    # v7x TensorCores can be used without partial-block handling.
    mb = 1024 if (M % 1024 == 0 and M > 1024) else M
    return pl.pallas_call(
        functools.partial(_gemm_bias_act_kernel, act=act),
        out_shape=jax.ShapeDtypeStruct((N, M), out_dtype),
        grid_spec=pltpu.PrefetchScalarGridSpec(
            num_scalar_prefetch=0,
            grid=(M // mb,),
            in_specs=[
                pl.BlockSpec((N, K), lambda i: (0, 0)),
                pl.BlockSpec((K, mb), lambda i: (0, i)),
                pl.BlockSpec((N, 1), lambda i: (0, 0)),
            ],
            out_specs=pl.BlockSpec((N, mb), lambda i: (0, i)),
        ),
        compiler_params=pltpu.CompilerParams(dimension_semantics=("parallel",)),
    )(w, p, b)


def _fc_reparam_fc_kernel(h_ref, muw_ref, mub_ref, lvw_ref, lvb_ref,
                          dfw_ref, dfb_ref, eps_ref, mu_ref, lv_ref, d_ref):
    # encoder FC (split into mu / logvar heads) + reparameterize + decoder FC + ReLU
    h = h_ref[...]                                                    # (B, 256) bf16
    mu = jnp.dot(h, muw_ref[...], preferred_element_type=jnp.float32) + mub_ref[...]
    lv = jnp.dot(h, lvw_ref[...], preferred_element_type=jnp.float32) + lvb_ref[...]
    std = jnp.exp(lv * 0.5)
    z = eps_ref[...] * std + mu
    d = jnp.dot(z.astype(jnp.bfloat16), dfw_ref[...],
                preferred_element_type=jnp.float32) + dfb_ref[...]
    mu_ref[...] = mu
    lv_ref[...] = lv
    d_ref[...] = jnp.maximum(d, 0.0).astype(d_ref.dtype)


def fc_reparam_fc(h, eps, muw, mub, lvw, lvb, dfw, dfb):
    B = h.shape[0]
    L = muw.shape[1]
    D = dfw.shape[1]
    shapes = [h.shape, muw.shape, mub.shape, lvw.shape, lvb.shape,
              dfw.shape, dfb.shape, eps.shape]
    return pl.pallas_call(
        _fc_reparam_fc_kernel,
        out_shape=(jax.ShapeDtypeStruct((B, L), jnp.float32),
                   jax.ShapeDtypeStruct((B, L), jnp.float32),
                   jax.ShapeDtypeStruct((B, D), jnp.bfloat16)),
        grid_spec=pltpu.PrefetchScalarGridSpec(
            num_scalar_prefetch=0,
            grid=(1,),
            in_specs=[pl.BlockSpec(s, lambda i: (0, 0)) for s in shapes],
            out_specs=(pl.BlockSpec((B, L), lambda i: (0, 0)),
                       pl.BlockSpec((B, L), lambda i: (0, 0)),
                       pl.BlockSpec((B, D), lambda i: (0, 0))),
        ),
    )(h, muw, mub, lvw, lvb, dfw, dfb, eps)


# ----------------------------------------------------------------------------
# Conv / ConvTranspose wrappers (channel-major layout, glue in plain JAX)
# ----------------------------------------------------------------------------
def _im2col_cmajor(a, kh, kw, stride):
    """a: (C, B, H, W) -> P: (C*kh*kw, B*Ho*Wo) with lane dim = B*Ho*Wo."""
    C, B, H, W = a.shape
    Ho = (H - kh) // stride + 1
    Wo = (W - kw) // stride + 1
    slabs = [a[:, :, ki:ki + stride * Ho:stride, kj:kj + stride * Wo:stride]
             for ki in range(kh) for kj in range(kw)]
    p = jnp.stack(slabs, axis=1)                 # (C, kh*kw, B, Ho, Wo)
    return p.reshape(C * kh * kw, B * Ho * Wo), Ho, Wo


def conv2d_cm(a, wg, bg, stride, act):
    """Conv2d(k=4, pad=0) in channel-major layout. a: (Cin, B, H, W) bf16."""
    _, B, _, _ = a.shape
    p, Ho, Wo = _im2col_cmajor(a, 4, 4, stride)
    out = gemm_nt(wg, p, bg, act)                # (Cout, B*Ho*Wo) lane-dense
    return out.reshape(-1, B, Ho, Wo)


def deconv2d_cm(a, wg, bg, act, oppad_fill=None, out_dtype=jnp.bfloat16):
    """ConvTranspose2d(k=4, s=2, pad=0) via the 4-output-phase decomposition:
    each phase is a stride-1 2x2 conv of the 1-padded input -> one GEMM."""
    Cin, B, H, W = a.shape
    Hu, Wu = H + 1, W + 1
    ap = jnp.pad(a, ((0, 0), (0, 0), (1, 1), (1, 1)))
    slabs = [ap[:, :, di:di + Hu, dj:dj + Wu] for di in range(2) for dj in range(2)]
    p = jnp.stack(slabs, axis=1).reshape(Cin * 4, B * Hu * Wu)
    out = gemm_nt(wg, p, bg, act, out_dtype)     # (4*Cout, B*Hu*Wu)
    Cout = out.shape[0] // 4
    y = out.reshape(2, 2, Cout, B, Hu, Wu).transpose(2, 3, 4, 0, 5, 1)
    y = y.reshape(Cout, B, 2 * Hu, 2 * Wu)       # interleave the 4 phases
    if oppad_fill is not None:                   # output_padding=1: extra row/col
        fill = oppad_fill.astype(y.dtype)[:, None, None, None]
        col = jnp.broadcast_to(fill, (Cout, B, 2 * Hu, 1))
        y = jnp.concatenate([y, col], axis=3)
        row = jnp.broadcast_to(fill, (Cout, B, 1, 2 * Wu + 1))
        y = jnp.concatenate([y, row], axis=2)
    return y


# ----------------------------------------------------------------------------
# Parameters: deterministic init (PyTorch layout) + one-time GEMM repack
# ----------------------------------------------------------------------------
def init_params(key, n_latents=32, n_channels=3):
    ks = jax.random.split(key, 10)
    s = 0.05

    def nrm(k, shape):
        return s * jax.random.normal(k, shape, jnp.float32)

    p = {}
    p["e1w"] = nrm(ks[0], (32, n_channels, 4, 4)); p["e1b"] = jnp.zeros((32,), jnp.float32)
    p["e2w"] = nrm(ks[1], (32, 32, 4, 4));          p["e2b"] = jnp.zeros((32,), jnp.float32)
    p["e3w"] = nrm(ks[2], (64, 32, 4, 4));          p["e3b"] = jnp.zeros((64,), jnp.float32)
    p["e4w"] = nrm(ks[3], (64, 64, 4, 4));          p["e4b"] = jnp.zeros((64,), jnp.float32)
    p["efw"] = nrm(ks[4], (256, 2 * n_latents));    p["efb"] = jnp.zeros((2 * n_latents,), jnp.float32)
    p["dfw"] = nrm(ks[5], (n_latents, 256));        p["dfb"] = jnp.zeros((256,), jnp.float32)
    p["d1w"] = nrm(ks[6], (64, 64, 4, 4));          p["d1b"] = jnp.zeros((64,), jnp.float32)
    p["d2w"] = nrm(ks[7], (64, 32, 4, 4));          p["d2b"] = jnp.zeros((32,), jnp.float32)
    p["d3w"] = nrm(ks[8], (32, 32, 4, 4));          p["d3b"] = jnp.zeros((32,), jnp.float32)
    p["d4w"] = nrm(ks[9], (32, n_channels, 4, 4));  p["d4b"] = jnp.zeros((n_channels,), jnp.float32)
    return p


def _prep_conv(w, b):
    Cout = w.shape[0]
    return (w.reshape(Cout, -1).astype(jnp.bfloat16),
            b.reshape(Cout, 1).astype(jnp.float32))


def _prep_deconv(w, b):
    # w: (Cin, Cout, 4, 4) -> W_gemm (4*Cout, 4*Cin) with
    #   W_gemm[(p*2+q)*Cout + co, ci*4 + a*2 + bb] = w[ci, co, p + 2*(1-a), q + 2*(1-bb)]
    # so that each output phase (p, q) is a stride-1 2x2 conv of the 1-padded input.
    Cin, Cout = w.shape[0], w.shape[1]
    sub = jnp.stack([jnp.stack([w[:, :, ph::2, qh::2] for qh in range(2)], axis=0)
                     for ph in range(2)], axis=0)      # (p, q, ci, co, da, db)
    sub = sub[:, :, :, :, ::-1, ::-1]                  # -> (p, q, ci, co, a, bb)
    wg = sub.transpose(0, 1, 3, 2, 4, 5).reshape(4 * Cout, 4 * Cin)
    bg = jnp.tile(b, 4).reshape(4 * Cout, 1)
    return wg.astype(jnp.bfloat16), bg.astype(jnp.float32)


def prepare_params(p, n_latents=32):
    """Re-pack raw parameters into GEMM-ready bf16 layout (done once)."""
    L = n_latents
    pp = {}
    for name in ("e1", "e2", "e3", "e4"):
        pp[name + "w"], pp[name + "b"] = _prep_conv(p[name + "w"], p[name + "b"])
    pp["muw"] = p["efw"][:, :L].astype(jnp.bfloat16)
    pp["mub"] = p["efb"][:L].reshape(1, L).astype(jnp.float32)
    pp["lvw"] = p["efw"][:, L:].astype(jnp.bfloat16)
    pp["lvb"] = p["efb"][L:].reshape(1, L).astype(jnp.float32)
    pp["dfw"] = p["dfw"].astype(jnp.bfloat16)
    pp["dfb"] = p["dfb"].reshape(1, -1).astype(jnp.float32)
    for name in ("d1", "d2", "d3", "d4"):
        pp[name + "w"], pp[name + "b"] = _prep_deconv(p[name + "w"], p[name + "b"])
    # output_padding=1 positions of d3 receive bias only; d3 is followed by ReLU.
    pp["d3fill"] = jnp.maximum(p["d3b"], 0.0)
    return pp


# ----------------------------------------------------------------------------
# Forward
# ----------------------------------------------------------------------------
def beta_vae_forward(pp, x, eps, n_latents=32, n_channels=3):
    # ---- encode (channel-major activations: (C, B, H, W), bf16) ----
    x = x.reshape(-1, n_channels, 64, 64)
    a = x.transpose(1, 0, 2, 3).astype(jnp.bfloat16)
    a = conv2d_cm(a, pp["e1w"], pp["e1b"], 2, "relu")         # (32, B, 31, 31)
    a = conv2d_cm(a, pp["e2w"], pp["e2b"], 2, "relu")         # (32, B, 14, 14)
    a = conv2d_cm(a, pp["e3w"], pp["e3b"], 2, "relu")         # (64, B, 6, 6)
    a = conv2d_cm(a, pp["e4w"], pp["e4b"], 2, "relu")         # (64, B, 2, 2)
    B = a.shape[1]
    h = a.transpose(1, 0, 2, 3).reshape(B, 256)               # PyTorch View(-1, 256)

    # ---- encoder FC + reparameterize + decoder FC + ReLU (one fused kernel) ----
    mu, logvar, d = fc_reparam_fc(h, eps, pp["muw"], pp["mub"],
                                  pp["lvw"], pp["lvb"], pp["dfw"], pp["dfb"])

    # ---- decode ----
    a = d.reshape(B, 64, 2, 2).transpose(1, 0, 2, 3)          # (64, B, 2, 2)
    a = deconv2d_cm(a, pp["d1w"], pp["d1b"], "relu")          # (64, B, 6, 6)
    a = deconv2d_cm(a, pp["d2w"], pp["d2b"], "relu")          # (32, B, 14, 14)
    a = deconv2d_cm(a, pp["d3w"], pp["d3b"], "relu",
                    oppad_fill=pp["d3fill"])                  # (32, B, 31, 31)
    a = deconv2d_cm(a, pp["d4w"], pp["d4b"], None,
                    out_dtype=jnp.float32)                    # (3, B, 64, 64)
    recon = a.transpose(1, 0, 2, 3)                           # back to NCHW
    return recon, mu, logvar


if __name__ == "__main__":
    n_latents, n_channels, batch = 32, 3, 2
    key = jax.random.PRNGKey(0)
    k_params, k_x, k_eps = jax.random.split(key, 3)

    raw = init_params(k_params, n_latents, n_channels)
    pp = prepare_params(raw, n_latents)

    # input must be 64x64 (the encoder's View(-1, 256) pins the spatial size)
    x = jax.random.normal(k_x, (batch, n_channels, 64, 64), jnp.float32)
    # samples ~ N(0, 1) for reparameterization (torch.normal equivalent)
    eps = jax.random.normal(k_eps, (batch, n_latents), jnp.float32)

    fwd = jax.jit(functools.partial(beta_vae_forward,
                                    n_latents=n_latents, n_channels=n_channels))
    recon, mu, logvar = fwd(pp, x, eps)
    jax.block_until_ready((recon, mu, logvar))

    assert recon.shape == (batch, n_channels, 64, 64), recon.shape
    assert mu.shape == (batch, n_latents), mu.shape
    assert logvar.shape == (batch, n_latents), logvar.shape
    assert bool(jnp.all(jnp.isfinite(recon)))
    assert bool(jnp.all(jnp.isfinite(mu)))
    assert bool(jnp.all(jnp.isfinite(logvar)))
    print("KERNEL_OK")
</pallas_src>

<mosaic_0001>
module attributes {stable_mosaic.version = 11 : i64} {
  func.func @_gemm_bias_act_kernel(%arg0: i32, %arg1: memref<32x48xbf16, #tpu.memory_space<vmem>>, %arg2: memref<48x1922xbf16, #tpu.memory_space<vmem>>, %arg3: memref<32x1xf32, #tpu.memory_space<vmem>>, %arg4: memref<32x1922xbf16, #tpu.memory_space<vmem>>) attributes {dimension_semantics = [#tpu.dimension_semantics<parallel>], iteration_bounds = array<i64: 1>, scalar_prefetch = 0 : i64, scratch_operands = 0 : i64, tpu.core_type = #tpu.core_type<tc>, window_params = [{pipeline_mode = #tpu.pipeline_mode<synchronous>, transform_indices = @transform_0, window_bounds = array<i64: 32, 48>}, {transform_indices = @transform_1, window_bounds = array<i64: 48, 1922>}, {pipeline_mode = #tpu.pipeline_mode<synchronous>, transform_indices = @transform_2, window_bounds = array<i64: 32, 1>}, {transform_indices = @transform_3, window_bounds = array<i64: 32, 1922>}]} {
    %c0 = arith.constant 0 : index
    %c0_0 = arith.constant 0 : index
    %0 = vector.load %arg1[%c0, %c0_0] : memref<32x48xbf16, #tpu.memory_space<vmem>>, vector<32x48xbf16>
    %c0_1 = arith.constant 0 : index
    %c0_2 = arith.constant 0 : index
    %1 = vector.load %arg2[%c0_1, %c0_2] : memref<48x1922xbf16, #tpu.memory_space<vmem>>, vector<48x1922xbf16>
    %cst = arith.constant dense<0.000000e+00> : vector<32x1922xf32>
    %2 = tpu.matmul %0, %1, %cst {dimension_numbers = #tpu.dot_dimension_numbers<[1], [0], [0], [1], [0, 0, 1, 1], [], []>} : vector<32x48xbf16>, vector<48x1922xbf16>, vector<32x1922xf32> -> vector<32x1922xf32>
    %c0_3 = arith.constant 0 : index
    %c0_4 = arith.constant 0 : index
    %3 = vector.load %arg3[%c0_3, %c0_4] : memref<32x1xf32, #tpu.memory_space<vmem>>, vector<32x1xf32>
    %4 = vector.broadcast %3 : vector<32x1xf32> to vector<32x1922xf32>
    %5 = arith.addf %2, %4 : vector<32x1922xf32>
    %cst_5 = arith.constant 0.000000e+00 : f32
    %6 = vector.broadcast %cst_5 : f32 to vector<32x1922xf32>
    %7 = arith.maximumf %5, %6 : vector<32x1922xf32>
    %8 = arith.truncf %7 : vector<32x1922xf32> to vector<32x1922xbf16>
    %c0_6 = arith.constant 0 : index
    %c0_7 = arith.constant 0 : index
    %9 = vector.load %arg4[%c0_6, %c0_7] : memref<32x1922xbf16, #tpu.memory_space<vmem>>, vector<32x1922xbf16>
    tpu.vector_store %arg4[%c0_6, %c0_7], %8 {strides = array<i32>} : memref<32x1922xbf16, #tpu.memory_space<vmem>>, vector<32x1922xbf16>,
    return
  }
  func.func @transform_0(%arg0: i32) -> (i32, i32) {
    %c0_i32 = arith.constant 0 : i32
    %c0_i32_0 = arith.constant 0 : i32
    %c0_i32_1 = arith.constant 0 : i32
    return %c0_i32, %c0_i32_0 : i32, i32
  }
  func.func @transform_1(%arg0: i32) -> (i32, i32) {
    %c0_i32 = arith.constant 0 : i32
    %c0_i32_0 = arith.constant 0 : i32
    return %c0_i32, %arg0 : i32, i32
  }
  func.func @transform_2(%arg0: i32) -> (i32, i32) {
    %c0_i32 = arith.constant 0 : i32
    %c0_i32_0 = arith.constant 0 : i32
    %c0_i32_1 = arith.constant 0 : i32
    return %c0_i32, %c0_i32_0 : i32, i32
  }
  func.func @transform_3(%arg0: i32) -> (i32, i32) {
    %c0_i32 = arith.constant 0 : i32
    %c0_i32_0 = arith.constant 0 : i32
    return %c0_i32, %arg0 : i32, i32
  }
}

module attributes {stable_mosaic.version = 11 : i64} {
  func.func @_gemm_bias_act_kernel(%arg0: i32, %arg1: memref<32x512xbf16, #tpu.memory_space<vmem>>, %arg2: memref<512x392xbf16, #tpu.memory_space<vmem>>, %arg3: memref<32x1xf32, #tpu.memory_space<vmem>>, %arg4: memref<32x392xbf16, #tpu.memory_space<vmem>>) attributes {dimension_semantics = [#tpu.dimension_semantics<parallel>], iteration_bounds = array<i64: 1>, scalar_prefetch = 0 : i64, scratch_operands = 0 : i64, tpu.core_type = #tpu.core_type<tc>, window_params = [{pipeline_mode = #tpu.pipeline_mode<synchronous>, transform_indices = @transform_0, window_bounds = array<i64: 32, 512>}, {transform_indices = @transform_1, window_bounds = array<i64: 512, 392>}, {pipeline_mode = #tpu.pipeline_mode<synchronous>, transform_indices = @transform_2, window_bounds = array<i64: 32, 1>}, {transform_indices = @transform_3, window_bounds = array<i64: 32, 392>}]} {
    %c0 = arith.constant 0 : index
    %c0_0 = arith.constant 0 : index
    %0 = vector.load %arg1[%c0, %c0_0] : memref<32x512xbf16, #tpu.memory_space<vmem>>, vector<32x512xbf16>
    %c0_1 = arith.constant 0 : index
    %c0_2 = arith.constant 0 : index
    %1 = vector.load %arg2[%c0_1, %c0_2] : memref<512x392xbf16, #tpu.memory_space<vmem>>, vector<512x392xbf16>
    %cst = arith.constant dense<0.000000e+00> : vector<32x392xf32>
    %2 = tpu.matmul %0, %1, %cst {dimension_numbers = #tpu.dot_dimension_numbers<[1], [0], [0], [1], [0, 0, 1, 1], [], []>} : vector<32x512xbf16>, vector<512x392xbf16>, vector<32x392xf32> -> vector<32x392xf32>
    %c0_3 = arith.constant 0 : index
    %c0_4 = arith.constant 0 : index
    %3 = vector.load %arg3[%c0_3, %c0_4] : memref<32x1xf32, #tpu.memory_space<vmem>>, vector<32x1xf32>
    %4 = vector.broadcast %3 : vector<32x1xf32> to vector<32x392xf32>
    %5 = arith.addf %2, %4 : vector<32x392xf32>
    %cst_5 = arith.constant 0.000000e+00 : f32
    %6 = vector.broadcast %cst_5 : f32 to vector<32x392xf32>
    %7 = arith.maximumf %5, %6 : vector<32x392xf32>
    %8 = arith.truncf %7 : vector<32x392xf32> to vector<32x392xbf16>
    %c0_6 = arith.constant 0 : index
    %c0_7 = arith.constant 0 : index
    %9 = vector.load %arg4[%c0_6, %c0_7] : memref<32x392xbf16, #tpu.memory_space<vmem>>, vector<32x392xbf16>
    tpu.vector_store %arg4[%c0_6, %c0_7], %8 {strides = array<i32>} : memref<32x392xbf16, #tpu.memory_space<vmem>>, vector<32x392xbf16>,
    return
  }
  func.func @transform_0(%arg0: i32) -> (i32, i32) {
    %c0_i32 = arith.constant 0 : i32
    %c0_i32_0 = arith.constant 0 : i32
    %c0_i32_1 = arith.constant 0 : i32
    return %c0_i32, %c0_i32_0 : i32, i32
  }
  func.func @transform_1(%arg0: i32) -> (i32, i32) {
    %c0_i32 = arith.constant 0 : i32
    %c0_i32_0 = arith.constant 0 : i32
    return %c0_i32, %arg0 : i32, i32
  }
  func.func @transform_2(%arg0: i32) -> (i32, i32) {
    %c0_i32 = arith.constant 0 : i32
    %c0_i32_0 = arith.constant 0 : i32
    %c0_i32_1 = arith.constant 0 : i32
    return %c0_i32, %c0_i32_0 : i32, i32
  }
  func.func @transform_3(%arg0: i32) -> (i32, i32) {
    %c0_i32 = arith.constant 0 : i32
    %c0_i32_0 = arith.constant 0 : i32
    return %c0_i32, %arg0 : i32, i32
  }
}

module attributes {stable_mosaic.version = 11 : i64} {
  func.func @_gemm_bias_act_kernel(%arg0: i32, %arg1: memref<64x512xbf16, #tpu.memory_space<vmem>>, %arg2: memref<512x72xbf16, #tpu.memory_space<vmem>>, %arg3: memref<64x1xf32, #tpu.memory_space<vmem>>, %arg4: memref<64x72xbf16, #tpu.memory_space<vmem>>) attributes {dimension_semantics = [#tpu.dimension_semantics<parallel>], iteration_bounds = array<i64: 1>, scalar_prefetch = 0 : i64, scratch_operands = 0 : i64, tpu.core_type = #tpu.core_type<tc>, window_params = [{pipeline_mode = #tpu.pipeline_mode<synchronous>, transform_indices = @transform_0, window_bounds = array<i64: 64, 512>}, {transform_indices = @transform_1, window_bounds = array<i64: 512, 72>}, {pipeline_mode = #tpu.pipeline_mode<synchronous>, transform_indices = @transform_2, window_bounds = array<i64: 64, 1>}, {transform_indices = @transform_3, window_bounds = array<i64: 64, 72>}]} {
    %c0 = arith.constant 0 : index
    %c0_0 = arith.constant 0 : index
    %0 = vector.load %arg1[%c0, %c0_0] : memref<64x512xbf16, #tpu.memory_space<vmem>>, vector<64x512xbf16>
    %c0_1 = arith.constant 0 : index
    %c0_2 = arith.constant 0 : index
    %1 = vector.load %arg2[%c0_1, %c0_2] : memref<512x72xbf16, #tpu.memory_space<vmem>>, vector<512x72xbf16>
    %cst = arith.constant dense<0.000000e+00> : vector<64x72xf32>
    %2 = tpu.matmul %0, %1, %cst {dimension_numbers = #tpu.dot_dimension_numbers<[1], [0], [0], [1], [0, 0, 1, 1], [], []>} : vector<64x512xbf16>, vector<512x72xbf16>, vector<64x72xf32> -> vector<64x72xf32>
    %c0_3 = arith.constant 0 : index
    %c0_4 = arith.constant 0 : index
    %3 = vector.load %arg3[%c0_3, %c0_4] : memref<64x1xf32, #tpu.memory_space<vmem>>, vector<64x1xf32>
    %4 = vector.broadcast %3 : vector<64x1xf32> to vector<64x72xf32>
    %5 = arith.addf %2, %4 : vector<64x72xf32>
    %cst_5 = arith.constant 0.000000e+00 : f32
    %6 = vector.broadcast %cst_5 : f32 to vector<64x72xf32>
    %7 = arith.maximumf %5, %6 : vector<64x72xf32>
    %8 = arith.truncf %7 : vector<64x72xf32> to vector<64x72xbf16>
    %c0_6 = arith.constant 0 : index
    %c0_7 = arith.constant 0 : index
    %9 = vector.load %arg4[%c0_6, %c0_7] : memref<64x72xbf16, #tpu.memory_space<vmem>>, vector<64x72xbf16>
    tpu.vector_store %arg4[%c0_6, %c0_7], %8 {strides = array<i32>} : memref<64x72xbf16, #tpu.memory_space<vmem>>, vector<64x72xbf16>,
    return
  }
  func.func @transform_0(%arg0: i32) -> (i32, i32) {
    %c0_i32 = arith.constant 0 : i32
    %c0_i32_0 = arith.constant 0 : i32
    %c0_i32_1 = arith.constant 0 : i32
    return %c0_i32, %c0_i32_0 : i32, i32
  }
  func.func @transform_1(%arg0: i32) -> (i32, i32) {
    %c0_i32 = arith.constant 0 : i32
    %c0_i32_0 = arith.constant 0 : i32
    return %c0_i32, %arg0 : i32, i32
  }
  func.func @transform_2(%arg0: i32) -> (i32, i32) {
    %c0_i32 = arith.constant 0 : i32
    %c0_i32_0 = arith.constant 0 : i32
    %c0_i32_1 = arith.constant 0 : i32
    return %c0_i32, %c0_i32_0 : i32, i32
  }
  func.func @transform_3(%arg0: i32) -> (i32, i32) {
    %c0_i32 = arith.constant 0 : i32
    %c0_i32_0 = arith.constant 0 : i32
    return %c0_i32, %arg0 : i32, i32
  }
}

module attributes {stable_mosaic.version = 11 : i64} {
  func.func @_gemm_bias_act_kernel(%arg0: i32, %arg1: memref<64x1024xbf16, #tpu.memory_space<vmem>>, %arg2: memref<1024x8xbf16, #tpu.memory_space<vmem>>, %arg3: memref<64x1xf32, #tpu.memory_space<vmem>>, %arg4: memref<64x8xbf16, #tpu.memory_space<vmem>>) attributes {dimension_semantics = [#tpu.dimension_semantics<parallel>], iteration_bounds = array<i64: 1>, scalar_prefetch = 0 : i64, scratch_operands = 0 : i64, tpu.core_type = #tpu.core_type<tc>, window_params = [{pipeline_mode = #tpu.pipeline_mode<synchronous>, transform_indices = @transform_0, window_bounds = array<i64: 64, 1024>}, {transform_indices = @transform_1, window_bounds = array<i64: 1024, 8>}, {pipeline_mode = #tpu.pipeline_mode<synchronous>, transform_indices = @transform_2, window_bounds = array<i64: 64, 1>}, {transform_indices = @transform_3, window_bounds = array<i64: 64, 8>}]} {
    %c0 = arith.constant 0 : index
    %c0_0 = arith.constant 0 : index
    %0 = vector.load %arg1[%c0, %c0_0] : memref<64x1024xbf16, #tpu.memory_space<vmem>>, vector<64x1024xbf16>
    %c0_1 = arith.constant 0 : index
    %c0_2 = arith.constant 0 : index
    %1 = vector.load %arg2[%c0_1, %c0_2] : memref<1024x8xbf16, #tpu.memory_space<vmem>>, vector<1024x8xbf16>
    %cst = arith.constant dense<0.000000e+00> : vector<64x8xf32>
    %2 = tpu.matmul %0, %1, %cst {dimension_numbers = #tpu.dot_dimension_numbers<[1], [0], [0], [1], [0, 0, 1, 1], [], []>} : vector<64x1024xbf16>, vector<1024x8xbf16>, vector<64x8xf32> -> vector<64x8xf32>
    %c0_3 = arith.constant 0 : index
    %c0_4 = arith.constant 0 : index
    %3 = vector.load %arg3[%c0_3, %c0_4] : memref<64x1xf32, #tpu.memory_space<vmem>>, vector<64x1xf32>
    %4 = vector.broadcast %3 : vector<64x1xf32> to vector<64x8xf32>
    %5 = arith.addf %2, %4 : vector<64x8xf32>
    %cst_5 = arith.constant 0.000000e+00 : f32
    %6 = vector.broadcast %cst_5 : f32 to vector<64x8xf32>
    %7 = arith.maximumf %5, %6 : vector<64x8xf32>
    %8 = arith.truncf %7 : vector<64x8xf32> to vector<64x8xbf16>
    %c0_6 = arith.constant 0 : index
    %c0_7 = arith.constant 0 : index
    %9 = vector.load %arg4[%c0_6, %c0_7] : memref<64x8xbf16, #tpu.memory_space<vmem>>, vector<64x8xbf16>
    tpu.vector_store %arg4[%c0_6, %c0_7], %8 {strides = array<i32>} : memref<64x8xbf16, #tpu.memory_space<vmem>>, vector<64x8xbf16>,
    return
  }
  func.func @transform_0(%arg0: i32) -> (i32, i32) {
    %c0_i32 = arith.constant 0 : i32
    %c0_i32_0 = arith.constant 0 : i32
    %c0_i32_1 = arith.constant 0 : i32
    return %c0_i32, %c0_i32_0 : i32, i32
  }
  func.func @transform_1(%arg0: i32) -> (i32, i32) {
    %c0_i32 = arith.constant 0 : i32
    %c0_i32_0 = arith.constant 0 : i32
    return %c0_i32, %arg0 : i32, i32
  }
  func.func @transform_2(%arg0: i32) -> (i32, i32) {
    %c0_i32 = arith.constant 0 : i32
    %c0_i32_0 = arith.constant 0 : i32
    %c0_i32_1 = arith.constant 0 : i32
    return %c0_i32, %c0_i32_0 : i32, i32
  }
  func.func @transform_3(%arg0: i32) -> (i32, i32) {
    %c0_i32 = arith.constant 0 : i32
    %c0_i32_0 = arith.constant 0 : i32
    return %c0_i32, %arg0 : i32, i32
  }
}

module attributes {stable_mosaic.version = 11 : i64} {
  func.func @_fc_reparam_fc_kernel(%arg0: i32, %arg1: memref<2x256xbf16, #tpu.memory_space<vmem>>, %arg2: memref<256x32xbf16, #tpu.memory_space<vmem>>, %arg3: memref<1x32xf32, #tpu.memory_space<vmem>>, %arg4: memref<256x32xbf16, #tpu.memory_space<vmem>>, %arg5: memref<1x32xf32, #tpu.memory_space<vmem>>, %arg6: memref<32x256xbf16, #tpu.memory_space<vmem>>, %arg7: memref<1x256xf32, #tpu.memory_space<vmem>>, %arg8: memref<2x32xf32, #tpu.memory_space<vmem>>, %arg9: memref<2x32xf32, #tpu.memory_space<vmem>>, %arg10: memref<2x32xf32, #tpu.memory_space<vmem>>, %arg11: memref<2x256xbf16, #tpu.memory_space<vmem>>) attributes {dimension_semantics = [#tpu.dimension_semantics<arbitrary>], iteration_bounds = array<i64: 1>, scalar_prefetch = 0 : i64, scratch_operands = 0 : i64, tpu.core_type = #tpu.core_type<tc>, window_params = [{pipeline_mode = #tpu.pipeline_mode<synchronous>, transform_indices = @transform_0, window_bounds = array<i64: 2, 256>}, {pipeline_mode = #tpu.pipeline_mode<synchronous>, transform_indices = @transform_1, window_bounds = array<i64: 256, 32>}, {pipeline_mode = #tpu.pipeline_mode<synchronous>, transform_indices = @transform_2, window_bounds = array<i64: 1, 32>}, {pipeline_mode = #tpu.pipeline_mode<synchronous>, transform_indices = @transform_3, window_bounds = array<i64: 256, 32>}, {pipeline_mode = #tpu.pipeline_mode<synchronous>, transform_indices = @transform_4, window_bounds = array<i64: 1, 32>}, {pipeline_mode = #tpu.pipeline_mode<synchronous>, transform_indices = @transform_5, window_bounds = array<i64: 32, 256>}, {pipeline_mode = #tpu.pipeline_mode<synchronous>, transform_indices = @transform_6, window_bounds = array<i64: 1, 256>}, {pipeline_mode = #tpu.pipeline_mode<synchronous>, transform_indices = @transform_7, window_bounds = array<i64: 2, 32>}, {pipeline_mode = #tpu.pipeline_mode<synchronous>, transform_indices = @transform_8, window_bounds = array<i64: 2, 32>}, {pipeline_mode = #tpu.pipeline_mode<synchronous>, transform_indices = @transform_9, window_bounds = array<i64: 2, 32>}, {pipeline_mode = #tpu.pipeline_mode<synchronous>, transform_indices = @transform_10, window_bounds = array<i64: 2, 256>}]} {
    %c0 = arith.constant 0 : index
    %c0_0 = arith.constant 0 : index
    %0 = vector.load %arg1[%c0, %c0_0] : memref<2x256xbf16, #tpu.memory_space<vmem>>, vector<2x256xbf16>
    %c0_1 = arith.constant 0 : index
    %c0_2 = arith.constant 0 : index
    %1 = vector.load %arg2[%c0_1, %c0_2] : memref<256x32xbf16, #tpu.memory_space<vmem>>, vector<256x32xbf16>
    %cst = arith.constant dense<0.000000e+00> : vector<2x32xf32>
    %2 = tpu.matmul %0, %1, %cst {dimension_numbers = #tpu.dot_dimension_numbers<[1], [0], [0], [1], [0, 0, 1, 1], [], []>} : vector<2x256xbf16>, vector<256x32xbf16>, vector<2x32xf32> -> vector<2x32xf32>
    %c0_3 = arith.constant 0 : index
    %c0_4 = arith.constant 0 : index
    %3 = vector.load %arg3[%c0_3, %c0_4] : memref<1x32xf32, #tpu.memory_space<vmem>>, vector<1x32xf32>
    %4 = vector.broadcast %3 : vector<1x32xf32> to vector<2x32xf32>
    %5 = arith.addf %2, %4 : vector<2x32xf32>
    %c0_5 = arith.constant 0 : index
    %c0_6 = arith.constant 0 : index
    %6 = vector.load %arg4[%c0_5, %c0_6] : memref<256x32xbf16, #tpu.memory_space<vmem>>, vector<256x32xbf16>
    %cst_7 = arith.constant dense<0.000000e+00> : vector<2x32xf32>
    %7 = tpu.matmul %0, %6, %cst_7 {dimension_numbers = #tpu.dot_dimension_numbers<[1], [0], [0], [1], [0, 0, 1, 1], [], []>} : vector<2x256xbf16>, vector<256x32xbf16>, vector<2x32xf32> -> vector<2x32xf32>
    %c0_8 = arith.constant 0 : index
    %c0_9 = arith.constant 0 : index
    %8 = vector.load %arg5[%c0_8, %c0_9] : memref<1x32xf32, #tpu.memory_space<vmem>>, vector<1x32xf32>
    %9 = vector.broadcast %8 : vector<1x32xf32> to vector<2x32xf32>
    %10 = arith.addf %7, %9 : vector<2x32xf32>
    %cst_10 = arith.constant 5.000000e-01 : f32
    %11 = vector.broadcast %cst_10 : f32 to vector<2x32xf32>
    %12 = arith.mulf %10, %11 : vector<2x32xf32>
    %13 = math.exp %12 : vector<2x32xf32>
    %c0_11 = arith.constant 0 : index
    %c0_12 = arith.constant 0 : index
    %14 = vector.load %arg8[%c0_11, %c0_12] : memref<2x32xf32, #tpu.memory_space<vmem>>, vector<2x32xf32>
    %15 = arith.mulf %14, %13 : vector<2x32xf32>
    %16 = arith.addf %15, %5 : vector<2x32xf32>
    %17 = arith.truncf %16 : vector<2x32xf32> to vector<2x32xbf16>
    %c0_13 = arith.constant 0 : index
    %c0_14 = arith.constant 0 : index
    %18 = vector.load %arg6[%c0_13, %c0_14] : memref<32x256xbf16, #tpu.memory_space<vmem>>, vector<32x256xbf16>
    %cst_15 = arith.constant dense<0.000000e+00> : vector<2x256xf32>
    %19 = tpu.matmul %17, %18, %cst_15 {dimension_numbers = #tpu.dot_dimension_numbers<[1], [0], [0], [1], [0, 0, 1, 1], [], []>} : vector<2x32xbf16>, vector<32x256xbf16>, vector<2x256xf32> -> vector<2x256xf32>
    %c0_16 = arith.constant 0 : index
    %c0_17 = arith.constant 0 : index
    %20 = vector.load %arg7[%c0_16, %c0_17] : memref<1x256xf32, #tpu.memory_space<vmem>>, vector<1x256xf32>
    %21 = vector.broadcast %20 : vector<1x256xf32> to vector<2x256xf32>
    %22 = arith.addf %19, %21 : vector<2x256xf32>
    %c0_18 = arith.constant 0 : index
    %c0_19 = arith.constant 0 : index
    %23 = vector.load %arg9[%c0_18, %c0_19] : memref<2x32xf32, #tpu.memory_space<vmem>>, vector<2x32xf32>
    tpu.vector_store %arg9[%c0_18, %c0_19], %5 {strides = array<i32>} : memref<2x32xf32, #tpu.memory_space<vmem>>, vector<2x32xf32>,
    %c0_20 = arith.constant 0 : index
    %c0_21 = arith.constant 0 : index
    %24 = vector.load %arg10[%c0_20, %c0_21] : memref<2x32xf32, #tpu.memory_space<vmem>>, vector<2x32xf32>
    tpu.vector_store %arg10[%c0_20, %c0_21], %10 {strides = array<i32>} : memref<2x32xf32, #tpu.memory_space<vmem>>, vector<2x32xf32>,
    %cst_22 = arith.constant 0.000000e+00 : f32
    %25 = vector.broadcast %cst_22 : f32 to vector<2x256xf32>
    %26 = arith.maximumf %22, %25 : vector<2x256xf32>
    %27 = arith.truncf %26 : vector<2x256xf32> to vector<2x256xbf16>
    %c0_23 = arith.constant 0 : index
    %c0_24 = arith.constant 0 : index
    %28 = vector.load %arg11[%c0_23, %c0_24] : memref<2x256xbf16, #tpu.memory_space<vmem>>, vector<2x256xbf16>
    tpu.vector_store %arg11[%c0_23, %c0_24], %27 {strides = array<i32>} : memref<2x256xbf16, #tpu.memory_space<vmem>>, vector<2x256xbf16>,
    return
  }
  func.func @transform_0(%arg0: i32) -> (i32, i32) {
    %c0_i32 = arith.constant 0 : i32
    %c0_i32_0 = arith.constant 0 : i32
    %c0_i32_1 = arith.constant 0 : i32
    return %c0_i32, %c0_i32_0 : i32, i32
  }
  func.func @transform_1(%arg0: i32) -> (i32, i32) {
    %c0_i32 = arith.constant 0 : i32
    %c0_i32_0 = arith.constant 0 : i32
    %c0_i32_1 = arith.constant 0 : i32
    return %c0_i32, %c0_i32_0 : i32, i32
  }
  func.func @transform_2(%arg0: i32) -> (i32, i32) {
    %c0_i32 = arith.constant 0 : i32
    %c0_i32_0 = arith.constant 0 : i32
    %c0_i32_1 = arith.constant 0 : i32
    return %c0_i32, %c0_i32_0 : i32, i32
  }
  func.func @transform_3(%arg0: i32) -> (i32, i32) {
    %c0_i32 = arith.constant 0 : i32
    %c0_i32_0 = arith.constant 0 : i32
    %c0_i32_1 = arith.constant 0 : i32
    return %c0_i32, %c0_i32_0 : i32, i32
  }
  func.func @transform_4(%arg0: i32) -> (i32, i32) {
    %c0_i32 = arith.constant 0 : i32
    %c0_i32_0 = arith.constant 0 : i32
    %c0_i32_1 = arith.constant 0 : i32
    return %c0_i32, %c0_i32_0 : i32, i32
  }
  func.func @transform_5(%arg0: i32) -> (i32, i32) {
    %c0_i32 = arith.constant 0 : i32
    %c0_i32_0 = arith.constant 0 : i32
    %c0_i32_1 = arith.constant 0 : i32
    return %c0_i32, %c0_i32_0 : i32, i32
  }
  func.func @transform_6(%arg0: i32) -> (i32, i32) {
    %c0_i32 = arith.constant 0 : i32
    %c0_i32_0 = arith.constant 0 : i32
    %c0_i32_1 = arith.constant 0 : i32
    return %c0_i32, %c0_i32_0 : i32, i32
  }
  func.func @transform_7(%arg0: i32) -> (i32, i32) {
    %c0_i32 = arith.constant 0 : i32
    %c0_i32_0 = arith.constant 0 : i32
    %c0_i32_1 = arith.constant 0 : i32
    return %c0_i32, %c0_i32_0 : i32, i32
  }
  func.func @transform_8(%arg0: i32) -> (i32, i32) {
    %c0_i32 = arith.constant 0 : i32
    %c0_i32_0 = arith.constant 0 : i32
    %c0_i32_1 = arith.constant 0 : i32
    return %c0_i32, %c0_i32_0 : i32, i32
  }
  func.func @transform_9(%arg0: i32) -> (i32, i32) {
    %c0_i32 = arith.constant 0 : i32
    %c0_i32_0 = arith.constant 0 : i32
    %c0_i32_1 = arith.constant 0 : i32
    return %c0_i32, %c0_i32_0 : i32, i32
  }
  func.func @transform_10(%arg0: i32) -> (i32, i32) {
    %c0_i32 = arith.constant 0 : i32
    %c0_i32_0 = arith.constant 0 : i32
    %c0_i32_1 = arith.constant 0 : i32
    return %c0_i32, %c0_i32_0 : i32, i32
  }
}

module attributes {stable_mosaic.version = 11 : i64} {
  func.func @_gemm_bias_act_kernel(%arg0: i32, %arg1: memref<256x256xbf16, #tpu.memory_space<vmem>>, %arg2: memref<256x18xbf16, #tpu.memory_space<vmem>>, %arg3: memref<256x1xf32, #tpu.memory_space<vmem>>, %arg4: memref<256x18xbf16, #tpu.memory_space<vmem>>) attributes {dimension_semantics = [#tpu.dimension_semantics<parallel>], iteration_bounds = array<i64: 1>, scalar_prefetch = 0 : i64, scratch_operands = 0 : i64, tpu.core_type = #tpu.core_type<tc>, window_params = [{pipeline_mode = #tpu.pipeline_mode<synchronous>, transform_indices = @transform_0, window_bounds = array<i64: 256, 256>}, {transform_indices = @transform_1, window_bounds = array<i64: 256, 18>}, {pipeline_mode = #tpu.pipeline_mode<synchronous>, transform_indices = @transform_2, window_bounds = array<i64: 256, 1>}, {transform_indices = @transform_3, window_bounds = array<i64: 256, 18>}]} {
    %c0 = arith.constant 0 : index
    %c0_0 = arith.constant 0 : index
    %0 = vector.load %arg1[%c0, %c0_0] : memref<256x256xbf16, #tpu.memory_space<vmem>>, vector<256x256xbf16>
    %c0_1 = arith.constant 0 : index
    %c0_2 = arith.constant 0 : index
    %1 = vector.load %arg2[%c0_1, %c0_2] : memref<256x18xbf16, #tpu.memory_space<vmem>>, vector<256x18xbf16>
    %cst = arith.constant dense<0.000000e+00> : vector<256x18xf32>
    %2 = tpu.matmul %0, %1, %cst {dimension_numbers = #tpu.dot_dimension_numbers<[1], [0], [0], [1], [0, 0, 1, 1], [], []>} : vector<256x256xbf16>, vector<256x18xbf16>, vector<256x18xf32> -> vector<256x18xf32>
    %c0_3 = arith.constant 0 : index
    %c0_4 = arith.constant 0 : index
    %3 = vector.load %arg3[%c0_3, %c0_4] : memref<256x1xf32, #tpu.memory_space<vmem>>, vector<256x1xf32>
    %4 = vector.broadcast %3 : vector<256x1xf32> to vector<256x18xf32>
    %5 = arith.addf %2, %4 : vector<256x18xf32>
    %cst_5 = arith.constant 0.000000e+00 : f32
    %6 = vector.broadcast %cst_5 : f32 to vector<256x18xf32>
    %7 = arith.maximumf %5, %6 : vector<256x18xf32>
    %8 = arith.truncf %7 : vector<256x18xf32> to vector<256x18xbf16>
    %c0_6 = arith.constant 0 : index
    %c0_7 = arith.constant 0 : index
    %9 = vector.load %arg4[%c0_6, %c0_7] : memref<256x18xbf16, #tpu.memory_space<vmem>>, vector<256x18xbf16>
    tpu.vector_store %arg4[%c0_6, %c0_7], %8 {strides = array<i32>} : memref<256x18xbf16, #tpu.memory_space<vmem>>, vector<256x18xbf16>,
    return
  }
  func.func @transform_0(%arg0: i32) -> (i32, i32) {
    %c0_i32 = arith.constant 0 : i32
    %c0_i32_0 = arith.constant 0 : i32
    %c0_i32_1 = arith.constant 0 : i32
    return %c0_i32, %c0_i32_0 : i32, i32
  }
  func.func @transform_1(%arg0: i32) -> (i32, i32) {
    %c0_i32 = arith.constant 0 : i32
    %c0_i32_0 = arith.constant 0 : i32
    return %c0_i32, %arg0 : i32, i32
  }
  func.func @transform_2(%arg0: i32) -> (i32, i32) {
    %c0_i32 = arith.constant 0 : i32
    %c0_i32_0 = arith.constant 0 : i32
    %c0_i32_1 = arith.constant 0 : i32
    return %c0_i32, %c0_i32_0 : i32, i32
  }
  func.func @transform_3(%arg0: i32) -> (i32, i32) {
    %c0_i32 = arith.constant 0 : i32
    %c0_i32_0 = arith.constant 0 : i32
    return %c0_i32, %arg0 : i32, i32
  }
}

module attributes {stable_mosaic.version = 11 : i64} {
  func.func @_gemm_bias_act_kernel(%arg0: i32, %arg1: memref<128x256xbf16, #tpu.memory_space<vmem>>, %arg2: memref<256x98xbf16, #tpu.memory_space<vmem>>, %arg3: memref<128x1xf32, #tpu.memory_space<vmem>>, %arg4: memref<128x98xbf16, #tpu.memory_space<vmem>>) attributes {dimension_semantics = [#tpu.dimension_semantics<parallel>], iteration_bounds = array<i64: 1>, scalar_prefetch = 0 : i64, scratch_operands = 0 : i64, tpu.core_type = #tpu.core_type<tc>, window_params = [{pipeline_mode = #tpu.pipeline_mode<synchronous>, transform_indices = @transform_0, window_bounds = array<i64: 128, 256>}, {transform_indices = @transform_1, window_bounds = array<i64: 256, 98>}, {pipeline_mode = #tpu.pipeline_mode<synchronous>, transform_indices = @transform_2, window_bounds = array<i64: 128, 1>}, {transform_indices = @transform_3, window_bounds = array<i64: 128, 98>}]} {
    %c0 = arith.constant 0 : index
    %c0_0 = arith.constant 0 : index
    %0 = vector.load %arg1[%c0, %c0_0] : memref<128x256xbf16, #tpu.memory_space<vmem>>, vector<128x256xbf16>
    %c0_1 = arith.constant 0 : index
    %c0_2 = arith.constant 0 : index
    %1 = vector.load %arg2[%c0_1, %c0_2] : memref<256x98xbf16, #tpu.memory_space<vmem>>, vector<256x98xbf16>
    %cst = arith.constant dense<0.000000e+00> : vector<128x98xf32>
    %2 = tpu.matmul %0, %1, %cst {dimension_numbers = #tpu.dot_dimension_numbers<[1], [0], [0], [1], [0, 0, 1, 1], [], []>} : vector<128x256xbf16>, vector<256x98xbf16>, vector<128x98xf32> -> vector<128x98xf32>
    %c0_3 = arith.constant 0 : index
    %c0_4 = arith.constant 0 : index
    %3 = vector.load %arg3[%c0_3, %c0_4] : memref<128x1xf32, #tpu.memory_space<vmem>>, vector<128x1xf32>
    %4 = vector.broadcast %3 : vector<128x1xf32> to vector<128x98xf32>
    %5 = arith.addf %2, %4 : vector<128x98xf32>
    %cst_5 = arith.constant 0.000000e+00 : f32
    %6 = vector.broadcast %cst_5 : f32 to vector<128x98xf32>
    %7 = arith.maximumf %5, %6 : vector<128x98xf32>
    %8 = arith.truncf %7 : vector<128x98xf32> to vector<128x98xbf16>
    %c0_6 = arith.constant 0 : index
    %c0_7 = arith.constant 0 : index
    %9 = vector.load %arg4[%c0_6, %c0_7] : memref<128x98xbf16, #tpu.memory_space<vmem>>, vector<128x98xbf16>
    tpu.vector_store %arg4[%c0_6, %c0_7], %8 {strides = array<i32>} : memref<128x98xbf16, #tpu.memory_space<vmem>>, vector<128x98xbf16>,
    return
  }
  func.func @transform_0(%arg0: i32) -> (i32, i32) {
    %c0_i32 = arith.constant 0 : i32
    %c0_i32_0 = arith.constant 0 : i32
    %c0_i32_1 = arith.constant 0 : i32
    return %c0_i32, %c0_i32_0 : i32, i32
  }
  func.func @transform_1(%arg0: i32) -> (i32, i32) {
    %c0_i32 = arith.constant 0 : i32
    %c0_i32_0 = arith.constant 0 : i32
    return %c0_i32, %arg0 : i32, i32
  }
  func.func @transform_2(%arg0: i32) -> (i32, i32) {
    %c0_i32 = arith.constant 0 : i32
    %c0_i32_0 = arith.constant 0 : i32
    %c0_i32_1 = arith.constant 0 : i32
    return %c0_i32, %c0_i32_0 : i32, i32
  }
  func.func @transform_3(%arg0: i32) -> (i32, i32) {
    %c0_i32 = arith.constant 0 : i32
    %c0_i32_0 = arith.constant 0 : i32
    return %c0_i32, %arg0 : i32, i32
  }
}

module attributes {stable_mosaic.version = 11 : i64} {
  func.func @_gemm_bias_act_kernel(%arg0: i32, %arg1: memref<128x128xbf16, #tpu.memory_space<vmem>>, %arg2: memref<128x450xbf16, #tpu.memory_space<vmem>>, %arg3: memref<128x1xf32, #tpu.memory_space<vmem>>, %arg4: memref<128x450xbf16, #tpu.memory_space<vmem>>) attributes {dimension_semantics = [#tpu.dimension_semantics<parallel>], iteration_bounds = array<i64: 1>, scalar_prefetch = 0 : i64, scratch_operands = 0 : i64, tpu.core_type = #tpu.core_type<tc>, window_params = [{pipeline_mode = #tpu.pipeline_mode<synchronous>, transform_indices = @transform_0, window_bounds = array<i64: 128, 128>}, {transform_indices = @transform_1, window_bounds = array<i64: 128, 450>}, {pipeline_mode = #tpu.pipeline_mode<synchronous>, transform_indices = @transform_2, window_bounds = array<i64: 128, 1>}, {transform_indices = @transform_3, window_bounds = array<i64: 128, 450>}]} {
    %c0 = arith.constant 0 : index
    %c0_0 = arith.constant 0 : index
    %0 = vector.load %arg1[%c0, %c0_0] : memref<128x128xbf16, #tpu.memory_space<vmem>>, vector<128x128xbf16>
    %c0_1 = arith.constant 0 : index
    %c0_2 = arith.constant 0 : index
    %1 = vector.load %arg2[%c0_1, %c0_2] : memref<128x450xbf16, #tpu.memory_space<vmem>>, vector<128x450xbf16>
    %cst = arith.constant dense<0.000000e+00> : vector<128x450xf32>
    %2 = tpu.matmul %0, %1, %cst {dimension_numbers = #tpu.dot_dimension_numbers<[1], [0], [0], [1], [0, 0, 1, 1], [], []>} : vector<128x128xbf16>, vector<128x450xbf16>, vector<128x450xf32> -> vector<128x450xf32>
    %c0_3 = arith.constant 0 : index
    %c0_4 = arith.constant 0 : index
    %3 = vector.load %arg3[%c0_3, %c0_4] : memref<128x1xf32, #tpu.memory_space<vmem>>, vector<128x1xf32>
    %4 = vector.broadcast %3 : vector<128x1xf32> to vector<128x450xf32>
    %5 = arith.addf %2, %4 : vector<128x450xf32>
    %cst_5 = arith.constant 0.000000e+00 : f32
    %6 = vector.broadcast %cst_5 : f32 to vector<128x450xf32>
    %7 = arith.maximumf %5, %6 : vector<128x450xf32>
    %8 = arith.truncf %7 : vector<128x450xf32> to vector<128x450xbf16>
    %c0_6 = arith.constant 0 : index
    %c0_7 = arith.constant 0 : index
    %9 = vector.load %arg4[%c0_6, %c0_7] : memref<128x450xbf16, #tpu.memory_space<vmem>>, vector<128x450xbf16>
    tpu.vector_store %arg4[%c0_6, %c0_7], %8 {strides = array<i32>} : memref<128x450xbf16, #tpu.memory_space<vmem>>, vector<128x450xbf16>,
    return
  }
  func.func @transform_0(%arg0: i32) -> (i32, i32) {
    %c0_i32 = arith.constant 0 : i32
    %c0_i32_0 = arith.constant 0 : i32
    %c0_i32_1 = arith.constant 0 : i32
    return %c0_i32, %c0_i32_0 : i32, i32
  }
  func.func @transform_1(%arg0: i32) -> (i32, i32) {
    %c0_i32 = arith.constant 0 : i32
    %c0_i32_0 = arith.constant 0 : i32
    return %c0_i32, %arg0 : i32, i32
  }
  func.func @transform_2(%arg0: i32) -> (i32, i32) {
    %c0_i32 = arith.constant 0 : i32
    %c0_i32_0 = arith.constant 0 : i32
    %c0_i32_1 = arith.constant 0 : i32
    return %c0_i32, %c0_i32_0 : i32, i32
  }
  func.func @transform_3(%arg0: i32) -> (i32, i32) {
    %c0_i32 = arith.constant 0 : i32
    %c0_i32_0 = arith.constant 0 : i32
    return %c0_i32, %arg0 : i32, i32
  }
}

module attributes {stable_mosaic.version = 11 : i64} {
  func.func @_gemm_bias_act_kernel(%arg0: i32, %arg1: memref<12x128xbf16, #tpu.memory_space<vmem>>, %arg2: memref<128x1024xbf16, #tpu.memory_space<vmem>>, %arg3: memref<12x1xf32, #tpu.memory_space<vmem>>, %arg4: memref<12x1024xf32, #tpu.memory_space<vmem>>) attributes {dimension_semantics = [#tpu.dimension_semantics<parallel>], iteration_bounds = array<i64: 2>, scalar_prefetch = 0 : i64, scratch_operands = 0 : i64, tpu.core_type = #tpu.core_type<tc>, window_params = [{pipeline_mode = #tpu.pipeline_mode<synchronous>, transform_indices = @transform_0, window_bounds = array<i64: 12, 128>}, {transform_indices = @transform_1, window_bounds = array<i64: 128, 1024>}, {pipeline_mode = #tpu.pipeline_mode<synchronous>, transform_indices = @transform_2, window_bounds = array<i64: 12, 1>}, {transform_indices = @transform_3, window_bounds = array<i64: 12, 1024>}]} {
    %c0 = arith.constant 0 : index
    %c0_0 = arith.constant 0 : index
    %0 = vector.load %arg1[%c0, %c0_0] : memref<12x128xbf16, #tpu.memory_space<vmem>>, vector<12x128xbf16>
    %c0_1 = arith.constant 0 : index
    %c0_2 = arith.constant 0 : index
    %1 = vector.load %arg2[%c0_1, %c0_2] : memref<128x1024xbf16, #tpu.memory_space<vmem>>, vector<128x1024xbf16>
    %cst = arith.constant dense<0.000000e+00> : vector<12x1024xf32>
    %2 = tpu.matmul %0, %1, %cst {dimension_numbers = #tpu.dot_dimension_numbers<[1], [0], [0], [1], [0, 0, 1, 1], [], []>} : vector<12x128xbf16>, vector<128x1024xbf16>, vector<12x1024xf32> -> vector<12x1024xf32>
    %c0_3 = arith.constant 0 : index
    %c0_4 = arith.constant 0 : index
    %3 = vector.load %arg3[%c0_3, %c0_4] : memref<12x1xf32, #tpu.memory_space<vmem>>, vector<12x1xf32>
    %4 = vector.broadcast %3 : vector<12x1xf32> to vector<12x1024xf32>
    %5 = arith.addf %2, %4 : vector<12x1024xf32>
    %c0_5 = arith.constant 0 : index
    %c0_6 = arith.constant 0 : index
    %6 = vector.load %arg4[%c0_5, %c0_6] : memref<12x1024xf32, #tpu.memory_space<vmem>>, vector<12x1024xf32>
    tpu.vector_store %arg4[%c0_5, %c0_6], %5 {strides = array<i32>} : memref<12x1024xf32, #tpu.memory_space<vmem>>, vector<12x1024xf32>,
    return
  }
  func.func @transform_0(%arg0: i32) -> (i32, i32) {
    %c0_i32 = arith.constant 0 : i32
    %c0_i32_0 = arith.constant 0 : i32
    %c0_i32_1 = arith.constant 0 : i32
    return %c0_i32, %c0_i32_0 : i32, i32
  }
  func.func @transform_1(%arg0: i32) -> (i32, i32) {
    %c0_i32 = arith.constant 0 : i32
    %c0_i32_0 = arith.constant 0 : i32
    return %c0_i32, %arg0 : i32, i32
  }
  func.func @transform_2(%arg0: i32) -> (i32, i32) {
    %c0_i32 = arith.constant 0 : i32
    %c0_i32_0 = arith.constant 0 : i32
    %c0_i32_1 = arith.constant 0 : i32
    return %c0_i32, %c0_i32_0 : i32, i32
  }
  func.func @transform_3(%arg0: i32) -> (i32, i32) {
    %c0_i32 = arith.constant 0 : i32
    %c0_i32_0 = arith.constant 0 : i32
    return %c0_i32, %arg0 : i32, i32
  }
}

</mosaic_0001>

<bundles_post_ra>
// kernel: beta_vae_forward.9
= control target key start
LH: loop header
LB: loop body
LE: loop exit
PB: predicated region body
PF: predicated region fallthrough
CT: control target
= control target key end

     0   :  { %v1072_v3 = vmov 0   ;;  %vm341_vm0 = vcmask 392192   ;;  %vm755_vm1 = vcmask 1043456   ;;  %vm756_vm2 = vcmask 15364   ;;  %s1647_s1 = inlined_call_operand.vmem [shape: bf16[48,1922], index: 1, kind: input, shape index: {}]   ;;  %s1648_s0 = inlined_call_operand.vmem [shape: bf16[32,48], index: 0, kind: input, shape index: {}]   ;;  %s1649_s2 = inlined_call_operand.vmem [shape: f32[32,1], index: 2, kind: input, shape index: {}]   ;;  %s1650_s3 = inlined_call_operand.vmem [shape: bf16[32,1922], index: 3, kind: output, shape index: {}]  }
   0x1   :  { %v925_v0 = vld [vmem:[%s1647_s1 + $0x100] sm:$0xf]  ;;  %v1053_v2 = vld [vmem:[%s1647_s1 + $0x104] sm:$0xf]  ;;  %1070 = vset.pattern.permute.xlu0 %v1072_v3  ;;  %1071 = vset.pattern.permute.xlu1 %v1072_v3  ;;  %v933_v6 = vld [vmem:[%s1647_s1 + $0x108] sm:$0xf] }
   0x2   :  { %v1061_v1 = vld [vmem:[%s1647_s1 + $0x13c] sm:$0xf0]  ;;  %v927_v5 = vld [vmem:[%s1647_s1 + $0x140] sm:$0xf0]  ;;  %v1062_v7 = vld [vmem:[%s1647_s1 + $0x144] sm:$0xf0] }
   0x3   :  { %v926_v4 = vor.u32 %v1061_v1, %v925_v0  ;;  %v930_v8 = vor.u32 %v1053_v2, %v927_v5  ;;  %v934_v9 = vor.u32 %v1062_v7, %v933_v6  ;;  %v1054_v10 = vld [vmem:[%s1647_s1 + $0x10c] sm:$0xf]  ;;  %v861_v12 = vld [vmem:[%s1647_s1 + $0x80] sm:$0xf]  ;;  %v1037_v15 = vld [vmem:[%s1647_s1 + $0x84] sm:$0xf] }
   0x4   :  { %v935_v11 = vld [vmem:[%s1647_s1 + $0x148] sm:$0xf0]  ;;  %v1045_v14 = vld [vmem:[%s1647_s1 + $0xbc] sm:$0xf0]  ;;  %v863_v16 = vld [vmem:[%s1647_s1 + $0xc0] sm:$0xf0] }
   0x5   :  { %353 = vmatpush.bf16.msra.mxu0 %v926_v4  ;;  %v938_v13 = vor.u32 %v1054_v10, %v935_v11  ;;  %372 = vmatpush.bf16.msra.mxu1 %v930_v8  ;;  %v862_v17 = vor.u32 %v1045_v14, %v861_v12  ;;  %v866_v18 = vor.u32 %v1037_v15, %v863_v16  ;;  %v869_v19 = vld [vmem:[%s1647_s1 + $0x88] sm:$0xf]  ;;  %v1038_v21 = vld [vmem:[%s1647_s1 + $0x8c] sm:$0xf]  ;;  %v797_v24 = vld [vmem:[%s1647_s1] sm:$0xf] }
   0x6   :  { %391 = vmatpush.bf16.msra.mxu2 %v934_v9  ;;  %v1046_v20 = vld [vmem:[%s1647_s1 + $0xc4] sm:$0xf0]  ;;  %v871_v23 = vld [vmem:[%s1647_s1 + $0xc8] sm:$0xf0]  ;;  %v1029_v25 = vld [vmem:[%s1647_s1 + $0x3c] sm:$0xf0] }
   0x7   :  { %410 = vmatpush.bf16.msra.mxu3 %v938_v13  ;;  %v870_v22 = vor.u32 %v1046_v20, %v869_v19  ;;  %v874_v26 = vor.u32 %v1038_v21, %v871_v23  ;;  %v1021_v27 = vld [vmem:[%s1647_s1 + $0x4] sm:$0xf]  ;;  %v805_v29 = vld [vmem:[%s1647_s1 + $0x8] sm:$0xf]  ;;  %v798_v30 = vor.u32 %v1029_v25, %v797_v24  ;;  %v1022_v32 = vld [vmem:[%s1647_s1 + $0xc] sm:$0xf] }
   0x8   :  { %v799_v28 = vld [vmem:[%s1647_s1 + $0x40] sm:$0xf0]  ;;  %v1030_v31 = vld [vmem:[%s1647_s1 + $0x44] sm:$0xf0]  ;;  %v807_v33 = vld [vmem:[%s1647_s1 + $0x48] sm:$0xf0] }
   0x9   :  { %354 = vmatpush.bf16.msra.mxu0 %v862_v17  ;;  %373 = vmatpush.bf16.msra.mxu1 %v866_v18  ;;  %v802_v34 = vor.u32 %v1021_v27, %v799_v28  ;;  %v806_v35 = vor.u32 %v1030_v31, %v805_v29  ;;  %v1168_v36 = vld [vmem:[%s1648_s0] sm:$0xff]  ;;  %v949_v37 = vld [vmem:[%s1647_s1 + $0x118] sm:$0xf]  ;;  %v810_v39 = vor.u32 %v1022_v32, %v807_v33  ;;  %v1056_v41 = vld [vmem:[%s1647_s1 + $0x11c] sm:$0xf] }
   0xa   :  { %392 = vmatpush.bf16.msra.mxu2 %v870_v22  ;;  %v1064_v38 = vld [vmem:[%s1647_s1 + $0x154] sm:$0xf0]  ;;  %v951_v42 = vld [vmem:[%s1647_s1 + $0x158] sm:$0xf0]  ;;  %v941_v43 = vld [vmem:[%s1647_s1 + $0x110] sm:$0xf] }
   0xb   :  { %411 = vmatpush.bf16.msra.mxu3 %v874_v26  ;;  %v950_v40 = vor.u32 %v1064_v38, %v949_v37  ;;  %v954_v44 = vor.u32 %v1056_v41, %v951_v42  ;;  %v1063_v45 = vld [vmem:[%s1647_s1 + $0x14c] sm:$0xf0]  ;;  %v1055_v46 = vld [vmem:[%s1647_s1 + $0x114] sm:$0xf]  ;;  %v885_v48 = vld [vmem:[%s1647_s1 + $0x98] sm:$0xf] }
   0xc   :  { %v943_v47 = vld [vmem:[%s1647_s1 + $0x150] sm:$0xf0]  ;;  %v1048_v49 = vld [vmem:[%s1647_s1 + $0xd4] sm:$0xf0]  ;;  %v942_v50 = vor.u32 %v1063_v45, %v941_v43  ;;  %v1040_v51 = vld [vmem:[%s1647_s1 + $0x9c] sm:$0xf] }
   0xd   :  { %355 = vmatpush.bf16.msra.mxu0 %v798_v30  ;;  %374 = vmatpush.bf16.msra.mxu1 %v802_v34  ;;  %v887_v52 = vld [vmem:[%s1647_s1 + $0xd8] sm:$0xf0]  ;;  %v946_v53 = vor.u32 %v1055_v46, %v943_v47  ;;  %v67_v54 = vld [vmem:[%s1649_s2] sm:$0xff]  ;;  %v877_v55 = vld [vmem:[%s1647_s1 + $0x90] sm:$0xf]  ;;  %v886_v57 = vor.u32 %v1048_v49, %v885_v48 }
   0xe   :  { %393 = vmatpush.bf16.msra.mxu2 %v806_v35  ;;  %v1047_v56 = vld [vmem:[%s1647_s1 + $0xcc] sm:$0xf0]  ;;  %v890_v58 = vor.u32 %v1040_v51, %v887_v52  ;;  %v1039_v59 = vld [vmem:[%s1647_s1 + $0x94] sm:$0xf]  ;;  %v821_v61 = vld [vmem:[%s1647_s1 + $0x18] sm:$0xf]  ;;  %73 = vperm.xlu0 %1070, %v67_v54  }
   0xf   :  { %412 = vmatpush.bf16.msra.mxu3 %v810_v39  ;;  %v879_v60 = vld [vmem:[%s1647_s1 + $0xd0] sm:$0xf0]  ;;  %v1032_v62 = vld [vmem:[%s1647_s1 + $0x54] sm:$0xf0]  ;;  %v1024_v63 = vld [vmem:[%s1647_s1 + $0x1c] sm:$0xf]  ;;  %v878_v1 = vor.u32 %v1047_v56, %v877_v55 }
  0x10   :  { %987 = vmatmul.msk.bf16.vlgmr.msra.gmra.mxu0 %vm341_vm0, %v1168_v36  ;;  %989 = vmatmul.msk.bf16.vlgmr.msra.gmra.mxu1 %vm341_vm0, %v1168_v36  ;;  %v823_v0 = vld [vmem:[%s1647_s1 + $0x58] sm:$0xf0]  ;;  %v69_v2 = vld [vmem:[%s1649_s2 + $0x10] sm:$0xff]  ;;  %v882_v5 = vor.u32 %v1039_v59, %v879_v60  ;;  %v965_v8 = vld [vmem:[%s1647_s1 + $0x128] sm:$0xf]  ;;  %v822_v9 = vor.u32 %v1032_v62, %v821_v61 }
  0x11   :  { %991 = vmatmul.msk.bf16.vlgmr.msra.gmra.mxu2 %vm341_vm0, %v1168_v36  ;;  %429 = vmatpush.bf16.msrb.mxu0 %v942_v50  ;;  %v813_v3 = vld [vmem:[%s1647_s1 + $0x10] sm:$0xf]  ;;  %v1023_v6 = vld [vmem:[%s1647_s1 + $0x14] sm:$0xf]  ;;  %v826_v10 = vor.u32 %v1024_v63, %v823_v0  ;;  %v1066_v11 = vld [vmem:[%s1647_s1 + $0x164] sm:$0xf0] }
  0x12   :  { %467 = vmatpush.bf16.msrb.mxu2 %v950_v40  ;;  %993 = vmatmul.msk.bf16.vlgmr.msra.gmra.mxu3 %vm341_vm0, %v1168_v36  ;;  %v1031_v4 = vld [vmem:[%s1647_s1 + $0x4c] sm:$0xf0]  ;;  %v815_v7 = vld [vmem:[%s1647_s1 + $0x50] sm:$0xf0]  ;;  %v1058_v12 = vld [vmem:[%s1647_s1 + $0x12c] sm:$0xf]  ;;  %v966_v14 = vor.u32 %v1066_v11, %v965_v8 }
  0x13   :  { %486 = vmatpush.bf16.msrb.mxu3 %v954_v44  ;;  %448 = vmatpush.bf16.msrb.mxu1 %v946_v53  ;;  %v967_v13 = vld [vmem:[%s1647_s1 + $0x168] sm:$0xf0]  ;;  %v957_v16 = vld [vmem:[%s1647_s1 + $0x120] sm:$0xf]  ;;  %v814_v18 = vor.u32 %v1031_v4, %v813_v3  ;;  %v1057_v19 = vld [vmem:[%s1647_s1 + $0x124] sm:$0xf]  ;;  %v818_v22 = vor.u32 %v1023_v6, %v815_v7 }
  0x14   :  { %83 = vperm.xlu1 %1071, %v69_v2   ;;  %v970_v15 = vor.u32 %v1058_v12, %v967_v13  ;;  %v1065_v17 = vld [vmem:[%s1647_s1 + $0x15c] sm:$0xf0]  ;;  %v959_v20 = vld [vmem:[%s1647_s1 + $0x160] sm:$0xf0]  ;;  %v901_v21 = vld [vmem:[%s1647_s1 + $0xa8] sm:$0xf] }
  0x15   :  { %430 = vmatpush.bf16.msrb.mxu0 %v878_v1  ;;  %v1050_v23 = vld [vmem:[%s1647_s1 + $0xe4] sm:$0xf0]  ;;  %v1042_v24 = vld [vmem:[%s1647_s1 + $0xac] sm:$0xf]  ;;  %v958_v27 = vor.u32 %v1065_v17, %v957_v16  ;;  %v962_v28 = vor.u32 %v1057_v19, %v959_v20  ;;  %v70_v30 = vld [vmem:[%s1649_s2 + $0x18] sm:$0xff] }
  0x16   :  { %468 = vmatpush.bf16.msrb.mxu2 %v886_v57  ;;  %v903_v25 = vld [vmem:[%s1647_s1 + $0xe8] sm:$0xf0]  ;;  %v902_v29 = vor.u32 %v1050_v23, %v901_v21  ;;  %v893_v33 = vld [vmem:[%s1647_s1 + $0xa0] sm:$0xf]  ;;  %v1041_v35 = vld [vmem:[%s1647_s1 + $0xa4] sm:$0xf] }
  0x17   :  { %487 = vmatpush.bf16.msrb.mxu3 %v890_v58  ;;  %449 = vmatpush.bf16.msrb.mxu1 %v882_v5  ;;  %v68_v26 = vld [vmem:[%s1649_s2 + $0x8] sm:$0xff]  ;;  %v906_v31 = vor.u32 %v1042_v24, %v903_v25  ;;  %v1049_v34 = vld [vmem:[%s1647_s1 + $0xdc] sm:$0xf0]  ;;  %v895_v38 = vld [vmem:[%s1647_s1 + $0xe0] sm:$0xf0] }
  0x18   :  { %78 = vperm.xlu0 %1070, %v68_v26   ;;  %v1301_v32 = vld [vmem:[%s1648_s0 + $0x8] sm:$0xff]  ;;  %v894_v37 = vor.u32 %v1049_v34, %v893_v33  ;;  %v898_v41 = vor.u32 %v1041_v35, %v895_v38  ;;  %v829_v45 = vld [vmem:[%s1647_s1 + $0x20] sm:$0xf]  ;;  %v1025_v48 = vld [vmem:[%s1647_s1 + $0x24] sm:$0xf] }
  0x19   :  { %431 = vmatpush.bf16.msrb.mxu0 %v814_v18  ;;  %v837_v39 = vld [vmem:[%s1647_s1 + $0x28] sm:$0xf]  ;;  %v1026_v43 = vld [vmem:[%s1647_s1 + $0x2c] sm:$0xf]  ;;  %v1033_v47 = vld [vmem:[%s1647_s1 + $0x5c] sm:$0xf0] }
  0x1a   :  { %469 = vmatpush.bf16.msrb.mxu2 %v822_v9  ;;  %v1034_v40 = vld [vmem:[%s1647_s1 + $0x64] sm:$0xf0]  ;;  %v839_v44 = vld [vmem:[%s1647_s1 + $0x68] sm:$0xf0]  ;;  %v831_v49 = vld [vmem:[%s1647_s1 + $0x60] sm:$0xf0]  ;;  %v830_v50 = vor.u32 %v1033_v47, %v829_v45 }
  0x1b   :  { %488 = vmatpush.bf16.msrb.mxu3 %v826_v10  ;;  %450 = vmatpush.bf16.msrb.mxu1 %v818_v22  ;;  %v838_v42 = vor.u32 %v1034_v40, %v837_v39  ;;  %v842_v46 = vor.u32 %v1026_v43, %v839_v44  ;;  %v834_v51 = vor.u32 %v1025_v48, %v831_v49  ;;  %v981_v52 = vld [vmem:[%s1647_s1 + $0x138] sm:$0xf]  ;;  %v1060_v54 = vld [vmem:[%s1647_s1 + $0x13c] sm:$0xf]  ;;  %v973_v57 = vld [vmem:[%s1647_s1 + $0x130] sm:$0xf] }
  0x1c   :  { %88 = vperm.xlu1 %1071, %v70_v30   ;;  %v1068_v53 = vld [vmem:[%s1647_s1 + $0x174] sm:$0xf0]  ;;  %v983_v56 = vld [vmem:[%s1647_s1 + $0x178] sm:$0xf0]  ;;  %v1067_v58 = vld [vmem:[%s1647_s1 + $0x16c] sm:$0xf0] }
  0x1d   :  { %505 = vmatpush.bf16.msra.mxu0 %v958_v27  ;;  %v982_v55 = vor.u32 %v1068_v53, %v981_v52  ;;  %v986_v59 = vor.u32 %v1060_v54, %v983_v56  ;;  %v974_v60 = vor.u32 %v1067_v58, %v973_v57  ;;  %v1059_v61 = vld [vmem:[%s1647_s1 + $0x134] sm:$0xf]  ;;  %v917_v63 = vld [vmem:[%s1647_s1 + $0xb8] sm:$0xf]  ;;  %v1044_v2 = vld [vmem:[%s1647_s1 + $0xbc] sm:$0xf] }
  0x1e   :  { %543 = vmatpush.bf16.msra.mxu2 %v966_v14  ;;  %v975_v62 = vld [vmem:[%s1647_s1 + $0x170] sm:$0xf0]  ;;  %v1052_v1 = vld [vmem:[%s1647_s1 + $0xf4] sm:$0xf0]  ;;  %v919_v3 = vld [vmem:[%s1647_s1 + $0xf8] sm:$0xf0] }
  0x1f   :  { %562 = vmatpush.bf16.msra.mxu3 %v970_v15  ;;  %524 = vmatpush.bf16.msra.mxu1 %v962_v28  ;;  %v978_v0 = vor.u32 %v1059_v61, %v975_v62  ;;  %v918_v4 = vor.u32 %v1052_v1, %v917_v63  ;;  %v922_v5 = vor.u32 %v1044_v2, %v919_v3  ;;  %v909_v6 = vld [vmem:[%s1647_s1 + $0xb0] sm:$0xf]  ;;  %v1043_v8 = vld [vmem:[%s1647_s1 + $0xb4] sm:$0xf]  ;;  %v853_v11 = vld [vmem:[%s1647_s1 + $0x38] sm:$0xf] }
  0x20   :  { %988 = vmatmul.msk.bf16.gmra.mxu0 %vm341_vm0, %v1301_v32  ;;  %990 = vmatmul.msk.bf16.gmra.mxu1 %vm341_vm0, %v1301_v32  ;;  %v1051_v7 = vld [vmem:[%s1647_s1 + $0xec] sm:$0xf0]  ;;  %v911_v10 = vld [vmem:[%s1647_s1 + $0xf0] sm:$0xf0]  ;;  %v1036_v12 = vld [vmem:[%s1647_s1 + $0x74] sm:$0xf0] }
  0x21   :  { %992 = vmatmul.msk.bf16.gmra.mxu2 %vm341_vm0, %v1301_v32  ;;  %506 = vmatpush.bf16.msra.mxu0 %v894_v37  ;;  %v910_v9 = vor.u32 %v1051_v7, %v909_v6  ;;  %v914_v13 = vor.u32 %v1043_v8, %v911_v10  ;;  %v854_v14 = vor.u32 %v1036_v12, %v853_v11  ;;  %v1028_v15 = vld [vmem:[%s1647_s1 + $0x3c] sm:$0xf]  ;;  %v845_v17 = vld [vmem:[%s1647_s1 + $0x30] sm:$0xf]  ;;  %v1027_v20 = vld [vmem:[%s1647_s1 + $0x34] sm:$0xf] }
  0x22   :  { %544 = vmatpush.bf16.msra.mxu2 %v902_v29  ;;  %994 = vmatmul.msk.bf16.gmra.mxu3 %vm341_vm0, %v1301_v32  ;;  %v855_v16 = vld [vmem:[%s1647_s1 + $0x78] sm:$0xf0]  ;;  %v1035_v19 = vld [vmem:[%s1647_s1 + $0x6c] sm:$0xf0]  ;;  %v847_v21 = vld [vmem:[%s1647_s1 + $0x70] sm:$0xf0] }
  0x23   :  { %563 = vmatpush.bf16.msra.mxu3 %v906_v31  ;;  %525 = vmatpush.bf16.msra.mxu1 %v898_v41  ;;  %v858_v18 = vor.u32 %v1028_v15, %v855_v16  ;;  %v846_v22 = vor.u32 %v1035_v19, %v845_v17  ;;  %v850_v23 = vor.u32 %v1027_v20, %v847_v21  ;;  %vm1604_vm3 = vmor %vm756_vm2, %vm755_vm1 }
  0x25   :  { %507 = vmatpush.bf16.msra.mxu0 %v830_v50 }
  0x26   :  { %545 = vmatpush.bf16.msra.mxu2 %v838_v42 }
  0x27   :  { %564 = vmatpush.bf16.msra.mxu3 %v842_v46  ;;  %526 = vmatpush.bf16.msra.mxu1 %v834_v51 }
  0x30   :  { %995 = vmatmul.msk.bf16.vlgmr.msrb.gmra.mxu0 %vm341_vm0, %v1168_v36  ;;  %997 = vmatmul.msk.bf16.vlgmr.msrb.gmra.mxu1 %vm341_vm0, %v1168_v36 }
  0x31   :  { %999 = vmatmul.msk.bf16.vlgmr.msrb.gmra.mxu2 %vm341_vm0, %v1168_v36  ;;  %581 = vmatpush.bf16.msrb.mxu0 %v974_v60 }
  0x32   :  { %1001 = vmatmul.msk.bf16.vlgmr.msrb.gmra.mxu3 %vm341_vm0, %v1168_v36  ;;  %619 = vmatpush.bf16.msrb.mxu2 %v982_v55 }
  0x33   :  { %638 = vmatpush.bf16.msrb.mxu3 %v986_v59  ;;  %600 = vmatpush.bf16.msrb.mxu1 %v978_v0 }
  0x35   :  { %582 = vmatpush.bf16.msrb.mxu0 %v910_v9 }
  0x36   :  { %620 = vmatpush.bf16.msrb.mxu2 %v918_v4 }
  0x37   :  { %639 = vmatpush.bf16.msrb.mxu3 %v922_v5  ;;  %601 = vmatpush.bf16.msrb.mxu1 %v914_v13 }
  0x39   :  { %583 = vmatpush.bf16.msrb.mxu0 %v846_v22 }
  0x3a   :  { %621 = vmatpush.bf16.msrb.mxu2 %v854_v14 }
  0x3b   :  { %640 = vmatpush.bf16.msrb.mxu3 %v858_v18  ;;  %602 = vmatpush.bf16.msrb.mxu1 %v850_v23 }
  0x40   :  { %996 = vmatmul.msk.bf16.gmra.mxu0 %vm341_vm0, %v1301_v32  ;;  %998 = vmatmul.msk.bf16.gmra.mxu1 %vm341_vm0, %v1301_v32 }
  0x41   :  { %1000 = vmatmul.msk.bf16.gmra.mxu2 %vm341_vm0, %v1301_v32 }
  0x42   :  { %1002 = vmatmul.msk.bf16.gmra.mxu3 %vm341_vm0, %v1301_v32 }
  0x50   :  { %1003 = vmatmul.msk.bf16.vlgmr.msra.gmra.mxu0 %vm341_vm0, %v1168_v36  ;;  %1005 = vmatmul.msk.bf16.vlgmr.msra.gmra.mxu1 %vm341_vm0, %v1168_v36 }
  0x51   :  { %1007 = vmatmul.msk.bf16.vlgmr.msra.gmra.mxu2 %vm341_vm0, %v1168_v36 }
  0x52   :  { %1009 = vmatmul.msk.bf16.vlgmr.msra.gmra.mxu3 %vm341_vm0, %v1168_v36 }
  0x60   :  { %1004 = vmatmul.msk.bf16.gmra.mxu0 %vm341_vm0, %v1301_v32  ;;  %1006 = vmatmul.msk.bf16.gmra.mxu1 %vm341_vm0, %v1301_v32 }
  0x61   :  { %1008 = vmatmul.msk.bf16.gmra.mxu2 %vm341_vm0, %v1301_v32 }
  0x62   :  { %1010 = vmatmul.msk.bf16.gmra.mxu3 %vm341_vm0, %v1301_v32 }
  0x70   :  { %1011 = vmatmul.msk.bf16.vlgmr.msrb.gmra.mxu0 %vm341_vm0, %v1168_v36  ;;  %1013 = vmatmul.msk.bf16.vlgmr.msrb.gmra.mxu1 %vm341_vm0, %v1168_v36 }
  0x71   :  { %1015 = vmatmul.msk.bf16.vlgmr.msrb.gmra.mxu2 %vm341_vm0, %v1168_v36 }
  0x72   :  { %1017 = vmatmul.msk.bf16.vlgmr.msrb.gmra.mxu3 %vm341_vm0, %v1168_v36 }
  0x80   :  { %1012 = vmatmul.msk.bf16.gmra.mxu0 %vm341_vm0, %v1301_v32  ;;  %1014 = vmatmul.msk.bf16.gmra.mxu1 %vm341_vm0, %v1301_v32  ;;  %v1467_v24 = vpop.permute.xlu0 %73 }
  0x81   :  { %1016 = vmatmul.msk.bf16.gmra.mxu2 %vm341_vm0, %v1301_v32 }
  0x82   :  { %1018 = vmatmul.msk.bf16.gmra.mxu3 %vm341_vm0, %v1301_v32 }
  0x86   :  { %v1480_v45 = vpop.permute.xlu1 %83 }
  0x8a   :  { %v1471_v31 = vpop.permute.xlu0 %78 }
  0x8d   :  { %v357_v25 = vpop.f32.mrf.mxu0  ;;  %v376_v27 = vpop.f32.mrf.mxu1 }
  0x8e   :  { %v358_v26 = vadd.f32 %v357_v25, %v1467_v24  ;;  %v377_v36 = vadd.f32 %v376_v27, %v1467_v24  ;;  %v1492_v62 = vpop.permute.xlu1 %88 }
  0x90   :  { %v652_v28 = vmax.f32 %v358_v26, 0.0  ;;  %v653_v29 = vmax.f32 %v377_v36, 0.0 }
  0x92   :  { %v716_v30 = vpack.c.bf16 %v653_v29, %v652_v28 }
  0x94   :  { %v395_v33 = vpop.f32.mrf.mxu2  ;;  %748 = vst [vmem:[%s1650_s3] sm:$0xff] %v716_v30 }
  0x95   :  { %v396_v32 = vadd.f32 %v395_v33, %v1467_v24  ;;  %v414_v34 = vpop.f32.mrf.mxu3  ;;  %v359_v35 = vpop.f32.mrf.mxu0 }
  0x96   :  { %v415_v37 = vadd.f32 %v414_v34, %v1467_v24  ;;  %v360_v38 = vadd.f32 %v359_v35, %v1471_v31  ;;  %v378_v39 = vpop.f32.mrf.mxu1 }
  0x97   :  { %v654_v40 = vmax.f32 %v396_v32, 0.0  ;;  %v379_v41 = vadd.f32 %v378_v39, %v1471_v31 }
  0x98   :  { %v655_v42 = vmax.f32 %v415_v37, 0.0  ;;  %v668_v43 = vmax.f32 %v360_v38, 0.0 }
  0x99   :  { %v669_v44 = vmax.f32 %v379_v41, 0.0 }
  0x9a   :  { %v717_v46 = vpack.c.bf16 %v655_v42, %v654_v40 }
  0x9b   :  { %v724_v47 = vpack.c.bf16 %v669_v44, %v668_v43 }
  0x9c   :  { %749 = vst [vmem:[%s1650_s3 + $0x8] sm:$0xff] %v717_v46  ;;  %v397_v48 = vpop.f32.mrf.mxu2 }
  0x9d   :  { %759 = vst [vmem:[%s1650_s3 + $0x40] sm:$0xff] %v724_v47  ;;  %v398_v49 = vadd.f32 %v397_v48, %v1471_v31  ;;  %v416_v50 = vpop.f32.mrf.mxu3  ;;  %v362_v51 = vpop.f32.mrf.mxu0 }
  0x9e   :  { %v417_v52 = vadd.f32 %v416_v50, %v1471_v31  ;;  %v363_v53 = vadd.f32 %v362_v51, %v1480_v45  ;;  %v381_v54 = vpop.f32.mrf.mxu1 }
  0x9f   :  { %v670_v55 = vmax.f32 %v398_v49, 0.0  ;;  %v382_v56 = vadd.f32 %v381_v54, %v1480_v45 }
  0xa0   :  { %v671_v57 = vmax.f32 %v417_v52, 0.0  ;;  %v684_v58 = vmax.f32 %v363_v53, 0.0 }
  0xa1   :  { %v685_v59 = vmax.f32 %v382_v56, 0.0 }
  0xa2   :  { %v725_v60 = vpack.c.bf16 %v671_v57, %v670_v55 }
  0xa3   :  { %v732_v61 = vpack.c.bf16 %v685_v59, %v684_v58 }
  0xa4   :  { %760 = vst [vmem:[%s1650_s3 + $0x48] sm:$0xff] %v725_v60  ;;  %v400_v63 = vpop.f32.mrf.mxu2 }
  0xa5   :  { %767 = vst [vmem:[%s1650_s3 + $0x80] sm:$0xff] %v732_v61  ;;  %v401_v0 = vadd.f32 %v400_v63, %v1480_v45  ;;  %v419_v1 = vpop.f32.mrf.mxu3  ;;  %v364_v2 = vpop.f32.mrf.mxu0 }
  0xa6   :  { %v420_v3 = vadd.f32 %v419_v1, %v1480_v45  ;;  %v365_v4 = vadd.f32 %v364_v2, %v1492_v62  ;;  %v383_v5 = vpop.f32.mrf.mxu1 }
  0xa7   :  { %v686_v6 = vmax.f32 %v401_v0, 0.0  ;;  %v384_v7 = vadd.f32 %v383_v5, %v1492_v62 }
  0xa8   :  { %v687_v8 = vmax.f32 %v420_v3, 0.0  ;;  %v700_v9 = vmax.f32 %v365_v4, 0.0 }
  0xa9   :  { %v701_v10 = vmax.f32 %v384_v7, 0.0 }
  0xaa   :  { %v733_v11 = vpack.c.bf16 %v687_v8, %v686_v6 }
  0xab   :  { %v740_v12 = vpack.c.bf16 %v701_v10, %v700_v9 }
  0xac   :  { %768 = vst [vmem:[%s1650_s3 + $0x88] sm:$0xff] %v733_v11  ;;  %v402_v13 = vpop.f32.mrf.mxu2 }
  0xad   :  { %775 = vst [vmem:[%s1650_s3 + $0xc0] sm:$0xff] %v740_v12  ;;  %v403_v14 = vadd.f32 %v402_v13, %v1492_v62  ;;  %v421_v15 = vpop.f32.mrf.mxu3  ;;  %v433_v16 = vpop.f32.mrf.mxu0 }
  0xae   :  { %v422_v17 = vadd.f32 %v421_v15, %v1492_v62  ;;  %v434_v18 = vadd.f32 %v433_v16, %v1467_v24  ;;  %v452_v19 = vpop.f32.mrf.mxu1 }
  0xaf   :  { %v702_v20 = vmax.f32 %v403_v14, 0.0  ;;  %v453_v21 = vadd.f32 %v452_v19, %v1467_v24 }
  0xb0   :  { %v703_v22 = vmax.f32 %v422_v17, 0.0  ;;  %v656_v23 = vmax.f32 %v434_v18, 0.0 }
  0xb1   :  { %v657_v25 = vmax.f32 %v453_v21, 0.0 }
  0xb2   :  { %v741_v26 = vpack.c.bf16 %v703_v22, %v702_v20 }
  0xb3   :  { %v718_v27 = vpack.c.bf16 %v657_v25, %v656_v23 }
  0xb4   :  { %776 = vst [vmem:[%s1650_s3 + $0xc8] sm:$0xff] %v741_v26  ;;  %v471_v36 = vpop.f32.mrf.mxu2 }
  0xb5   :  { %750 = vst [vmem:[%s1650_s3 + $0x10] sm:$0xff] %v718_v27  ;;  %v472_v28 = vadd.f32 %v471_v36, %v1467_v24  ;;  %v490_v29 = vpop.f32.mrf.mxu3  ;;  %v435_v30 = vpop.f32.mrf.mxu0 }
  0xb6   :  { %v491_v33 = vadd.f32 %v490_v29, %v1467_v24  ;;  %v436_v32 = vadd.f32 %v435_v30, %v1471_v31  ;;  %v454_v34 = vpop.f32.mrf.mxu1 }
  0xb7   :  { %v658_v35 = vmax.f32 %v472_v28, 0.0  ;;  %v455_v37 = vadd.f32 %v454_v34, %v1471_v31 }
  0xb8   :  { %v659_v38 = vmax.f32 %v491_v33, 0.0  ;;  %v672_v39 = vmax.f32 %v436_v32, 0.0 }
  0xb9   :  { %v673_v40 = vmax.f32 %v455_v37, 0.0 }
  0xba   :  { %v719_v41 = vpack.c.bf16 %v659_v38, %v658_v35 }
  0xbb   :  { %v726_v42 = vpack.c.bf16 %v673_v40, %v672_v39 }
  0xbc   :  { %751 = vst [vmem:[%s1650_s3 + $0x18] sm:$0xff] %v719_v41  ;;  %v473_v43 = vpop.f32.mrf.mxu2 }
  0xbd   :  { %761 = vst [vmem:[%s1650_s3 + $0x50] sm:$0xff] %v726_v42  ;;  %v474_v44 = vadd.f32 %v473_v43, %v1471_v31  ;;  %v492_v46 = vpop.f32.mrf.mxu3  ;;  %v438_v47 = vpop.f32.mrf.mxu0 }
  0xbe   :  { %v493_v48 = vadd.f32 %v492_v46, %v1471_v31  ;;  %v439_v49 = vadd.f32 %v438_v47, %v1480_v45  ;;  %v457_v50 = vpop.f32.mrf.mxu1 }
  0xbf   :  { %v674_v51 = vmax.f32 %v474_v44, 0.0  ;;  %v458_v52 = vadd.f32 %v457_v50, %v1480_v45 }
  0xc0   :  { %v675_v53 = vmax.f32 %v493_v48, 0.0  ;;  %v688_v54 = vmax.f32 %v439_v49, 0.0 }
  0xc1   :  { %v689_v55 = vmax.f32 %v458_v52, 0.0 }
  0xc2   :  { %v727_v56 = vpack.c.bf16 %v675_v53, %v674_v51 }
  0xc3   :  { %v734_v57 = vpack.c.bf16 %v689_v55, %v688_v54 }
  0xc4   :  { %762 = vst [vmem:[%s1650_s3 + $0x58] sm:$0xff] %v727_v56  ;;  %v476_v58 = vpop.f32.mrf.mxu2 }
  0xc5   :  { %769 = vst [vmem:[%s1650_s3 + $0x90] sm:$0xff] %v734_v57  ;;  %v477_v59 = vadd.f32 %v476_v58, %v1480_v45  ;;  %v495_v60 = vpop.f32.mrf.mxu3  ;;  %v440_v61 = vpop.f32.mrf.mxu0 }
  0xc6   :  { %v496_v63 = vadd.f32 %v495_v60, %v1480_v45  ;;  %v441_v0 = vadd.f32 %v440_v61, %v1492_v62  ;;  %v459_v1 = vpop.f32.mrf.mxu1 }
  0xc7   :  { %v690_v2 = vmax.f32 %v477_v59, 0.0  ;;  %v460_v3 = vadd.f32 %v459_v1, %v1492_v62 }
  0xc8   :  { %v691_v4 = vmax.f32 %v496_v63, 0.0  ;;  %v704_v5 = vmax.f32 %v441_v0, 0.0 }
  0xc9   :  { %v705_v6 = vmax.f32 %v460_v3, 0.0 }
  0xca   :  { %v735_v7 = vpack.c.bf16 %v691_v4, %v690_v2 }
  0xcb   :  { %v742_v8 = vpack.c.bf16 %v705_v6, %v704_v5 }
  0xcc   :  { %770 = vst [vmem:[%s1650_s3 + $0x98] sm:$0xff] %v735_v7  ;;  %v478_v9 = vpop.f32.mrf.mxu2 }
  0xcd   :  { %777 = vst [vmem:[%s1650_s3 + $0xd0] sm:$0xff] %v742_v8  ;;  %v479_v10 = vadd.f32 %v478_v9, %v1492_v62  ;;  %v497_v11 = vpop.f32.mrf.mxu3  ;;  %v509_v12 = vpop.f32.mrf.mxu0 }
  0xce   :  { %v498_v13 = vadd.f32 %v497_v11, %v1492_v62  ;;  %v510_v14 = vadd.f32 %v509_v12, %v1467_v24  ;;  %v528_v15 = vpop.f32.mrf.mxu1 }
  0xcf   :  { %v706_v16 = vmax.f32 %v479_v10, 0.0  ;;  %v529_v17 = vadd.f32 %v528_v15, %v1467_v24 }
  0xd0   :  { %v707_v18 = vmax.f32 %v498_v13, 0.0  ;;  %v660_v19 = vmax.f32 %v510_v14, 0.0 }
  0xd1   :  { %v661_v20 = vmax.f32 %v529_v17, 0.0 }
  0xd2   :  { %v743_v21 = vpack.c.bf16 %v707_v18, %v706_v16 }
  0xd3   :  { %v720_v22 = vpack.c.bf16 %v661_v20, %v660_v19 }
  0xd4   :  { %778 = vst [vmem:[%s1650_s3 + $0xd8] sm:$0xff] %v743_v21  ;;  %v547_v23 = vpop.f32.mrf.mxu2 }
  0xd5   :  { %752 = vst [vmem:[%s1650_s3 + $0x20] sm:$0xff] %v720_v22  ;;  %v548_v25 = vadd.f32 %v547_v23, %v1467_v24  ;;  %v566_v26 = vpop.f32.mrf.mxu3  ;;  %v511_v27 = vpop.f32.mrf.mxu0 }
  0xd6   :  { %v567_v36 = vadd.f32 %v566_v26, %v1467_v24  ;;  %v512_v28 = vadd.f32 %v511_v27, %v1471_v31  ;;  %v530_v29 = vpop.f32.mrf.mxu1 }
  0xd7   :  { %v662_v30 = vmax.f32 %v548_v25, 0.0  ;;  %v531_v33 = vadd.f32 %v530_v29, %v1471_v31 }
  0xd8   :  { %v663_v32 = vmax.f32 %v567_v36, 0.0  ;;  %v676_v34 = vmax.f32 %v512_v28, 0.0 }
  0xd9   :  { %v677_v35 = vmax.f32 %v531_v33, 0.0 }
  0xda   :  { %v721_v37 = vpack.c.bf16 %v663_v32, %v662_v30 }
  0xdb   :  { %v728_v38 = vpack.c.bf16 %v677_v35, %v676_v34 }
  0xdc   :  { %753 = vst [vmem:[%s1650_s3 + $0x28] sm:$0xff] %v721_v37  ;;  %v549_v39 = vpop.f32.mrf.mxu2 }
  0xdd   :  { %763 = vst [vmem:[%s1650_s3 + $0x60] sm:$0xff] %v728_v38  ;;  %v550_v40 = vadd.f32 %v549_v39, %v1471_v31  ;;  %v568_v41 = vpop.f32.mrf.mxu3  ;;  %v514_v42 = vpop.f32.mrf.mxu0 }
  0xde   :  { %v569_v43 = vadd.f32 %v568_v41, %v1471_v31  ;;  %v515_v44 = vadd.f32 %v514_v42, %v1480_v45  ;;  %v533_v46 = vpop.f32.mrf.mxu1 }
  0xdf   :  { %v678_v47 = vmax.f32 %v550_v40, 0.0  ;;  %v534_v48 = vadd.f32 %v533_v46, %v1480_v45 }
  0xe0   :  { %v679_v49 = vmax.f32 %v569_v43, 0.0  ;;  %v692_v50 = vmax.f32 %v515_v44, 0.0 }
  0xe1   :  { %v693_v51 = vmax.f32 %v534_v48, 0.0 }
  0xe2   :  { %v729_v52 = vpack.c.bf16 %v679_v49, %v678_v47 }
  0xe3   :  { %v736_v53 = vpack.c.bf16 %v693_v51, %v692_v50 }
  0xe4   :  { %764 = vst [vmem:[%s1650_s3 + $0x68] sm:$0xff] %v729_v52  ;;  %v552_v54 = vpop.f32.mrf.mxu2 }
  0xe5   :  { %771 = vst [vmem:[%s1650_s3 + $0xa0] sm:$0xff] %v736_v53  ;;  %v553_v55 = vadd.f32 %v552_v54, %v1480_v45  ;;  %v571_v56 = vpop.f32.mrf.mxu3  ;;  %v516_v57 = vpop.f32.mrf.mxu0 }
  0xe6   :  { %v572_v58 = vadd.f32 %v571_v56, %v1480_v45  ;;  %v517_v59 = vadd.f32 %v516_v57, %v1492_v62  ;;  %v535_v60 = vpop.f32.mrf.mxu1 }
  0xe7   :  { %v694_v61 = vmax.f32 %v553_v55, 0.0  ;;  %v536_v63 = vadd.f32 %v535_v60, %v1492_v62 }
  0xe8   :  { %v695_v0 = vmax.f32 %v572_v58, 0.0  ;;  %v708_v1 = vmax.f32 %v517_v59, 0.0 }
  0xe9   :  { %v709_v2 = vmax.f32 %v536_v63, 0.0 }
  0xea   :  { %v737_v3 = vpack.c.bf16 %v695_v0, %v694_v61 }
  0xeb   :  { %v744_v4 = vpack.c.bf16 %v709_v2, %v708_v1 }
  0xec   :  { %772 = vst [vmem:[%s1650_s3 + $0xa8] sm:$0xff] %v737_v3  ;;  %v554_v5 = vpop.f32.mrf.mxu2 }
  0xed   :  { %779 = vst [vmem:[%s1650_s3 + $0xe0] sm:$0xff] %v744_v4  ;;  %v555_v6 = vadd.f32 %v554_v5, %v1492_v62  ;;  %v573_v7 = vpop.f32.mrf.mxu3  ;;  %v585_v8 = vpop.f32.mrf.mxu0 }
  0xee   :  { %v574_v9 = vadd.f32 %v573_v7, %v1492_v62  ;;  %v586_v10 = vadd.f32 %v585_v8, %v1467_v24  ;;  %v604_v11 = vpop.f32.mrf.mxu1 }
  0xef   :  { %v710_v12 = vmax.f32 %v555_v6, 0.0  ;;  %v605_v13 = vadd.f32 %v604_v11, %v1467_v24 }
  0xf0   :  { %v711_v14 = vmax.f32 %v574_v9, 0.0  ;;  %v664_v15 = vmax.f32 %v586_v10, 0.0 }
  0xf1   :  { %v665_v16 = vmax.f32 %v605_v13, 0.0 }
  0xf2   :  { %v745_v17 = vpack.c.bf16 %v711_v14, %v710_v12 }
  0xf3   :  { %v722_v18 = vpack.c.bf16 %v665_v16, %v664_v15 }
  0xf4   :  { %780 = vst [vmem:[%s1650_s3 + $0xe8] sm:$0xff] %v745_v17  ;;  %v623_v19 = vpop.f32.mrf.mxu2 }
  0xf5   :  { %754 = vst [vmem:[%s1650_s3 + $0x30] sm:$0xff] %v722_v18  ;;  %v624_v20 = vadd.f32 %v623_v19, %v1467_v24  ;;  %v642_v21 = vpop.f32.mrf.mxu3  ;;  %v587_v22 = vpop.f32.mrf.mxu0 }
  0xf6   :  { %v643_v23 = vadd.f32 %v642_v21, %v1467_v24  ;;  %v588_v25 = vadd.f32 %v587_v22, %v1471_v31  ;;  %v606_v26 = vpop.f32.mrf.mxu1 }
  0xf7   :  { %v666_v27 = vmax.f32 %v624_v20, 0.0  ;;  %v607_v36 = vadd.f32 %v606_v26, %v1471_v31 }
  0xf8   :  { %v667_v28 = vmax.f32 %v643_v23, 0.0  ;;  %v680_v29 = vmax.f32 %v588_v25, 0.0 }
  0xf9   :  { %v681_v33 = vmax.f32 %v607_v36, 0.0 }
  0xfa   :  { %v723_v32 = vpack.c.bf16 %v667_v28, %v666_v27 }
  0xfb   :  { %v730_v34 = vpack.c.bf16 %v681_v33, %v680_v29 }
  0xfc   :  { %758 = vst.msk [vmem:[%s1650_s3 + $0x38] sm:$0xff] %vm1604_vm3, %v723_v32  ;;  %v625_v24 = vpop.f32.mrf.mxu2 }
  0xfd   :  { %765 = vst [vmem:[%s1650_s3 + $0x70] sm:$0xff] %v730_v34  ;;  %v626_v35 = vadd.f32 %v625_v24, %v1471_v31  ;;  %v644_v37 = vpop.f32.mrf.mxu3  ;;  %v590_v38 = vpop.f32.mrf.mxu0 }
  0xfe   :  { %v645_v39 = vadd.f32 %v644_v37, %v1471_v31  ;;  %v591_v40 = vadd.f32 %v590_v38, %v1480_v45  ;;  %v609_v41 = vpop.f32.mrf.mxu1 }
  0xff   :  { %v682_v42 = vmax.f32 %v626_v35, 0.0  ;;  %v610_v43 = vadd.f32 %v609_v41, %v1480_v45 }
 0x100   :  { %v683_v44 = vmax.f32 %v645_v39, 0.0  ;;  %v696_v46 = vmax.f32 %v591_v40, 0.0 }
 0x101   :  { %v697_v47 = vmax.f32 %v610_v43, 0.0 }
 0x102   :  { %v731_v48 = vpack.c.bf16 %v683_v44, %v682_v42 }
 0x103   :  { %v738_v49 = vpack.c.bf16 %v697_v47, %v696_v46 }
 0x104   :  { %766 = vst.msk [vmem:[%s1650_s3 + $0x78] sm:$0xff] %vm1604_vm3, %v731_v48  ;;  %v628_v50 = vpop.f32.mrf.mxu2 }
 0x105   :  { %773 = vst [vmem:[%s1650_s3 + $0xb0] sm:$0xff] %v738_v49  ;;  %v629_v31 = vadd.f32 %v628_v50, %v1480_v45  ;;  %v647_v51 = vpop.f32.mrf.mxu3  ;;  %v592_v52 = vpop.f32.mrf.mxu0 }
 0x106   :  { %v648_v53 = vadd.f32 %v647_v51, %v1480_v45  ;;  %v593_v54 = vadd.f32 %v592_v52, %v1492_v62  ;;  %v611_v55 = vpop.f32.mrf.mxu1 }
 0x107   :  { %v698_v56 = vmax.f32 %v629_v31, 0.0  ;;  %v612_v57 = vadd.f32 %v611_v55, %v1492_v62 }
 0x108   :  { %v699_v58 = vmax.f32 %v648_v53, 0.0  ;;  %v712_v59 = vmax.f32 %v593_v54, 0.0 }
 0x109   :  { %v713_v60 = vmax.f32 %v612_v57, 0.0 }
 0x10a   :  { %v739_v61 = vpack.c.bf16 %v699_v58, %v698_v56 }
 0x10b   :  { %v746_v63 = vpack.c.bf16 %v713_v60, %v712_v59 }
 0x10c   :  { %774 = vst.msk [vmem:[%s1650_s3 + $0xb8] sm:$0xff] %vm1604_vm3, %v739_v61  ;;  %v630_v0 = vpop.f32.mrf.mxu2 }
 0x10d   :  { %781 = vst [vmem:[%s1650_s3 + $0xf0] sm:$0xff] %v746_v63  ;;  %v631_v45 = vadd.f32 %v630_v0, %v1492_v62  ;;  %v649_v1 = vpop.f32.mrf.mxu3 }
 0x10e   :  { %v650_v2 = vadd.f32 %v649_v1, %v1492_v62 }
 0x10f   :  { %v714_v3 = vmax.f32 %v631_v45, 0.0 }
 0x110   :  { %v715_v4 = vmax.f32 %v650_v2, 0.0 }
 0x112   :  { %v747_v5 = vpack.c.bf16 %v715_v4, %v714_v3 }
 0x114   :  { %782 = vst.msk [vmem:[%s1650_s3 + $0xf8] sm:$0xff] %vm1604_vm3, %v747_v5 }

// kernel: beta_vae_forward.10
= control target key start
LH: loop header
LB: loop body
LE: loop exit
PB: predicated region body
PF: predicated region fallthrough
CT: control target
= control target key end

     0   :  { %vm1183_vm0 = vcmask 1043456   ;;  %vm1184_vm1 = vcmask 64516   ;;  %s2837_s1 = inlined_call_operand.vmem [shape: bf16[512,392], index: 1, kind: input, shape index: {}]   ;;  %s2838_s0 = inlined_call_operand.vmem [shape: bf16[32,512], index: 0, kind: input, shape index: {}]   ;;  %s2839_s2 = inlined_call_operand.vmem [shape: f32[32,1], index: 2, kind: input, shape index: {}]   ;;  %s2840_s3 = inlined_call_operand.vmem [shape: bf16[32,392], index: 3, kind: output, shape index: {}]  }
   0x1   :  { %v1343_v0 = vld [vmem:[%s2837_s1 + $0xe0] sm:$0xf]  ;;  %v1779_v1 = vld [vmem:[%s2837_s1 + $0xec] sm:$0xf0]  ;;  %vm2810_vm2 = vmor %vm1184_vm1, %vm1183_vm0 }
   0x2   :  { %v1471_v2 = vld [vmem:[%s2837_s1 + $0x1e0] sm:$0xf]  ;;  %v1344_v3 = vor.u32 %v1779_v1, %v1343_v0  ;;  %v1811_v4 = vld [vmem:[%s2837_s1 + $0x1ec] sm:$0xf0] }
   0x3   :  { %v1599_v5 = vld [vmem:[%s2837_s1 + $0x2e0] sm:$0xf]  ;;  %v1843_v6 = vld [vmem:[%s2837_s1 + $0x2ec] sm:$0xf0]  ;;  %v1472_v7 = vor.u32 %v1811_v4, %v1471_v2 }
   0x4   :  { %v1600_v8 = vor.u32 %v1843_v6, %v1599_v5  ;;  %v1727_v9 = vld [vmem:[%s2837_s1 + $0x3e0] sm:$0xf]  ;;  %v1875_v10 = vld [vmem:[%s2837_s1 + $0x3ec] sm:$0xf0]  ;;  %854 = vmatpush.bf16.msra.mxu0 %v1344_v3 }
   0x5   :  { %v1327_v11 = vld [vmem:[%s2837_s1 + $0xc0] sm:$0xf]  ;;  %v1728_v12 = vor.u32 %v1875_v10, %v1727_v9  ;;  %v1775_v13 = vld [vmem:[%s2837_s1 + $0xcc] sm:$0xf0]  ;;  %873 = vmatpush.bf16.msra.mxu1 %v1472_v7 }
   0x6   :  { %v1455_v14 = vld [vmem:[%s2837_s1 + $0x1c0] sm:$0xf]  ;;  %v1807_v15 = vld [vmem:[%s2837_s1 + $0x1cc] sm:$0xf0]  ;;  %892 = vmatpush.bf16.msra.mxu2 %v1600_v8  ;;  %v1328_v16 = vor.u32 %v1775_v13, %v1327_v11 }
   0x7   :  { %v1456_v17 = vor.u32 %v1807_v15, %v1455_v14  ;;  %v1583_v18 = vld [vmem:[%s2837_s1 + $0x2c0] sm:$0xf]  ;;  %v1839_v19 = vld [vmem:[%s2837_s1 + $0x2cc] sm:$0xf0]  ;;  %911 = vmatpush.bf16.msra.mxu3 %v1728_v12 }
   0x8   :  { %v1711_v20 = vld [vmem:[%s2837_s1 + $0x3c0] sm:$0xf]  ;;  %v1584_v21 = vor.u32 %v1839_v19, %v1583_v18  ;;  %v1871_v22 = vld [vmem:[%s2837_s1 + $0x3cc] sm:$0xf0]  ;;  %855 = vmatpush.bf16.msra.mxu0 %v1328_v16 }
   0x9   :  { %v1311_v23 = vld [vmem:[%s2837_s1 + $0xa0] sm:$0xf]  ;;  %v1771_v24 = vld [vmem:[%s2837_s1 + $0xac] sm:$0xf0]  ;;  %v1712_v25 = vor.u32 %v1871_v22, %v1711_v20  ;;  %874 = vmatpush.bf16.msra.mxu1 %v1456_v17 }
   0xa   :  { %v1439_v26 = vld [vmem:[%s2837_s1 + $0x1a0] sm:$0xf]  ;;  %v1803_v27 = vld [vmem:[%s2837_s1 + $0x1ac] sm:$0xf0]  ;;  %v1312_v29 = vor.u32 %v1771_v24, %v1311_v23  ;;  %893 = vmatpush.bf16.msra.mxu2 %v1584_v21 }
   0xb   :  { %v1567_v28 = vld [vmem:[%s2837_s1 + $0x2a0] sm:$0xf]  ;;  %v1835_v30 = vld [vmem:[%s2837_s1 + $0x2ac] sm:$0xf0]  ;;  %v1440_v33 = vor.u32 %v1803_v27, %v1439_v26  ;;  %912 = vmatpush.bf16.msra.mxu3 %v1712_v25 }
   0xc   :  { %v1695_v31 = vld [vmem:[%s2837_s1 + $0x3a0] sm:$0xf]  ;;  %v1867_v32 = vld [vmem:[%s2837_s1 + $0x3ac] sm:$0xf0]  ;;  %v1568_v34 = vor.u32 %v1835_v30, %v1567_v28  ;;  %856 = vmatpush.bf16.msra.mxu0 %v1312_v29  ;;  %v1741_v30 = vld [vmem:[%s2838_s0 + $0x4] sm:$0xf] }
   0xd   :  { %v1295_v35 = vld [vmem:[%s2837_s1 + $0x80] sm:$0xf]  ;;  %v1767_v36 = vld [vmem:[%s2837_s1 + $0x8c] sm:$0xf0]  ;;  %v1696_v38 = vor.u32 %v1867_v32, %v1695_v31  ;;  %875 = vmatpush.bf16.msra.mxu1 %v1440_v33  ;;  %v1201_v31 = vld [vmem:[%s2838_s0 + $0x10] sm:$0xf0] }
   0xe   :  { %v1423_v37 = vld [vmem:[%s2837_s1 + $0x180] sm:$0xf]  ;;  %v1799_v39 = vld [vmem:[%s2837_s1 + $0x18c] sm:$0xf0]  ;;  %v1296_v44 = vor.u32 %v1767_v36, %v1295_v35  ;;  %894 = vmatpush.bf16.msra.mxu2 %v1568_v34  ;;  %v1841_v32 = vld [vmem:[%s2837_s1 + $0x2e4] sm:$0xf] }
   0xf   :  { %v1551_v40 = vld [vmem:[%s2837_s1 + $0x280] sm:$0xf]  ;;  %v1831_v41 = vld [vmem:[%s2837_s1 + $0x28c] sm:$0xf0]  ;;  %v1424_v45 = vor.u32 %v1799_v39, %v1423_v37  ;;  %913 = vmatpush.bf16.msra.mxu3 %v1696_v38  ;;  %v1601_v33 = vld [vmem:[%s2837_s1 + $0x2f0] sm:$0xf0] }
  0x10   :  { %v1679_v42 = vld [vmem:[%s2837_s1 + $0x380] sm:$0xf]  ;;  %v1863_v43 = vld [vmem:[%s2837_s1 + $0x38c] sm:$0xf0]  ;;  %v1552_v46 = vor.u32 %v1831_v41, %v1551_v40  ;;  %857 = vmatpush.bf16.msra.mxu0 %v1296_v44  ;;  %v1207_v35 = vld [vmem:[%s2838_s0 + $0x8] sm:$0xf]  ;;  %v1604_v44 = vor.u32 %v1841_v32, %v1601_v33 }
  0x11   :  { %v1279_v47 = vld [vmem:[%s2837_s1 + $0x60] sm:$0xf]  ;;  %v1763_v48 = vld [vmem:[%s2837_s1 + $0x6c] sm:$0xf0]  ;;  %v1680_v50 = vor.u32 %v1863_v43, %v1679_v42  ;;  %876 = vmatpush.bf16.msra.mxu1 %v1424_v45  ;;  %v1809_v36 = vld [vmem:[%s2837_s1 + $0x1e4] sm:$0xf] }
  0x12   :  { %v1407_v49 = vld [vmem:[%s2837_s1 + $0x160] sm:$0xf]  ;;  %v1795_v51 = vld [vmem:[%s2837_s1 + $0x16c] sm:$0xf0]  ;;  %v1280_v56 = vor.u32 %v1763_v48, %v1279_v47  ;;  %895 = vmatpush.bf16.msra.mxu2 %v1552_v46  ;;  %v1473_v37 = vld [vmem:[%s2837_s1 + $0x1f0] sm:$0xf0] }
  0x13   :  { %v1535_v52 = vld [vmem:[%s2837_s1 + $0x260] sm:$0xf]  ;;  %v1827_v53 = vld [vmem:[%s2837_s1 + $0x26c] sm:$0xf0]  ;;  %v1408_v57 = vor.u32 %v1795_v51, %v1407_v49  ;;  %914 = vmatpush.bf16.msra.mxu3 %v1680_v50  ;;  %v1744_v40 = vld [vmem:[%s2838_s0 + $0x14] sm:$0xf0]  ;;  %v1476_v49 = vor.u32 %v1809_v36, %v1473_v37 }
  0x14   :  { %v1663_v54 = vld [vmem:[%s2837_s1 + $0x360] sm:$0xf]  ;;  %v1859_v55 = vld [vmem:[%s2837_s1 + $0x36c] sm:$0xf0]  ;;  %v1536_v58 = vor.u32 %v1827_v53, %v1535_v52  ;;  %858 = vmatpush.bf16.msra.mxu0 %v1280_v56  ;;  %v1742_v41 = vld [vmem:[%s2838_s0 + $0xc] sm:$0xf]  ;;  %v2149_v53 = vor.u32 %v1741_v30, %v1201_v31 }
  0x15   :  { %v1263_v59 = vld [vmem:[%s2837_s1 + $0x40] sm:$0xf]  ;;  %v1759_v60 = vld [vmem:[%s2837_s1 + $0x4c] sm:$0xf0]  ;;  %v1664_v62 = vor.u32 %v1859_v55, %v1663_v54  ;;  %877 = vmatpush.bf16.msra.mxu1 %v1408_v57  ;;  %v1209_v42 = vld [vmem:[%s2838_s0 + $0x18] sm:$0xf0]  ;;  %v2151_v54 = vor.u32 %v1744_v40, %v1207_v35 }
  0x16   :  { %v1391_v61 = vld [vmem:[%s2837_s1 + $0x140] sm:$0xf]  ;;  %v1791_v63 = vld [vmem:[%s2837_s1 + $0x14c] sm:$0xf0]  ;;  %v1264_v4 = vor.u32 %v1759_v60, %v1263_v59  ;;  %896 = vmatpush.bf16.msra.mxu2 %v1536_v58  ;;  %v1777_v45 = vld [vmem:[%s2837_s1 + $0xe4] sm:$0xf]  ;;  %v2159_v57 = vor.u32 %v1742_v41, %v1209_v42 }
  0x17   :  { %v1519_v0 = vld [vmem:[%s2837_s1 + $0x240] sm:$0xf]  ;;  %v1823_v1 = vld [vmem:[%s2837_s1 + $0x24c] sm:$0xf0]  ;;  %v1392_v5 = vor.u32 %v1791_v63, %v1391_v61  ;;  %915 = vmatpush.bf16.msra.mxu3 %v1664_v62  ;;  %v1345_v46 = vld [vmem:[%s2837_s1 + $0xf0] sm:$0xf0] }
  0x18   :  { %v1647_v2 = vld [vmem:[%s2837_s1 + $0x340] sm:$0xf]  ;;  %v1855_v3 = vld [vmem:[%s2837_s1 + $0x34c] sm:$0xf0]  ;;  %v1520_v6 = vor.u32 %v1823_v1, %v1519_v0  ;;  %859 = vmatpush.bf16.msra.mxu0 %v1264_v4  ;;  %v1873_v47 = vld [vmem:[%s2837_s1 + $0x3e4] sm:$0xf]  ;;  %v1348_v58 = vor.u32 %v1777_v45, %v1345_v46 }
  0x19   :  { %v1247_v7 = vld [vmem:[%s2837_s1 + $0x20] sm:$0xf]  ;;  %v1755_v8 = vld [vmem:[%s2837_s1 + $0x2c] sm:$0xf0]  ;;  %v1648_v10 = vor.u32 %v1855_v3, %v1647_v2  ;;  %878 = vmatpush.bf16.msra.mxu1 %v1392_v5  ;;  %v1729_v50 = vld [vmem:[%s2837_s1 + $0x3f0] sm:$0xf0] }
  0x1a   :  { %v1375_v9 = vld [vmem:[%s2837_s1 + $0x120] sm:$0xf]  ;;  %v1787_v11 = vld [vmem:[%s2837_s1 + $0x12c] sm:$0xf0]  ;;  %v1248_v17 = vor.u32 %v1755_v8, %v1247_v7  ;;  %897 = vmatpush.bf16.msra.mxu2 %v1520_v6  ;;  %v1837_v51 = vld [vmem:[%s2837_s1 + $0x2c4] sm:$0xf]  ;;  %v1732_v59 = vor.u32 %v1873_v47, %v1729_v50 }
  0x1b   :  { %v1503_v12 = vld [vmem:[%s2837_s1 + $0x220] sm:$0xf]  ;;  %v1819_v13 = vld [vmem:[%s2837_s1 + $0x22c] sm:$0xf0]  ;;  %v1376_v21 = vor.u32 %v1787_v11, %v1375_v9  ;;  %916 = vmatpush.bf16.msra.mxu3 %v1648_v10  ;;  %v1585_v52 = vld [vmem:[%s2837_s1 + $0x2d0] sm:$0xf0] }
  0x1c   :  { %v1631_v14 = vld [vmem:[%s2837_s1 + $0x320] sm:$0xf]  ;;  %v1851_v15 = vld [vmem:[%s2837_s1 + $0x32c] sm:$0xf0]  ;;  %v1504_v22 = vor.u32 %v1819_v13, %v1503_v12  ;;  %860 = vmatpush.bf16.msra.mxu0 %v1248_v17  ;;  %v1805_v55 = vld [vmem:[%s2837_s1 + $0x1c4] sm:$0xf]  ;;  %v1588_v60 = vor.u32 %v1837_v51, %v1585_v52 }
  0x1d   :  { %v1231_v16 = vld [vmem:[%s2837_s1] sm:$0xf]  ;;  %v1751_v18 = vld [vmem:[%s2837_s1 + $0xc] sm:$0xf0]  ;;  %v1632_v26 = vor.u32 %v1851_v15, %v1631_v14  ;;  %879 = vmatpush.bf16.msra.mxu1 %v1376_v21  ;;  %v1457_v56 = vld [vmem:[%s2837_s1 + $0x1d0] sm:$0xf0] }
  0x1e   :  { %v1359_v19 = vld [vmem:[%s2837_s1 + $0x100] sm:$0xf]  ;;  %v1783_v20 = vld [vmem:[%s2837_s1 + $0x10c] sm:$0xf0]  ;;  %v1232_v34 = vor.u32 %v1751_v18, %v1231_v16  ;;  %898 = vmatpush.bf16.msra.mxu2 %v1504_v22  ;;  %v1773_v61 = vld [vmem:[%s2837_s1 + $0xc4] sm:$0xf]  ;;  %v1460_v0 = vor.u32 %v1805_v55, %v1457_v56 }
  0x1f   :  { %v1487_v23 = vld [vmem:[%s2837_s1 + $0x200] sm:$0xf]  ;;  %v1815_v24 = vld [vmem:[%s2837_s1 + $0x20c] sm:$0xf0]  ;;  %v1360_v38 = vor.u32 %v1783_v20, %v1359_v19  ;;  %917 = vmatpush.bf16.msra.mxu3 %v1632_v26  ;;  %v1329_v62 = vld [vmem:[%s2837_s1 + $0xd0] sm:$0xf0] }
  0x20   :  { %v1615_v25 = vld [vmem:[%s2837_s1 + $0x300] sm:$0xf]  ;;  %v1847_v27 = vld [vmem:[%s2837_s1 + $0x30c] sm:$0xf0]  ;;  %v1488_v39 = vor.u32 %v1815_v24, %v1487_v23  ;;  %861 = vmatpush.bf16.msra.mxu0 %v1232_v34  ;;  %v1869_v63 = vld [vmem:[%s2837_s1 + $0x3c4] sm:$0xf]  ;;  %v1332_v6 = vor.u32 %v1773_v61, %v1329_v62 }
  0x21   :  { %v1199_v28 = vld [vmem:[%s2838_s0] sm:$0xf]  ;;  %v1743_v29 = vld [vmem:[%s2838_s0 + $0xc] sm:$0xf0]  ;;  %v1616_v43 = vor.u32 %v1847_v27, %v1615_v25  ;;  %880 = vmatpush.bf16.msra.mxu1 %v1360_v38  ;;  %v1713_v1 = vld [vmem:[%s2837_s1 + $0x3d0] sm:$0xf0] }
  0x22   :  { %v2138_v48 = vor.u32 %v1743_v29, %v1199_v28  ;;  %899 = vmatpush.bf16.msra.mxu2 %v1488_v39  ;;  %v1833_v2 = vld [vmem:[%s2837_s1 + $0x2a4] sm:$0xf]  ;;  %v1569_v3 = vld [vmem:[%s2837_s1 + $0x2b0] sm:$0xf0]  ;;  %v1716_v8 = vor.u32 %v1869_v63, %v1713_v1  ;;  %v1880_v15 = vmov 0   ;;  %v151_v42 = vld [vmem:[%s2839_s2 + $0x8] sm:$0xff] }
  0x23   :  { %918 = vmatpush.bf16.msra.mxu3 %v1616_v43  ;;  %v1801_v4 = vld [vmem:[%s2837_s1 + $0x1a4] sm:$0xf]  ;;  %v1441_v5 = vld [vmem:[%s2837_s1 + $0x1b0] sm:$0xf0]  ;;  %v1572_v9 = vor.u32 %v1833_v2, %v1569_v3  ;;  %1878 = vset.pattern.permute.xlu0 %v1880_v15  ;;  %v1215_v27 = vld [vmem:[%s2838_s0 + $0x20] sm:$0xf] }
  0x24   :  { %862 = vmatmul.bf16.vlgmr.msra.gmra.mxu0 %v2138_v48  ;;  %881 = vmatmul.bf16.vlgmr.msra.gmra.mxu1 %v2149_v53  ;;  %v150_v7 = vld [vmem:[%s2839_s2] sm:$0xff]  ;;  %v1313_v11 = vld [vmem:[%s2837_s1 + $0xb0] sm:$0xf0]  ;;  %v1444_v13 = vor.u32 %v1801_v4, %v1441_v5  ;;  %v1747_v28 = vld [vmem:[%s2838_s0 + $0x2c] sm:$0xf0] }
  0x25   :  { %949 = vmatpush.bf16.msrb.mxu1 %v1476_v49  ;;  %900 = vmatmul.bf16.vlgmr.msra.gmra.mxu2 %v2151_v54  ;;  %v1769_v10 = vld [vmem:[%s2837_s1 + $0xa4] sm:$0xf]  ;;  %v1697_v14 = vld [vmem:[%s2837_s1 + $0x3b0] sm:$0xf0]  ;;  %v1223_v32 = vld [vmem:[%s2838_s0 + $0x28] sm:$0xf]  ;;  %v2279_v49 = vor.u32 %v1747_v28, %v1215_v27 }
  0x26   :  { %968 = vmatpush.bf16.msrb.mxu2 %v1604_v44  ;;  %919 = vmatmul.bf16.vlgmr.msra.gmra.mxu3 %v2159_v57  ;;  %v1865_v12 = vld [vmem:[%s2837_s1 + $0x3a4] sm:$0xf]  ;;  %v1553_v17 = vld [vmem:[%s2837_s1 + $0x290] sm:$0xf0]  ;;  %v1316_v20 = vor.u32 %v1769_v10, %v1313_v11  ;;  %v1748_v33 = vld [vmem:[%s2838_s0 + $0x34] sm:$0xf0] }
  0x27   :  { %930 = vmatpush.bf16.msrb.mxu0 %v1348_v58  ;;  %987 = vmatpush.bf16.msrb.mxu3 %v1732_v59  ;;  %v1829_v16 = vld [vmem:[%s2837_s1 + $0x284] sm:$0xf]  ;;  %v1425_v19 = vld [vmem:[%s2837_s1 + $0x190] sm:$0xf0]  ;;  %v1700_v24 = vor.u32 %v1865_v12, %v1697_v14  ;;  %v1746_v36 = vld [vmem:[%s2838_s0 + $0x2c] sm:$0xf]  ;;  %v2292_v58 = vor.u32 %v1748_v33, %v1223_v32 }
  0x28   :  { %156 = vperm.xlu0 %1878, %v150_v7   ;;  %v1797_v18 = vld [vmem:[%s2837_s1 + $0x184] sm:$0xf]  ;;  %1879 = vset.pattern.permute.xlu1 %v1880_v15  ;;  %v1297_v22 = vld [vmem:[%s2837_s1 + $0x90] sm:$0xf0]  ;;  %v1556_v25 = vor.u32 %v1829_v16, %v1553_v17  ;;  %v1225_v40 = vld [vmem:[%s2838_s0 + $0x38] sm:$0xf0] }
  0x29   :  { %950 = vmatpush.bf16.msrb.mxu1 %v1460_v0  ;;  %v1765_v21 = vld [vmem:[%s2837_s1 + $0x84] sm:$0xf]  ;;  %v1681_v26 = vld [vmem:[%s2837_s1 + $0x390] sm:$0xf0]  ;;  %v1428_v29 = vor.u32 %v1797_v18, %v1425_v19  ;;  %v2300_v61 = vor.u32 %v1746_v36, %v1225_v40  ;;  %v153_v12 = vld [vmem:[%s2839_s2 + $0x18] sm:$0xff] }
  0x2a   :  { %969 = vmatpush.bf16.msrb.mxu2 %v1588_v60  ;;  %v1861_v23 = vld [vmem:[%s2837_s1 + $0x384] sm:$0xf]  ;;  %v1217_v31 = vld [vmem:[%s2838_s0 + $0x30] sm:$0xf0]  ;;  %v1300_v39 = vor.u32 %v1765_v21, %v1297_v22  ;;  %v1479_v27 = vld [vmem:[%s2837_s1 + $0x1e8] sm:$0xf] }
  0x2b   :  { %931 = vmatpush.bf16.msrb.mxu0 %v1332_v6  ;;  %988 = vmatpush.bf16.msrb.mxu3 %v1716_v8  ;;  %v1745_v30 = vld [vmem:[%s2838_s0 + $0x24] sm:$0xf]  ;;  %v1537_v35 = vld [vmem:[%s2837_s1 + $0x270] sm:$0xf0]  ;;  %v1684_v43 = vor.u32 %v1861_v23, %v1681_v26  ;;  %v1607_v23 = vld [vmem:[%s2837_s1 + $0x2e8] sm:$0xf] }
  0x2c   :  { %v1825_v34 = vld [vmem:[%s2837_s1 + $0x264] sm:$0xf]  ;;  %v1409_v38 = vld [vmem:[%s2837_s1 + $0x170] sm:$0xf0]  ;;  %v2290_v56 = vor.u32 %v1745_v30, %v1217_v31  ;;  %v1812_v28 = vld [vmem:[%s2837_s1 + $0x1f4] sm:$0xf0] }
  0x2d   :  { %951 = vmatpush.bf16.msrb.mxu1 %v1444_v13  ;;  %v1793_v37 = vld [vmem:[%s2837_s1 + $0x164] sm:$0xf]  ;;  %v1540_v44 = vor.u32 %v1825_v34, %v1537_v35  ;;  %v1281_v45 = vld [vmem:[%s2837_s1 + $0x70] sm:$0xf0]  ;;  %v1351_v36 = vld [vmem:[%s2837_s1 + $0xe8] sm:$0xf] }
  0x2e   :  { %970 = vmatpush.bf16.msrb.mxu2 %v1572_v9  ;;  %v1761_v41 = vld [vmem:[%s2837_s1 + $0x64] sm:$0xf]  ;;  %v1665_v47 = vld [vmem:[%s2837_s1 + $0x370] sm:$0xf0]  ;;  %v1412_v50 = vor.u32 %v1793_v37, %v1409_v38  ;;  %v1780_v37 = vld [vmem:[%s2837_s1 + $0xf4] sm:$0xf0] }
  0x2f   :  { %932 = vmatpush.bf16.msrb.mxu0 %v1316_v20  ;;  %989 = vmatpush.bf16.msrb.mxu3 %v1700_v24  ;;  %v1857_v46 = vld [vmem:[%s2837_s1 + $0x364] sm:$0xf]  ;;  %v1521_v52 = vld [vmem:[%s2837_s1 + $0x250] sm:$0xf0]  ;;  %v1284_v62 = vor.u32 %v1761_v41, %v1281_v45  ;;  %v1844_v24 = vld [vmem:[%s2837_s1 + $0x2f4] sm:$0xf0]  ;;  %v1352_v45 = vor.u32 %v1780_v37, %v1351_v36 }
  0x30   :  { %v1821_v51 = vld [vmem:[%s2837_s1 + $0x244] sm:$0xf]  ;;  %v152_v55 = vld [vmem:[%s2839_s2 + $0x10] sm:$0xff]  ;;  %161 = vperm.xlu0 %1878, %v151_v42   ;;  %v1668_v63 = vor.u32 %v1857_v46, %v1665_v47  ;;  %v1608_v35 = vor.u32 %v1844_v24, %v1607_v23  ;;  %v1735_v38 = vld [vmem:[%s2837_s1 + $0x3e8] sm:$0xf] }
  0x31   :  { %952 = vmatpush.bf16.msrb.mxu1 %v1428_v29  ;;  %v1789_v59 = vld [vmem:[%s2837_s1 + $0x144] sm:$0xf]  ;;  %v1393_v60 = vld [vmem:[%s2837_s1 + $0x150] sm:$0xf0]  ;;  %166 = vperm.xlu1 %1879, %v152_v55   ;;  %v1524_v0 = vor.u32 %v1821_v51, %v1521_v52  ;;  %v1876_v40 = vld [vmem:[%s2837_s1 + $0x3f4] sm:$0xf0] }
  0x32   :  { %971 = vmatpush.bf16.msrb.mxu2 %v1556_v25  ;;  %v1757_v1 = vld [vmem:[%s2837_s1 + $0x44] sm:$0xf]  ;;  %v1265_v2 = vld [vmem:[%s2837_s1 + $0x50] sm:$0xf0]  ;;  %v1396_v4 = vor.u32 %v1789_v59, %v1393_v60  ;;  %v1591_v41 = vld [vmem:[%s2837_s1 + $0x2c8] sm:$0xf] }
  0x33   :  { %933 = vmatpush.bf16.msrb.mxu0 %v1300_v39  ;;  %990 = vmatpush.bf16.msrb.mxu3 %v1684_v43  ;;  %v1853_v3 = vld [vmem:[%s2837_s1 + $0x344] sm:$0xf]  ;;  %v1649_v5 = vld [vmem:[%s2837_s1 + $0x350] sm:$0xf0]  ;;  %v1268_v10 = vor.u32 %v1757_v1, %v1265_v2  ;;  %v1480_v39 = vor.u32 %v1812_v28, %v1479_v27  ;;  %v1840_v42 = vld [vmem:[%s2837_s1 + $0x2d4] sm:$0xf0] }
  0x34   :  { %867 = vmatmul.bf16.gmra.mxu0 %v2279_v49  ;;  %v1817_v6 = vld [vmem:[%s2837_s1 + $0x224] sm:$0xf]  ;;  %v1505_v7 = vld [vmem:[%s2837_s1 + $0x230] sm:$0xf0]  ;;  %886 = vmatmul.bf16.gmra.mxu1 %v2290_v56  ;;  %v1652_v13 = vor.u32 %v1853_v3, %v1649_v5  ;;  %v1335_v46 = vld [vmem:[%s2837_s1 + $0xc8] sm:$0xf]  ;;  %v1592_v51 = vor.u32 %v1840_v42, %v1591_v41 }
  0x35   :  { %953 = vmatpush.bf16.msrb.mxu1 %v1412_v50  ;;  %905 = vmatmul.bf16.gmra.mxu2 %v2292_v58  ;;  %v1785_v8 = vld [vmem:[%s2837_s1 + $0x124] sm:$0xf]  ;;  %v1377_v9 = vld [vmem:[%s2837_s1 + $0x130] sm:$0xf0]  ;;  %v1508_v14 = vor.u32 %v1817_v6, %v1505_v7  ;;  %v1776_v47 = vld [vmem:[%s2837_s1 + $0xd4] sm:$0xf0]  ;;  %v1736_v50 = vor.u32 %v1876_v40, %v1735_v38 }
  0x36   :  { %972 = vmatpush.bf16.msrb.mxu2 %v1540_v44  ;;  %924 = vmatmul.bf16.gmra.mxu3 %v2300_v61  ;;  %v1753_v11 = vld [vmem:[%s2837_s1 + $0x24] sm:$0xf]  ;;  %v1249_v15 = vld [vmem:[%s2837_s1 + $0x30] sm:$0xf0]  ;;  %v1380_v18 = vor.u32 %v1785_v8, %v1377_v9  ;;  %v1463_v52 = vld [vmem:[%s2837_s1 + $0x1c8] sm:$0xf] }
  0x37   :  { %934 = vmatpush.bf16.msrb.mxu0 %v1284_v62  ;;  %991 = vmatpush.bf16.msrb.mxu3 %v1668_v63  ;;  %v1849_v16 = vld [vmem:[%s2837_s1 + $0x324] sm:$0xf]  ;;  %v1633_v17 = vld [vmem:[%s2837_s1 + $0x330] sm:$0xf0]  ;;  %v1252_v25 = vor.u32 %v1753_v11, %v1249_v15  ;;  %v1808_v55 = vld [vmem:[%s2837_s1 + $0x1d4] sm:$0xf0] }
  0x38   :  { %v1813_v19 = vld [vmem:[%s2837_s1 + $0x204] sm:$0xf]  ;;  %v1489_v20 = vld [vmem:[%s2837_s1 + $0x210] sm:$0xf0]  ;;  %v1636_v29 = vor.u32 %v1849_v16, %v1633_v17  ;;  %v1719_v59 = vld [vmem:[%s2837_s1 + $0x3c8] sm:$0xf]  ;;  %v1464_v1 = vor.u32 %v1808_v55, %v1463_v52 }
  0x39   :  { %954 = vmatpush.bf16.msrb.mxu1 %v1396_v4  ;;  %v1781_v21 = vld [vmem:[%s2837_s1 + $0x104] sm:$0xf]  ;;  %v1361_v22 = vld [vmem:[%s2837_s1 + $0x110] sm:$0xf0]  ;;  %171 = vperm.xlu1 %1879, %v153_v12   ;;  %v1492_v30 = vor.u32 %v1813_v19, %v1489_v20  ;;  %v1872_v60 = vld [vmem:[%s2837_s1 + $0x3d4] sm:$0xf0] }
  0x3a   :  { %973 = vmatpush.bf16.msrb.mxu2 %v1524_v0  ;;  %v1749_v26 = vld [vmem:[%s2837_s1 + $0x4] sm:$0xf]  ;;  %v1233_v31 = vld [vmem:[%s2837_s1 + $0x10] sm:$0xf0]  ;;  %v1364_v34 = vor.u32 %v1781_v21, %v1361_v22  ;;  %v1575_v62 = vld [vmem:[%s2837_s1 + $0x2a8] sm:$0xf]  ;;  %v1336_v0 = vor.u32 %v1776_v47, %v1335_v46  ;;  %v1720_v4 = vor.u32 %v1872_v60, %v1719_v59 }
  0x3b   :  { %935 = vmatpush.bf16.msrb.mxu0 %v1268_v10  ;;  %992 = vmatpush.bf16.msrb.mxu3 %v1652_v13  ;;  %v1845_v32 = vld [vmem:[%s2837_s1 + $0x304] sm:$0xf]  ;;  %v1617_v33 = vld [vmem:[%s2837_s1 + $0x310] sm:$0xf0]  ;;  %v1236_v43 = vor.u32 %v1749_v26, %v1233_v31  ;;  %v1836_v63 = vld [vmem:[%s2837_s1 + $0x2b4] sm:$0xf0] }
  0x3c   :  { %v1620_v44 = vor.u32 %v1845_v32, %v1617_v33  ;;  %v1319_v2 = vld [vmem:[%s2837_s1 + $0xa8] sm:$0xf]  ;;  %v1772_v3 = vld [vmem:[%s2837_s1 + $0xb4] sm:$0xf0]  ;;  %v1576_v5 = vor.u32 %v1836_v63, %v1575_v62 }
  0x3d   :  { %955 = vmatpush.bf16.msrb.mxu1 %v1380_v18  ;;  %v1447_v6 = vld [vmem:[%s2837_s1 + $0x1a8] sm:$0xf]  ;;  %v1804_v7 = vld [vmem:[%s2837_s1 + $0x1b4] sm:$0xf0]  ;;  %v1320_v12 = vor.u32 %v1772_v3, %v1319_v2 }
  0x3e   :  { %974 = vmatpush.bf16.msrb.mxu2 %v1508_v14  ;;  %v1703_v8 = vld [vmem:[%s2837_s1 + $0x3a8] sm:$0xf]  ;;  %v1868_v9 = vld [vmem:[%s2837_s1 + $0x3b4] sm:$0xf0]  ;;  %v1448_v13 = vor.u32 %v1804_v7, %v1447_v6 }
  0x3f   :  { %936 = vmatpush.bf16.msrb.mxu0 %v1252_v25  ;;  %993 = vmatpush.bf16.msrb.mxu3 %v1636_v29  ;;  %v1559_v10 = vld [vmem:[%s2837_s1 + $0x288] sm:$0xf]  ;;  %v1832_v11 = vld [vmem:[%s2837_s1 + $0x294] sm:$0xf0]  ;;  %v1704_v16 = vor.u32 %v1868_v9, %v1703_v8 }
  0x40   :  { %v1303_v14 = vld [vmem:[%s2837_s1 + $0x88] sm:$0xf]  ;;  %v1768_v15 = vld [vmem:[%s2837_s1 + $0x94] sm:$0xf0]  ;;  %v1560_v17 = vor.u32 %v1832_v11, %v1559_v10 }
  0x41   :  { %956 = vmatpush.bf16.msrb.mxu1 %v1364_v34  ;;  %v1431_v18 = vld [vmem:[%s2837_s1 + $0x188] sm:$0xf]  ;;  %v1800_v19 = vld [vmem:[%s2837_s1 + $0x194] sm:$0xf0]  ;;  %v1304_v24 = vor.u32 %v1768_v15, %v1303_v14 }
  0x42   :  { %975 = vmatpush.bf16.msrb.mxu2 %v1492_v30  ;;  %v1687_v20 = vld [vmem:[%s2837_s1 + $0x388] sm:$0xf]  ;;  %v1864_v21 = vld [vmem:[%s2837_s1 + $0x394] sm:$0xf0]  ;;  %v1432_v25 = vor.u32 %v1800_v19, %v1431_v18  ;;  %v1353_v18 = vld [vmem:[%s2837_s1 + $0xf8] sm:$0xf0] }
  0x43   :  { %937 = vmatpush.bf16.msrb.mxu0 %v1236_v43  ;;  %994 = vmatpush.bf16.msrb.mxu3 %v1620_v44  ;;  %v1543_v22 = vld [vmem:[%s2837_s1 + $0x268] sm:$0xf]  ;;  %v1828_v23 = vld [vmem:[%s2837_s1 + $0x274] sm:$0xf0]  ;;  %v1688_v28 = vor.u32 %v1864_v21, %v1687_v20  ;;  %v1810_v19 = vld [vmem:[%s2837_s1 + $0x1ec] sm:$0xf] }
  0x44   :  { %957 = vmatmul.bf16.vlgmr.msrb.gmra.mxu1 %v2149_v53  ;;  %v1287_v26 = vld [vmem:[%s2837_s1 + $0x68] sm:$0xf]  ;;  %v1764_v27 = vld [vmem:[%s2837_s1 + $0x74] sm:$0xf0]  ;;  %v1544_v29 = vor.u32 %v1828_v23, %v1543_v22  ;;  %v1481_v20 = vld [vmem:[%s2837_s1 + $0x1f8] sm:$0xf0] }
  0x45   :  { %1025 = vmatpush.bf16.msra.mxu1 %v1480_v39  ;;  %976 = vmatmul.bf16.vlgmr.msrb.gmra.mxu2 %v2151_v54  ;;  %v1415_v30 = vld [vmem:[%s2837_s1 + $0x168] sm:$0xf]  ;;  %v1796_v31 = vld [vmem:[%s2837_s1 + $0x174] sm:$0xf0]  ;;  %v1288_v36 = vor.u32 %v1764_v27, %v1287_v26  ;;  %v1874_v21 = vld [vmem:[%s2837_s1 + $0x3ec] sm:$0xf] }
  0x46   :  { %1044 = vmatpush.bf16.msra.mxu2 %v1608_v35  ;;  %938 = vmatmul.bf16.vlgmr.msrb.gmra.mxu0 %v2138_v48  ;;  %v1671_v32 = vld [vmem:[%s2837_s1 + $0x368] sm:$0xf]  ;;  %v1860_v33 = vld [vmem:[%s2837_s1 + $0x374] sm:$0xf0]  ;;  %v1416_v37 = vor.u32 %v1796_v31, %v1415_v30  ;;  %v1737_v22 = vld [vmem:[%s2837_s1 + $0x3f8] sm:$0xf0] }
  0x47   :  { %1006 = vmatpush.bf16.msra.mxu0 %v1352_v45  ;;  %1063 = vmatpush.bf16.msra.mxu3 %v1736_v50  ;;  %v1527_v34 = vld [vmem:[%s2837_s1 + $0x248] sm:$0xf]  ;;  %v1824_v35 = vld [vmem:[%s2837_s1 + $0x254] sm:$0xf0]  ;;  %v1672_v40 = vor.u32 %v1860_v33, %v1671_v32  ;;  %v1593_v26 = vld [vmem:[%s2837_s1 + $0x2d8] sm:$0xf0]  ;;  %v1740_v30 = vor.u32 %v1874_v21, %v1737_v22 }
  0x48   :  { %995 = vmatmul.bf16.vlgmr.msrb.gmra.mxu3 %v2159_v57  ;;  %v1271_v38 = vld [vmem:[%s2837_s1 + $0x48] sm:$0xf]  ;;  %v1760_v39 = vld [vmem:[%s2837_s1 + $0x54] sm:$0xf0]  ;;  %v1528_v41 = vor.u32 %v1824_v35, %v1527_v34  ;;  %v1774_v31 = vld [vmem:[%s2837_s1 + $0xcc] sm:$0xf] }
  0x49   :  { %1026 = vmatpush.bf16.msra.mxu1 %v1464_v1  ;;  %v1399_v42 = vld [vmem:[%s2837_s1 + $0x148] sm:$0xf]  ;;  %v1792_v43 = vld [vmem:[%s2837_s1 + $0x154] sm:$0xf0]  ;;  %v1272_v50 = vor.u32 %v1760_v39, %v1271_v38  ;;  %v1337_v32 = vld [vmem:[%s2837_s1 + $0xd8] sm:$0xf0] }
  0x4a   :  { %1045 = vmatpush.bf16.msra.mxu2 %v1592_v51  ;;  %v1655_v44 = vld [vmem:[%s2837_s1 + $0x348] sm:$0xf]  ;;  %v1856_v45 = vld [vmem:[%s2837_s1 + $0x354] sm:$0xf0]  ;;  %v1400_v51 = vor.u32 %v1792_v43, %v1399_v42  ;;  %v1806_v34 = vld [vmem:[%s2837_s1 + $0x1cc] sm:$0xf] }
  0x4b   :  { %1007 = vmatpush.bf16.msra.mxu0 %v1336_v0  ;;  %1064 = vmatpush.bf16.msra.mxu3 %v1720_v4  ;;  %v1511_v46 = vld [vmem:[%s2837_s1 + $0x228] sm:$0xf]  ;;  %v1820_v47 = vld [vmem:[%s2837_s1 + $0x234] sm:$0xf0]  ;;  %v1656_v59 = vor.u32 %v1856_v45, %v1655_v44  ;;  %v1842_v4 = vld [vmem:[%s2837_s1 + $0x2ec] sm:$0xf] }
  0x4c   :  { %v1255_v52 = vld [vmem:[%s2837_s1 + $0x28] sm:$0xf]  ;;  %v1756_v55 = vld [vmem:[%s2837_s1 + $0x34] sm:$0xf0]  ;;  %v1512_v60 = vor.u32 %v1820_v47, %v1511_v46  ;;  %v1465_v35 = vld [vmem:[%s2837_s1 + $0x1d8] sm:$0xf0] }
  0x4d   :  { %1027 = vmatpush.bf16.msra.mxu1 %v1448_v13  ;;  %v1383_v62 = vld [vmem:[%s2837_s1 + $0x128] sm:$0xf]  ;;  %v1788_v63 = vld [vmem:[%s2837_s1 + $0x134] sm:$0xf0]  ;;  %v1256_v6 = vor.u32 %v1756_v55, %v1255_v52  ;;  %v1721_v38 = vld [vmem:[%s2837_s1 + $0x3d8] sm:$0xf0]  ;;  %v1468_v43 = vor.u32 %v1806_v34, %v1465_v35 }
  0x4e   :  { %1046 = vmatpush.bf16.msra.mxu2 %v1576_v5  ;;  %v1639_v0 = vld [vmem:[%s2837_s1 + $0x328] sm:$0xf]  ;;  %v1852_v1 = vld [vmem:[%s2837_s1 + $0x334] sm:$0xf0]  ;;  %v1609_v5 = vld [vmem:[%s2837_s1 + $0x2f8] sm:$0xf0]  ;;  %v1384_v7 = vor.u32 %v1788_v63, %v1383_v62 }
  0x4f   :  { %1008 = vmatpush.bf16.msra.mxu0 %v1320_v12  ;;  %1065 = vmatpush.bf16.msra.mxu3 %v1704_v16  ;;  %v1495_v2 = vld [vmem:[%s2837_s1 + $0x208] sm:$0xf]  ;;  %v1816_v3 = vld [vmem:[%s2837_s1 + $0x214] sm:$0xf0]  ;;  %v1640_v11 = vor.u32 %v1852_v1, %v1639_v0  ;;  %v1612_v16 = vor.u32 %v1842_v4, %v1609_v5  ;;  %v1834_v39 = vld [vmem:[%s2837_s1 + $0x2ac] sm:$0xf] }
  0x50   :  { %v1239_v8 = vld [vmem:[%s2837_s1 + $0x8] sm:$0xf]  ;;  %v1752_v9 = vld [vmem:[%s2837_s1 + $0x14] sm:$0xf0]  ;;  %v1496_v12 = vor.u32 %v1816_v3, %v1495_v2  ;;  %v1321_v42 = vld [vmem:[%s2837_s1 + $0xb8] sm:$0xf0] }
  0x51   :  { %1028 = vmatpush.bf16.msra.mxu1 %v1432_v25  ;;  %v1367_v10 = vld [vmem:[%s2837_s1 + $0x108] sm:$0xf]  ;;  %v1784_v13 = vld [vmem:[%s2837_s1 + $0x114] sm:$0xf0]  ;;  %v1240_v23 = vor.u32 %v1752_v9, %v1239_v8  ;;  %v1838_v25 = vld [vmem:[%s2837_s1 + $0x2cc] sm:$0xf] }
  0x52   :  { %1047 = vmatpush.bf16.msra.mxu2 %v1560_v17  ;;  %v1623_v14 = vld [vmem:[%s2837_s1 + $0x308] sm:$0xf]  ;;  %v1848_v15 = vld [vmem:[%s2837_s1 + $0x314] sm:$0xf0]  ;;  %v1778_v17 = vld [vmem:[%s2837_s1 + $0xec] sm:$0xf]  ;;  %v1596_v33 = vor.u32 %v1838_v25, %v1593_v26 }
  0x53   :  { %1009 = vmatpush.bf16.msra.mxu0 %v1304_v24  ;;  %1066 = vmatpush.bf16.msra.mxu3 %v1688_v28  ;;  %v1368_v24 = vor.u32 %v1784_v13, %v1367_v10  ;;  %v1624_v27 = vor.u32 %v1848_v15, %v1623_v14  ;;  %v1356_v28 = vor.u32 %v1778_v17, %v1353_v18  ;;  %v1802_v45 = vld [vmem:[%s2837_s1 + $0x1ac] sm:$0xf]  ;;  %v1449_v46 = vld [vmem:[%s2837_s1 + $0x1b8] sm:$0xf0] }
  0x54   :  { %962 = vmatmul.bf16.gmra.mxu1 %v2290_v56  ;;  %v1705_v52 = vld [vmem:[%s2837_s1 + $0x3b8] sm:$0xf0]  ;;  %v1830_v55 = vld [vmem:[%s2837_s1 + $0x28c] sm:$0xf]  ;;  %v1452_v63 = vor.u32 %v1802_v45, %v1449_v46 }
  0x55   :  { %1029 = vmatpush.bf16.msra.mxu1 %v1416_v37  ;;  %981 = vmatmul.bf16.gmra.mxu2 %v2292_v58  ;;  %v1870_v37 = vld [vmem:[%s2837_s1 + $0x3cc] sm:$0xf]  ;;  %v1305_v62 = vld [vmem:[%s2837_s1 + $0x98] sm:$0xf0] }
  0x56   :  { %1048 = vmatpush.bf16.msra.mxu2 %v1544_v29  ;;  %943 = vmatmul.bf16.gmra.mxu0 %v2279_v49  ;;  %v1484_v29 = vor.u32 %v1810_v19, %v1481_v20  ;;  %v1724_v44 = vor.u32 %v1870_v37, %v1721_v38  ;;  %v1798_v1 = vld [vmem:[%s2837_s1 + $0x18c] sm:$0xf]  ;;  %v1433_v2 = vld [vmem:[%s2837_s1 + $0x198] sm:$0xf0] }
  0x57   :  { %1010 = vmatpush.bf16.msra.mxu0 %v1288_v36  ;;  %1067 = vmatpush.bf16.msra.mxu3 %v1672_v40  ;;  %v1340_v36 = vor.u32 %v1774_v31, %v1337_v32  ;;  %v1577_v40 = vld [vmem:[%s2837_s1 + $0x2b8] sm:$0xf0]  ;;  %v1862_v5 = vld [vmem:[%s2837_s1 + $0x38c] sm:$0xf] }
  0x58   :  { %1000 = vmatmul.bf16.gmra.mxu3 %v2300_v61  ;;  %v1580_v47 = vor.u32 %v1834_v39, %v1577_v40  ;;  %v1545_v8 = vld [vmem:[%s2837_s1 + $0x278] sm:$0xf0]  ;;  %v1762_v9 = vld [vmem:[%s2837_s1 + $0x6c] sm:$0xf] }
  0x59   :  { %1030 = vmatpush.bf16.msra.mxu1 %v1400_v51  ;;  %v1866_v51 = vld [vmem:[%s2837_s1 + $0x3ac] sm:$0xf]  ;;  %v1289_v10 = vld [vmem:[%s2837_s1 + $0x78] sm:$0xf0] }
  0x5a   :  { %1049 = vmatpush.bf16.msra.mxu2 %v1528_v41  ;;  %v1770_v41 = vld [vmem:[%s2837_s1 + $0xac] sm:$0xf]  ;;  %v1708_v0 = vor.u32 %v1866_v51, %v1705_v52  ;;  %v1417_v14 = vld [vmem:[%s2837_s1 + $0x178] sm:$0xf0] }
  0x5b   :  { %1011 = vmatpush.bf16.msra.mxu0 %v1272_v50  ;;  %1068 = vmatpush.bf16.msra.mxu3 %v1656_v59  ;;  %v1324_v50 = vor.u32 %v1770_v41, %v1321_v42  ;;  %v1561_v59 = vld [vmem:[%s2837_s1 + $0x298] sm:$0xf0]  ;;  %v1794_v13 = vld [vmem:[%s2837_s1 + $0x16c] sm:$0xf] }
  0x5c   :  { %v1564_v3 = vor.u32 %v1830_v55, %v1561_v59  ;;  %v1858_v17 = vld [vmem:[%s2837_s1 + $0x36c] sm:$0xf]  ;;  %v1673_v18 = vld [vmem:[%s2837_s1 + $0x378] sm:$0xf0] }
  0x5d   :  { %1031 = vmatpush.bf16.msra.mxu1 %v1384_v7  ;;  %v1826_v7 = vld [vmem:[%s2837_s1 + $0x26c] sm:$0xf]  ;;  %v1529_v20 = vld [vmem:[%s2837_s1 + $0x258] sm:$0xf0] }
  0x5e   :  { %1050 = vmatpush.bf16.msra.mxu2 %v1512_v60  ;;  %v1766_v60 = vld [vmem:[%s2837_s1 + $0x8c] sm:$0xf]  ;;  %v1548_v15 = vor.u32 %v1826_v7, %v1545_v8  ;;  %v1273_v22 = vld [vmem:[%s2837_s1 + $0x58] sm:$0xf0] }
  0x5f   :  { %1012 = vmatpush.bf16.msra.mxu0 %v1256_v6  ;;  %1069 = vmatpush.bf16.msra.mxu3 %v1640_v11  ;;  %v1308_v4 = vor.u32 %v1766_v60, %v1305_v62  ;;  %v1689_v6 = vld [vmem:[%s2837_s1 + $0x398] sm:$0xf0]  ;;  %v1436_v11 = vor.u32 %v1798_v1, %v1433_v2  ;;  %v1822_v19 = vld [vmem:[%s2837_s1 + $0x24c] sm:$0xf] }
  0x60   :  { %v1758_v21 = vld [vmem:[%s2837_s1 + $0x4c] sm:$0xf]  ;;  %v1401_v26 = vld [vmem:[%s2837_s1 + $0x158] sm:$0xf0] }
  0x61   :  { %1032 = vmatpush.bf16.msra.mxu1 %v1368_v24  ;;  %v1676_v24 = vor.u32 %v1858_v17, %v1673_v18  ;;  %v1790_v25 = vld [vmem:[%s2837_s1 + $0x14c] sm:$0xf]  ;;  %v1513_v32 = vld [vmem:[%s2837_s1 + $0x238] sm:$0xf0] }
  0x62   :  { %1051 = vmatpush.bf16.msra.mxu2 %v1496_v12  ;;  %v1692_v12 = vor.u32 %v1862_v5, %v1689_v6  ;;  %v1818_v31 = vld [vmem:[%s2837_s1 + $0x22c] sm:$0xf]  ;;  %v1257_v34 = vld [vmem:[%s2837_s1 + $0x38] sm:$0xf0]  ;;  %v1404_v35 = vor.u32 %v1790_v25, %v1401_v26 }
  0x63   :  { %1013 = vmatpush.bf16.msra.mxu0 %v1240_v23  ;;  %1070 = vmatpush.bf16.msra.mxu3 %v1624_v27  ;;  %v1420_v23 = vor.u32 %v1794_v13, %v1417_v14  ;;  %v1532_v27 = vor.u32 %v1822_v19, %v1529_v20  ;;  %v1786_v37 = vld [vmem:[%s2837_s1 + $0x12c] sm:$0xf]  ;;  %v1385_v38 = vld [vmem:[%s2837_s1 + $0x138] sm:$0xf0]  ;;  %v1516_v39 = vor.u32 %v1818_v31, %v1513_v32 }
  0x64   :  { %1033 = vmatmul.bf16.vlgmr.msra.gmra.mxu1 %v2149_v53  ;;  %v1850_v41 = vld [vmem:[%s2837_s1 + $0x32c] sm:$0xf]  ;;  %v1641_v42 = vld [vmem:[%s2837_s1 + $0x338] sm:$0xf0] }
  0x65   :  { %1101 = vmatpush.bf16.msrb.mxu1 %v1484_v29  ;;  %1052 = vmatmul.bf16.vlgmr.msra.gmra.mxu2 %v2151_v54  ;;  %v1854_v29 = vld [vmem:[%s2837_s1 + $0x34c] sm:$0xf]  ;;  %v1241_v46 = vld [vmem:[%s2837_s1 + $0x18] sm:$0xf0] }
  0x66   :  { %1120 = vmatpush.bf16.msrb.mxu2 %v1612_v16  ;;  %1014 = vmatmul.bf16.vlgmr.msra.gmra.mxu0 %v2138_v48  ;;  %v1292_v16 = vor.u32 %v1762_v9, %v1289_v10  ;;  %v1750_v45 = vld [vmem:[%s2837_s1 + $0xc] sm:$0xf]  ;;  %v1369_v59 = vld [vmem:[%s2837_s1 + $0x118] sm:$0xf0] }
  0x67   :  { %1082 = vmatpush.bf16.msrb.mxu0 %v1356_v28  ;;  %1139 = vmatpush.bf16.msrb.mxu3 %v1740_v30  ;;  %v1276_v28 = vor.u32 %v1758_v21, %v1273_v22  ;;  %v1657_v30 = vld [vmem:[%s2837_s1 + $0x358] sm:$0xf0]  ;;  %v1782_v51 = vld [vmem:[%s2837_s1 + $0x10c] sm:$0xf]  ;;  %v1244_v55 = vor.u32 %v1750_v45, %v1241_v46 }
  0x68   :  { %1071 = vmatmul.bf16.vlgmr.msra.gmra.mxu3 %v2159_v57  ;;  %v1846_v60 = vld [vmem:[%s2837_s1 + $0x30c] sm:$0xf]  ;;  %v1625_v62 = vld [vmem:[%s2837_s1 + $0x318] sm:$0xf0] }
  0x69   :  { %1102 = vmatpush.bf16.msrb.mxu1 %v1468_v43  ;;  %v1814_v43 = vld [vmem:[%s2837_s1 + $0x20c] sm:$0xf] }
  0x6a   :  { %1121 = vmatpush.bf16.msrb.mxu2 %v1596_v33  ;;  %v1754_v33 = vld [vmem:[%s2837_s1 + $0x2c] sm:$0xf] }
  0x6b   :  { %1083 = vmatpush.bf16.msrb.mxu0 %v1340_v36  ;;  %1140 = vmatpush.bf16.msrb.mxu3 %v1724_v44  ;;  %v1660_v36 = vor.u32 %v1854_v29, %v1657_v30  ;;  %v1260_v40 = vor.u32 %v1754_v33, %v1257_v34  ;;  %v1497_v44 = vld [vmem:[%s2837_s1 + $0x218] sm:$0xf0] }
  0x6c   :  { %v1500_v52 = vor.u32 %v1814_v43, %v1497_v44 }
  0x6d   :  { %1103 = vmatpush.bf16.msrb.mxu1 %v1452_v63  ;;  %v1372_v63 = vor.u32 %v1782_v51, %v1369_v59 }
  0x6e   :  { %1122 = vmatpush.bf16.msrb.mxu2 %v1580_v47  ;;  %v1388_v47 = vor.u32 %v1786_v37, %v1385_v38 }
  0x6f   :  { %1084 = vmatpush.bf16.msrb.mxu0 %v1324_v50  ;;  %1141 = vmatpush.bf16.msrb.mxu3 %v1708_v0  ;;  %v1644_v50 = vor.u32 %v1850_v41, %v1641_v42  ;;  %v1628_v0 = vor.u32 %v1846_v60, %v1625_v62 }
  0x71   :  { %1104 = vmatpush.bf16.msrb.mxu1 %v1436_v11 }
  0x72   :  { %1123 = vmatpush.bf16.msrb.mxu2 %v1564_v3 }
  0x73   :  { %1085 = vmatpush.bf16.msrb.mxu0 %v1308_v4  ;;  %1142 = vmatpush.bf16.msrb.mxu3 %v1692_v12 }
  0x74   :  { %1038 = vmatmul.bf16.gmra.mxu1 %v2290_v56 }
  0x75   :  { %1105 = vmatpush.bf16.msrb.mxu1 %v1420_v23  ;;  %1057 = vmatmul.bf16.gmra.mxu2 %v2292_v58 }
  0x76   :  { %1124 = vmatpush.bf16.msrb.mxu2 %v1548_v15  ;;  %1019 = vmatmul.bf16.gmra.mxu0 %v2279_v49 }
  0x77   :  { %1086 = vmatpush.bf16.msrb.mxu0 %v1292_v16  ;;  %1143 = vmatpush.bf16.msrb.mxu3 %v1676_v24 }
  0x78   :  { %1076 = vmatmul.bf16.gmra.mxu3 %v2300_v61 }
  0x79   :  { %1106 = vmatpush.bf16.msrb.mxu1 %v1404_v35 }
  0x7a   :  { %1125 = vmatpush.bf16.msrb.mxu2 %v1532_v27 }
  0x7b   :  { %1087 = vmatpush.bf16.msrb.mxu0 %v1276_v28  ;;  %1144 = vmatpush.bf16.msrb.mxu3 %v1660_v36 }
  0x7d   :  { %1107 = vmatpush.bf16.msrb.mxu1 %v1388_v47 }
  0x7e   :  { %1126 = vmatpush.bf16.msrb.mxu2 %v1516_v39 }
  0x7f   :  { %1088 = vmatpush.bf16.msrb.mxu0 %v1260_v40  ;;  %1145 = vmatpush.bf16.msrb.mxu3 %v1644_v50 }
  0x81   :  { %1108 = vmatpush.bf16.msrb.mxu1 %v1372_v63 }
  0x82   :  { %1127 = vmatpush.bf16.msrb.mxu2 %v1500_v52 }
  0x83   :  { %1089 = vmatpush.bf16.msrb.mxu0 %v1244_v55  ;;  %1146 = vmatpush.bf16.msrb.mxu3 %v1628_v0 }
  0x84   :  { %1109 = vmatmul.bf16.vlgmr.msrb.gmra.mxu1 %v2149_v53 }
  0x85   :  { %1128 = vmatmul.bf16.vlgmr.msrb.gmra.mxu2 %v2151_v54 }
  0x86   :  { %1090 = vmatmul.bf16.vlgmr.msrb.gmra.mxu0 %v2138_v48 }
  0x88   :  { %1147 = vmatmul.bf16.vlgmr.msrb.gmra.mxu3 %v2159_v57 }
  0x94   :  { %1114 = vmatmul.bf16.gmra.mxu1 %v2290_v56 }
  0x95   :  { %1133 = vmatmul.bf16.gmra.mxu2 %v2292_v58 }
  0x96   :  { %1095 = vmatmul.bf16.gmra.mxu0 %v2279_v49 }
  0x98   :  { %1152 = vmatmul.bf16.gmra.mxu3 %v2300_v61 }
  0x9a   :  { %v2777_v10 = vpop.permute.xlu0 %156 }
  0xa1   :  { %v863_v1 = vpop.f32.mrf.mxu0  ;;  %v882_v2 = vpop.f32.mrf.mxu1 }
  0xa2   :  { %v864_v56 = vadd.f32 %v863_v1, %v2777_v10  ;;  %v2781_v15 = vpop.permute.xlu0 %161 }
  0xa3   :  { %v2784_v25 = vpop.permute.xlu1 %166 }
  0xa4   :  { %v883_v11 = vadd.f32 %v882_v2, %v864_v56 }
  0xa8   :  { %v901_v3 = vpop.f32.mrf.mxu2 }
  0xa9   :  { %v920_v4 = vpop.f32.mrf.mxu3  ;;  %v865_v5 = vpop.f32.mrf.mxu0  ;;  %v902_v16 = vadd.f32 %v901_v3, %v883_v11 }
  0xaa   :  { %v884_v48 = vpop.f32.mrf.mxu1  ;;  %v866_v18 = vadd.f32 %v865_v5, %v2781_v15 }
  0xab   :  { %v921_v21 = vadd.f32 %v920_v4, %v902_v16  ;;  %v2792_v44 = vpop.permute.xlu1 %171 }
  0xac   :  { %v885_v26 = vadd.f32 %v884_v48, %v866_v18 }
  0xad   :  { %v1158_v29 = vmax.f32 %v921_v21, 0.0 }
  0xb0   :  { %v903_v6 = vpop.f32.mrf.mxu2 }
  0xb1   :  { %v922_v53 = vpop.f32.mrf.mxu3  ;;  %v868_v7 = vpop.f32.mrf.mxu0  ;;  %v904_v30 = vadd.f32 %v903_v6, %v885_v26 }
  0xb2   :  { %v887_v54 = vpop.f32.mrf.mxu1  ;;  %v869_v31 = vadd.f32 %v868_v7, %v2784_v25 }
  0xb3   :  { %v923_v37 = vadd.f32 %v922_v53, %v904_v30 }
  0xb4   :  { %v888_v38 = vadd.f32 %v887_v54, %v869_v31 }
  0xb5   :  { %v1162_v45 = vmax.f32 %v923_v37, 0.0 }
  0xb8   :  { %v906_v8 = vpop.f32.mrf.mxu2 }
  0xb9   :  { %v925_v57 = vpop.f32.mrf.mxu3  ;;  %v870_v9 = vpop.f32.mrf.mxu0  ;;  %v907_v46 = vadd.f32 %v906_v8, %v888_v38 }
  0xba   :  { %v889_v49 = vpop.f32.mrf.mxu1  ;;  %v871_v51 = vadd.f32 %v870_v9, %v2792_v44 }
  0xbb   :  { %v926_v60 = vadd.f32 %v925_v57, %v907_v46 }
  0xbc   :  { %v890_v1 = vadd.f32 %v889_v49, %v871_v51 }
  0xbd   :  { %v1166_v4 = vmax.f32 %v926_v60, 0.0 }
  0xc0   :  { %v908_v58 = vpop.f32.mrf.mxu2 }
  0xc1   :  { %v927_v61 = vpop.f32.mrf.mxu3  ;;  %v909_v5 = vadd.f32 %v908_v58, %v890_v1 }
  0xc2   :  { %v958_v13 = vpop.f32.mrf.mxu1 }
  0xc3   :  { %v939_v12 = vpop.f32.mrf.mxu0  ;;  %v928_v8 = vadd.f32 %v927_v61, %v909_v5 }
  0xc4   :  { %v940_v14 = vadd.f32 %v939_v12, %v2777_v10 }
  0xc5   :  { %v1170_v49 = vmax.f32 %v928_v8, 0.0 }
  0xc6   :  { %v959_v17 = vadd.f32 %v958_v13, %v940_v14 }
  0xc8   :  { %v977_v19 = vpop.f32.mrf.mxu2 }
  0xc9   :  { %v978_v22 = vadd.f32 %v977_v19, %v959_v17 }
  0xca   :  { %v960_v24 = vpop.f32.mrf.mxu1 }
  0xcb   :  { %v996_v20 = vpop.f32.mrf.mxu3  ;;  %v941_v23 = vpop.f32.mrf.mxu0 }
  0xcc   :  { %v997_v27 = vadd.f32 %v996_v20, %v978_v22  ;;  %v942_v28 = vadd.f32 %v941_v23, %v2781_v15 }
  0xce   :  { %v1159_v32 = vmax.f32 %v997_v27, 0.0  ;;  %v961_v34 = vadd.f32 %v960_v24, %v942_v28 }
  0xd0   :  { %v1174_v33 = vpack.c.bf16 %v1159_v32, %v1158_v29  ;;  %v979_v35 = vpop.f32.mrf.mxu2 }
  0xd1   :  { %v980_v39 = vadd.f32 %v979_v35, %v961_v34 }
  0xd2   :  { %1182 = vst [vmem:[%s2840_s3] sm:$0xff] %v1174_v33  ;;  %v963_v41 = vpop.f32.mrf.mxu1 }
  0xd3   :  { %v998_v36 = vpop.f32.mrf.mxu3  ;;  %v944_v40 = vpop.f32.mrf.mxu0 }
  0xd4   :  { %v945_v42 = vadd.f32 %v944_v40, %v2784_v25  ;;  %v999_v43 = vadd.f32 %v998_v36, %v980_v39 }
  0xd6   :  { %v1163_v47 = vmax.f32 %v999_v43, 0.0  ;;  %v964_v50 = vadd.f32 %v963_v41, %v945_v42 }
  0xd8   :  { %v1176_v52 = vpack.c.bf16 %v1163_v47, %v1162_v45  ;;  %v982_v55 = vpop.f32.mrf.mxu2 }
  0xd9   :  { %v983_v62 = vadd.f32 %v982_v55, %v964_v50 }
  0xda   :  { %1187 = vst [vmem:[%s2840_s3 + $0x10] sm:$0xff] %v1176_v52  ;;  %v965_v0 = vpop.f32.mrf.mxu1 }
  0xdb   :  { %v1001_v59 = vpop.f32.mrf.mxu3  ;;  %v946_v63 = vpop.f32.mrf.mxu0 }
  0xdc   :  { %v1002_v2 = vadd.f32 %v1001_v59, %v983_v62  ;;  %v947_v3 = vadd.f32 %v946_v63, %v2792_v44 }
  0xde   :  { %v1167_v48 = vmax.f32 %v1002_v2, 0.0  ;;  %v966_v53 = vadd.f32 %v965_v0, %v947_v3 }
  0xe0   :  { %v1178_v6 = vpack.c.bf16 %v1167_v48, %v1166_v4  ;;  %v984_v7 = vpop.f32.mrf.mxu2 }
  0xe1   :  { %v985_v57 = vadd.f32 %v984_v7, %v966_v53 }
  0xe2   :  { %1189 = vst [vmem:[%s2840_s3 + $0x20] sm:$0xff] %v1178_v6  ;;  %v1034_v56 = vpop.f32.mrf.mxu1 }
  0xe3   :  { %v1003_v54 = vpop.f32.mrf.mxu3  ;;  %v1015_v9 = vpop.f32.mrf.mxu0 }
  0xe4   :  { %v1004_v11 = vadd.f32 %v1003_v54, %v985_v57  ;;  %v1016_v26 = vadd.f32 %v1015_v9, %v2777_v10 }
  0xe6   :  { %v1171_v12 = vmax.f32 %v1004_v11, 0.0  ;;  %v1035_v29 = vadd.f32 %v1034_v56, %v1016_v26 }
  0xe8   :  { %v1180_v13 = vpack.c.bf16 %v1171_v12, %v1170_v49  ;;  %v1053_v14 = vpop.f32.mrf.mxu2 }
  0xe9   :  { %v1054_v33 = vadd.f32 %v1053_v14, %v1035_v29 }
  0xea   :  { %1191 = vst [vmem:[%s2840_s3 + $0x30] sm:$0xff] %v1180_v13  ;;  %v1036_v17 = vpop.f32.mrf.mxu1 }
  0xeb   :  { %v1072_v16 = vpop.f32.mrf.mxu3  ;;  %v1017_v58 = vpop.f32.mrf.mxu0 }
  0xec   :  { %v1018_v35 = vadd.f32 %v1017_v58, %v2781_v15  ;;  %v1073_v38 = vadd.f32 %v1072_v16, %v1054_v33 }
  0xee   :  { %v1037_v41 = vadd.f32 %v1036_v17, %v1018_v35  ;;  %v1160_v46 = vmax.f32 %v1073_v38, 0.0 }
  0xf0   :  { %v1055_v61 = vpop.f32.mrf.mxu2 }
  0xf1   :  { %v1056_v47 = vadd.f32 %v1055_v61, %v1037_v41 }
  0xf2   :  { %v1039_v20 = vpop.f32.mrf.mxu1 }
  0xf3   :  { %v1074_v18 = vpop.f32.mrf.mxu3  ;;  %v1020_v19 = vpop.f32.mrf.mxu0 }
  0xf4   :  { %v1075_v62 = vadd.f32 %v1074_v18, %v1056_v47 }
  0xf6   :  { %v1164_v4 = vmax.f32 %v1075_v62, 0.0 }
  0xf8   :  { %v1058_v21 = vpop.f32.mrf.mxu2 }
  0xfa   :  { %v1041_v24 = vpop.f32.mrf.mxu1 }
  0xfb   :  { %v1077_v22 = vpop.f32.mrf.mxu3  ;;  %v1022_v23 = vpop.f32.mrf.mxu0 }
  0xfc   :  { %v1023_v53 = vadd.f32 %v1022_v23, %v2792_v44 }
  0xfe   :  { %v1042_v56 = vadd.f32 %v1041_v24, %v1023_v53 }
 0x100   :  { %v1060_v27 = vpop.f32.mrf.mxu2 }
 0x101   :  { %v1061_v13 = vadd.f32 %v1060_v27, %v1042_v56 }
 0x102   :  { %v1110_v31 = vpop.f32.mrf.mxu1 }
 0x103   :  { %v1079_v28 = vpop.f32.mrf.mxu3  ;;  %v1091_v30 = vpop.f32.mrf.mxu0 }
 0x104   :  { %v1092_v32 = vadd.f32 %v1091_v30, %v2777_v10  ;;  %v1021_v10 = vadd.f32 %v1020_v19, %v2784_v25  ;;  %v1080_v18 = vadd.f32 %v1079_v28, %v1061_v13 }
 0x106   :  { %v1111_v34 = vadd.f32 %v1110_v31, %v1092_v32  ;;  %v1040_v63 = vadd.f32 %v1039_v20, %v1021_v10 }
 0x108   :  { %v1129_v36 = vpop.f32.mrf.mxu2  ;;  %v1059_v5 = vadd.f32 %v1058_v21, %v1040_v63 }
 0x109   :  { %v1130_v39 = vadd.f32 %v1129_v36, %v1111_v34 }
 0x10a   :  { %v1112_v42 = vpop.f32.mrf.mxu1  ;;  %v1078_v57 = vadd.f32 %v1077_v22, %v1059_v5  ;;  %v1172_v22 = vmax.f32 %v1080_v18, 0.0 }
 0x10b   :  { %v1148_v37 = vpop.f32.mrf.mxu3  ;;  %v1093_v40 = vpop.f32.mrf.mxu0 }
 0x10c   :  { %v1149_v43 = vadd.f32 %v1148_v37, %v1130_v39  ;;  %v1094_v45 = vadd.f32 %v1093_v40, %v2781_v15  ;;  %v1168_v12 = vmax.f32 %v1078_v57, 0.0 }
 0x10e   :  { %v1161_v50 = vmax.f32 %v1149_v43, 0.0  ;;  %v1113_v55 = vadd.f32 %v1112_v42, %v1094_v45 }
 0x110   :  { %v1175_v52 = vpack.c.bf16 %v1161_v50, %v1160_v46  ;;  %v1131_v59 = vpop.f32.mrf.mxu2 }
 0x111   :  { %v1132_v15 = vadd.f32 %v1131_v59, %v1113_v55 }
 0x112   :  { %1186 = vst.msk [vmem:[%s2840_s3 + $0x8] sm:$0xff] %vm2810_vm2, %v1175_v52  ;;  %v1115_v3 = vpop.f32.mrf.mxu1 }
 0x113   :  { %v1150_v60 = vpop.f32.mrf.mxu3  ;;  %v1096_v0 = vpop.f32.mrf.mxu0 }
 0x114   :  { %v1097_v1 = vadd.f32 %v1096_v0, %v2784_v25  ;;  %v1151_v2 = vadd.f32 %v1150_v60, %v1132_v15 }
 0x116   :  { %v1165_v48 = vmax.f32 %v1151_v2, 0.0  ;;  %v1116_v6 = vadd.f32 %v1115_v3, %v1097_v1 }
 0x118   :  { %v1177_v7 = vpack.c.bf16 %v1165_v48, %v1164_v4  ;;  %v1134_v54 = vpop.f32.mrf.mxu2 }
 0x119   :  { %v1135_v9 = vadd.f32 %v1134_v54, %v1116_v6 }
 0x11a   :  { %1188 = vst.msk [vmem:[%s2840_s3 + $0x18] sm:$0xff] %vm2810_vm2, %v1177_v7  ;;  %v1117_v16 = vpop.f32.mrf.mxu1 }
 0x11b   :  { %v1153_v8 = vpop.f32.mrf.mxu3  ;;  %v1098_v25 = vpop.f32.mrf.mxu0 }
 0x11c   :  { %v1154_v11 = vadd.f32 %v1153_v8, %v1135_v9  ;;  %v1099_v49 = vadd.f32 %v1098_v25, %v2792_v44 }
 0x11e   :  { %v1169_v14 = vmax.f32 %v1154_v11, 0.0  ;;  %v1118_v17 = vadd.f32 %v1117_v16, %v1099_v49 }
 0x120   :  { %v1179_v58 = vpack.c.bf16 %v1169_v14, %v1168_v12  ;;  %v1136_v61 = vpop.f32.mrf.mxu2 }
 0x121   :  { %v1137_v19 = vadd.f32 %v1136_v61, %v1118_v17 }
 0x122   :  { %1190 = vst.msk [vmem:[%s2840_s3 + $0x28] sm:$0xff] %vm2810_vm2, %v1179_v58 }
 0x123   :  { %v1155_v20 = vpop.f32.mrf.mxu3 }
 0x124   :  { %v1156_v21 = vadd.f32 %v1155_v20, %v1137_v19 }
 0x126   :  { %v1173_v23 = vmax.f32 %v1156_v21, 0.0 }
 0x128   :  { %v1181_v44 = vpack.c.bf16 %v1173_v23, %v1172_v22 }
 0x12a   :  { %1192 = vst.msk [vmem:[%s2840_s3 + $0x38] sm:$0xff] %vm2810_vm2, %v1181_v44 }

// kernel: beta_vae_forward.11
= control target key start
LH: loop header
LB: loop body
LE: loop exit
PB: predicated region body
PF: predicated region fallthrough
CT: control target
= control target key end

     0   :  { %v803_v8 = vmov 0   ;;  %vm546_vm0 = vcmask 584704   ;;  %s1072_s1 = inlined_call_operand.vmem [shape: bf16[512,72], index: 1, kind: input, shape index: {}]   ;;  %s1073_s2 = inlined_call_operand.vmem [shape: f32[64,1], index: 2, kind: input, shape index: {}]   ;;  %s1074_s0 = inlined_call_operand.vmem [shape: bf16[64,512], index: 0, kind: input, shape index: {}]   ;;  %s1075_s3 = inlined_call_operand.vmem [shape: bf16[64,72], index: 3, kind: output, shape index: {}]  }
   0x1   :  { %v774_v0 = vld [vmem:[%s1072_s1 + $0x38] sm:$0xff]  ;;  %v773_v4 = vld [vmem:[%s1072_s1 + $0x30] sm:$0xff]  ;;  %800 = vset.pattern.permute.xlu0 %v803_v8  ;;  %801 = vset.pattern.permute.xlu1 %v803_v8  ;;  %v772_v9 = vld [vmem:[%s1072_s1 + $0x28] sm:$0xff] }
   0x2   :  { %v782_v1 = vld [vmem:[%s1072_s1 + $0x78] sm:$0xff]  ;;  %414 = vmatpush.bf16.msra.mxu0 %v774_v0  ;;  %v781_v5 = vld [vmem:[%s1072_s1 + $0x70] sm:$0xff]  ;;  %802 = vset.pattern.permute.xlu2 %v803_v8  ;;  %v780_v10 = vld [vmem:[%s1072_s1 + $0x68] sm:$0xff] }
   0x3   :  { %v790_v2 = vld [vmem:[%s1072_s1 + $0xb8] sm:$0xff]  ;;  %443 = vmatpush.bf16.msra.mxu1 %v782_v1  ;;  %v789_v6 = vld [vmem:[%s1072_s1 + $0xb0] sm:$0xff]  ;;  %v788_v11 = vld [vmem:[%s1072_s1 + $0xa8] sm:$0xff] }
   0x4   :  { %v798_v3 = vld [vmem:[%s1072_s1 + $0xf8] sm:$0xff]  ;;  %472 = vmatpush.bf16.msra.mxu2 %v790_v2  ;;  %v797_v7 = vld [vmem:[%s1072_s1 + $0xf0] sm:$0xff]  ;;  %v796_v12 = vld [vmem:[%s1072_s1 + $0xe8] sm:$0xff] }
   0x5   :  { %501 = vmatpush.bf16.msra.mxu3 %v798_v3  ;;  %v771_v13 = vld [vmem:[%s1072_s1 + $0x20] sm:$0xff]  ;;  %v770_v18 = vld [vmem:[%s1072_s1 + $0x18] sm:$0xff]  ;;  %v769_v22 = vld [vmem:[%s1072_s1 + $0x10] sm:$0xff] }
   0x6   :  { %415 = vmatpush.bf16.msra.mxu0 %v773_v4  ;;  %v779_v14 = vld [vmem:[%s1072_s1 + $0x60] sm:$0xff]  ;;  %v778_v19 = vld [vmem:[%s1072_s1 + $0x58] sm:$0xff]  ;;  %v777_v23 = vld [vmem:[%s1072_s1 + $0x50] sm:$0xff] }
   0x7   :  { %444 = vmatpush.bf16.msra.mxu1 %v781_v5  ;;  %v787_v15 = vld [vmem:[%s1072_s1 + $0xa0] sm:$0xff]  ;;  %v786_v20 = vld [vmem:[%s1072_s1 + $0x98] sm:$0xff]  ;;  %v96_v24 = vld [vmem:[%s1073_s2 + $0x10] sm:$0xff] }
   0x8   :  { %473 = vmatpush.bf16.msra.mxu2 %v789_v6  ;;  %v795_v16 = vld [vmem:[%s1072_s1 + $0xe0] sm:$0xff]  ;;  %v794_v21 = vld [vmem:[%s1072_s1 + $0xd8] sm:$0xff]  ;;  %v785_v25 = vld [vmem:[%s1072_s1 + $0x90] sm:$0xff]  ;;  %114 = vperm.xlu1 %801, %v96_v24  }
   0x9   :  { %502 = vmatpush.bf16.msra.mxu3 %v797_v7  ;;  %v94_v17 = vld [vmem:[%s1073_s2] sm:$0xff]  ;;  %v793_v26 = vld [vmem:[%s1072_s1 + $0xd0] sm:$0xff]  ;;  %v95_v27 = vld [vmem:[%s1073_s2 + $0x8] sm:$0xff] }
   0xa   :  { %416 = vmatpush.bf16.msra.mxu0 %v772_v9  ;;  %104 = vperm.xlu0 %800, %v94_v17   ;;  %v768_v28 = vld [vmem:[%s1072_s1 + $0x8] sm:$0xff]  ;;  %v767_v32 = vld [vmem:[%s1072_s1] sm:$0xff]  ;;  %v753_v37 = vld [vmem:[%s1074_s0 + $0xc] sm:$0xf0] }
   0xb   :  { %445 = vmatpush.bf16.msra.mxu1 %v780_v10  ;;  %v776_v29 = vld [vmem:[%s1072_s1 + $0x48] sm:$0xff]  ;;  %v775_v33 = vld [vmem:[%s1072_s1 + $0x40] sm:$0xff]  ;;  %v563_v39 = vld [vmem:[%s1074_s0 + $0x10] sm:$0xf0] }
   0xc   :  { %474 = vmatpush.bf16.msra.mxu2 %v788_v11  ;;  %v784_v30 = vld [vmem:[%s1072_s1 + $0x88] sm:$0xff]  ;;  %v783_v34 = vld [vmem:[%s1072_s1 + $0x80] sm:$0xff]  ;;  %v754_v41 = vld [vmem:[%s1074_s0 + $0x14] sm:$0xf0] }
   0xd   :  { %503 = vmatpush.bf16.msra.mxu3 %v796_v12  ;;  %v792_v31 = vld [vmem:[%s1072_s1 + $0xc8] sm:$0xff]  ;;  %v791_v35 = vld [vmem:[%s1072_s1 + $0xc0] sm:$0xff]  ;;  %v571_v43 = vld [vmem:[%s1074_s0 + $0x18] sm:$0xf0] }
   0xe   :  { %417 = vmatpush.bf16.msra.mxu0 %v771_v13  ;;  %v561_v36 = vld [vmem:[%s1074_s0] sm:$0xf]  ;;  %v751_v38 = vld [vmem:[%s1074_s0 + $0x4] sm:$0xf]  ;;  %v569_v40 = vld [vmem:[%s1074_s0 + $0x8] sm:$0xf] }
   0xf   :  { %446 = vmatpush.bf16.msra.mxu1 %v779_v14  ;;  %v752_v42 = vld [vmem:[%s1074_s0 + $0xc] sm:$0xf]  ;;  %v562_v44 = vor.u32 %v753_v37, %v561_v36  ;;  %v566_v45 = vor.u32 %v751_v38, %v563_v39  ;;  %v570_v46 = vor.u32 %v754_v41, %v569_v40  ;;  %v97_v48 = vld [vmem:[%s1073_s2 + $0x18] sm:$0xff]  ;;  %v577_v49 = vld [vmem:[%s1074_s0 + $0x20] sm:$0xf] }
  0x10   :  { %475 = vmatpush.bf16.msra.mxu2 %v787_v15  ;;  %v574_v47 = vor.u32 %v752_v42, %v571_v43  ;;  %119 = vperm.xlu1 %801, %v97_v48   ;;  %v757_v50 = vld [vmem:[%s1074_s0 + $0x2c] sm:$0xf0]  ;;  %v755_v51 = vld [vmem:[%s1074_s0 + $0x24] sm:$0xf]  ;;  %v579_v52 = vld [vmem:[%s1074_s0 + $0x30] sm:$0xf0] }
  0x11   :  { %504 = vmatpush.bf16.msra.mxu3 %v795_v16  ;;  %v585_v53 = vld [vmem:[%s1074_s0 + $0x28] sm:$0xf]  ;;  %v758_v54 = vld [vmem:[%s1074_s0 + $0x34] sm:$0xf0]  ;;  %v756_v55 = vld [vmem:[%s1074_s0 + $0x2c] sm:$0xf]  ;;  %v578_v57 = vor.u32 %v757_v50, %v577_v49  ;;  %v582_v58 = vor.u32 %v755_v51, %v579_v52 }
  0x12   :  { %418 = vmatpush.bf16.msra.mxu0 %v770_v18  ;;  %109 = vperm.xlu0 %800, %v95_v27   ;;  %v587_v56 = vld [vmem:[%s1074_s0 + $0x38] sm:$0xf0]  ;;  %v586_v59 = vor.u32 %v758_v54, %v585_v53  ;;  %v100_v62 = vld [vmem:[%s1073_s2 + $0x30] sm:$0xff]  ;;  %v98_v63 = vld [vmem:[%s1073_s2 + $0x20] sm:$0xff] }
  0x13   :  { %447 = vmatpush.bf16.msra.mxu1 %v778_v19  ;;  %v590_v60 = vor.u32 %v756_v55, %v587_v56  ;;  %v101_v61 = vld [vmem:[%s1073_s2 + $0x38] sm:$0xff]  ;;  %124 = vperm.xlu2 %802, %v98_v63   ;;  %v593_v0 = vld [vmem:[%s1074_s0 + $0x40] sm:$0xf]  ;;  %v761_v1 = vld [vmem:[%s1074_s0 + $0x4c] sm:$0xf0] }
  0x14   :  { %476 = vmatpush.bf16.msra.mxu2 %v786_v20  ;;  %v99_v2 = vld [vmem:[%s1073_s2 + $0x28] sm:$0xff]  ;;  %v759_v3 = vld [vmem:[%s1074_s0 + $0x44] sm:$0xf]  ;;  %v595_v4 = vld [vmem:[%s1074_s0 + $0x50] sm:$0xf0]  ;;  %v594_v9 = vor.u32 %v761_v1, %v593_v0 }
  0x15   :  { %505 = vmatpush.bf16.msra.mxu3 %v794_v21  ;;  %v601_v5 = vld [vmem:[%s1074_s0 + $0x48] sm:$0xf]  ;;  %v762_v6 = vld [vmem:[%s1074_s0 + $0x54] sm:$0xf0]  ;;  %v760_v7 = vld [vmem:[%s1074_s0 + $0x4c] sm:$0xf]  ;;  %v598_v10 = vor.u32 %v759_v3, %v595_v4 }
  0x16   :  { %419 = vmatpush.bf16.msra.mxu0 %v769_v22  ;;  %v603_v8 = vld [vmem:[%s1074_s0 + $0x58] sm:$0xf0]  ;;  %v602_v11 = vor.u32 %v762_v6, %v601_v5  ;;  %v609_v13 = vld [vmem:[%s1074_s0 + $0x60] sm:$0xf]  ;;  %v765_v14 = vld [vmem:[%s1074_s0 + $0x6c] sm:$0xf0] }
  0x17   :  { %448 = vmatpush.bf16.msra.mxu1 %v777_v23  ;;  %v606_v12 = vor.u32 %v760_v7, %v603_v8  ;;  %v763_v15 = vld [vmem:[%s1074_s0 + $0x64] sm:$0xf]  ;;  %v611_v16 = vld [vmem:[%s1074_s0 + $0x70] sm:$0xf0]  ;;  %v617_v17 = vld [vmem:[%s1074_s0 + $0x68] sm:$0xf]  ;;  %v610_v21 = vor.u32 %v765_v14, %v609_v13 }
  0x18   :  { %477 = vmatpush.bf16.msra.mxu2 %v785_v25  ;;  %139 = vperm.xlu1 %801, %v101_v61   ;;  %v766_v18 = vld [vmem:[%s1074_s0 + $0x74] sm:$0xf0]  ;;  %v764_v19 = vld [vmem:[%s1074_s0 + $0x6c] sm:$0xf]  ;;  %v619_v20 = vld [vmem:[%s1074_s0 + $0x78] sm:$0xf0]  ;;  %v614_v22 = vor.u32 %v763_v15, %v611_v16 }
  0x19   :  { %506 = vmatpush.bf16.msra.mxu3 %v793_v26  ;;  %v618_v23 = vor.u32 %v766_v18, %v617_v17  ;;  %v622_v24 = vor.u32 %v764_v19, %v619_v20 }
  0x1a   :  { %420 = vmatpush.bf16.msra.mxu0 %v768_v28  ;;  %134 = vperm.xlu0 %800, %v100_v62  }
  0x1b   :  { %449 = vmatpush.bf16.msra.mxu1 %v776_v29  ;;  %129 = vperm.xlu2 %802, %v99_v2  }
  0x1c   :  { %478 = vmatpush.bf16.msra.mxu2 %v784_v30 }
  0x1d   :  { %507 = vmatpush.bf16.msra.mxu3 %v792_v31 }
  0x1e   :  { %421 = vmatpush.bf16.msra.mxu0 %v767_v32 }
  0x1f   :  { %450 = vmatpush.bf16.msra.mxu1 %v775_v33 }
  0x20   :  { %479 = vmatpush.bf16.msra.mxu2 %v783_v34 }
  0x21   :  { %508 = vmatpush.bf16.msra.mxu3 %v791_v35  ;;  %422 = vmatmul.bf16.vlgmr.msra.gmra.mxu0 %v562_v44 }
  0x22   :  { %451 = vmatmul.bf16.vlgmr.msra.gmra.mxu1 %v566_v45 }
  0x23   :  { %480 = vmatmul.bf16.vlgmr.msra.gmra.mxu2 %v570_v46 }
  0x24   :  { %509 = vmatmul.bf16.vlgmr.msra.gmra.mxu3 %v574_v47 }
  0x31   :  { %427 = vmatmul.bf16.gmra.mxu0 %v578_v57 }
  0x32   :  { %456 = vmatmul.bf16.gmra.mxu1 %v582_v58 }
  0x33   :  { %485 = vmatmul.bf16.gmra.mxu2 %v586_v59 }
  0x34   :  { %514 = vmatmul.bf16.gmra.mxu3 %v590_v60 }
  0x41   :  { %432 = vmatmul.bf16.gmra.mxu0 %v594_v9 }
  0x42   :  { %461 = vmatmul.bf16.gmra.mxu1 %v598_v10 }
  0x43   :  { %490 = vmatmul.bf16.gmra.mxu2 %v602_v11 }
  0x44   :  { %519 = vmatmul.bf16.gmra.mxu3 %v606_v12 }
  0x51   :  { %437 = vmatmul.bf16.gmra.mxu0 %v610_v21 }
  0x52   :  { %466 = vmatmul.bf16.gmra.mxu1 %v614_v22 }
  0x53   :  { %495 = vmatmul.bf16.gmra.mxu2 %v618_v23 }
  0x54   :  { %524 = vmatmul.bf16.gmra.mxu3 %v622_v24 }
  0x6d   :  { %v125_v61 = vpop.permute.xlu2 %124 }
  0x75   :  { %v130_v10 = vpop.permute.xlu2 %129 }
  0x7a   :  { %v115_v39 = vpop.permute.xlu1 %114 }
  0x7c   :  { %v105_v25 = vpop.permute.xlu0 %104 }
  0x82   :  { %v120_v52 = vpop.permute.xlu1 %119 }
  0x84   :  { %v110_v30 = vpop.permute.xlu0 %109 }
  0x9e   :  { %v423_v26 = vpop.f32.mrf.mxu0 }
  0x9f   :  { %v452_v27 = vpop.f32.mrf.mxu1  ;;  %v424_v28 = vadd.f32 %v423_v26, %v105_v25  ;;  %v135_v25 = vpop.permute.xlu0 %134 }
  0xa1   :  { %v453_v29 = vadd.f32 %v452_v27, %v424_v28 }
  0xa6   :  { %v481_v31 = vpop.f32.mrf.mxu2  ;;  %v425_v34 = vpop.f32.mrf.mxu0 }
  0xa7   :  { %v510_v32 = vpop.f32.mrf.mxu3  ;;  %v482_v33 = vadd.f32 %v481_v31, %v453_v29  ;;  %v454_v35 = vpop.f32.mrf.mxu1  ;;  %v426_v37 = vadd.f32 %v425_v34, %v110_v30 }
  0xa9   :  { %v511_v36 = vadd.f32 %v510_v32, %v482_v33  ;;  %v455_v41 = vadd.f32 %v454_v35, %v426_v37 }
  0xab   :  { %v530_v38 = vmax.f32 %v511_v36, 0.0  ;;  %v140_v36 = vpop.permute.xlu1 %139 }
  0xad   :  { %v538_v40 = vpack.c.bf16 %v530_v38, %v530_v38 }
  0xae   :  { %v483_v42 = vpop.f32.mrf.mxu2  ;;  %v428_v45 = vpop.f32.mrf.mxu0 }
  0xaf   :  { %v512_v43 = vpop.f32.mrf.mxu3  ;;  %547 = vst.msk [vmem:[%s1075_s3] sm:$0xf] %vm546_vm0, %v538_v40  ;;  %v484_v44 = vadd.f32 %v483_v42, %v455_v41  ;;  %v457_v46 = vpop.f32.mrf.mxu1  ;;  %v429_v47 = vadd.f32 %v428_v45, %v115_v39 }
  0xb1   :  { %v513_v48 = vadd.f32 %v512_v43, %v484_v44  ;;  %v458_v50 = vadd.f32 %v457_v46, %v429_v47 }
  0xb3   :  { %v531_v49 = vmax.f32 %v513_v48, 0.0 }
  0xb5   :  { %v539_v51 = vpack.c.bf16 %v531_v49, %v531_v49 }
  0xb6   :  { %v486_v53 = vpop.f32.mrf.mxu2  ;;  %v430_v56 = vpop.f32.mrf.mxu0 }
  0xb7   :  { %v515_v54 = vpop.f32.mrf.mxu3  ;;  %548 = vst.msk [vmem:[%s1075_s3 + $0x4] sm:$0xf] %vm546_vm0, %v539_v51  ;;  %v487_v55 = vadd.f32 %v486_v53, %v458_v50  ;;  %v459_v57 = vpop.f32.mrf.mxu1  ;;  %v431_v59 = vadd.f32 %v430_v56, %v120_v52 }
  0xb9   :  { %v516_v58 = vadd.f32 %v515_v54, %v487_v55  ;;  %v460_v63 = vadd.f32 %v459_v57, %v431_v59 }
  0xbb   :  { %v532_v60 = vmax.f32 %v516_v58, 0.0 }
  0xbd   :  { %v540_v62 = vpack.c.bf16 %v532_v60, %v532_v60 }
  0xbe   :  { %v488_v0 = vpop.f32.mrf.mxu2  ;;  %v433_v3 = vpop.f32.mrf.mxu0 }
  0xbf   :  { %v517_v1 = vpop.f32.mrf.mxu3  ;;  %549 = vst.msk [vmem:[%s1075_s3 + $0x8] sm:$0xf] %vm546_vm0, %v540_v62  ;;  %v489_v2 = vadd.f32 %v488_v0, %v460_v63  ;;  %v462_v4 = vpop.f32.mrf.mxu1  ;;  %v434_v5 = vadd.f32 %v433_v3, %v125_v61 }
  0xc1   :  { %v518_v6 = vadd.f32 %v517_v1, %v489_v2  ;;  %v463_v8 = vadd.f32 %v462_v4, %v434_v5 }
  0xc3   :  { %v533_v7 = vmax.f32 %v518_v6, 0.0 }
  0xc5   :  { %v541_v9 = vpack.c.bf16 %v533_v7, %v533_v7 }
  0xc6   :  { %v491_v11 = vpop.f32.mrf.mxu2  ;;  %v435_v14 = vpop.f32.mrf.mxu0 }
  0xc7   :  { %v520_v12 = vpop.f32.mrf.mxu3  ;;  %550 = vst.msk [vmem:[%s1075_s3 + $0xc] sm:$0xf] %vm546_vm0, %v541_v9  ;;  %v492_v13 = vadd.f32 %v491_v11, %v463_v8  ;;  %v464_v15 = vpop.f32.mrf.mxu1  ;;  %v436_v17 = vadd.f32 %v435_v14, %v130_v10 }
  0xc9   :  { %v521_v16 = vadd.f32 %v520_v12, %v492_v13  ;;  %v465_v20 = vadd.f32 %v464_v15, %v436_v17 }
  0xcb   :  { %v534_v18 = vmax.f32 %v521_v16, 0.0 }
  0xcd   :  { %v542_v19 = vpack.c.bf16 %v534_v18, %v534_v18 }
  0xce   :  { %v493_v21 = vpop.f32.mrf.mxu2  ;;  %v438_v24 = vpop.f32.mrf.mxu0 }
  0xcf   :  { %v522_v22 = vpop.f32.mrf.mxu3  ;;  %551 = vst.msk [vmem:[%s1075_s3 + $0x10] sm:$0xf] %vm546_vm0, %v542_v19  ;;  %v494_v23 = vadd.f32 %v493_v21, %v465_v20  ;;  %v439_v27 = vadd.f32 %v438_v24, %v135_v25  ;;  %v467_v28 = vpop.f32.mrf.mxu1 }
  0xd1   :  { %v523_v26 = vadd.f32 %v522_v22, %v494_v23  ;;  %v468_v31 = vadd.f32 %v467_v28, %v439_v27 }
  0xd3   :  { %v535_v29 = vmax.f32 %v523_v26, 0.0 }
  0xd5   :  { %v543_v30 = vpack.c.bf16 %v535_v29, %v535_v29 }
  0xd6   :  { %v496_v32 = vpop.f32.mrf.mxu2  ;;  %v440_v35 = vpop.f32.mrf.mxu0 }
  0xd7   :  { %v525_v33 = vpop.f32.mrf.mxu3  ;;  %552 = vst.msk [vmem:[%s1075_s3 + $0x14] sm:$0xf] %vm546_vm0, %v543_v30  ;;  %v497_v34 = vadd.f32 %v496_v32, %v468_v31  ;;  %v441_v38 = vadd.f32 %v440_v35, %v140_v36  ;;  %v469_v40 = vpop.f32.mrf.mxu1 }
  0xd9   :  { %v526_v37 = vadd.f32 %v525_v33, %v497_v34  ;;  %v470_v42 = vadd.f32 %v469_v40, %v441_v38 }
  0xdb   :  { %v536_v39 = vmax.f32 %v526_v37, 0.0 }
  0xdd   :  { %v544_v41 = vpack.c.bf16 %v536_v39, %v536_v39 }
  0xde   :  { %v498_v43 = vpop.f32.mrf.mxu2 }
  0xdf   :  { %553 = vst.msk [vmem:[%s1075_s3 + $0x18] sm:$0xf] %vm546_vm0, %v544_v41  ;;  %v499_v44 = vadd.f32 %v498_v43, %v470_v42  ;;  %v527_v45 = vpop.f32.mrf.mxu3 }
  0xe1   :  { %v528_v46 = vadd.f32 %v527_v45, %v499_v44 }
  0xe3   :  { %v537_v47 = vmax.f32 %v528_v46, 0.0 }
  0xe5   :  { %v545_v48 = vpack.c.bf16 %v537_v47, %v537_v47 }
  0xe7   :  { %554 = vst.msk [vmem:[%s1075_s3 + $0x1c] sm:$0xf] %vm546_vm0, %v545_v48 }

// kernel: beta_vae_forward.12
= control target key start
LH: loop header
LB: loop body
LE: loop exit
PB: predicated region body
PF: predicated region fallthrough
CT: control target
= control target key end

     0   :  { %v1511_v8 = vmov 0   ;;  %vm1014_vm0 = vcmask 60416   ;;  %s2020_s1 = inlined_call_operand.vmem [shape: bf16[1024,8], index: 1, kind: input, shape index: {}]   ;;  %s2021_s2 = inlined_call_operand.vmem [shape: f32[64,1], index: 2, kind: input, shape index: {}]   ;;  %s2022_s0 = inlined_call_operand.vmem [shape: bf16[64,1024], index: 0, kind: input, shape index: {}]   ;;  %s2023_s3 = inlined_call_operand.vmem [shape: bf16[64,8], index: 3, kind: output, shape index: {}]  }
   0x1   :  { %v1450_v0 = vld [vmem:[%s2020_s1 + $0x38] sm:$0xff]  ;;  %v1449_v4 = vld [vmem:[%s2020_s1 + $0x30] sm:$0xff]  ;;  %1508 = vset.pattern.permute.xlu0 %v1511_v8  ;;  %1509 = vset.pattern.permute.xlu1 %v1511_v8  ;;  %v1448_v9 = vld [vmem:[%s2020_s1 + $0x28] sm:$0xff] }
   0x2   :  { %v1458_v1 = vld [vmem:[%s2020_s1 + $0x78] sm:$0xff]  ;;  %766 = vmatpush.bf16.msra.mxu0 %v1450_v0  ;;  %v1457_v5 = vld [vmem:[%s2020_s1 + $0x70] sm:$0xff]  ;;  %v1456_v10 = vld [vmem:[%s2020_s1 + $0x68] sm:$0xff]  ;;  %1510 = vset.pattern.permute.xlu2 %v1511_v8 }
   0x3   :  { %v1466_v2 = vld [vmem:[%s2020_s1 + $0xb8] sm:$0xff]  ;;  %795 = vmatpush.bf16.msra.mxu1 %v1458_v1  ;;  %v1465_v6 = vld [vmem:[%s2020_s1 + $0xb0] sm:$0xff]  ;;  %v1464_v11 = vld [vmem:[%s2020_s1 + $0xa8] sm:$0xff] }
   0x4   :  { %v1474_v3 = vld [vmem:[%s2020_s1 + $0xf8] sm:$0xff]  ;;  %824 = vmatpush.bf16.msra.mxu2 %v1466_v2  ;;  %v1473_v7 = vld [vmem:[%s2020_s1 + $0xf0] sm:$0xff]  ;;  %v1472_v12 = vld [vmem:[%s2020_s1 + $0xe8] sm:$0xff] }
   0x5   :  { %853 = vmatpush.bf16.msra.mxu3 %v1474_v3  ;;  %v1447_v13 = vld [vmem:[%s2020_s1 + $0x20] sm:$0xff]  ;;  %v1446_v17 = vld [vmem:[%s2020_s1 + $0x18] sm:$0xff]  ;;  %v1445_v22 = vld [vmem:[%s2020_s1 + $0x10] sm:$0xff] }
   0x6   :  { %767 = vmatpush.bf16.msra.mxu0 %v1449_v4  ;;  %v1455_v14 = vld [vmem:[%s2020_s1 + $0x60] sm:$0xff]  ;;  %v1454_v18 = vld [vmem:[%s2020_s1 + $0x58] sm:$0xff]  ;;  %v1453_v23 = vld [vmem:[%s2020_s1 + $0x50] sm:$0xff] }
   0x7   :  { %796 = vmatpush.bf16.msra.mxu1 %v1457_v5  ;;  %v1463_v15 = vld [vmem:[%s2020_s1 + $0xa0] sm:$0xff]  ;;  %v1462_v19 = vld [vmem:[%s2020_s1 + $0x98] sm:$0xff]  ;;  %v1461_v24 = vld [vmem:[%s2020_s1 + $0x90] sm:$0xff] }
   0x8   :  { %825 = vmatpush.bf16.msra.mxu2 %v1465_v6  ;;  %v1471_v16 = vld [vmem:[%s2020_s1 + $0xe0] sm:$0xff]  ;;  %v1470_v20 = vld [vmem:[%s2020_s1 + $0xd8] sm:$0xff]  ;;  %v1469_v25 = vld [vmem:[%s2020_s1 + $0xd0] sm:$0xff] }
   0x9   :  { %854 = vmatpush.bf16.msra.mxu3 %v1473_v7  ;;  %v174_v21 = vld [vmem:[%s2021_s2] sm:$0xff]  ;;  %v175_v26 = vld [vmem:[%s2021_s2 + $0x8] sm:$0xff]  ;;  %v176_v27 = vld [vmem:[%s2021_s2 + $0x10] sm:$0xff] }
   0xa   :  { %768 = vmatpush.bf16.msra.mxu0 %v1448_v9  ;;  %184 = vperm.xlu0 %1508, %v174_v21   ;;  %v1444_v28 = vld [vmem:[%s2020_s1 + $0x8] sm:$0xff]  ;;  %v1443_v32 = vld [vmem:[%s2020_s1] sm:$0xff]  ;;  %v1498_v44 = vld [vmem:[%s2020_s1 + $0x1b8] sm:$0xff] }
   0xb   :  { %797 = vmatpush.bf16.msra.mxu1 %v1456_v10  ;;  %v1452_v29 = vld [vmem:[%s2020_s1 + $0x48] sm:$0xff]  ;;  %v1451_v33 = vld [vmem:[%s2020_s1 + $0x40] sm:$0xff]  ;;  %194 = vperm.xlu1 %1509, %v176_v27   ;;  %v1482_v45 = vld [vmem:[%s2020_s1 + $0x138] sm:$0xff] }
   0xc   :  { %826 = vmatpush.bf16.msra.mxu2 %v1464_v11  ;;  %v1460_v30 = vld [vmem:[%s2020_s1 + $0x88] sm:$0xff]  ;;  %v1459_v34 = vld [vmem:[%s2020_s1 + $0x80] sm:$0xff]  ;;  %v1506_v50 = vld [vmem:[%s2020_s1 + $0x1f8] sm:$0xff] }
   0xd   :  { %855 = vmatpush.bf16.msra.mxu3 %v1472_v12  ;;  %v1468_v31 = vld [vmem:[%s2020_s1 + $0xc8] sm:$0xff]  ;;  %v1467_v35 = vld [vmem:[%s2020_s1 + $0xc0] sm:$0xff]  ;;  %v1490_v51 = vld [vmem:[%s2020_s1 + $0x178] sm:$0xff] }
   0xe   :  { %769 = vmatpush.bf16.msra.mxu0 %v1447_v13  ;;  %v1029_v36 = vld [vmem:[%s2022_s0] sm:$0xf]  ;;  %v1411_v38 = vld [vmem:[%s2022_s0 + $0x4] sm:$0xf]  ;;  %v1037_v40 = vld [vmem:[%s2022_s0 + $0x8] sm:$0xf] }
   0xf   :  { %798 = vmatpush.bf16.msra.mxu1 %v1455_v14  ;;  %v1415_v37 = vld [vmem:[%s2022_s0 + $0x1c] sm:$0xf0]  ;;  %v1031_v39 = vld [vmem:[%s2022_s0 + $0x20] sm:$0xf0]  ;;  %v1416_v41 = vld [vmem:[%s2022_s0 + $0x24] sm:$0xf0] }
  0x10   :  { %827 = vmatpush.bf16.msra.mxu2 %v1463_v15  ;;  %v1412_v42 = vld [vmem:[%s2022_s0 + $0xc] sm:$0xf]  ;;  %v1030_v46 = vor.u32 %v1415_v37, %v1029_v36  ;;  %v1034_v47 = vor.u32 %v1411_v38, %v1031_v39  ;;  %v1038_v48 = vor.u32 %v1416_v41, %v1037_v40  ;;  %v1497_v52 = vld [vmem:[%s2020_s1 + $0x1b0] sm:$0xff]  ;;  %v177_v56 = vld [vmem:[%s2021_s2 + $0x18] sm:$0xff] }
  0x11   :  { %856 = vmatpush.bf16.msra.mxu3 %v1471_v16  ;;  %v1039_v43 = vld [vmem:[%s2022_s0 + $0x28] sm:$0xf0]  ;;  %v1481_v53 = vld [vmem:[%s2020_s1 + $0x130] sm:$0xff]  ;;  %v1061_v61 = vld [vmem:[%s2022_s0 + $0x40] sm:$0xf] }
  0x12   :  { %770 = vmatpush.bf16.msra.mxu0 %v1446_v17  ;;  %189 = vperm.xlu0 %1508, %v175_v26   ;;  %v1042_v49 = vor.u32 %v1412_v42, %v1039_v43  ;;  %v1505_v54 = vld [vmem:[%s2020_s1 + $0x1f0] sm:$0xff]  ;;  %v1496_v57 = vld [vmem:[%s2020_s1 + $0x1a8] sm:$0xff]  ;;  %v1495_v62 = vld [vmem:[%s2020_s1 + $0x1a0] sm:$0xff] }
  0x13   :  { %799 = vmatpush.bf16.msra.mxu1 %v1454_v18  ;;  %v1489_v55 = vld [vmem:[%s2020_s1 + $0x170] sm:$0xff]  ;;  %v1480_v58 = vld [vmem:[%s2020_s1 + $0x128] sm:$0xff]  ;;  %199 = vperm.xlu1 %1509, %v177_v56   ;;  %v1479_v63 = vld [vmem:[%s2020_s1 + $0x120] sm:$0xff] }
  0x14   :  { %828 = vmatpush.bf16.msra.mxu2 %v1462_v19  ;;  %v1504_v59 = vld [vmem:[%s2020_s1 + $0x1e8] sm:$0xff]  ;;  %v1423_v0 = vld [vmem:[%s2022_s0 + $0x5c] sm:$0xf0]  ;;  %v1419_v1 = vld [vmem:[%s2022_s0 + $0x44] sm:$0xf] }
  0x15   :  { %857 = vmatpush.bf16.msra.mxu3 %v1470_v20  ;;  %v1488_v60 = vld [vmem:[%s2020_s1 + $0x168] sm:$0xff]  ;;  %v1063_v2 = vld [vmem:[%s2022_s0 + $0x60] sm:$0xf0]  ;;  %v1494_v9 = vld [vmem:[%s2020_s1 + $0x198] sm:$0xff]  ;;  %v1062_v11 = vor.u32 %v1423_v0, %v1061_v61 }
  0x16   :  { %771 = vmatpush.bf16.msra.mxu0 %v1445_v22  ;;  %v1069_v3 = vld [vmem:[%s2022_s0 + $0x48] sm:$0xf]  ;;  %v1420_v5 = vld [vmem:[%s2022_s0 + $0x4c] sm:$0xf]  ;;  %v1503_v7 = vld [vmem:[%s2020_s1 + $0x1e0] sm:$0xff]  ;;  %v1066_v12 = vor.u32 %v1419_v1, %v1063_v2 }
  0x17   :  { %800 = vmatpush.bf16.msra.mxu1 %v1453_v23  ;;  %v1424_v4 = vld [vmem:[%s2022_s0 + $0x64] sm:$0xf0]  ;;  %v1071_v6 = vld [vmem:[%s2022_s0 + $0x68] sm:$0xf0]  ;;  %v1487_v8 = vld [vmem:[%s2020_s1 + $0x160] sm:$0xff] }
  0x18   :  { %829 = vmatpush.bf16.msra.mxu2 %v1461_v24  ;;  %v1478_v10 = vld [vmem:[%s2020_s1 + $0x118] sm:$0xff]  ;;  %v1070_v13 = vor.u32 %v1424_v4, %v1069_v3  ;;  %v1074_v14 = vor.u32 %v1420_v5, %v1071_v6  ;;  %v1493_v17 = vld [vmem:[%s2020_s1 + $0x190] sm:$0xff]  ;;  %v1492_v21 = vld [vmem:[%s2020_s1 + $0x188] sm:$0xff] }
  0x19   :  { %858 = vmatpush.bf16.msra.mxu3 %v1469_v25  ;;  %v1502_v15 = vld [vmem:[%s2020_s1 + $0x1d8] sm:$0xff]  ;;  %v1477_v18 = vld [vmem:[%s2020_s1 + $0x110] sm:$0xff]  ;;  %v1476_v22 = vld [vmem:[%s2020_s1 + $0x108] sm:$0xff] }
  0x1a   :  { %772 = vmatpush.bf16.msra.mxu0 %v1444_v28  ;;  %v1486_v16 = vld [vmem:[%s2020_s1 + $0x158] sm:$0xff]  ;;  %v1501_v19 = vld [vmem:[%s2020_s1 + $0x1d0] sm:$0xff]  ;;  %v1500_v24 = vld [vmem:[%s2020_s1 + $0x1c8] sm:$0xff] }
  0x1b   :  { %801 = vmatpush.bf16.msra.mxu1 %v1452_v29  ;;  %v1485_v20 = vld [vmem:[%s2020_s1 + $0x150] sm:$0xff]  ;;  %v1484_v25 = vld [vmem:[%s2020_s1 + $0x148] sm:$0xff]  ;;  %v1093_v26 = vld [vmem:[%s2022_s0 + $0x80] sm:$0xf] }
  0x1c   :  { %830 = vmatpush.bf16.msra.mxu2 %v1460_v30  ;;  %v180_v23 = vld [vmem:[%s2021_s2 + $0x30] sm:$0xff]  ;;  %v1491_v27 = vld [vmem:[%s2020_s1 + $0x180] sm:$0xff]  ;;  %v181_v43 = vld [vmem:[%s2021_s2 + $0x38] sm:$0xff] }
  0x1d   :  { %859 = vmatpush.bf16.msra.mxu3 %v1468_v31  ;;  %214 = vperm.xlu0 %1508, %v180_v23   ;;  %v1475_v28 = vld [vmem:[%s2020_s1 + $0x100] sm:$0xff]  ;;  %v1053_v61 = vld [vmem:[%s2022_s0 + $0x18] sm:$0xf]  ;;  %v1055_v0 = vld [vmem:[%s2022_s0 + $0x38] sm:$0xf0] }
  0x1e   :  { %773 = vmatpush.bf16.msra.mxu0 %v1443_v32  ;;  %v1431_v29 = vld [vmem:[%s2022_s0 + $0x9c] sm:$0xf0]  ;;  %v1427_v30 = vld [vmem:[%s2022_s0 + $0x84] sm:$0xf]  ;;  %v1101_v32 = vld [vmem:[%s2022_s0 + $0x88] sm:$0xf]  ;;  %219 = vperm.xlu1 %1509, %v181_v43  }
  0x1f   :  { %802 = vmatpush.bf16.msra.mxu1 %v1451_v33  ;;  %v1095_v31 = vld [vmem:[%s2022_s0 + $0xa0] sm:$0xf0]  ;;  %v1432_v33 = vld [vmem:[%s2022_s0 + $0xa4] sm:$0xf0]  ;;  %v1094_v38 = vor.u32 %v1431_v29, %v1093_v26  ;;  %v1077_v5 = vld [vmem:[%s2022_s0 + $0x50] sm:$0xf] }
  0x20   :  { %831 = vmatpush.bf16.msra.mxu2 %v1459_v34  ;;  %v1428_v34 = vld [vmem:[%s2022_s0 + $0x8c] sm:$0xf]  ;;  %v1499_v36 = vld [vmem:[%s2020_s1 + $0x1c0] sm:$0xff]  ;;  %v1098_v39 = vor.u32 %v1427_v30, %v1095_v31  ;;  %v1102_v40 = vor.u32 %v1432_v33, %v1101_v32  ;;  %v1425_v6 = vld [vmem:[%s2022_s0 + $0x6c] sm:$0xf0] }
  0x21   :  { %860 = vmatpush.bf16.msra.mxu3 %v1467_v35  ;;  %774 = vmatmul.bf16.vlgmr.msra.gmra.mxu0 %v1030_v46  ;;  %v1103_v35 = vld [vmem:[%s2022_s0 + $0xa8] sm:$0xf0]  ;;  %v1483_v37 = vld [vmem:[%s2020_s1 + $0x140] sm:$0xff]  ;;  %v1430_v23 = vld [vmem:[%s2022_s0 + $0x9c] sm:$0xf] }
  0x22   :  { %882 = vmatpush.bf16.msrb.mxu0 %v1482_v45  ;;  %803 = vmatmul.bf16.vlgmr.msra.gmra.mxu1 %v1034_v47  ;;  %v1106_v41 = vor.u32 %v1428_v34, %v1103_v35  ;;  %v178_v42 = vld [vmem:[%s2021_s2 + $0x20] sm:$0xff]  ;;  %v1141_v29 = vld [vmem:[%s2022_s0 + $0xd0] sm:$0xf]  ;;  %v1437_v31 = vld [vmem:[%s2022_s0 + $0xd4] sm:$0xf] }
  0x23   :  { %832 = vmatmul.bf16.vlgmr.msra.gmra.mxu2 %v1038_v48  ;;  %911 = vmatpush.bf16.msrb.mxu1 %v1490_v51  ;;  %v1125_v45 = vld [vmem:[%s2022_s0 + $0xc0] sm:$0xf]  ;;  %v1435_v47 = vld [vmem:[%s2022_s0 + $0xc4] sm:$0xf]  ;;  %v1436_v51 = vld [vmem:[%s2022_s0 + $0xcc] sm:$0xf] }
  0x24   :  { %940 = vmatpush.bf16.msrb.mxu2 %v1498_v44  ;;  %861 = vmatmul.bf16.vlgmr.msra.gmra.mxu3 %v1042_v49  ;;  %v179_v44 = vld [vmem:[%s2021_s2 + $0x28] sm:$0xff]  ;;  %v1439_v46 = vld [vmem:[%s2022_s0 + $0xdc] sm:$0xf0]  ;;  %v1127_v48 = vld [vmem:[%s2022_s0 + $0xe0] sm:$0xf0] }
  0x25   :  { %969 = vmatpush.bf16.msrb.mxu3 %v1506_v50  ;;  %204 = vperm.xlu2 %1510, %v178_v42   ;;  %v1133_v49 = vld [vmem:[%s2022_s0 + $0xc8] sm:$0xf]  ;;  %v1441_v30 = vld [vmem:[%s2022_s0 + $0xec] sm:$0xf0]  ;;  %v1143_v32 = vld [vmem:[%s2022_s0 + $0xf0] sm:$0xf0] }
  0x26   :  { %883 = vmatpush.bf16.msrb.mxu0 %v1481_v53  ;;  %v1440_v50 = vld [vmem:[%s2022_s0 + $0xe4] sm:$0xf0]  ;;  %v1126_v53 = vor.u32 %v1439_v46, %v1125_v45  ;;  %v1149_v33 = vld [vmem:[%s2022_s0 + $0xd8] sm:$0xf]  ;;  %v1438_v35 = vld [vmem:[%s2022_s0 + $0xdc] sm:$0xf] }
  0x27   :  { %912 = vmatpush.bf16.msrb.mxu1 %v1489_v55  ;;  %v1134_v55 = vor.u32 %v1440_v50, %v1133_v49  ;;  %v1442_v34 = vld [vmem:[%s2022_s0 + $0xf4] sm:$0xf0] }
  0x28   :  { %941 = vmatpush.bf16.msrb.mxu2 %v1497_v52  ;;  %v1135_v52 = vld [vmem:[%s2022_s0 + $0xe8] sm:$0xf0] }
  0x29   :  { %970 = vmatpush.bf16.msrb.mxu3 %v1505_v54  ;;  %v1130_v54 = vor.u32 %v1435_v47, %v1127_v48  ;;  %v1138_v56 = vor.u32 %v1436_v51, %v1135_v52 }
  0x2a   :  { %884 = vmatpush.bf16.msrb.mxu0 %v1480_v58  ;;  %v1417_v58 = vld [vmem:[%s2022_s0 + $0x2c] sm:$0xf0] }
  0x2b   :  { %913 = vmatpush.bf16.msrb.mxu1 %v1488_v60  ;;  %v1047_v60 = vld [vmem:[%s2022_s0 + $0x30] sm:$0xf0] }
  0x2c   :  { %942 = vmatpush.bf16.msrb.mxu2 %v1496_v57  ;;  %v1045_v57 = vld [vmem:[%s2022_s0 + $0x10] sm:$0xf] }
  0x2d   :  { %971 = vmatpush.bf16.msrb.mxu3 %v1504_v59  ;;  %209 = vperm.xlu2 %1510, %v179_v44   ;;  %v1413_v59 = vld [vmem:[%s2022_s0 + $0x14] sm:$0xf]  ;;  %v1046_v1 = vor.u32 %v1417_v58, %v1045_v57 }
  0x2e   :  { %885 = vmatpush.bf16.msrb.mxu0 %v1479_v63  ;;  %v1414_v63 = vld [vmem:[%s2022_s0 + $0x1c] sm:$0xf]  ;;  %v1050_v2 = vor.u32 %v1413_v59, %v1047_v60 }
  0x2f   :  { %914 = vmatpush.bf16.msrb.mxu1 %v1487_v8  ;;  %v1058_v4 = vor.u32 %v1414_v63, %v1055_v0  ;;  %v1079_v8 = vld [vmem:[%s2022_s0 + $0x70] sm:$0xf0] }
  0x30   :  { %943 = vmatpush.bf16.msrb.mxu2 %v1495_v62  ;;  %v1418_v62 = vld [vmem:[%s2022_s0 + $0x34] sm:$0xf0] }
  0x31   :  { %972 = vmatpush.bf16.msrb.mxu3 %v1503_v7  ;;  %779 = vmatmul.bf16.gmra.mxu0 %v1062_v11  ;;  %v1054_v3 = vor.u32 %v1418_v62, %v1053_v61  ;;  %v1421_v7 = vld [vmem:[%s2022_s0 + $0x54] sm:$0xf]  ;;  %v1422_v11 = vld [vmem:[%s2022_s0 + $0x5c] sm:$0xf] }
  0x32   :  { %886 = vmatpush.bf16.msrb.mxu0 %v1478_v10  ;;  %808 = vmatmul.bf16.gmra.mxu1 %v1066_v12  ;;  %v1426_v10 = vld [vmem:[%s2022_s0 + $0x74] sm:$0xf0]  ;;  %v1087_v12 = vld [vmem:[%s2022_s0 + $0x78] sm:$0xf0] }
  0x33   :  { %837 = vmatmul.bf16.gmra.mxu2 %v1070_v13  ;;  %915 = vmatpush.bf16.msrb.mxu1 %v1486_v16  ;;  %v1078_v13 = vor.u32 %v1425_v6, %v1077_v5  ;;  %v1090_v16 = vor.u32 %v1422_v11, %v1087_v12 }
  0x34   :  { %944 = vmatpush.bf16.msrb.mxu2 %v1494_v9  ;;  %866 = vmatmul.bf16.gmra.mxu3 %v1074_v14  ;;  %v1085_v9 = vld [vmem:[%s2022_s0 + $0x58] sm:$0xf]  ;;  %v1082_v14 = vor.u32 %v1421_v7, %v1079_v8 }
  0x35   :  { %973 = vmatpush.bf16.msrb.mxu3 %v1502_v15  ;;  %v1086_v15 = vor.u32 %v1426_v10, %v1085_v9 }
  0x36   :  { %887 = vmatpush.bf16.msrb.mxu0 %v1477_v18  ;;  %v1433_v18 = vld [vmem:[%s2022_s0 + $0xac] sm:$0xf0] }
  0x37   :  { %916 = vmatpush.bf16.msrb.mxu1 %v1485_v20  ;;  %v1111_v20 = vld [vmem:[%s2022_s0 + $0xb0] sm:$0xf0] }
  0x38   :  { %945 = vmatpush.bf16.msrb.mxu2 %v1493_v17  ;;  %v1109_v17 = vld [vmem:[%s2022_s0 + $0x90] sm:$0xf] }
  0x39   :  { %974 = vmatpush.bf16.msrb.mxu3 %v1501_v19  ;;  %v1429_v19 = vld [vmem:[%s2022_s0 + $0x94] sm:$0xf] }
  0x3a   :  { %888 = vmatpush.bf16.msrb.mxu0 %v1476_v22  ;;  %v1434_v22 = vld [vmem:[%s2022_s0 + $0xb4] sm:$0xf0]  ;;  %v1114_v26 = vor.u32 %v1429_v19, %v1111_v20 }
  0x3b   :  { %917 = vmatpush.bf16.msrb.mxu1 %v1484_v25  ;;  %v1110_v25 = vor.u32 %v1433_v18, %v1109_v17 }
  0x3c   :  { %946 = vmatpush.bf16.msrb.mxu2 %v1492_v21  ;;  %v1117_v21 = vld [vmem:[%s2022_s0 + $0x98] sm:$0xf] }
  0x3d   :  { %975 = vmatpush.bf16.msrb.mxu3 %v1500_v24  ;;  %v1119_v24 = vld [vmem:[%s2022_s0 + $0xb8] sm:$0xf0] }
  0x3e   :  { %889 = vmatpush.bf16.msrb.mxu0 %v1475_v28  ;;  %v1122_v28 = vor.u32 %v1430_v23, %v1119_v24 }
  0x3f   :  { %918 = vmatpush.bf16.msrb.mxu1 %v1483_v37  ;;  %v1142_v37 = vor.u32 %v1441_v30, %v1141_v29 }
  0x40   :  { %947 = vmatpush.bf16.msrb.mxu2 %v1491_v27  ;;  %v1118_v27 = vor.u32 %v1434_v22, %v1117_v21 }
  0x41   :  { %976 = vmatpush.bf16.msrb.mxu3 %v1499_v36  ;;  %784 = vmatmul.bf16.gmra.mxu0 %v1094_v38  ;;  %v1151_v36 = vld [vmem:[%s2022_s0 + $0xf8] sm:$0xf0]  ;;  %v1146_v38 = vor.u32 %v1437_v31, %v1143_v32 }
  0x42   :  { %813 = vmatmul.bf16.gmra.mxu1 %v1098_v39  ;;  %v1150_v39 = vor.u32 %v1442_v34, %v1149_v33 }
  0x43   :  { %842 = vmatmul.bf16.gmra.mxu2 %v1102_v40  ;;  %v1154_v40 = vor.u32 %v1438_v35, %v1151_v36 }
  0x44   :  { %871 = vmatmul.bf16.gmra.mxu3 %v1106_v41 }
  0x51   :  { %789 = vmatmul.bf16.gmra.mxu0 %v1126_v53 }
  0x52   :  { %818 = vmatmul.bf16.gmra.mxu1 %v1130_v54 }
  0x53   :  { %847 = vmatmul.bf16.gmra.mxu2 %v1134_v55 }
  0x54   :  { %876 = vmatmul.bf16.gmra.mxu3 %v1138_v56 }
  0x61   :  { %890 = vmatmul.bf16.vlgmr.msrb.gmra.mxu0 %v1046_v1 }
  0x62   :  { %919 = vmatmul.bf16.vlgmr.msrb.gmra.mxu1 %v1050_v2 }
  0x63   :  { %948 = vmatmul.bf16.vlgmr.msrb.gmra.mxu2 %v1054_v3 }
  0x64   :  { %977 = vmatmul.bf16.vlgmr.msrb.gmra.mxu3 %v1058_v4 }
  0x71   :  { %895 = vmatmul.bf16.gmra.mxu0 %v1078_v13 }
  0x72   :  { %924 = vmatmul.bf16.gmra.mxu1 %v1082_v14 }
  0x73   :  { %953 = vmatmul.bf16.gmra.mxu2 %v1086_v15 }
  0x74   :  { %982 = vmatmul.bf16.gmra.mxu3 %v1090_v16 }
  0x7c   :  { %v185_v3 = vpop.permute.xlu0 %184 }
  0x7d   :  { %v195_v18 = vpop.permute.xlu1 %194 }
  0x81   :  { %900 = vmatmul.bf16.gmra.mxu0 %v1110_v25 }
  0x82   :  { %929 = vmatmul.bf16.gmra.mxu1 %v1114_v26 }
  0x83   :  { %958 = vmatmul.bf16.gmra.mxu2 %v1118_v27 }
  0x84   :  { %987 = vmatmul.bf16.gmra.mxu3 %v1122_v28  ;;  %v190_v10 = vpop.permute.xlu0 %189 }
  0x85   :  { %v200_v33 = vpop.permute.xlu1 %199 }
  0x91   :  { %905 = vmatmul.bf16.gmra.mxu0 %v1142_v37 }
  0x92   :  { %934 = vmatmul.bf16.gmra.mxu1 %v1146_v38 }
  0x93   :  { %963 = vmatmul.bf16.gmra.mxu2 %v1150_v39 }
  0x94   :  { %992 = vmatmul.bf16.gmra.mxu3 %v1154_v40 }
  0x9e   :  { %v775_v41 = vpop.f32.mrf.mxu0 }
  0x9f   :  { %v804_v42 = vpop.f32.mrf.mxu1  ;;  %v776_v4 = vadd.f32 %v775_v41, %v185_v3 }
  0xa1   :  { %v805_v7 = vadd.f32 %v804_v42, %v776_v4 }
  0xa6   :  { %v833_v43 = vpop.f32.mrf.mxu2  ;;  %v777_v45 = vpop.f32.mrf.mxu0 }
  0xa7   :  { %v862_v44 = vpop.f32.mrf.mxu3  ;;  %v806_v46 = vpop.f32.mrf.mxu1  ;;  %v834_v11 = vadd.f32 %v833_v43, %v805_v7  ;;  %v778_v12 = vadd.f32 %v777_v45, %v190_v10 }
  0xa8   :  { %v205_v45 = vpop.permute.xlu2 %204 }
  0xa9   :  { %v863_v15 = vadd.f32 %v862_v44, %v834_v11  ;;  %v807_v19 = vadd.f32 %v806_v46, %v778_v12 }
  0xae   :  { %v835_v47 = vpop.f32.mrf.mxu2  ;;  %v780_v49 = vpop.f32.mrf.mxu0 }
  0xaf   :  { %v864_v48 = vpop.f32.mrf.mxu3  ;;  %v809_v50 = vpop.f32.mrf.mxu1  ;;  %v836_v21 = vadd.f32 %v835_v47, %v807_v19  ;;  %v781_v22 = vadd.f32 %v780_v49, %v195_v18 }
  0xb1   :  { %v865_v26 = vadd.f32 %v864_v48, %v836_v21  ;;  %v810_v27 = vadd.f32 %v809_v50, %v781_v22 }
  0xb6   :  { %v838_v51 = vpop.f32.mrf.mxu2  ;;  %v782_v53 = vpop.f32.mrf.mxu0 }
  0xb7   :  { %v867_v52 = vpop.f32.mrf.mxu3  ;;  %v811_v54 = vpop.f32.mrf.mxu1  ;;  %v839_v34 = vadd.f32 %v838_v51, %v810_v27  ;;  %v783_v36 = vadd.f32 %v782_v53, %v200_v33 }
  0xb9   :  { %v868_v41 = vadd.f32 %v867_v52, %v839_v34  ;;  %v812_v46 = vadd.f32 %v811_v54, %v783_v36 }
  0xbe   :  { %v840_v55 = vpop.f32.mrf.mxu2  ;;  %v785_v57 = vpop.f32.mrf.mxu0 }
  0xbf   :  { %v1940_v56 = vpop.f32.mrf.mxu3  ;;  %v1942_v58 = vpop.f32.mrf.mxu1  ;;  %v841_v49 = vadd.f32 %v840_v55, %v812_v46  ;;  %v786_v50 = vadd.f32 %v785_v57, %v205_v45 }
  0xc0   :  { %v210_v57 = vpop.permute.xlu2 %209 }
  0xc1   :  { %v870_v52 = vadd.f32 %v1940_v56, %v841_v49  ;;  %v815_v10 = vadd.f32 %v1942_v58, %v786_v50 }
  0xc6   :  { %v1944_v59 = vpop.f32.mrf.mxu2  ;;  %v1948_v61 = vpop.f32.mrf.mxu0 }
  0xc7   :  { %v1946_v60 = vpop.f32.mrf.mxu3  ;;  %v1950_v62 = vpop.f32.mrf.mxu1  ;;  %v788_v18 = vadd.f32 %v1948_v61, %v210_v57 }
  0xce   :  { %v1952_v63 = vpop.f32.mrf.mxu2  ;;  %v1956_v1 = vpop.f32.mrf.mxu0 }
  0xcf   :  { %v1954_v0 = vpop.f32.mrf.mxu3  ;;  %v1958_v2 = vpop.f32.mrf.mxu1 }
  0xd6   :  { %v1960_v5 = vpop.f32.mrf.mxu2  ;;  %v1964_v8 = vpop.f32.mrf.mxu0 }
  0xd7   :  { %v1962_v6 = vpop.f32.mrf.mxu3  ;;  %v1966_v9 = vpop.f32.mrf.mxu1 }
  0xde   :  { %v1968_v13 = vpop.f32.mrf.mxu2  ;;  %v891_v16 = vpop.f32.mrf.mxu0 }
  0xdf   :  { %v1970_v14 = vpop.f32.mrf.mxu3  ;;  %v920_v17 = vpop.f32.mrf.mxu1  ;;  %v892_v20 = vadd.f32 %v891_v16, %v863_v15  ;;  %v844_v16 = vadd.f32 %v1944_v59, %v815_v10  ;;  %v817_v59 = vadd.f32 %v1950_v62, %v788_v18 }
  0xe1   :  { %v921_v23 = vadd.f32 %v920_v17, %v892_v20  ;;  %v873_v21 = vadd.f32 %v1946_v60, %v844_v16  ;;  %v846_v61 = vadd.f32 %v1952_v63, %v817_v59 }
  0xe3   :  { %v875_v33 = vadd.f32 %v1954_v0, %v846_v61 }
  0xe6   :  { %v949_v24 = vpop.f32.mrf.mxu2  ;;  %v893_v29 = vpop.f32.mrf.mxu0 }
  0xe7   :  { %v978_v25 = vpop.f32.mrf.mxu3  ;;  %v950_v28 = vadd.f32 %v949_v24, %v921_v23  ;;  %v922_v30 = vpop.f32.mrf.mxu1  ;;  %v894_v32 = vadd.f32 %v893_v29, %v865_v26 }
  0xe9   :  { %v979_v31 = vadd.f32 %v978_v25, %v950_v28  ;;  %v923_v38 = vadd.f32 %v922_v30, %v894_v32  ;;  %v215_v25 = vpop.permute.xlu0 %214 }
  0xea   :  { %v791_v28 = vadd.f32 %v1956_v1, %v215_v25  ;;  %v220_v1 = vpop.permute.xlu1 %219 }
  0xeb   :  { %v998_v35 = vmax.f32 %v979_v31, 0.0 }
  0xec   :  { %v820_v34 = vadd.f32 %v1958_v2, %v791_v28 }
  0xed   :  { %v1006_v37 = vpack.c.bf16 %v998_v35, %v998_v35 }
  0xee   :  { %v951_v39 = vpop.f32.mrf.mxu2  ;;  %v896_v43 = vpop.f32.mrf.mxu0 }
  0xef   :  { %v980_v40 = vpop.f32.mrf.mxu3  ;;  %1015 = vst.msk [vmem:[%s2023_s3] sm:$0xf] %vm1014_vm0, %v1006_v37  ;;  %v952_v42 = vadd.f32 %v951_v39, %v923_v38  ;;  %v925_v44 = vpop.f32.mrf.mxu1  ;;  %v897_v48 = vadd.f32 %v896_v43, %v868_v41  ;;  %v849_v38 = vadd.f32 %v1960_v5, %v820_v34 }
  0xf1   :  { %v981_v47 = vadd.f32 %v980_v40, %v952_v42  ;;  %v926_v3 = vadd.f32 %v925_v44, %v897_v48  ;;  %v793_v40 = vadd.f32 %v1964_v8, %v220_v1  ;;  %v878_v43 = vadd.f32 %v1962_v6, %v849_v38 }
  0xf3   :  { %v999_v51 = vmax.f32 %v981_v47, 0.0  ;;  %v822_v46 = vadd.f32 %v1966_v9, %v793_v40 }
  0xf5   :  { %v1007_v53 = vpack.c.bf16 %v999_v51, %v999_v51  ;;  %v851_v8 = vadd.f32 %v1968_v13, %v822_v46 }
  0xf6   :  { %v954_v4 = vpop.f32.mrf.mxu2  ;;  %v898_v54 = vpop.f32.mrf.mxu0 }
  0xf7   :  { %v983_v7 = vpop.f32.mrf.mxu3  ;;  %1016 = vst.msk [vmem:[%s2023_s3 + $0x4] sm:$0xf] %vm1014_vm0, %v1007_v53  ;;  %v955_v11 = vadd.f32 %v954_v4, %v926_v3  ;;  %v927_v12 = vpop.f32.mrf.mxu1  ;;  %v899_v55 = vadd.f32 %v898_v54, %v870_v52  ;;  %v880_v6 = vadd.f32 %v1970_v14, %v851_v8 }
  0xf9   :  { %v984_v15 = vadd.f32 %v983_v7, %v955_v11  ;;  %v928_v56 = vadd.f32 %v927_v12, %v899_v55 }
  0xfb   :  { %v1000_v17 = vmax.f32 %v984_v15, 0.0 }
  0xfd   :  { %v1008_v19 = vpack.c.bf16 %v1000_v17, %v1000_v17 }
  0xfe   :  { %v956_v20 = vpop.f32.mrf.mxu2  ;;  %v901_v23 = vpop.f32.mrf.mxu0 }
  0xff   :  { %v985_v58 = vpop.f32.mrf.mxu3  ;;  %1017 = vst.msk [vmem:[%s2023_s3 + $0x8] sm:$0xf] %vm1014_vm0, %v1008_v19  ;;  %v957_v22 = vadd.f32 %v956_v20, %v928_v56  ;;  %v930_v24 = vpop.f32.mrf.mxu1  ;;  %v902_v27 = vadd.f32 %v901_v23, %v873_v21 }
 0x101   :  { %v986_v26 = vadd.f32 %v985_v58, %v957_v22  ;;  %v931_v60 = vadd.f32 %v930_v24, %v902_v27 }
 0x103   :  { %v1001_v29 = vmax.f32 %v986_v26, 0.0 }
 0x105   :  { %v1009_v30 = vpack.c.bf16 %v1001_v29, %v1001_v29 }
 0x106   :  { %v959_v31 = vpop.f32.mrf.mxu2  ;;  %v903_v35 = vpop.f32.mrf.mxu0 }
 0x107   :  { %v988_v32 = vpop.f32.mrf.mxu3  ;;  %1018 = vst.msk [vmem:[%s2023_s3 + $0xc] sm:$0xf] %vm1014_vm0, %v1009_v30  ;;  %v960_v62 = vadd.f32 %v959_v31, %v931_v60  ;;  %v932_v36 = vpop.f32.mrf.mxu1  ;;  %v904_v37 = vadd.f32 %v903_v35, %v875_v33 }
 0x109   :  { %v989_v63 = vadd.f32 %v988_v32, %v960_v62  ;;  %v933_v0 = vadd.f32 %v932_v36, %v904_v37 }
 0x10b   :  { %v1002_v39 = vmax.f32 %v989_v63, 0.0 }
 0x10d   :  { %v1010_v41 = vpack.c.bf16 %v1002_v39, %v1002_v39 }
 0x10e   :  { %v961_v42 = vpop.f32.mrf.mxu2  ;;  %v906_v45 = vpop.f32.mrf.mxu0 }
 0x10f   :  { %v990_v2 = vpop.f32.mrf.mxu3  ;;  %1019 = vst.msk [vmem:[%s2023_s3 + $0x10] sm:$0xf] %vm1014_vm0, %v1010_v41  ;;  %v962_v44 = vadd.f32 %v961_v42, %v933_v0  ;;  %v907_v5 = vadd.f32 %v906_v45, %v878_v43  ;;  %v935_v48 = vpop.f32.mrf.mxu1 }
 0x111   :  { %v991_v47 = vadd.f32 %v990_v2, %v962_v44  ;;  %v936_v51 = vadd.f32 %v935_v48, %v907_v5 }
 0x113   :  { %v1003_v49 = vmax.f32 %v991_v47, 0.0 }
 0x115   :  { %v1011_v50 = vpack.c.bf16 %v1003_v49, %v1003_v49 }
 0x116   :  { %v964_v53 = vpop.f32.mrf.mxu2  ;;  %v908_v7 = vpop.f32.mrf.mxu0 }
 0x117   :  { %v993_v3 = vpop.f32.mrf.mxu3  ;;  %1020 = vst.msk [vmem:[%s2023_s3 + $0x14] sm:$0xf] %vm1014_vm0, %v1011_v50  ;;  %v965_v4 = vadd.f32 %v964_v53, %v936_v51  ;;  %v909_v52 = vadd.f32 %v908_v7, %v880_v6  ;;  %v937_v11 = vpop.f32.mrf.mxu1 }
 0x119   :  { %v994_v9 = vadd.f32 %v993_v3, %v965_v4  ;;  %v938_v13 = vadd.f32 %v937_v11, %v909_v52 }
 0x11b   :  { %v1004_v10 = vmax.f32 %v994_v9, 0.0 }
 0x11d   :  { %v1012_v54 = vpack.c.bf16 %v1004_v10, %v1004_v10 }
 0x11e   :  { %v966_v12 = vpop.f32.mrf.mxu2 }
 0x11f   :  { %1021 = vst.msk [vmem:[%s2023_s3 + $0x18] sm:$0xf] %vm1014_vm0, %v1012_v54  ;;  %v967_v14 = vadd.f32 %v966_v12, %v938_v13  ;;  %v995_v15 = vpop.f32.mrf.mxu3 }
 0x121   :  { %v996_v55 = vadd.f32 %v995_v15, %v967_v14 }
 0x123   :  { %v1005_v57 = vmax.f32 %v996_v55, 0.0 }
 0x125   :  { %v1013_v16 = vpack.c.bf16 %v1005_v57, %v1005_v57 }
 0x127   :  { %1022 = vst.msk [vmem:[%s2023_s3 + $0x1c] sm:$0xf] %vm1014_vm0, %v1013_v16 }

// kernel: beta_vae_forward.13
= control target key start
LH: loop header
LB: loop body
LE: loop exit
PB: predicated region body
PF: predicated region fallthrough
CT: control target
= control target key end

     0   :  { %16 = vsyncpa [#allocation3], 0  ;;  %s921_s0 = inlined_call_operand.vmem [shape: bf16[2,256], index: 0, kind: input, shape index: {}]   ;;  %s922_s1 = inlined_call_operand.vmem [shape: bf16[256,32], index: 1, kind: input, shape index: {}]   ;;  %s923_s2 = inlined_call_operand.vmem [shape: f32[1,32], index: 2, kind: input, shape index: {}]   ;;  %s924_s3 = inlined_call_operand.vmem [shape: bf16[256,32], index: 3, kind: input, shape index: {}]   ;;  %s925_s4 = inlined_call_operand.vmem [shape: f32[1,32], index: 4, kind: input, shape index: {}]   ;;  %s926_s5 = inlined_call_operand.vmem [shape: bf16[32,256], index: 5, kind: input, shape index: {}]   ;;  %s927_s6 = inlined_call_operand.vmem [shape: f32[1,256], index: 6, kind: input, shape index: {}]   ;;  %s928_s7 = inlined_call_operand.vmem [shape: f32[2,32], index: 7, kind: input, shape index: {}]   ;;  %s929_s8 = inlined_call_operand.hbm [shape: f32[2,32], index: 8, kind: output, shape index: {0}]   ;;  %s930_s9 = inlined_call_operand.hbm [shape: f32[2,32], index: 9, kind: output, shape index: {1}]   ;;  %s931_s10 = inlined_call_operand.vmem [shape: bf16[2,256], index: 10, kind: output, shape index: {2}]  }
   0x1   :  { %v649_v0 = vld [vmem:[%s924_s3 + $0x38] sm:$0xff]  ;;  %v648_v2 = vld [vmem:[%s924_s3 + $0x30] sm:$0xff]  ;;  %v647_v8 = vld [vmem:[%s924_s3 + $0x28] sm:$0xff] }
   0x2   :  { %v657_v1 = vld [vmem:[%s924_s3 + $0x78] sm:$0xff]  ;;  %337 = vmatpush.bf16.msra.mxu2 %v649_v0  ;;  %v656_v3 = vld [vmem:[%s924_s3 + $0x70] sm:$0xff]  ;;  %v655_v9 = vld [vmem:[%s924_s3 + $0x68] sm:$0xff] }
   0x3   :  { %350 = vmatpush.bf16.msra.mxu3 %v657_v1  ;;  %v633_v4 = vld [vmem:[%s922_s1 + $0x38] sm:$0xff]  ;;  %v632_v6 = vld [vmem:[%s922_s1 + $0x30] sm:$0xff]  ;;  %v631_v10 = vld [vmem:[%s922_s1 + $0x28] sm:$0xff] }
   0x4   :  { %v641_v5 = vld [vmem:[%s922_s1 + $0x78] sm:$0xff]  ;;  %174 = vmatpush.bf16.msra.mxu0 %v633_v4  ;;  %v640_v7 = vld [vmem:[%s922_s1 + $0x70] sm:$0xff]  ;;  %v639_v11 = vld [vmem:[%s922_s1 + $0x68] sm:$0xff] }
   0x5   :  { %187 = vmatpush.bf16.msra.mxu1 %v641_v5  ;;  %v35_v12 = vld [vmem:[%s921_s0] sm:$0x3] }
   0x6   :  { %338 = vmatpush.bf16.msra.mxu2 %v648_v2  ;;  %v646_v13 = vld [vmem:[%s924_s3 + $0x20] sm:$0xff]  ;;  %73 = vst [vmem:[#allocation1] ss:$9 sm:$0xff] %v35_v12 }
   0x7   :  { %351 = vmatpush.bf16.msra.mxu3 %v656_v3  ;;  %v654_v14 = vld [vmem:[%s924_s3 + $0x60] sm:$0xff] }
   0x8   :  { %175 = vmatpush.bf16.msra.mxu0 %v632_v6  ;;  %v630_v15 = vld [vmem:[%s922_s1 + $0x20] sm:$0xff] }
   0x9   :  { %188 = vmatpush.bf16.msra.mxu1 %v640_v7 }
   0xa   :  { %339 = vmatpush.bf16.msra.mxu2 %v647_v8 }
   0xb   :  { %352 = vmatpush.bf16.msra.mxu3 %v655_v9 }
   0xc   :  { %176 = vmatpush.bf16.msra.mxu0 %v631_v10 }
   0xd   :  { %17 = vsyncpa [#allocation5], 0  ;;  %189 = vmatpush.bf16.msra.mxu1 %v639_v11  ;;  %v638_v16 = vld [vmem:[%s922_s1 + $0x60] sm:$0xff]  ;;  %v645_v17 = vld [vmem:[%s924_s3 + $0x18] sm:$0xff]  ;;  %vm430_vm0 = vcmask 254976   ;;  %vm400_vm1 = vcmask 261120  }
   0xe   :  { %340 = vmatpush.bf16.msra.mxu2 %v646_v13  ;;  %v653_v18 = vld [vmem:[%s924_s3 + $0x58] sm:$0xff]  ;;  %v74_v21 = vld [vmem:[#allocation1] sm:$0xff]  ;;  %v75_v22 = vld [vmem:[#allocation1 + $0x9] sm:$0xff]  ;;  %s721_s17 = smov [#allocation4]   ;;  %s462_s20 = sshll.u32 %s930_s9, 4  ;;  %vm438_vm2 = vcmask 1040384   ;;  %s463_s20 = int_to_ptr.hbm [resolvable:$true] %s462_s20 }
   0xf   :  { %353 = vmatpush.bf16.msra.mxu3 %v654_v14  ;;  %v629_v19 = vld [vmem:[%s922_s1 + $0x18] sm:$0xff]  ;;  %v644_v23 = vld [vmem:[%s924_s3 + $0x10] sm:$0xff]  ;;  %236 = vst [vmem:[#allocation1] ss:$9 sm:$0xff] %v35_v12  ;;  %v643_v27 = vld [vmem:[%s924_s3 + $0x8] sm:$0xff]  ;;  %s460_s18 = sshll.u32 %s721_s17, 4  ;;  %s461_s18 = int_to_ptr.vmem [resolvable:$true] %s460_s18 }
  0x10   :  { %177 = vmatpush.bf16.msra.mxu0 %v630_v15  ;;  %v637_v20 = vld [vmem:[%s922_s1 + $0x58] sm:$0xff]  ;;  %v652_v24 = vld [vmem:[%s924_s3 + $0x50] sm:$0xff]  ;;  %v651_v28 = vld [vmem:[%s924_s3 + $0x48] sm:$0xff] }
  0x11   :  { %190 = vmatpush.bf16.msra.mxu1 %v638_v16  ;;  %v628_v25 = vld [vmem:[%s922_s1 + $0x10] sm:$0xff]  ;;  %v627_v29 = vld [vmem:[%s922_s1 + $0x8] sm:$0xff]  ;;  %v642_v31 = vld [vmem:[%s924_s3] sm:$0xff] }
  0x12   :  { %341 = vmatpush.bf16.msra.mxu2 %v645_v17  ;;  %v636_v26 = vld [vmem:[%s922_s1 + $0x50] sm:$0xff]  ;;  %v635_v30 = vld [vmem:[%s922_s1 + $0x48] sm:$0xff]  ;;  %v650_v32 = vld [vmem:[%s924_s3 + $0x40] sm:$0xff]  ;;  %s451_s3 = sshll.u32 %s929_s8, 4  ;;  %s452_s3 = int_to_ptr.hbm [resolvable:$true] %s451_s3 }
  0x13   :  { %354 = vmatpush.bf16.msra.mxu3 %v653_v18  ;;  %v626_v33 = vld [vmem:[%s922_s1] sm:$0xff]  ;;  %v618_v37 = vld [vmem:[%s926_s5 + $0x10] sm:$0xf]  ;;  %v661_v38 = vld [vmem:[%s926_s5 + $0x14] sm:$0xf0] }
  0x14   :  { %178 = vmatpush.bf16.msra.mxu0 %v629_v19  ;;  %v634_v36 = vld [vmem:[%s922_s1 + $0x40] sm:$0xff]  ;;  %v619_v39 = vor.u32 %v661_v38, %v618_v37  ;;  %v660_v40 = vld [vmem:[%s926_s5 + $0x14] sm:$0xf]  ;;  %v620_v41 = vld [vmem:[%s926_s5 + $0x18] sm:$0xf0] }
  0x15   :  { %191 = vmatpush.bf16.msra.mxu1 %v637_v20  ;;  %v623_v42 = vor.u32 %v660_v40, %v620_v41  ;;  %v610_v43 = vld [vmem:[%s926_s5] sm:$0xf]  ;;  %v659_v44 = vld [vmem:[%s926_s5 + $0x4] sm:$0xf0]  ;;  %v658_v45 = vld [vmem:[%s926_s5 + $0x4] sm:$0xf] }
  0x16   :  { %342 = vmatpush.bf16.msra.mxu2 %v644_v23  ;;  %v237_v34 = vld [vmem:[#allocation1] sm:$0xff]  ;;  %v238_v35 = vld [vmem:[#allocation1 + $0x9] sm:$0xff]  ;;  %v611_v46 = vor.u32 %v659_v44, %v610_v43 }
  0x17   :  { %355 = vmatpush.bf16.msra.mxu3 %v652_v24  ;;  %v612_v47 = vld [vmem:[%s926_s5 + $0x8] sm:$0xf0]  ;;  %v665_v49 = vld [vmem:[%s923_s2] ss:$0 sm:$0xff] }
  0x18   :  { %179 = vmatpush.bf16.msra.mxu0 %v628_v25  ;;  %v615_v48 = vor.u32 %v658_v45, %v612_v47  ;;  %v664_v51 = vld [vmem:[%s925_s4] ss:$0 sm:$0xff]  ;;  %s720_s4 = smov [#allocation2]  }
  0x19   :  { %192 = vmatpush.bf16.msra.mxu1 %v636_v26  ;;  %v366_v1 = vld [vmem:[%s928_s7] sm:$0x3]  ;;  %s449_s14 = sshll.u32 %s720_s4, 4  ;;  %s450_s14 = int_to_ptr.vmem [resolvable:$true] %s449_s14 }
  0x1a   :  { %343 = vmatpush.bf16.msra.mxu2 %v643_v27  ;;  %v374_v6 = vld [vmem:[%s927_s6] sm:$0x3] }
  0x1b   :  { %356 = vmatpush.bf16.msra.mxu3 %v651_v28  ;;  %v376_v7 = vperm.slane %v374_v6, 0  ;;  %v377_v8 = vperm.slane %v374_v6, 1 }
  0x1c   :  { %180 = vmatpush.bf16.msra.mxu0 %v627_v29 }
  0x1d   :  { %193 = vmatpush.bf16.msra.mxu1 %v635_v30 }
  0x1e   :  { %344 = vmatpush.bf16.msra.mxu2 %v642_v31 }
  0x1f   :  { %357 = vmatpush.bf16.msra.mxu3 %v650_v32 }
  0x20   :  { %181 = vmatpush.bf16.msra.mxu0 %v626_v33 }
  0x21   :  { %345 = vmatmul.bf16.vlgmr.msra.gmra.mxu2 %v237_v34  ;;  %194 = vmatpush.bf16.msra.mxu1 %v634_v36 }
  0x22   :  { %358 = vmatmul.bf16.vlgmr.msra.gmra.mxu3 %v238_v35 }
  0x23   :  { %182 = vmatmul.bf16.vlgmr.msra.gmra.mxu0 %v74_v21 }
  0x24   :  { %195 = vmatmul.bf16.vlgmr.msra.gmra.mxu1 %v75_v22  ;;  %410 = vmatpush.bf16.msrb.mxu0 %v619_v39 }
  0x25   :  { %423 = vmatpush.bf16.msrb.mxu1 %v623_v42 }
  0x28   :  { %411 = vmatpush.bf16.msrb.mxu0 %v611_v46 }
  0x29   :  { %424 = vmatpush.bf16.msrb.mxu1 %v615_v48 }
  0xa0   :  { %v183_v50 = vpop.f32.mrf.mxu0 }
  0xa1   :  { %v184_v52 = vadd.f32 %v665_v49, %v183_v50  ;;  %v196_v53 = vpop.f32.mrf.mxu1 }
  0xa3   :  { %v197_v54 = vadd.f32 %v196_v53, %v184_v52 }
  0xa4   :  { %v346_v55 = vpop.f32.mrf.mxu2 }
  0xa5   :  { %v359_v56 = vpop.f32.mrf.mxu3  ;;  %v347_v57 = vadd.f32 %v664_v51, %v346_v55  ;;  %431 = vst.msk [vmem:[#allocation2] sm:$0x3] %vm430_vm0, %v197_v54 }
  0xa6   :  { %454 = dma.vmem_to_hbm [thread:$0]  %s450_s14, 32, %s452_s3, [#allocation3]  }
  0xa7   :  { %v360_v58 = vadd.f32 %v359_v56, %v347_v57 }
  0xa8   :  { %v185_v59 = vpop.f32.mrf.mxu0 }
  0xa9   :  { %v363_v60 = vmul.f32 0.5, %v360_v58  ;;  %432 = vst.msk [vmem:[#allocation4] sm:$0x3] %vm430_vm0, %v360_v58  ;;  %v198_v61 = vpop.f32.mrf.mxu1 }
  0xaa   :  { %465 = dma.vmem_to_hbm [thread:$0]  %s461_s18, 32, %s463_s20, [#allocation5]  }
  0xab   :  { %v364_v62 = vmul.f32 1.442695, %v363_v60 }
  0xac   :  { %v348_v63 = vpop.f32.mrf.mxu2 }
  0xad   :  { %v361_v0 = vpop.f32.mrf.mxu3  ;;  %666 = vpow2.f32 %v364_v62 }
  0xb3   :  { %v667_v2 = vpop.eup %666 }
  0xb4   :  { %v367_v3 = vmul.f32 %v667_v2, %v366_v1 }
  0xb6   :  { %v368_v4 = vadd.f32 %v367_v3, %v197_v54 }
  0xb8   :  { %v369_v5 = vpack.c.bf16 %v368_v4, %v368_v4 }
  0xba   :  { %624 = vmatmul.msk.bf16.vlgmr.msrb.gmra.mxu0 %vm400_vm1, %v369_v5  ;;  %625 = vmatmul.msk.bf16.vlgmr.msrb.gmra.mxu1 %vm400_vm1, %v369_v5 }
 0x137   :  { %v413_v9 = vpop.f32.mrf.mxu0  ;;  %v426_v10 = vpop.f32.mrf.mxu1 }
 0x138   :  { %v414_v11 = vadd.f32 %v413_v9, %v376_v7  ;;  %v427_v12 = vadd.f32 %v426_v10, %v377_v8 }
 0x13a   :  { %v433_v13 = vmax.f32 %v414_v11, 0.0  ;;  %v434_v14 = vmax.f32 %v427_v12, 0.0 }
 0x13c   :  { %v435_v15 = vpack.c.bf16 %v434_v14, %v433_v13 }
 0x13e   :  { %v437_v16 = vrot.slane %v435_v15, 3 }
 0x13f   :  { %v415_v17 = vpop.f32.mrf.mxu0  ;;  %v428_v18 = vpop.f32.mrf.mxu1 }
 0x140   :  { %v441_v19 = vsel %vm438_vm2, %v435_v15, %v437_v16 }
 0x141   :  { %443 = vst [vmem:[%s931_s10] sm:$0x3] %v441_v19 }
 0x142   :  { %716 = dma.done.wait [#allocation3], 32  }
 0x143   :  { %717 = vsyncadd [#allocation3], 4294967264 }
 0x144   :  { %718 = dma.done.wait [#allocation5], 32  }
 0x145   :  { %719 = vsyncadd [#allocation5], 4294967264 }
 0x146   :  { %478 = vsyncpa [#allocation3], 1 }
 0x147   :  { %479 = vsyncpa [#allocation5], 1 }

// kernel: beta_vae_forward.14
= control target key start
LH: loop header
LB: loop body
LE: loop exit
PB: predicated region body
PF: predicated region fallthrough
CT: control target
= control target key end

     0   :  { %v1065_v2 = vmov 0   ;;  %vm768_vm0 = vcmask 142336   ;;  %s1592_s1 = inlined_call_operand.vmem [shape: bf16[256,18], index: 1, kind: input, shape index: {}]   ;;  %s1593_s2 = inlined_call_operand.vmem [shape: f32[256,1], index: 2, kind: input, shape index: {}]   ;;  %s1594_s0 = inlined_call_operand.vmem [shape: bf16[256,256], index: 0, kind: input, shape index: {}]   ;;  %s1595_s3 = inlined_call_operand.vmem [shape: bf16[256,18], index: 3, kind: output, shape index: {}]  }
   0x1   :  { %v1036_v0 = vld [vmem:[%s1592_s1 + $0x38] sm:$0xff]  ;;  %1063 = vset.pattern.permute.xlu1 %v1065_v2  ;;  %1062 = vset.pattern.permute.xlu0 %v1065_v2  ;;  %v80_v3 = vld [vmem:[%s1593_s2 + $0x10] sm:$0xff]  ;;  %v78_v4 = vld [vmem:[%s1593_s2] sm:$0xff] }
   0x2   :  { %v1044_v1 = vld [vmem:[%s1592_s1 + $0x78] sm:$0xff]  ;;  %1064 = vset.pattern.permute.xlu2 %v1065_v2  ;;  %526 = vmatpush.bf16.msra.mxu0 %v1036_v0  ;;  %v1035_v5 = vld [vmem:[%s1592_s1 + $0x30] sm:$0xff]  ;;  %v1034_v7 = vld [vmem:[%s1592_s1 + $0x28] sm:$0xff] }
   0x3   :  { %1045 = vmatpush.bf16.msra.mxu2 %v1036_v0  ;;  %615 = vmatpush.bf16.msra.mxu1 %v1044_v1  ;;  %v1043_v6 = vld [vmem:[%s1592_s1 + $0x70] sm:$0xff]  ;;  %v1042_v8 = vld [vmem:[%s1592_s1 + $0x68] sm:$0xff]  ;;  %v81_v9 = vld [vmem:[%s1593_s2 + $0x18] sm:$0xff] }
   0x4   :  { %1053 = vmatpush.bf16.msra.mxu3 %v1044_v1  ;;  %122 = vperm.xlu1 %1063, %v80_v3   ;;  %v79_v10 = vld [vmem:[%s1593_s2 + $0x8] sm:$0xff]  ;;  %v1033_v11 = vld [vmem:[%s1592_s1 + $0x20] sm:$0xff]  ;;  %v1032_v14 = vld [vmem:[%s1592_s1 + $0x18] sm:$0xff] }
   0x5   :  { %112 = vperm.xlu0 %1062, %v78_v4   ;;  %v82_v12 = vld [vmem:[%s1593_s2 + $0x20] sm:$0xff]  ;;  %v1040_v15 = vld [vmem:[%s1592_s1 + $0x58] sm:$0xff]  ;;  %v84_v17 = vld [vmem:[%s1593_s2 + $0x30] sm:$0xff] }
   0x6   :  { %527 = vmatpush.bf16.msra.mxu0 %v1035_v5  ;;  %v1041_v13 = vld [vmem:[%s1592_s1 + $0x60] sm:$0xff]  ;;  %132 = vperm.xlu2 %1064, %v82_v12   ;;  %v85_v16 = vld [vmem:[%s1593_s2 + $0x38] sm:$0xff]  ;;  %v1031_v18 = vld [vmem:[%s1592_s1 + $0x10] sm:$0xff] }
   0x7   :  { %1046 = vmatpush.bf16.msra.mxu2 %v1035_v5  ;;  %616 = vmatpush.bf16.msra.mxu1 %v1043_v6  ;;  %v83_v19 = vld [vmem:[%s1593_s2 + $0x28] sm:$0xff]  ;;  %v1039_v20 = vld [vmem:[%s1592_s1 + $0x50] sm:$0xff]  ;;  %v1029_v23 = vld [vmem:[%s1592_s1] sm:$0xff] }
   0x8   :  { %1054 = vmatpush.bf16.msra.mxu3 %v1043_v6  ;;  %v1030_v21 = vld [vmem:[%s1592_s1 + $0x8] sm:$0xff]  ;;  %v807_v24 = vld [vmem:[%s1594_s0] sm:$0xf]  ;;  %v88_v28 = vld [vmem:[%s1593_s2 + $0x50] sm:$0xff] }
   0x9   :  { %v1038_v22 = vld [vmem:[%s1592_s1 + $0x48] sm:$0xff]  ;;  %v1037_v26 = vld [vmem:[%s1592_s1 + $0x40] sm:$0xff]  ;;  %v89_v42 = vld [vmem:[%s1593_s2 + $0x58] sm:$0xff] }
   0xa   :  { %528 = vmatpush.bf16.msra.mxu0 %v1034_v7  ;;  %v998_v25 = vld [vmem:[%s1594_s0 + $0x4] sm:$0xf0]  ;;  %v871_v27 = vld [vmem:[%s1594_s0 + $0x80] sm:$0xf]  ;;  %v997_v31 = vld [vmem:[%s1594_s0 + $0x4] sm:$0xf] }
   0xb   :  { %1047 = vmatpush.bf16.msra.mxu2 %v1034_v7  ;;  %617 = vmatpush.bf16.msra.mxu1 %v1042_v8  ;;  %v87_v29 = vld [vmem:[%s1593_s2 + $0x48] sm:$0xff]  ;;  %v86_v32 = vld [vmem:[%s1593_s2 + $0x40] sm:$0xff]  ;;  %v808_v36 = vor.u32 %v998_v25, %v807_v24  ;;  %v815_v43 = vld [vmem:[%s1594_s0 + $0x10] sm:$0xf] }
   0xc   :  { %1055 = vmatpush.bf16.msra.mxu3 %v1042_v8  ;;  %127 = vperm.xlu1 %1063, %v81_v9   ;;  %v1014_v30 = vld [vmem:[%s1594_s0 + $0x84] sm:$0xf0]  ;;  %v809_v33 = vld [vmem:[%s1594_s0 + $0x8] sm:$0xf0]  ;;  %v1013_v34 = vld [vmem:[%s1594_s0 + $0x84] sm:$0xf] }
   0xd   :  { %117 = vperm.xlu0 %1062, %v79_v10   ;;  %v873_v35 = vld [vmem:[%s1594_s0 + $0x88] sm:$0xf0]  ;;  %v872_v37 = vor.u32 %v1014_v30, %v871_v27  ;;  %v812_v38 = vor.u32 %v997_v31, %v809_v33  ;;  %v90_v41 = vld [vmem:[%s1593_s2 + $0x60] sm:$0xff]  ;;  %v1000_v44 = vld [vmem:[%s1594_s0 + $0x14] sm:$0xf0] }
   0xe   :  { %529 = vmatpush.bf16.msra.mxu0 %v1033_v11  ;;  %137 = vperm.xlu2 %1064, %v83_v19   ;;  %v876_v39 = vor.u32 %v1013_v34, %v873_v35  ;;  %v91_v40 = vld [vmem:[%s1593_s2 + $0x68] sm:$0xff]  ;;  %v879_v45 = vld [vmem:[%s1594_s0 + $0x90] sm:$0xf]  ;;  %v94_v46 = vld [vmem:[%s1593_s2 + $0x80] sm:$0xff]  ;;  %v816_v54 = vor.u32 %v1000_v44, %v815_v43 }
   0xf   :  { %1048 = vmatpush.bf16.msra.mxu2 %v1033_v11  ;;  %618 = vmatpush.bf16.msra.mxu1 %v1041_v13  ;;  %v93_v47 = vld [vmem:[%s1593_s2 + $0x78] sm:$0xff]  ;;  %v999_v49 = vld [vmem:[%s1594_s0 + $0x14] sm:$0xf]  ;;  %v95_v60 = vld [vmem:[%s1593_s2 + $0x88] sm:$0xff] }
  0x10   :  { %1056 = vmatpush.bf16.msra.mxu3 %v1041_v13  ;;  %v1016_v48 = vld [vmem:[%s1594_s0 + $0x94] sm:$0xf0]  ;;  %v92_v50 = vld [vmem:[%s1593_s2 + $0x70] sm:$0xff]  ;;  %v817_v51 = vld [vmem:[%s1594_s0 + $0x18] sm:$0xf0] }
  0x11   :  { %v1015_v52 = vld [vmem:[%s1594_s0 + $0x94] sm:$0xf]  ;;  %v881_v53 = vld [vmem:[%s1594_s0 + $0x98] sm:$0xf0]  ;;  %v880_v55 = vor.u32 %v1016_v48, %v879_v45  ;;  %v820_v56 = vor.u32 %v999_v49, %v817_v51  ;;  %v823_v61 = vld [vmem:[%s1594_s0 + $0x20] sm:$0xf] }
  0x12   :  { %530 = vmatpush.bf16.msra.mxu0 %v1032_v14  ;;  %v884_v57 = vor.u32 %v1015_v52, %v881_v53  ;;  %v97_v58 = vld [vmem:[%s1593_s2 + $0x98] sm:$0xff]  ;;  %v96_v59 = vld [vmem:[%s1593_s2 + $0x90] sm:$0xff]  ;;  %v1002_v62 = vld [vmem:[%s1594_s0 + $0x24] sm:$0xf0] }
  0x13   :  { %1049 = vmatpush.bf16.msra.mxu2 %v1032_v14  ;;  %619 = vmatpush.bf16.msra.mxu1 %v1040_v15  ;;  %v100_v63 = vld [vmem:[%s1593_s2 + $0xb0] sm:$0xff]  ;;  %v99_v0 = vld [vmem:[%s1593_s2 + $0xa8] sm:$0xff]  ;;  %v887_v1 = vld [vmem:[%s1594_s0 + $0xa0] sm:$0xf]  ;;  %v824_v7 = vor.u32 %v1002_v62, %v823_v61 }
  0x14   :  { %1057 = vmatpush.bf16.msra.mxu3 %v1040_v15  ;;  %147 = vperm.xlu1 %1063, %v85_v16   ;;  %v1018_v2 = vld [vmem:[%s1594_s0 + $0xa4] sm:$0xf0]  ;;  %v1001_v3 = vld [vmem:[%s1594_s0 + $0x24] sm:$0xf]  ;;  %v825_v4 = vld [vmem:[%s1594_s0 + $0x28] sm:$0xf0] }
  0x15   :  { %142 = vperm.xlu0 %1062, %v84_v17   ;;  %v1017_v5 = vld [vmem:[%s1594_s0 + $0xa4] sm:$0xf]  ;;  %v889_v6 = vld [vmem:[%s1594_s0 + $0xa8] sm:$0xf0]  ;;  %v888_v8 = vor.u32 %v1018_v2, %v887_v1  ;;  %v828_v9 = vor.u32 %v1001_v3, %v825_v4  ;;  %v831_v14 = vld [vmem:[%s1594_s0 + $0x30] sm:$0xf] }
  0x16   :  { %531 = vmatpush.bf16.msra.mxu0 %v1031_v18  ;;  %152 = vperm.xlu2 %1064, %v86_v32   ;;  %v892_v10 = vor.u32 %v1017_v5, %v889_v6  ;;  %v103_v11 = vld [vmem:[%s1593_s2 + $0xc8] sm:$0xff]  ;;  %v102_v12 = vld [vmem:[%s1593_s2 + $0xc0] sm:$0xff]  ;;  %v101_v15 = vld [vmem:[%s1593_s2 + $0xb8] sm:$0xff] }
  0x17   :  { %1050 = vmatpush.bf16.msra.mxu2 %v1031_v18  ;;  %620 = vmatpush.bf16.msra.mxu1 %v1039_v20  ;;  %v98_v13 = vld [vmem:[%s1593_s2 + $0xa0] sm:$0xff]  ;;  %v1004_v16 = vld [vmem:[%s1594_s0 + $0x34] sm:$0xf0]  ;;  %v895_v19 = vld [vmem:[%s1594_s0 + $0xb0] sm:$0xf] }
  0x18   :  { %1058 = vmatpush.bf16.msra.mxu3 %v1039_v20  ;;  %v106_v17 = vld [vmem:[%s1593_s2 + $0xe0] sm:$0xff]  ;;  %v105_v18 = vld [vmem:[%s1593_s2 + $0xd8] sm:$0xff]  ;;  %v832_v25 = vor.u32 %v1004_v16, %v831_v14  ;;  %v108_v30 = vld [vmem:[%s1593_s2 + $0xf0] sm:$0xff] }
  0x19   :  { %v1020_v20 = vld [vmem:[%s1594_s0 + $0xb4] sm:$0xf0]  ;;  %v897_v24 = vld [vmem:[%s1594_s0 + $0xb8] sm:$0xf0]  ;;  %v104_v31 = vld [vmem:[%s1593_s2 + $0xd0] sm:$0xff] }
  0x1a   :  { %532 = vmatpush.bf16.msra.mxu0 %v1030_v21  ;;  %v107_v32 = vld [vmem:[%s1593_s2 + $0xe8] sm:$0xff]  ;;  %v839_v33 = vld [vmem:[%s1594_s0 + $0x40] sm:$0xf]  ;;  %v847_v45 = vld [vmem:[%s1594_s0 + $0x50] sm:$0xf] }
  0x1b   :  { %1051 = vmatpush.bf16.msra.mxu2 %v1030_v21  ;;  %621 = vmatpush.bf16.msra.mxu1 %v1038_v22  ;;  %v1003_v21 = vld [vmem:[%s1594_s0 + $0x34] sm:$0xf]  ;;  %v1006_v34 = vld [vmem:[%s1594_s0 + $0x44] sm:$0xf0]  ;;  %v903_v35 = vld [vmem:[%s1594_s0 + $0xc0] sm:$0xf] }
  0x1c   :  { %1059 = vmatpush.bf16.msra.mxu3 %v1038_v22  ;;  %162 = vperm.xlu1 %1063, %v88_v28   ;;  %v833_v22 = vld [vmem:[%s1594_s0 + $0x38] sm:$0xf0]  ;;  %v1024_v48 = vld [vmem:[%s1594_s0 + $0xd4] sm:$0xf0]  ;;  %v1007_v49 = vld [vmem:[%s1594_s0 + $0x54] sm:$0xf] }
  0x1d   :  { %157 = vperm.xlu0 %1062, %v87_v29   ;;  %v836_v27 = vor.u32 %v1003_v21, %v833_v22  ;;  %v109_v29 = vld [vmem:[%s1593_s2 + $0xf8] sm:$0xff]  ;;  %v1023_v51 = vld [vmem:[%s1594_s0 + $0xd4] sm:$0xf]  ;;  %v1010_v61 = vld [vmem:[%s1594_s0 + $0x64] sm:$0xf0] }
  0x1e   :  { %533 = vmatpush.bf16.msra.mxu0 %v1029_v23  ;;  %167 = vperm.xlu2 %1064, %v89_v42   ;;  %v913_v52 = vld [vmem:[%s1594_s0 + $0xd8] sm:$0xf0]  ;;  %v919_v62 = vld [vmem:[%s1594_s0 + $0xe0] sm:$0xf]  ;;  %v857_v1 = vld [vmem:[%s1594_s0 + $0x68] sm:$0xf0] }
  0x1f   :  { %1052 = vmatpush.bf16.msra.mxu2 %v1029_v23  ;;  %622 = vmatpush.bf16.msra.mxu1 %v1037_v26  ;;  %v1019_v23 = vld [vmem:[%s1594_s0 + $0xb4] sm:$0xf]  ;;  %v1025_v2 = vld [vmem:[%s1594_s0 + $0xe4] sm:$0xf]  ;;  %v921_v3 = vld [vmem:[%s1594_s0 + $0xe8] sm:$0xf0] }
  0x20   :  { %1060 = vmatpush.bf16.msra.mxu3 %v1037_v26  ;;  %v896_v26 = vor.u32 %v1020_v20, %v895_v19  ;;  %v900_v28 = vor.u32 %v1019_v23, %v897_v24  ;;  %v927_v14 = vld [vmem:[%s1594_s0 + $0xf0] sm:$0xf]  ;;  %v1011_v16 = vld [vmem:[%s1594_s0 + $0x74] sm:$0xf]  ;;  %v929_v19 = vld [vmem:[%s1594_s0 + $0xf8] sm:$0xf0] }
  0x21   :  { %534 = vmatmul.bf16.vlgmr.msra.gmra.mxu0 %v808_v36  ;;  %v1022_v36 = vld [vmem:[%s1594_s0 + $0xc4] sm:$0xf0] }
  0x22   :  { %574 = vmatmul.bf16.vlgmr.msra.gmra.mxu2 %v872_v37  ;;  %623 = vmatmul.bf16.vlgmr.msra.gmra.mxu1 %v812_v38  ;;  %v1005_v37 = vld [vmem:[%s1594_s0 + $0x44] sm:$0xf]  ;;  %v841_v38 = vld [vmem:[%s1594_s0 + $0x48] sm:$0xf0]  ;;  %v904_v42 = vor.u32 %v1022_v36, %v903_v35 }
  0x23   :  { %663 = vmatmul.bf16.vlgmr.msra.gmra.mxu3 %v876_v39  ;;  %v1021_v39 = vld [vmem:[%s1594_s0 + $0xc4] sm:$0xf]  ;;  %v844_v43 = vor.u32 %v1005_v37, %v841_v38 }
  0x24   :  { %177 = vperm.xlu1 %1063, %v91_v40   ;;  %v905_v40 = vld [vmem:[%s1594_s0 + $0xc8] sm:$0xf0] }
  0x25   :  { %172 = vperm.xlu0 %1062, %v90_v41   ;;  %v840_v41 = vor.u32 %v1006_v34, %v839_v33  ;;  %v908_v44 = vor.u32 %v1021_v39, %v905_v40 }
  0x26   :  { %182 = vperm.xlu2 %1064, %v92_v50   ;;  %v849_v50 = vld [vmem:[%s1594_s0 + $0x58] sm:$0xf0] }
  0x2c   :  { %192 = vperm.xlu1 %1063, %v94_v46   ;;  %v1008_v46 = vld [vmem:[%s1594_s0 + $0x54] sm:$0xf0] }
  0x2d   :  { %187 = vperm.xlu0 %1062, %v93_v47   ;;  %v911_v47 = vld [vmem:[%s1594_s0 + $0xd0] sm:$0xf]  ;;  %v848_v53 = vor.u32 %v1008_v46, %v847_v45 }
  0x2e   :  { %197 = vperm.xlu2 %1064, %v95_v60   ;;  %v855_v60 = vld [vmem:[%s1594_s0 + $0x60] sm:$0xf] }
  0x2f   :  { %v856_v4 = vor.u32 %v1010_v61, %v855_v60 }
  0x31   :  { %539 = vmatmul.bf16.gmra.mxu0 %v816_v54  ;;  %v912_v54 = vor.u32 %v1024_v48, %v911_v47 }
  0x32   :  { %579 = vmatmul.bf16.gmra.mxu2 %v880_v55  ;;  %628 = vmatmul.bf16.gmra.mxu1 %v820_v56  ;;  %v852_v55 = vor.u32 %v1007_v49, %v849_v50  ;;  %v916_v56 = vor.u32 %v1023_v51, %v913_v52 }
  0x33   :  { %668 = vmatmul.bf16.gmra.mxu3 %v884_v57 }
  0x34   :  { %207 = vperm.xlu1 %1063, %v97_v58  }
  0x35   :  { %202 = vperm.xlu0 %1062, %v96_v59  }
  0x36   :  { %212 = vperm.xlu2 %1064, %v98_v13   ;;  %v1012_v13 = vld [vmem:[%s1594_s0 + $0x74] sm:$0xf0] }
  0x3c   :  { %222 = vperm.xlu1 %1063, %v100_v63   ;;  %v1026_v63 = vld [vmem:[%s1594_s0 + $0xe4] sm:$0xf0] }
  0x3d   :  { %217 = vperm.xlu0 %1062, %v99_v0   ;;  %v1009_v0 = vld [vmem:[%s1594_s0 + $0x64] sm:$0xf]  ;;  %v920_v5 = vor.u32 %v1026_v63, %v919_v62 }
  0x3e   :  { %227 = vperm.xlu2 %1064, %v101_v15   ;;  %v860_v6 = vor.u32 %v1009_v0, %v857_v1  ;;  %v1028_v15 = vld [vmem:[%s1594_s0 + $0xf4] sm:$0xf0] }
  0x3f   :  { %v928_v23 = vor.u32 %v1028_v15, %v927_v14 }
  0x41   :  { %544 = vmatmul.bf16.gmra.mxu0 %v824_v7  ;;  %v924_v7 = vor.u32 %v1025_v2, %v921_v3 }
  0x42   :  { %584 = vmatmul.bf16.gmra.mxu2 %v888_v8  ;;  %633 = vmatmul.bf16.gmra.mxu1 %v828_v9 }
  0x43   :  { %673 = vmatmul.bf16.gmra.mxu3 %v892_v10 }
  0x44   :  { %237 = vperm.xlu1 %1063, %v103_v11  }
  0x45   :  { %232 = vperm.xlu0 %1062, %v102_v12   ;;  %v863_v12 = vld [vmem:[%s1594_s0 + $0x70] sm:$0xf] }
  0x46   :  { %242 = vperm.xlu2 %1064, %v104_v31   ;;  %v864_v22 = vor.u32 %v1012_v13, %v863_v12 }
  0x4c   :  { %252 = vperm.xlu1 %1063, %v106_v17   ;;  %v865_v17 = vld [vmem:[%s1594_s0 + $0x78] sm:$0xf0] }
  0x4d   :  { %247 = vperm.xlu0 %1062, %v105_v18   ;;  %v1027_v18 = vld [vmem:[%s1594_s0 + $0xf4] sm:$0xf]  ;;  %v868_v24 = vor.u32 %v1011_v16, %v865_v17 }
  0x4e   :  { %257 = vperm.xlu2 %1064, %v107_v32  }
  0x51   :  { %549 = vmatmul.bf16.gmra.mxu0 %v832_v25  ;;  %v932_v25 = vor.u32 %v1027_v18, %v929_v19 }
  0x52   :  { %589 = vmatmul.bf16.gmra.mxu2 %v896_v26  ;;  %638 = vmatmul.bf16.gmra.mxu1 %v836_v27 }
  0x53   :  { %678 = vmatmul.bf16.gmra.mxu3 %v900_v28 }
  0x54   :  { %267 = vperm.xlu1 %1063, %v109_v29  }
  0x55   :  { %262 = vperm.xlu0 %1062, %v108_v30  }
  0x60   :  { %v1376_v59 = vpop.permute.xlu2 %132 }
  0x61   :  { %554 = vmatmul.bf16.gmra.mxu0 %v840_v41 }
  0x62   :  { %594 = vmatmul.bf16.gmra.mxu2 %v904_v42  ;;  %643 = vmatmul.bf16.gmra.mxu1 %v844_v43 }
  0x63   :  { %683 = vmatmul.bf16.gmra.mxu3 %v908_v44 }
  0x68   :  { %v1404_v10 = vpop.permute.xlu2 %137 }
  0x70   :  { %v1434_v21 = vpop.permute.xlu2 %152 }
  0x71   :  { %559 = vmatmul.bf16.gmra.mxu0 %v848_v53 }
  0x72   :  { %599 = vmatmul.bf16.gmra.mxu2 %v912_v54  ;;  %648 = vmatmul.bf16.gmra.mxu1 %v852_v55 }
  0x73   :  { %688 = vmatmul.bf16.gmra.mxu3 %v916_v56 }
  0x76   :  { %v1374_v57 = vpop.permute.xlu1 %122 }
  0x77   :  { %v113_v58 = vpop.permute.xlu0 %112 }
  0x78   :  { %v1440_v28 = vpop.permute.xlu2 %167 }
  0x7e   :  { %v1402_v8 = vpop.permute.xlu1 %127 }
  0x7f   :  { %v118_v9 = vpop.permute.xlu0 %117 }
  0x80   :  { %v1446_v34 = vpop.permute.xlu2 %182 }
  0x81   :  { %564 = vmatmul.bf16.gmra.mxu0 %v856_v4 }
  0x82   :  { %604 = vmatmul.bf16.gmra.mxu2 %v920_v5  ;;  %653 = vmatmul.bf16.gmra.mxu1 %v860_v6 }
  0x83   :  { %693 = vmatmul.bf16.gmra.mxu3 %v924_v7 }
  0x86   :  { %v1406_v11 = vpop.permute.xlu1 %147 }
  0x87   :  { %v1432_v20 = vpop.permute.xlu0 %142 }
  0x88   :  { %v198_v49 = vpop.permute.xlu2 %197 }
  0x8e   :  { %v1436_v26 = vpop.permute.xlu1 %162 }
  0x8f   :  { %v1438_v27 = vpop.permute.xlu0 %157 }
  0x91   :  { %569 = vmatmul.bf16.gmra.mxu0 %v864_v22 }
  0x92   :  { %609 = vmatmul.bf16.gmra.mxu2 %v928_v23  ;;  %658 = vmatmul.bf16.gmra.mxu1 %v868_v24 }
  0x93   :  { %698 = vmatmul.bf16.gmra.mxu3 %v932_v25 }
  0x96   :  { %v1442_v29 = vpop.permute.xlu1 %177 }
  0x97   :  { %v1444_v33 = vpop.permute.xlu0 %172 }
  0x9e   :  { %v535_v30 = vpop.f32.mrf.mxu0  ;;  %v193_v36 = vpop.permute.xlu1 %192 }
  0x9f   :  { %v536_v31 = vadd.f32 %v535_v30, %v113_v58  ;;  %v624_v32 = vpop.f32.mrf.mxu1  ;;  %v1452_v48 = vpop.permute.xlu0 %187 }
  0xa1   :  { %v625_v35 = vadd.f32 %v624_v32, %v536_v31 }
  0xa3   :  { %v704_v37 = vmax.f32 %v625_v35, 0.0 }
  0xa5   :  { %v575_v38 = vpop.f32.mrf.mxu2  ;;  %v736_v39 = vpack.c.bf16 %v704_v37, %v704_v37  ;;  %v213_v37 = vpop.permute.xlu2 %212 }
  0xa6   :  { %v576_v40 = vadd.f32 %v575_v38, %v193_v36  ;;  %v664_v41 = vpop.f32.mrf.mxu3  ;;  %v537_v42 = vpop.f32.mrf.mxu0 }
  0xa7   :  { %769 = vst.msk [vmem:[%s1595_s3] sm:$0xf] %vm768_vm0, %v736_v39  ;;  %v538_v44 = vadd.f32 %v537_v42, %v118_v9  ;;  %v626_v45 = vpop.f32.mrf.mxu1  ;;  %v203_v2 = vpop.permute.xlu0 %202 }
  0xa8   :  { %v665_v43 = vadd.f32 %v664_v41, %v576_v40  ;;  %v208_v17 = vpop.permute.xlu1 %207 }
  0xa9   :  { %v627_v47 = vadd.f32 %v626_v45, %v538_v44 }
  0xaa   :  { %v720_v46 = vmax.f32 %v665_v43, 0.0 }
  0xab   :  { %v705_v51 = vmax.f32 %v627_v47, 0.0 }
  0xac   :  { %v752_v50 = vpack.c.bf16 %v720_v46, %v720_v46 }
  0xad   :  { %v577_v52 = vpop.f32.mrf.mxu2  ;;  %v737_v53 = vpack.c.bf16 %v705_v51, %v705_v51 }
  0xae   :  { %785 = vst.msk [vmem:[%s1595_s3 + $0x40] sm:$0xf] %vm768_vm0, %v752_v50  ;;  %v578_v54 = vadd.f32 %v577_v52, %v198_v49  ;;  %v666_v55 = vpop.f32.mrf.mxu3  ;;  %v540_v56 = vpop.f32.mrf.mxu0 }
  0xaf   :  { %770 = vst.msk [vmem:[%s1595_s3 + $0x4] sm:$0xf] %vm768_vm0, %v737_v53  ;;  %v541_v60 = vadd.f32 %v540_v56, %v1374_v57  ;;  %v629_v61 = vpop.f32.mrf.mxu1  ;;  %v218_v50 = vpop.permute.xlu0 %217 }
  0xb0   :  { %v667_v58 = vadd.f32 %v666_v55, %v578_v54 }
  0xb1   :  { %v630_v63 = vadd.f32 %v629_v61, %v541_v60 }
  0xb2   :  { %v721_v62 = vmax.f32 %v667_v58, 0.0 }
  0xb3   :  { %v706_v1 = vmax.f32 %v630_v63, 0.0 }
  0xb4   :  { %v753_v0 = vpack.c.bf16 %v721_v62, %v721_v62 }
  0xb5   :  { %v580_v3 = vpop.f32.mrf.mxu2  ;;  %v738_v4 = vpack.c.bf16 %v706_v1, %v706_v1 }
  0xb6   :  { %786 = vst.msk [vmem:[%s1595_s3 + $0x44] sm:$0xf] %vm768_vm0, %v753_v0  ;;  %v581_v5 = vadd.f32 %v580_v3, %v203_v2  ;;  %v669_v6 = vpop.f32.mrf.mxu3  ;;  %v542_v7 = vpop.f32.mrf.mxu0 }
  0xb7   :  { %771 = vst.msk [vmem:[%s1595_s3 + $0x8] sm:$0xf] %vm768_vm0, %v738_v4  ;;  %v543_v9 = vadd.f32 %v542_v7, %v1402_v8  ;;  %v631_v12 = vpop.f32.mrf.mxu1  ;;  %v223_v0 = vpop.permute.xlu1 %222 }
  0xb8   :  { %v670_v57 = vadd.f32 %v669_v6, %v581_v5 }
  0xb9   :  { %v632_v14 = vadd.f32 %v631_v12, %v543_v9 }
  0xba   :  { %v722_v13 = vmax.f32 %v670_v57, 0.0 }
  0xbb   :  { %v707_v16 = vmax.f32 %v632_v14, 0.0  ;;  %v228_v14 = vpop.permute.xlu2 %227 }
  0xbc   :  { %v754_v15 = vpack.c.bf16 %v722_v13, %v722_v13 }
  0xbd   :  { %v582_v18 = vpop.f32.mrf.mxu2  ;;  %v739_v19 = vpack.c.bf16 %v707_v16, %v707_v16 }
  0xbe   :  { %787 = vst.msk [vmem:[%s1595_s3 + $0x48] sm:$0xf] %vm768_vm0, %v754_v15  ;;  %v583_v22 = vadd.f32 %v582_v18, %v208_v17  ;;  %v671_v23 = vpop.f32.mrf.mxu3  ;;  %v545_v24 = vpop.f32.mrf.mxu0 }
  0xbf   :  { %772 = vst.msk [vmem:[%s1595_s3 + $0xc] sm:$0xf] %vm768_vm0, %v739_v19  ;;  %v546_v25 = vadd.f32 %v545_v24, %v1376_v59  ;;  %v634_v30 = vpop.f32.mrf.mxu1 }
  0xc0   :  { %v672_v8 = vadd.f32 %v671_v23, %v583_v22 }
  0xc1   :  { %v635_v32 = vadd.f32 %v634_v30, %v546_v25 }
  0xc2   :  { %v723_v31 = vmax.f32 %v672_v8, 0.0 }
  0xc3   :  { %v708_v36 = vmax.f32 %v635_v32, 0.0 }
  0xc4   :  { %v755_v35 = vpack.c.bf16 %v723_v31, %v723_v31  ;;  %v233_v31 = vpop.permute.xlu0 %232 }
  0xc5   :  { %v585_v38 = vpop.f32.mrf.mxu2  ;;  %v740_v39 = vpack.c.bf16 %v708_v36, %v708_v36 }
  0xc6   :  { %788 = vst.msk [vmem:[%s1595_s3 + $0x4c] sm:$0xf] %vm768_vm0, %v755_v35  ;;  %v586_v40 = vadd.f32 %v585_v38, %v213_v37  ;;  %v674_v41 = vpop.f32.mrf.mxu3  ;;  %v547_v42 = vpop.f32.mrf.mxu0 }
  0xc7   :  { %773 = vst.msk [vmem:[%s1595_s3 + $0x10] sm:$0xf] %vm768_vm0, %v740_v39  ;;  %v548_v43 = vadd.f32 %v547_v42, %v1404_v10  ;;  %v636_v44 = vpop.f32.mrf.mxu1 }
  0xc8   :  { %v675_v59 = vadd.f32 %v674_v41, %v586_v40 }
  0xc9   :  { %v637_v46 = vadd.f32 %v636_v44, %v548_v43  ;;  %v238_v44 = vpop.permute.xlu1 %237 }
  0xca   :  { %v724_v45 = vmax.f32 %v675_v59, 0.0 }
  0xcb   :  { %v709_v49 = vmax.f32 %v637_v46, 0.0 }
  0xcc   :  { %v756_v47 = vpack.c.bf16 %v724_v45, %v724_v45 }
  0xcd   :  { %v587_v51 = vpop.f32.mrf.mxu2  ;;  %v741_v52 = vpack.c.bf16 %v709_v49, %v709_v49 }
  0xce   :  { %789 = vst.msk [vmem:[%s1595_s3 + $0x50] sm:$0xf] %vm768_vm0, %v756_v47  ;;  %v588_v53 = vadd.f32 %v587_v51, %v218_v50  ;;  %v676_v54 = vpop.f32.mrf.mxu3  ;;  %v550_v55 = vpop.f32.mrf.mxu0 }
  0xcf   :  { %774 = vst.msk [vmem:[%s1595_s3 + $0x14] sm:$0xf] %vm768_vm0, %v741_v52  ;;  %v551_v56 = vadd.f32 %v550_v55, %v1432_v20  ;;  %v639_v58 = vpop.f32.mrf.mxu1 }
  0xd0   :  { %v677_v10 = vadd.f32 %v676_v54, %v588_v53 }
  0xd1   :  { %v640_v61 = vadd.f32 %v639_v58, %v551_v56  ;;  %v243_v56 = vpop.permute.xlu2 %242 }
  0xd2   :  { %v725_v60 = vmax.f32 %v677_v10, 0.0 }
  0xd3   :  { %v710_v63 = vmax.f32 %v640_v61, 0.0 }
  0xd4   :  { %v757_v62 = vpack.c.bf16 %v725_v60, %v725_v60 }
  0xd5   :  { %v590_v1 = vpop.f32.mrf.mxu2  ;;  %v742_v2 = vpack.c.bf16 %v710_v63, %v710_v63 }
  0xd6   :  { %790 = vst.msk [vmem:[%s1595_s3 + $0x54] sm:$0xf] %vm768_vm0, %v757_v62  ;;  %v591_v3 = vadd.f32 %v590_v1, %v223_v0  ;;  %v679_v4 = vpop.f32.mrf.mxu3  ;;  %v552_v5 = vpop.f32.mrf.mxu0 }
  0xd7   :  { %775 = vst.msk [vmem:[%s1595_s3 + $0x18] sm:$0xf] %vm768_vm0, %v742_v2  ;;  %v553_v6 = vadd.f32 %v552_v5, %v1406_v11  ;;  %v641_v7 = vpop.f32.mrf.mxu1 }
  0xd8   :  { %v680_v20 = vadd.f32 %v679_v4, %v591_v3 }
  0xd9   :  { %v642_v9 = vadd.f32 %v641_v7, %v553_v6 }
  0xda   :  { %v726_v57 = vmax.f32 %v680_v20, 0.0  ;;  %v248_v20 = vpop.permute.xlu0 %247 }
  0xdb   :  { %v711_v13 = vmax.f32 %v642_v9, 0.0 }
  0xdc   :  { %v758_v12 = vpack.c.bf16 %v726_v57, %v726_v57 }
  0xdd   :  { %v592_v15 = vpop.f32.mrf.mxu2  ;;  %v743_v16 = vpack.c.bf16 %v711_v13, %v711_v13 }
  0xde   :  { %791 = vst.msk [vmem:[%s1595_s3 + $0x58] sm:$0xf] %vm768_vm0, %v758_v12  ;;  %v593_v17 = vadd.f32 %v592_v15, %v228_v14  ;;  %v681_v18 = vpop.f32.mrf.mxu3  ;;  %v555_v19 = vpop.f32.mrf.mxu0 }
  0xdf   :  { %776 = vst.msk [vmem:[%s1595_s3 + $0x1c] sm:$0xf] %vm768_vm0, %v743_v16  ;;  %v556_v22 = vadd.f32 %v555_v19, %v1434_v21  ;;  %v644_v23 = vpop.f32.mrf.mxu1  ;;  %v253_v19 = vpop.permute.xlu1 %252 }
  0xe0   :  { %v682_v11 = vadd.f32 %v681_v18, %v593_v17 }
  0xe1   :  { %v645_v8 = vadd.f32 %v644_v23, %v556_v22 }
  0xe2   :  { %v727_v24 = vmax.f32 %v682_v11, 0.0 }
  0xe3   :  { %v712_v30 = vmax.f32 %v645_v8, 0.0 }
  0xe4   :  { %v759_v25 = vpack.c.bf16 %v727_v24, %v727_v24 }
  0xe5   :  { %v595_v32 = vpop.f32.mrf.mxu2  ;;  %v744_v35 = vpack.c.bf16 %v712_v30, %v712_v30 }
  0xe6   :  { %792 = vst.msk [vmem:[%s1595_s3 + $0x5c] sm:$0xf] %vm768_vm0, %v759_v25  ;;  %v596_v36 = vadd.f32 %v595_v32, %v233_v31  ;;  %v684_v37 = vpop.f32.mrf.mxu3  ;;  %v557_v38 = vpop.f32.mrf.mxu0 }
  0xe7   :  { %777 = vst.msk [vmem:[%s1595_s3 + $0x20] sm:$0xf] %vm768_vm0, %v744_v35  ;;  %v558_v39 = vadd.f32 %v557_v38, %v1438_v27  ;;  %v646_v40 = vpop.f32.mrf.mxu1 }
  0xe8   :  { %v685_v21 = vadd.f32 %v684_v37, %v596_v36  ;;  %v258_v37 = vpop.permute.xlu2 %257 }
  0xe9   :  { %v647_v42 = vadd.f32 %v646_v40, %v558_v39 }
  0xea   :  { %v728_v41 = vmax.f32 %v685_v21, 0.0 }
  0xeb   :  { %v713_v43 = vmax.f32 %v647_v42, 0.0 }
  0xec   :  { %v760_v59 = vpack.c.bf16 %v728_v41, %v728_v41 }
  0xed   :  { %v597_v45 = vpop.f32.mrf.mxu2  ;;  %v745_v46 = vpack.c.bf16 %v713_v43, %v713_v43 }
  0xee   :  { %793 = vst.msk [vmem:[%s1595_s3 + $0x60] sm:$0xf] %vm768_vm0, %v760_v59  ;;  %v598_v47 = vadd.f32 %v597_v45, %v238_v44  ;;  %v686_v49 = vpop.f32.mrf.mxu3  ;;  %v560_v50 = vpop.f32.mrf.mxu0 }
  0xef   :  { %778 = vst.msk [vmem:[%s1595_s3 + $0x24] sm:$0xf] %vm768_vm0, %v745_v46  ;;  %v561_v51 = vadd.f32 %v560_v50, %v1436_v26  ;;  %v649_v52 = vpop.f32.mrf.mxu1 }
  0xf0   :  { %v687_v27 = vadd.f32 %v686_v49, %v598_v47  ;;  %v263_v47 = vpop.permute.xlu0 %262 }
  0xf1   :  { %v650_v54 = vadd.f32 %v649_v52, %v561_v51 }
  0xf2   :  { %v729_v53 = vmax.f32 %v687_v27, 0.0 }
  0xf3   :  { %v714_v10 = vmax.f32 %v650_v54, 0.0 }
  0xf4   :  { %v761_v55 = vpack.c.bf16 %v729_v53, %v729_v53 }
  0xf5   :  { %v600_v58 = vpop.f32.mrf.mxu2  ;;  %v746_v60 = vpack.c.bf16 %v714_v10, %v714_v10 }
  0xf6   :  { %794 = vst.msk [vmem:[%s1595_s3 + $0x64] sm:$0xf] %vm768_vm0, %v761_v55  ;;  %v601_v61 = vadd.f32 %v600_v58, %v243_v56  ;;  %v689_v62 = vpop.f32.mrf.mxu3  ;;  %v562_v63 = vpop.f32.mrf.mxu0 }
  0xf7   :  { %779 = vst.msk [vmem:[%s1595_s3 + $0x28] sm:$0xf] %vm768_vm0, %v746_v60  ;;  %v563_v0 = vadd.f32 %v562_v63, %v1440_v28  ;;  %v651_v1 = vpop.f32.mrf.mxu1  ;;  %v268_v60 = vpop.permute.xlu1 %267 }
  0xf8   :  { %v690_v26 = vadd.f32 %v689_v62, %v601_v61 }
  0xf9   :  { %v652_v3 = vadd.f32 %v651_v1, %v563_v0 }
  0xfa   :  { %v730_v2 = vmax.f32 %v690_v26, 0.0 }
  0xfb   :  { %v715_v5 = vmax.f32 %v652_v3, 0.0 }
  0xfc   :  { %v762_v4 = vpack.c.bf16 %v730_v2, %v730_v2 }
  0xfd   :  { %v602_v6 = vpop.f32.mrf.mxu2  ;;  %v747_v7 = vpack.c.bf16 %v715_v5, %v715_v5 }
  0xfe   :  { %795 = vst.msk [vmem:[%s1595_s3 + $0x68] sm:$0xf] %vm768_vm0, %v762_v4  ;;  %v603_v57 = vadd.f32 %v602_v6, %v248_v20  ;;  %v691_v9 = vpop.f32.mrf.mxu3  ;;  %v565_v12 = vpop.f32.mrf.mxu0 }
  0xff   :  { %780 = vst.msk [vmem:[%s1595_s3 + $0x2c] sm:$0xf] %vm768_vm0, %v747_v7  ;;  %v566_v13 = vadd.f32 %v565_v12, %v1444_v33  ;;  %v654_v14 = vpop.f32.mrf.mxu1 }
 0x100   :  { %v692_v28 = vadd.f32 %v691_v9, %v603_v57 }
 0x101   :  { %v655_v16 = vadd.f32 %v654_v14, %v566_v13 }
 0x102   :  { %v731_v15 = vmax.f32 %v692_v28, 0.0 }
 0x103   :  { %v716_v18 = vmax.f32 %v655_v16, 0.0 }
 0x104   :  { %v763_v17 = vpack.c.bf16 %v731_v15, %v731_v15 }
 0x105   :  { %v605_v11 = vpop.f32.mrf.mxu2  ;;  %v748_v22 = vpack.c.bf16 %v716_v18, %v716_v18 }
 0x106   :  { %796 = vst.msk [vmem:[%s1595_s3 + $0x6c] sm:$0xf] %vm768_vm0, %v763_v17  ;;  %v606_v23 = vadd.f32 %v605_v11, %v253_v19  ;;  %v694_v24 = vpop.f32.mrf.mxu3  ;;  %v567_v8 = vpop.f32.mrf.mxu0 }
 0x107   :  { %781 = vst.msk [vmem:[%s1595_s3 + $0x30] sm:$0xf] %vm768_vm0, %v748_v22  ;;  %v568_v25 = vadd.f32 %v567_v8, %v1442_v29  ;;  %v656_v30 = vpop.f32.mrf.mxu1 }
 0x108   :  { %v695_v33 = vadd.f32 %v694_v24, %v606_v23 }
 0x109   :  { %v657_v32 = vadd.f32 %v656_v30, %v568_v25 }
 0x10a   :  { %v732_v31 = vmax.f32 %v695_v33, 0.0 }
 0x10b   :  { %v717_v36 = vmax.f32 %v657_v32, 0.0 }
 0x10c   :  { %v764_v35 = vpack.c.bf16 %v732_v31, %v732_v31 }
 0x10d   :  { %v607_v38 = vpop.f32.mrf.mxu2  ;;  %v749_v21 = vpack.c.bf16 %v717_v36, %v717_v36 }
 0x10e   :  { %797 = vst.msk [vmem:[%s1595_s3 + $0x70] sm:$0xf] %vm768_vm0, %v764_v35  ;;  %v608_v39 = vadd.f32 %v607_v38, %v258_v37  ;;  %v696_v40 = vpop.f32.mrf.mxu3  ;;  %v570_v41 = vpop.f32.mrf.mxu0 }
 0x10f   :  { %782 = vst.msk [vmem:[%s1595_s3 + $0x34] sm:$0xf] %vm768_vm0, %v749_v21  ;;  %v571_v42 = vadd.f32 %v570_v41, %v1446_v34  ;;  %v659_v59 = vpop.f32.mrf.mxu1 }
 0x110   :  { %v697_v29 = vadd.f32 %v696_v40, %v608_v39 }
 0x111   :  { %v660_v44 = vadd.f32 %v659_v59, %v571_v42 }
 0x112   :  { %v733_v43 = vmax.f32 %v697_v29, 0.0 }
 0x113   :  { %v718_v46 = vmax.f32 %v660_v44, 0.0 }
 0x114   :  { %v765_v45 = vpack.c.bf16 %v733_v43, %v733_v43 }
 0x115   :  { %v610_v49 = vpop.f32.mrf.mxu2  ;;  %v750_v50 = vpack.c.bf16 %v718_v46, %v718_v46 }
 0x116   :  { %798 = vst.msk [vmem:[%s1595_s3 + $0x74] sm:$0xf] %vm768_vm0, %v765_v45  ;;  %v611_v27 = vadd.f32 %v610_v49, %v263_v47  ;;  %v699_v51 = vpop.f32.mrf.mxu3  ;;  %v572_v52 = vpop.f32.mrf.mxu0 }
 0x117   :  { %783 = vst.msk [vmem:[%s1595_s3 + $0x38] sm:$0xf] %vm768_vm0, %v750_v50  ;;  %v573_v53 = vadd.f32 %v572_v52, %v1452_v48  ;;  %v661_v54 = vpop.f32.mrf.mxu1 }
 0x118   :  { %v700_v34 = vadd.f32 %v699_v51, %v611_v27 }
 0x119   :  { %v662_v10 = vadd.f32 %v661_v54, %v573_v53 }
 0x11a   :  { %v734_v55 = vmax.f32 %v700_v34, 0.0 }
 0x11b   :  { %v719_v58 = vmax.f32 %v662_v10, 0.0 }
 0x11c   :  { %v766_v56 = vpack.c.bf16 %v734_v55, %v734_v55 }
 0x11d   :  { %v612_v61 = vpop.f32.mrf.mxu2  ;;  %v751_v62 = vpack.c.bf16 %v719_v58, %v719_v58 }
 0x11e   :  { %799 = vst.msk [vmem:[%s1595_s3 + $0x78] sm:$0xf] %vm768_vm0, %v766_v56  ;;  %v613_v63 = vadd.f32 %v612_v61, %v268_v60  ;;  %v701_v26 = vpop.f32.mrf.mxu3 }
 0x11f   :  { %784 = vst.msk [vmem:[%s1595_s3 + $0x3c] sm:$0xf] %vm768_vm0, %v751_v62 }
 0x120   :  { %v702_v48 = vadd.f32 %v701_v26, %v613_v63 }
 0x122   :  { %v735_v0 = vmax.f32 %v702_v48, 0.0 }
 0x124   :  { %v767_v1 = vpack.c.bf16 %v735_v0, %v735_v0 }
 0x126   :  { %800 = vst.msk [vmem:[%s1595_s3 + $0x7c] sm:$0xf] %vm768_vm0, %v767_v1 }

// kernel: beta_vae_forward.15
= control target key start
LH: loop header
LB: loop body
LE: loop exit
PB: predicated region body
PF: predicated region fallthrough
CT: control target
= control target key end

     0   :  { %v665_v2 = vmov 0   ;;  %vm464_vm0 = vcmask 797696   ;;  %s954_s1 = inlined_call_operand.vmem [shape: bf16[256,98], index: 1, kind: input, shape index: {}]   ;;  %s955_s2 = inlined_call_operand.vmem [shape: f32[128,1], index: 2, kind: input, shape index: {}]   ;;  %s956_s0 = inlined_call_operand.vmem [shape: bf16[128,256], index: 0, kind: input, shape index: {}]   ;;  %s957_s3 = inlined_call_operand.vmem [shape: bf16[128,98], index: 3, kind: output, shape index: {}]  }
   0x1   :  { %v636_v0 = vld [vmem:[%s954_s1 + $0x38] sm:$0xff]  ;;  %662 = vset.pattern.permute.xlu0 %v665_v2  ;;  %663 = vset.pattern.permute.xlu1 %v665_v2  ;;  %v635_v3 = vld [vmem:[%s954_s1 + $0x30] sm:$0xff]  ;;  %v62_v5 = vld [vmem:[%s955_s2] sm:$0xff] }
   0x2   :  { %v644_v1 = vld [vmem:[%s954_s1 + $0x78] sm:$0xff]  ;;  %664 = vset.pattern.permute.xlu2 %v665_v2  ;;  %334 = vmatpush.bf16.msra.mxu0 %v636_v0  ;;  %v643_v4 = vld [vmem:[%s954_s1 + $0x70] sm:$0xff]  ;;  %v634_v6 = vld [vmem:[%s954_s1 + $0x28] sm:$0xff] }
   0x3   :  { %645 = vmatpush.bf16.msra.mxu2 %v636_v0  ;;  %383 = vmatpush.bf16.msra.mxu1 %v644_v1  ;;  %v642_v7 = vld [vmem:[%s954_s1 + $0x68] sm:$0xff]  ;;  %v64_v8 = vld [vmem:[%s955_s2 + $0x10] sm:$0xff]  ;;  %v633_v9 = vld [vmem:[%s954_s1 + $0x20] sm:$0xff] }
   0x4   :  { %653 = vmatpush.bf16.msra.mxu3 %v644_v1  ;;  %80 = vperm.xlu0 %662, %v62_v5   ;;  %v63_v10 = vld [vmem:[%s955_s2 + $0x8] sm:$0xff]  ;;  %v641_v11 = vld [vmem:[%s954_s1 + $0x60] sm:$0xff]  ;;  %v632_v12 = vld [vmem:[%s954_s1 + $0x18] sm:$0xff] }
   0x5   :  { %90 = vperm.xlu1 %663, %v64_v8   ;;  %v640_v13 = vld [vmem:[%s954_s1 + $0x58] sm:$0xff]  ;;  %v631_v14 = vld [vmem:[%s954_s1 + $0x10] sm:$0xff]  ;;  %v66_v17 = vld [vmem:[%s955_s2 + $0x20] sm:$0xff] }
   0x6   :  { %335 = vmatpush.bf16.msra.mxu0 %v635_v3  ;;  %v68_v15 = vld [vmem:[%s955_s2 + $0x30] sm:$0xff]  ;;  %v65_v16 = vld [vmem:[%s955_s2 + $0x18] sm:$0xff]  ;;  %100 = vperm.xlu2 %664, %v66_v17   ;;  %v630_v19 = vld [vmem:[%s954_s1 + $0x8] sm:$0xff] }
   0x7   :  { %646 = vmatpush.bf16.msra.mxu2 %v635_v3  ;;  %384 = vmatpush.bf16.msra.mxu1 %v643_v4  ;;  %v639_v18 = vld [vmem:[%s954_s1 + $0x50] sm:$0xff]  ;;  %v638_v20 = vld [vmem:[%s954_s1 + $0x48] sm:$0xff]  ;;  %v629_v21 = vld [vmem:[%s954_s1] sm:$0xff] }
   0x8   :  { %654 = vmatpush.bf16.msra.mxu3 %v643_v4  ;;  %v487_v22 = vld [vmem:[%s956_s0] sm:$0xf]  ;;  %v614_v24 = vld [vmem:[%s956_s0 + $0x4] sm:$0xf0]  ;;  %v69_v26 = vld [vmem:[%s955_s2 + $0x38] sm:$0xff] }
   0x9   :  { %v637_v23 = vld [vmem:[%s954_s1 + $0x40] sm:$0xff]  ;;  %v622_v27 = vld [vmem:[%s956_s0 + $0x44] sm:$0xf0]  ;;  %v489_v30 = vld [vmem:[%s956_s0 + $0x8] sm:$0xf0]  ;;  %v488_v33 = vor.u32 %v614_v24, %v487_v22 }
   0xa   :  { %336 = vmatpush.bf16.msra.mxu0 %v634_v6  ;;  %v519_v25 = vld [vmem:[%s956_s0 + $0x40] sm:$0xf]  ;;  %v613_v28 = vld [vmem:[%s956_s0 + $0x4] sm:$0xf]  ;;  %v71_v29 = vld [vmem:[%s955_s2 + $0x48] sm:$0xff] }
   0xb   :  { %647 = vmatpush.bf16.msra.mxu2 %v634_v6  ;;  %385 = vmatpush.bf16.msra.mxu1 %v642_v7  ;;  %v621_v31 = vld [vmem:[%s956_s0 + $0x44] sm:$0xf]  ;;  %v521_v32 = vld [vmem:[%s956_s0 + $0x48] sm:$0xf0]  ;;  %v520_v34 = vor.u32 %v622_v27, %v519_v25  ;;  %v492_v35 = vor.u32 %v613_v28, %v489_v30  ;;  %v72_v39 = vld [vmem:[%s955_s2 + $0x50] sm:$0xff] }
   0xc   :  { %655 = vmatpush.bf16.msra.mxu3 %v642_v7  ;;  %85 = vperm.xlu0 %662, %v63_v10   ;;  %v524_v36 = vor.u32 %v621_v31, %v521_v32  ;;  %v74_v37 = vld [vmem:[%s955_s2 + $0x60] sm:$0xff]  ;;  %v67_v38 = vld [vmem:[%s955_s2 + $0x28] sm:$0xff]  ;;  %v495_v40 = vld [vmem:[%s956_s0 + $0x10] sm:$0xf] }
   0xd   :  { %95 = vperm.xlu1 %663, %v65_v16   ;;  %v70_v41 = vld [vmem:[%s955_s2 + $0x40] sm:$0xff]  ;;  %v616_v42 = vld [vmem:[%s956_s0 + $0x14] sm:$0xf0]  ;;  %v527_v43 = vld [vmem:[%s956_s0 + $0x50] sm:$0xf] }
   0xe   :  { %337 = vmatpush.bf16.msra.mxu0 %v633_v9  ;;  %105 = vperm.xlu2 %664, %v67_v38   ;;  %v75_v44 = vld [vmem:[%s955_s2 + $0x68] sm:$0xff]  ;;  %v624_v45 = vld [vmem:[%s956_s0 + $0x54] sm:$0xf0]  ;;  %v615_v46 = vld [vmem:[%s956_s0 + $0x14] sm:$0xf]  ;;  %v496_v51 = vor.u32 %v616_v42, %v495_v40 }
   0xf   :  { %648 = vmatpush.bf16.msra.mxu2 %v633_v9  ;;  %386 = vmatpush.bf16.msra.mxu1 %v641_v11  ;;  %v77_v47 = vld [vmem:[%s955_s2 + $0x78] sm:$0xff]  ;;  %v623_v49 = vld [vmem:[%s956_s0 + $0x54] sm:$0xf]  ;;  %v528_v52 = vor.u32 %v624_v45, %v527_v43  ;;  %v503_v57 = vld [vmem:[%s956_s0 + $0x20] sm:$0xf] }
  0x10   :  { %656 = vmatpush.bf16.msra.mxu3 %v641_v11  ;;  %v497_v48 = vld [vmem:[%s956_s0 + $0x18] sm:$0xf0]  ;;  %v76_v56 = vld [vmem:[%s955_s2 + $0x70] sm:$0xff]  ;;  %v618_v58 = vld [vmem:[%s956_s0 + $0x24] sm:$0xf0] }
  0x11   :  { %v529_v50 = vld [vmem:[%s956_s0 + $0x58] sm:$0xf0]  ;;  %v500_v53 = vor.u32 %v615_v46, %v497_v48  ;;  %v535_v59 = vld [vmem:[%s956_s0 + $0x60] sm:$0xf]  ;;  %v626_v60 = vld [vmem:[%s956_s0 + $0x64] sm:$0xf0]  ;;  %v504_v1 = vor.u32 %v618_v58, %v503_v57 }
  0x12   :  { %338 = vmatpush.bf16.msra.mxu0 %v632_v12  ;;  %v532_v54 = vor.u32 %v623_v49, %v529_v50  ;;  %v73_v55 = vld [vmem:[%s955_s2 + $0x58] sm:$0xff]  ;;  %v617_v61 = vld [vmem:[%s956_s0 + $0x24] sm:$0xf]  ;;  %v505_v62 = vld [vmem:[%s956_s0 + $0x28] sm:$0xf0]  ;;  %v536_v2 = vor.u32 %v626_v60, %v535_v59 }
  0x13   :  { %649 = vmatpush.bf16.msra.mxu2 %v632_v12  ;;  %387 = vmatpush.bf16.msra.mxu1 %v640_v13  ;;  %v625_v63 = vld [vmem:[%s956_s0 + $0x64] sm:$0xf]  ;;  %v537_v0 = vld [vmem:[%s956_s0 + $0x68] sm:$0xf0]  ;;  %v508_v3 = vor.u32 %v617_v61, %v505_v62  ;;  %v511_v5 = vld [vmem:[%s956_s0 + $0x30] sm:$0xf] }
  0x14   :  { %657 = vmatpush.bf16.msra.mxu3 %v640_v13  ;;  %110 = vperm.xlu0 %662, %v68_v15   ;;  %v540_v4 = vor.u32 %v625_v63, %v537_v0  ;;  %v620_v6 = vld [vmem:[%s956_s0 + $0x34] sm:$0xf0]  ;;  %v543_v7 = vld [vmem:[%s956_s0 + $0x70] sm:$0xf]  ;;  %v619_v9 = vld [vmem:[%s956_s0 + $0x34] sm:$0xf] }
  0x15   :  { %115 = vperm.xlu1 %663, %v69_v26   ;;  %v628_v8 = vld [vmem:[%s956_s0 + $0x74] sm:$0xf0]  ;;  %v513_v10 = vld [vmem:[%s956_s0 + $0x38] sm:$0xf0]  ;;  %v627_v11 = vld [vmem:[%s956_s0 + $0x74] sm:$0xf]  ;;  %v512_v13 = vor.u32 %v620_v6, %v511_v5 }
  0x16   :  { %339 = vmatpush.bf16.msra.mxu0 %v631_v14  ;;  %120 = vperm.xlu2 %664, %v70_v41   ;;  %v545_v12 = vld [vmem:[%s956_s0 + $0x78] sm:$0xf0]  ;;  %v516_v15 = vor.u32 %v619_v9, %v513_v10 }
  0x17   :  { %650 = vmatpush.bf16.msra.mxu2 %v631_v14  ;;  %388 = vmatpush.bf16.msra.mxu1 %v639_v18  ;;  %v544_v14 = vor.u32 %v628_v8, %v543_v7  ;;  %v548_v16 = vor.u32 %v627_v11, %v545_v12 }
  0x18   :  { %658 = vmatpush.bf16.msra.mxu3 %v639_v18 }
  0x1a   :  { %340 = vmatpush.bf16.msra.mxu0 %v630_v19 }
  0x1b   :  { %651 = vmatpush.bf16.msra.mxu2 %v630_v19  ;;  %389 = vmatpush.bf16.msra.mxu1 %v638_v20 }
  0x1c   :  { %659 = vmatpush.bf16.msra.mxu3 %v638_v20  ;;  %125 = vperm.xlu0 %662, %v71_v29  }
  0x1d   :  { %130 = vperm.xlu1 %663, %v72_v39  }
  0x1e   :  { %341 = vmatpush.bf16.msra.mxu0 %v629_v21  ;;  %135 = vperm.xlu2 %664, %v73_v55  }
  0x1f   :  { %652 = vmatpush.bf16.msra.mxu2 %v629_v21  ;;  %390 = vmatpush.bf16.msra.mxu1 %v637_v23 }
  0x20   :  { %660 = vmatpush.bf16.msra.mxu3 %v637_v23 }
  0x21   :  { %342 = vmatmul.bf16.vlgmr.msra.gmra.mxu0 %v488_v33 }
  0x22   :  { %362 = vmatmul.bf16.vlgmr.msra.gmra.mxu2 %v520_v34  ;;  %391 = vmatmul.bf16.vlgmr.msra.gmra.mxu1 %v492_v35 }
  0x23   :  { %411 = vmatmul.bf16.vlgmr.msra.gmra.mxu3 %v524_v36 }
  0x24   :  { %140 = vperm.xlu0 %662, %v74_v37  }
  0x25   :  { %145 = vperm.xlu1 %663, %v75_v44  }
  0x26   :  { %150 = vperm.xlu2 %664, %v76_v56  }
  0x2c   :  { %155 = vperm.xlu0 %662, %v77_v47  }
  0x31   :  { %347 = vmatmul.bf16.gmra.mxu0 %v496_v51 }
  0x32   :  { %367 = vmatmul.bf16.gmra.mxu2 %v528_v52  ;;  %396 = vmatmul.bf16.gmra.mxu1 %v500_v53 }
  0x33   :  { %416 = vmatmul.bf16.gmra.mxu3 %v532_v54 }
  0x41   :  { %352 = vmatmul.bf16.gmra.mxu0 %v504_v1 }
  0x42   :  { %372 = vmatmul.bf16.gmra.mxu2 %v536_v2  ;;  %401 = vmatmul.bf16.gmra.mxu1 %v508_v3 }
  0x43   :  { %421 = vmatmul.bf16.gmra.mxu3 %v540_v4 }
  0x51   :  { %357 = vmatmul.bf16.gmra.mxu0 %v512_v13 }
  0x52   :  { %377 = vmatmul.bf16.gmra.mxu2 %v544_v14  ;;  %406 = vmatmul.bf16.gmra.mxu1 %v516_v15 }
  0x53   :  { %426 = vmatmul.bf16.gmra.mxu3 %v548_v16 }
  0x60   :  { %v878_v18 = vpop.permute.xlu2 %100 }
  0x68   :  { %v880_v21 = vpop.permute.xlu2 %105 }
  0x70   :  { %v121_v28 = vpop.permute.xlu2 %120 }
  0x76   :  { %v81_v17 = vpop.permute.xlu0 %80 }
  0x77   :  { %v91_v19 = vpop.permute.xlu1 %90 }
  0x78   :  { %v136_v5 = vpop.permute.xlu2 %135 }
  0x7e   :  { %v86_v20 = vpop.permute.xlu0 %85 }
  0x7f   :  { %v96_v23 = vpop.permute.xlu1 %95 }
  0x86   :  { %v882_v27 = vpop.permute.xlu0 %110 }
  0x87   :  { %v888_v38 = vpop.permute.xlu1 %115 }
  0x8e   :  { %v126_v43 = vpop.permute.xlu0 %125 }
  0x8f   :  { %v131_v54 = vpop.permute.xlu1 %130 }
  0x9e   :  { %v343_v22 = vpop.f32.mrf.mxu0 }
  0x9f   :  { %v344_v24 = vadd.f32 %v343_v22, %v81_v17  ;;  %v392_v25 = vpop.f32.mrf.mxu1 }
  0xa1   :  { %v393_v26 = vadd.f32 %v392_v25, %v344_v24 }
  0xa3   :  { %v432_v29 = vmax.f32 %v393_v26, 0.0 }
  0xa5   :  { %v363_v30 = vpop.f32.mrf.mxu2  ;;  %v448_v31 = vpack.c.bf16 %v432_v29, %v432_v29 }
  0xa6   :  { %v364_v32 = vadd.f32 %v363_v30, %v121_v28  ;;  %v412_v33 = vpop.f32.mrf.mxu3  ;;  %v345_v34 = vpop.f32.mrf.mxu0 }
  0xa7   :  { %465 = vst.msk [vmem:[%s957_s3] sm:$0xf] %vm464_vm0, %v448_v31  ;;  %v346_v36 = vadd.f32 %v345_v34, %v86_v20  ;;  %v394_v37 = vpop.f32.mrf.mxu1 }
  0xa8   :  { %v413_v35 = vadd.f32 %v412_v33, %v364_v32  ;;  %v146_v33 = vpop.permute.xlu1 %145 }
  0xa9   :  { %v395_v40 = vadd.f32 %v394_v37, %v346_v36 }
  0xaa   :  { %v440_v39 = vmax.f32 %v413_v35, 0.0 }
  0xab   :  { %v433_v42 = vmax.f32 %v395_v40, 0.0 }
  0xac   :  { %v456_v41 = vpack.c.bf16 %v440_v39, %v440_v39 }
  0xad   :  { %v365_v44 = vpop.f32.mrf.mxu2  ;;  %v449_v45 = vpack.c.bf16 %v433_v42, %v433_v42 }
  0xae   :  { %473 = vst.msk [vmem:[%s957_s3 + $0x20] sm:$0xf] %vm464_vm0, %v456_v41  ;;  %v366_v46 = vadd.f32 %v365_v44, %v126_v43  ;;  %v414_v47 = vpop.f32.mrf.mxu3  ;;  %v348_v48 = vpop.f32.mrf.mxu0 }
  0xaf   :  { %466 = vst.msk [vmem:[%s957_s3 + $0x4] sm:$0xf] %vm464_vm0, %v449_v45  ;;  %v349_v50 = vadd.f32 %v348_v48, %v91_v19  ;;  %v397_v51 = vpop.f32.mrf.mxu1  ;;  %v141_v19 = vpop.permute.xlu0 %140 }
  0xb0   :  { %v415_v49 = vadd.f32 %v414_v47, %v366_v46  ;;  %v151_v46 = vpop.permute.xlu2 %150 }
  0xb1   :  { %v398_v53 = vadd.f32 %v397_v51, %v349_v50 }
  0xb2   :  { %v441_v52 = vmax.f32 %v415_v49, 0.0 }
  0xb3   :  { %v434_v56 = vmax.f32 %v398_v53, 0.0 }
  0xb4   :  { %v457_v55 = vpack.c.bf16 %v441_v52, %v441_v52 }
  0xb5   :  { %v368_v57 = vpop.f32.mrf.mxu2  ;;  %v450_v58 = vpack.c.bf16 %v434_v56, %v434_v56 }
  0xb6   :  { %474 = vst.msk [vmem:[%s957_s3 + $0x24] sm:$0xf] %vm464_vm0, %v457_v55  ;;  %v369_v59 = vadd.f32 %v368_v57, %v131_v54  ;;  %v417_v60 = vpop.f32.mrf.mxu3  ;;  %v350_v61 = vpop.f32.mrf.mxu0 }
  0xb7   :  { %467 = vst.msk [vmem:[%s957_s3 + $0x8] sm:$0xf] %vm464_vm0, %v450_v58  ;;  %v351_v63 = vadd.f32 %v350_v61, %v96_v23  ;;  %v399_v0 = vpop.f32.mrf.mxu1  ;;  %v156_v58 = vpop.permute.xlu0 %155 }
  0xb8   :  { %v418_v62 = vadd.f32 %v417_v60, %v369_v59 }
  0xb9   :  { %v400_v2 = vadd.f32 %v399_v0, %v351_v63 }
  0xba   :  { %v442_v1 = vmax.f32 %v418_v62, 0.0 }
  0xbb   :  { %v435_v4 = vmax.f32 %v400_v2, 0.0 }
  0xbc   :  { %v458_v3 = vpack.c.bf16 %v442_v1, %v442_v1 }
  0xbd   :  { %v370_v6 = vpop.f32.mrf.mxu2  ;;  %v451_v7 = vpack.c.bf16 %v435_v4, %v435_v4 }
  0xbe   :  { %475 = vst.msk [vmem:[%s957_s3 + $0x28] sm:$0xf] %vm464_vm0, %v458_v3  ;;  %v371_v8 = vadd.f32 %v370_v6, %v136_v5  ;;  %v419_v9 = vpop.f32.mrf.mxu3  ;;  %v353_v10 = vpop.f32.mrf.mxu0 }
  0xbf   :  { %468 = vst.msk [vmem:[%s957_s3 + $0xc] sm:$0xf] %vm464_vm0, %v451_v7  ;;  %v354_v12 = vadd.f32 %v353_v10, %v878_v18  ;;  %v402_v13 = vpop.f32.mrf.mxu1 }
  0xc0   :  { %v420_v11 = vadd.f32 %v419_v9, %v371_v8 }
  0xc1   :  { %v403_v15 = vadd.f32 %v402_v13, %v354_v12 }
  0xc2   :  { %v443_v14 = vmax.f32 %v420_v11, 0.0 }
  0xc3   :  { %v436_v17 = vmax.f32 %v403_v15, 0.0 }
  0xc4   :  { %v459_v16 = vpack.c.bf16 %v443_v14, %v443_v14 }
  0xc5   :  { %v373_v20 = vpop.f32.mrf.mxu2  ;;  %v452_v22 = vpack.c.bf16 %v436_v17, %v436_v17 }
  0xc6   :  { %476 = vst.msk [vmem:[%s957_s3 + $0x2c] sm:$0xf] %vm464_vm0, %v459_v16  ;;  %v374_v23 = vadd.f32 %v373_v20, %v141_v19  ;;  %v422_v24 = vpop.f32.mrf.mxu3  ;;  %v355_v25 = vpop.f32.mrf.mxu0 }
  0xc7   :  { %469 = vst.msk [vmem:[%s957_s3 + $0x10] sm:$0xf] %vm464_vm0, %v452_v22  ;;  %v356_v26 = vadd.f32 %v355_v25, %v880_v21  ;;  %v404_v28 = vpop.f32.mrf.mxu1 }
  0xc8   :  { %v423_v18 = vadd.f32 %v422_v24, %v374_v23 }
  0xc9   :  { %v405_v30 = vadd.f32 %v404_v28, %v356_v26 }
  0xca   :  { %v444_v29 = vmax.f32 %v423_v18, 0.0 }
  0xcb   :  { %v437_v32 = vmax.f32 %v405_v30, 0.0 }
  0xcc   :  { %v460_v31 = vpack.c.bf16 %v444_v29, %v444_v29 }
  0xcd   :  { %v375_v34 = vpop.f32.mrf.mxu2  ;;  %v453_v35 = vpack.c.bf16 %v437_v32, %v437_v32 }
  0xce   :  { %477 = vst.msk [vmem:[%s957_s3 + $0x30] sm:$0xf] %vm464_vm0, %v460_v31  ;;  %v376_v36 = vadd.f32 %v375_v34, %v146_v33  ;;  %v424_v37 = vpop.f32.mrf.mxu3  ;;  %v358_v39 = vpop.f32.mrf.mxu0 }
  0xcf   :  { %470 = vst.msk [vmem:[%s957_s3 + $0x14] sm:$0xf] %vm464_vm0, %v453_v35  ;;  %v359_v40 = vadd.f32 %v358_v39, %v882_v27  ;;  %v407_v41 = vpop.f32.mrf.mxu1 }
  0xd0   :  { %v425_v21 = vadd.f32 %v424_v37, %v376_v36 }
  0xd1   :  { %v408_v43 = vadd.f32 %v407_v41, %v359_v40 }
  0xd2   :  { %v445_v42 = vmax.f32 %v425_v21, 0.0 }
  0xd3   :  { %v438_v45 = vmax.f32 %v408_v43, 0.0 }
  0xd4   :  { %v461_v44 = vpack.c.bf16 %v445_v42, %v445_v42 }
  0xd5   :  { %v378_v47 = vpop.f32.mrf.mxu2  ;;  %v454_v48 = vpack.c.bf16 %v438_v45, %v438_v45 }
  0xd6   :  { %478 = vst.msk [vmem:[%s957_s3 + $0x34] sm:$0xf] %vm464_vm0, %v461_v44  ;;  %v379_v49 = vadd.f32 %v378_v47, %v151_v46  ;;  %v427_v50 = vpop.f32.mrf.mxu3  ;;  %v360_v51 = vpop.f32.mrf.mxu0 }
  0xd7   :  { %471 = vst.msk [vmem:[%s957_s3 + $0x18] sm:$0xf] %vm464_vm0, %v454_v48  ;;  %v361_v52 = vadd.f32 %v360_v51, %v888_v38  ;;  %v409_v53 = vpop.f32.mrf.mxu1 }
  0xd8   :  { %v428_v27 = vadd.f32 %v427_v50, %v379_v49 }
  0xd9   :  { %v410_v55 = vadd.f32 %v409_v53, %v361_v52 }
  0xda   :  { %v446_v54 = vmax.f32 %v428_v27, 0.0 }
  0xdb   :  { %v439_v57 = vmax.f32 %v410_v55, 0.0 }
  0xdc   :  { %v462_v56 = vpack.c.bf16 %v446_v54, %v446_v54 }
  0xdd   :  { %v380_v59 = vpop.f32.mrf.mxu2  ;;  %v455_v60 = vpack.c.bf16 %v439_v57, %v439_v57 }
  0xde   :  { %479 = vst.msk [vmem:[%s957_s3 + $0x38] sm:$0xf] %vm464_vm0, %v462_v56  ;;  %v381_v61 = vadd.f32 %v380_v59, %v156_v58  ;;  %v429_v62 = vpop.f32.mrf.mxu3 }
  0xdf   :  { %472 = vst.msk [vmem:[%s957_s3 + $0x1c] sm:$0xf] %vm464_vm0, %v455_v60 }
  0xe0   :  { %v430_v38 = vadd.f32 %v429_v62, %v381_v61 }
  0xe2   :  { %v447_v63 = vmax.f32 %v430_v38, 0.0 }
  0xe4   :  { %v463_v0 = vpack.c.bf16 %v447_v63, %v447_v63 }
  0xe6   :  { %480 = vst.msk [vmem:[%s957_s3 + $0x3c] sm:$0xf] %vm464_vm0, %v463_v0 }

// kernel: beta_vae_forward.16
= control target key start
LH: loop header
LB: loop body
LE: loop exit
PB: predicated region body
PF: predicated region fallthrough
CT: control target
= control target key end

     0   :  { %vm659_vm0 = vcmask 1043456   ;;  %vm660_vm1 = vcmask 539652   ;;  %s1318_s1 = inlined_call_operand.vmem [shape: bf16[128,450], index: 1, kind: input, shape index: {}]   ;;  %s1319_s2 = inlined_call_operand.vmem [shape: f32[128,1], index: 2, kind: input, shape index: {}]   ;;  %s1320_s0 = inlined_call_operand.vmem [shape: bf16[128,128], index: 0, kind: input, shape index: {}]   ;;  %s1321_s3 = inlined_call_operand.vmem [shape: bf16[128,450], index: 3, kind: output, shape index: {}]  }
   0x1   :  { %v843_v0 = vld [vmem:[%s1318_s1 + $0xe0] sm:$0xf]  ;;  %v895_v1 = vld [vmem:[%s1318_s1 + $0xec] sm:$0xf0]  ;;  %v893_v2 = vld [vmem:[%s1318_s1 + $0xe4] sm:$0xf] }
   0x2   :  { %v844_v3 = vor.u32 %v895_v1, %v843_v0  ;;  %v845_v4 = vld [vmem:[%s1318_s1 + $0xf0] sm:$0xf0]  ;;  %v851_v5 = vld [vmem:[%s1318_s1 + $0xe8] sm:$0xf]  ;;  %v896_v6 = vld [vmem:[%s1318_s1 + $0xf4] sm:$0xf0] }
   0x3   :  { %v848_v7 = vor.u32 %v893_v2, %v845_v4  ;;  %v852_v8 = vor.u32 %v896_v6, %v851_v5  ;;  %v894_v9 = vld [vmem:[%s1318_s1 + $0xec] sm:$0xf]  ;;  %v853_v10 = vld [vmem:[%s1318_s1 + $0xf8] sm:$0xf0]  ;;  %v827_v11 = vld [vmem:[%s1318_s1 + $0xc0] sm:$0xf] }
   0x4   :  { %366 = vmatpush.bf16.msra.mxu0 %v844_v3  ;;  %v856_v12 = vor.u32 %v894_v9, %v853_v10  ;;  %v891_v13 = vld [vmem:[%s1318_s1 + $0xcc] sm:$0xf0]  ;;  %v889_v14 = vld [vmem:[%s1318_s1 + $0xc4] sm:$0xf]  ;;  %v829_v15 = vld [vmem:[%s1318_s1 + $0xd0] sm:$0xf0] }
   0x5   :  { %415 = vmatpush.bf16.msra.mxu1 %v848_v7  ;;  %464 = vmatpush.bf16.msra.mxu2 %v852_v8  ;;  %v828_v16 = vor.u32 %v891_v13, %v827_v11  ;;  %v832_v17 = vor.u32 %v889_v14, %v829_v15  ;;  %v835_v18 = vld [vmem:[%s1318_s1 + $0xc8] sm:$0xf]  ;;  %v892_v19 = vld [vmem:[%s1318_s1 + $0xd4] sm:$0xf0]  ;;  %v890_v20 = vld [vmem:[%s1318_s1 + $0xcc] sm:$0xf] }
   0x6   :  { %513 = vmatpush.bf16.msra.mxu3 %v856_v12  ;;  %v836_v21 = vor.u32 %v892_v19, %v835_v18  ;;  %v837_v22 = vld [vmem:[%s1318_s1 + $0xd8] sm:$0xf0]  ;;  %v811_v23 = vld [vmem:[%s1318_s1 + $0xa0] sm:$0xf]  ;;  %v887_v24 = vld [vmem:[%s1318_s1 + $0xac] sm:$0xf0] }
   0x7   :  { %v840_v25 = vor.u32 %v890_v20, %v837_v22  ;;  %v885_v26 = vld [vmem:[%s1318_s1 + $0xa4] sm:$0xf]  ;;  %v813_v27 = vld [vmem:[%s1318_s1 + $0xb0] sm:$0xf0]  ;;  %v819_v28 = vld [vmem:[%s1318_s1 + $0xa8] sm:$0xf]  ;;  %v812_v29 = vor.u32 %v887_v24, %v811_v23 }
   0x8   :  { %367 = vmatpush.bf16.msra.mxu0 %v828_v16  ;;  %v888_v30 = vld [vmem:[%s1318_s1 + $0xb4] sm:$0xf0]  ;;  %v886_v31 = vld [vmem:[%s1318_s1 + $0xac] sm:$0xf]  ;;  %v821_v32 = vld [vmem:[%s1318_s1 + $0xb8] sm:$0xf0]  ;;  %v816_v33 = vor.u32 %v885_v26, %v813_v27 }
   0x9   :  { %416 = vmatpush.bf16.msra.mxu1 %v832_v17  ;;  %465 = vmatpush.bf16.msra.mxu2 %v836_v21  ;;  %v820_v34 = vor.u32 %v888_v30, %v819_v28  ;;  %v795_v35 = vld [vmem:[%s1318_s1 + $0x80] sm:$0xf]  ;;  %v883_v36 = vld [vmem:[%s1318_s1 + $0x8c] sm:$0xf0]  ;;  %v881_v37 = vld [vmem:[%s1318_s1 + $0x84] sm:$0xf]  ;;  %v824_v38 = vor.u32 %v886_v31, %v821_v32 }
   0xa   :  { %514 = vmatpush.bf16.msra.mxu3 %v840_v25  ;;  %v797_v39 = vld [vmem:[%s1318_s1 + $0x90] sm:$0xf0]  ;;  %v803_v40 = vld [vmem:[%s1318_s1 + $0x88] sm:$0xf]  ;;  %v884_v41 = vld [vmem:[%s1318_s1 + $0x94] sm:$0xf0]  ;;  %v796_v44 = vor.u32 %v883_v36, %v795_v35 }
   0xb   :  { %v882_v42 = vld [vmem:[%s1318_s1 + $0x8c] sm:$0xf]  ;;  %v805_v43 = vld [vmem:[%s1318_s1 + $0x98] sm:$0xf0]  ;;  %v800_v45 = vor.u32 %v881_v37, %v797_v39  ;;  %v804_v46 = vor.u32 %v884_v41, %v803_v40  ;;  %v779_v47 = vld [vmem:[%s1318_s1 + $0x60] sm:$0xf] }
   0xc   :  { %368 = vmatpush.bf16.msra.mxu0 %v812_v29  ;;  %v879_v48 = vld [vmem:[%s1318_s1 + $0x6c] sm:$0xf0]  ;;  %v877_v49 = vld [vmem:[%s1318_s1 + $0x64] sm:$0xf]  ;;  %v808_v50 = vor.u32 %v882_v42, %v805_v43  ;;  %v781_v51 = vld [vmem:[%s1318_s1 + $0x70] sm:$0xf0] }
   0xd   :  { %417 = vmatpush.bf16.msra.mxu1 %v816_v33  ;;  %466 = vmatpush.bf16.msra.mxu2 %v820_v34  ;;  %v787_v52 = vld [vmem:[%s1318_s1 + $0x68] sm:$0xf]  ;;  %v880_v53 = vld [vmem:[%s1318_s1 + $0x74] sm:$0xf0]  ;;  %v878_v54 = vld [vmem:[%s1318_s1 + $0x6c] sm:$0xf]  ;;  %v780_v56 = vor.u32 %v879_v48, %v779_v47  ;;  %v784_v57 = vor.u32 %v877_v49, %v781_v51 }
   0xe   :  { %515 = vmatpush.bf16.msra.mxu3 %v824_v38  ;;  %v789_v55 = vld [vmem:[%s1318_s1 + $0x78] sm:$0xf0]  ;;  %v788_v58 = vor.u32 %v880_v53, %v787_v52  ;;  %v763_v59 = vld [vmem:[%s1318_s1 + $0x40] sm:$0xf]  ;;  %v875_v60 = vld [vmem:[%s1318_s1 + $0x4c] sm:$0xf0] }
   0xf   :  { %v873_v61 = vld [vmem:[%s1318_s1 + $0x44] sm:$0xf]  ;;  %v792_v62 = vor.u32 %v878_v54, %v789_v55  ;;  %v765_v63 = vld [vmem:[%s1318_s1 + $0x50] sm:$0xf0]  ;;  %v771_v0 = vld [vmem:[%s1318_s1 + $0x48] sm:$0xf]  ;;  %v764_v4 = vor.u32 %v875_v60, %v763_v59 }
  0x10   :  { %369 = vmatpush.bf16.msra.mxu0 %v796_v44  ;;  %v876_v1 = vld [vmem:[%s1318_s1 + $0x54] sm:$0xf0]  ;;  %v874_v2 = vld [vmem:[%s1318_s1 + $0x4c] sm:$0xf]  ;;  %v773_v3 = vld [vmem:[%s1318_s1 + $0x58] sm:$0xf0]  ;;  %v768_v6 = vor.u32 %v873_v61, %v765_v63 }
  0x11   :  { %418 = vmatpush.bf16.msra.mxu1 %v800_v45  ;;  %467 = vmatpush.bf16.msra.mxu2 %v804_v46  ;;  %v747_v5 = vld [vmem:[%s1318_s1 + $0x20] sm:$0xf]  ;;  %v772_v7 = vor.u32 %v876_v1, %v771_v0  ;;  %v871_v8 = vld [vmem:[%s1318_s1 + $0x2c] sm:$0xf0]  ;;  %v869_v9 = vld [vmem:[%s1318_s1 + $0x24] sm:$0xf]  ;;  %v776_v11 = vor.u32 %v874_v2, %v773_v3 }
  0x12   :  { %516 = vmatpush.bf16.msra.mxu3 %v808_v50  ;;  %v749_v10 = vld [vmem:[%s1318_s1 + $0x30] sm:$0xf0]  ;;  %v755_v12 = vld [vmem:[%s1318_s1 + $0x28] sm:$0xf]  ;;  %v872_v13 = vld [vmem:[%s1318_s1 + $0x34] sm:$0xf0]  ;;  %v748_v19 = vor.u32 %v871_v8, %v747_v5 }
  0x13   :  { %v62_v14 = vld [vmem:[%s1319_s2] sm:$0xff]  ;;  %v870_v15 = vld [vmem:[%s1318_s1 + $0x2c] sm:$0xf]  ;;  %v757_v16 = vld [vmem:[%s1318_s1 + $0x38] sm:$0xf0]  ;;  %v901_v17 = vmov 0   ;;  %v752_v20 = vor.u32 %v869_v9, %v749_v10  ;;  %v756_v21 = vor.u32 %v872_v13, %v755_v12 }
  0x14   :  { %370 = vmatpush.bf16.msra.mxu0 %v780_v56  ;;  %898 = vset.pattern.permute.xlu0 %v901_v17  ;;  %v64_v18 = vld [vmem:[%s1319_s2 + $0x10] sm:$0xff]  ;;  %v731_v22 = vld [vmem:[%s1318_s1] sm:$0xf]  ;;  %v865_v24 = vld [vmem:[%s1318_s1 + $0x4] sm:$0xf]  ;;  %v760_v25 = vor.u32 %v870_v15, %v757_v16 }
  0x15   :  { %419 = vmatpush.bf16.msra.mxu1 %v784_v57  ;;  %468 = vmatpush.bf16.msra.mxu2 %v788_v58  ;;  %v867_v23 = vld [vmem:[%s1318_s1 + $0xc] sm:$0xf0]  ;;  %v733_v26 = vld [vmem:[%s1318_s1 + $0x10] sm:$0xf0]  ;;  %v739_v27 = vld [vmem:[%s1318_s1 + $0x8] sm:$0xf] }
  0x16   :  { %517 = vmatpush.bf16.msra.mxu3 %v792_v62  ;;  %899 = vset.pattern.permute.xlu1 %v901_v17  ;;  %v868_v28 = vld [vmem:[%s1318_s1 + $0x14] sm:$0xf0]  ;;  %v866_v29 = vld [vmem:[%s1318_s1 + $0xc] sm:$0xf]  ;;  %v741_v30 = vld [vmem:[%s1318_s1 + $0x18] sm:$0xf0]  ;;  %v732_v31 = vor.u32 %v867_v23, %v731_v22  ;;  %v736_v32 = vor.u32 %v865_v24, %v733_v26 }
  0x17   :  { %80 = vperm.xlu0 %898, %v62_v14   ;;  %90 = vperm.xlu1 %899, %v64_v18   ;;  %v740_v33 = vor.u32 %v868_v28, %v739_v27  ;;  %v63_v34 = vld [vmem:[%s1319_s2 + $0x8] sm:$0xff]  ;;  %v744_v35 = vor.u32 %v866_v29, %v741_v30  ;;  %v857_v36 = vld [vmem:[%s1320_s0] sm:$0xff]  ;;  %v65_v37 = vld [vmem:[%s1319_s2 + $0x18] sm:$0xff] }
  0x18   :  { %371 = vmatpush.bf16.msra.mxu0 %v764_v4  ;;  %900 = vset.pattern.permute.xlu2 %v901_v17  ;;  %v858_v38 = vld [vmem:[%s1320_s0 + $0x8] sm:$0xff]  ;;  %v859_v39 = vld [vmem:[%s1320_s0 + $0x10] sm:$0xff]  ;;  %v66_v41 = vld [vmem:[%s1319_s2 + $0x20] sm:$0xff] }
  0x19   :  { %420 = vmatpush.bf16.msra.mxu1 %v768_v6  ;;  %469 = vmatpush.bf16.msra.mxu2 %v772_v7  ;;  %v68_v40 = vld [vmem:[%s1319_s2 + $0x30] sm:$0xff]  ;;  %v69_v42 = vld [vmem:[%s1319_s2 + $0x38] sm:$0xff]  ;;  %v67_v43 = vld [vmem:[%s1319_s2 + $0x28] sm:$0xff] }
  0x1a   :  { %518 = vmatpush.bf16.msra.mxu3 %v776_v11  ;;  %100 = vperm.xlu2 %900, %v66_v41   ;;  %v860_v44 = vld [vmem:[%s1320_s0 + $0x18] sm:$0xff]  ;;  %v71_v45 = vld [vmem:[%s1319_s2 + $0x48] sm:$0xff]  ;;  %v74_v46 = vld [vmem:[%s1319_s2 + $0x60] sm:$0xff] }
  0x1b   :  { %v861_v47 = vld [vmem:[%s1320_s0 + $0x20] sm:$0xff]  ;;  %v72_v48 = vld [vmem:[%s1319_s2 + $0x50] sm:$0xff]  ;;  %v77_v49 = vld [vmem:[%s1319_s2 + $0x78] sm:$0xff] }
  0x1c   :  { %372 = vmatpush.bf16.msra.mxu0 %v748_v19  ;;  %v70_v50 = vld [vmem:[%s1319_s2 + $0x40] sm:$0xff]  ;;  %v75_v51 = vld [vmem:[%s1319_s2 + $0x68] sm:$0xff]  ;;  %v73_v53 = vld [vmem:[%s1319_s2 + $0x58] sm:$0xff] }
  0x1d   :  { %421 = vmatpush.bf16.msra.mxu1 %v752_v20  ;;  %470 = vmatpush.bf16.msra.mxu2 %v756_v21  ;;  %v862_v52 = vld [vmem:[%s1320_s0 + $0x28] sm:$0xff]  ;;  %v863_v54 = vld [vmem:[%s1320_s0 + $0x30] sm:$0xff]  ;;  %v864_v56 = vld [vmem:[%s1320_s0 + $0x38] sm:$0xff] }
  0x1e   :  { %519 = vmatpush.bf16.msra.mxu3 %v760_v25  ;;  %v76_v55 = vld [vmem:[%s1319_s2 + $0x70] sm:$0xff]  ;;  %vm1189_vm2 = vmor %vm660_vm1, %vm659_vm0 }
  0x1f   :  { %85 = vperm.xlu0 %898, %v63_v34   ;;  %95 = vperm.xlu1 %899, %v65_v37  }
  0x20   :  { %373 = vmatpush.bf16.msra.mxu0 %v732_v31 }
  0x21   :  { %422 = vmatpush.bf16.msra.mxu1 %v736_v32  ;;  %471 = vmatpush.bf16.msra.mxu2 %v740_v33 }
  0x22   :  { %520 = vmatpush.bf16.msra.mxu3 %v744_v35  ;;  %105 = vperm.xlu2 %900, %v67_v43  }
  0x23   :  { %374 = vmatmul.bf16.vlgmr.msra.gmra.mxu0 %v857_v36 }
  0x24   :  { %423 = vmatmul.bf16.vlgmr.msra.gmra.mxu1 %v857_v36  ;;  %472 = vmatmul.bf16.vlgmr.msra.gmra.mxu2 %v857_v36 }
  0x25   :  { %521 = vmatmul.bf16.vlgmr.msra.gmra.mxu3 %v857_v36 }
  0x27   :  { %110 = vperm.xlu0 %898, %v68_v40   ;;  %115 = vperm.xlu1 %899, %v69_v42  }
  0x2a   :  { %120 = vperm.xlu2 %900, %v70_v50  }
  0x2f   :  { %125 = vperm.xlu0 %898, %v71_v45   ;;  %130 = vperm.xlu1 %899, %v72_v48  }
  0x32   :  { %135 = vperm.xlu2 %900, %v73_v53  }
  0x33   :  { %379 = vmatmul.bf16.gmra.mxu0 %v858_v38 }
  0x34   :  { %428 = vmatmul.bf16.gmra.mxu1 %v858_v38  ;;  %477 = vmatmul.bf16.gmra.mxu2 %v858_v38 }
  0x35   :  { %526 = vmatmul.bf16.gmra.mxu3 %v858_v38 }
  0x37   :  { %140 = vperm.xlu0 %898, %v74_v46   ;;  %145 = vperm.xlu1 %899, %v75_v51  }
  0x3a   :  { %150 = vperm.xlu2 %900, %v76_v55  }
  0x3f   :  { %155 = vperm.xlu0 %898, %v77_v49  }
  0x43   :  { %384 = vmatmul.bf16.gmra.mxu0 %v859_v39 }
  0x44   :  { %433 = vmatmul.bf16.gmra.mxu1 %v859_v39  ;;  %482 = vmatmul.bf16.gmra.mxu2 %v859_v39 }
  0x45   :  { %531 = vmatmul.bf16.gmra.mxu3 %v859_v39 }
  0x53   :  { %389 = vmatmul.bf16.gmra.mxu0 %v860_v44 }
  0x54   :  { %438 = vmatmul.bf16.gmra.mxu1 %v860_v44  ;;  %487 = vmatmul.bf16.gmra.mxu2 %v860_v44 }
  0x55   :  { %536 = vmatmul.bf16.gmra.mxu3 %v860_v44 }
  0x63   :  { %394 = vmatmul.bf16.gmra.mxu0 %v861_v47 }
  0x64   :  { %443 = vmatmul.bf16.gmra.mxu1 %v861_v47  ;;  %492 = vmatmul.bf16.gmra.mxu2 %v861_v47 }
  0x65   :  { %541 = vmatmul.bf16.gmra.mxu3 %v861_v47 }
  0x73   :  { %399 = vmatmul.bf16.gmra.mxu0 %v862_v52 }
  0x74   :  { %448 = vmatmul.bf16.gmra.mxu1 %v862_v52  ;;  %497 = vmatmul.bf16.gmra.mxu2 %v862_v52  ;;  %v101_v45 = vpop.permute.xlu2 %100 }
  0x75   :  { %546 = vmatmul.bf16.gmra.mxu3 %v862_v52 }
  0x83   :  { %404 = vmatmul.bf16.gmra.mxu0 %v863_v54 }
  0x84   :  { %453 = vmatmul.bf16.gmra.mxu1 %v863_v54  ;;  %502 = vmatmul.bf16.gmra.mxu2 %v863_v54 }
  0x85   :  { %551 = vmatmul.bf16.gmra.mxu3 %v863_v54 }
  0x89   :  { %v81_v57 = vpop.permute.xlu0 %80  ;;  %v91_v15 = vpop.permute.xlu1 %90 }
  0x91   :  { %v86_v1 = vpop.permute.xlu0 %85  ;;  %v96_v32 = vpop.permute.xlu1 %95 }
  0x93   :  { %409 = vmatmul.bf16.gmra.mxu0 %v864_v56 }
  0x94   :  { %458 = vmatmul.bf16.gmra.mxu1 %v864_v56  ;;  %507 = vmatmul.bf16.gmra.mxu2 %v864_v56 }
  0x95   :  { %556 = vmatmul.bf16.gmra.mxu3 %v864_v56 }
  0xa0   :  { %v375_v58 = vpop.f32.mrf.mxu0 }
  0xa1   :  { %v376_v59 = vadd.f32 %v375_v58, %v81_v57  ;;  %v424_v60 = vpop.f32.mrf.mxu1 }
  0xa2   :  { %v425_v61 = vadd.f32 %v424_v60, %v81_v57 }
  0xa3   :  { %v562_v62 = vmax.f32 %v376_v59, 0.0 }
  0xa4   :  { %v563_v63 = vmax.f32 %v425_v61, 0.0 }
  0xa6   :  { %v626_v0 = vpack.c.bf16 %v563_v63, %v562_v62  ;;  %v106_v62 = vpop.permute.xlu2 %105 }
  0xa7   :  { %v473_v2 = vpop.f32.mrf.mxu2 }
  0xa8   :  { %658 = vst [vmem:[%s1321_s3] sm:$0xff] %v626_v0  ;;  %v474_v3 = vadd.f32 %v473_v2, %v81_v57  ;;  %v522_v4 = vpop.f32.mrf.mxu3  ;;  %v377_v5 = vpop.f32.mrf.mxu0 }
  0xa9   :  { %v523_v6 = vadd.f32 %v522_v4, %v81_v57  ;;  %v378_v7 = vadd.f32 %v377_v5, %v86_v1  ;;  %v426_v8 = vpop.f32.mrf.mxu1 }
  0xaa   :  { %v564_v9 = vmax.f32 %v474_v3, 0.0  ;;  %v427_v10 = vadd.f32 %v426_v8, %v86_v1 }
  0xab   :  { %v565_v11 = vmax.f32 %v523_v6, 0.0  ;;  %v566_v12 = vmax.f32 %v378_v7, 0.0 }
  0xac   :  { %v567_v14 = vmax.f32 %v427_v10, 0.0 }
  0xad   :  { %v627_v16 = vpack.c.bf16 %v565_v11, %v564_v9 }
  0xae   :  { %v628_v17 = vpack.c.bf16 %v567_v14, %v566_v12  ;;  %v111_v14 = vpop.permute.xlu0 %110 }
  0xaf   :  { %662 = vst.msk [vmem:[%s1321_s3 + $0x8] sm:$0xff] %vm1189_vm2, %v627_v16  ;;  %v475_v18 = vpop.f32.mrf.mxu2 }
  0xb0   :  { %663 = vst [vmem:[%s1321_s3 + $0x10] sm:$0xff] %v628_v17  ;;  %v476_v19 = vadd.f32 %v475_v18, %v86_v1  ;;  %v524_v20 = vpop.f32.mrf.mxu3  ;;  %v380_v21 = vpop.f32.mrf.mxu0 }
  0xb1   :  { %v525_v22 = vadd.f32 %v524_v20, %v86_v1  ;;  %v381_v23 = vadd.f32 %v380_v21, %v91_v15  ;;  %v429_v24 = vpop.f32.mrf.mxu1 }
  0xb2   :  { %v568_v25 = vmax.f32 %v476_v19, 0.0  ;;  %v430_v26 = vadd.f32 %v429_v24, %v91_v15 }
  0xb3   :  { %v569_v27 = vmax.f32 %v525_v22, 0.0  ;;  %v570_v28 = vmax.f32 %v381_v23, 0.0 }
  0xb4   :  { %v571_v29 = vmax.f32 %v430_v26, 0.0 }
  0xb5   :  { %v629_v30 = vpack.c.bf16 %v569_v27, %v568_v25 }
  0xb6   :  { %v630_v31 = vpack.c.bf16 %v571_v29, %v570_v28  ;;  %v116_v29 = vpop.permute.xlu1 %115 }
  0xb7   :  { %664 = vst.msk [vmem:[%s1321_s3 + $0x18] sm:$0xff] %vm1189_vm2, %v629_v30  ;;  %v478_v33 = vpop.f32.mrf.mxu2 }
  0xb8   :  { %665 = vst [vmem:[%s1321_s3 + $0x20] sm:$0xff] %v630_v31  ;;  %v479_v34 = vadd.f32 %v478_v33, %v91_v15  ;;  %v527_v35 = vpop.f32.mrf.mxu3  ;;  %v382_v36 = vpop.f32.mrf.mxu0 }
  0xb9   :  { %v528_v37 = vadd.f32 %v527_v35, %v91_v15  ;;  %v383_v38 = vadd.f32 %v382_v36, %v96_v32  ;;  %v431_v39 = vpop.f32.mrf.mxu1 }
  0xba   :  { %v572_v40 = vmax.f32 %v479_v34, 0.0  ;;  %v432_v41 = vadd.f32 %v431_v39, %v96_v32 }
  0xbb   :  { %v573_v42 = vmax.f32 %v528_v37, 0.0  ;;  %v574_v43 = vmax.f32 %v383_v38, 0.0 }
  0xbc   :  { %v575_v44 = vmax.f32 %v432_v41, 0.0 }
  0xbd   :  { %v631_v46 = vpack.c.bf16 %v573_v42, %v572_v40 }
  0xbe   :  { %v632_v47 = vpack.c.bf16 %v575_v44, %v574_v43  ;;  %v121_v44 = vpop.permute.xlu2 %120 }
  0xbf   :  { %666 = vst.msk [vmem:[%s1321_s3 + $0x28] sm:$0xff] %vm1189_vm2, %v631_v46  ;;  %v480_v48 = vpop.f32.mrf.mxu2 }
  0xc0   :  { %667 = vst [vmem:[%s1321_s3 + $0x30] sm:$0xff] %v632_v47  ;;  %v481_v49 = vadd.f32 %v480_v48, %v96_v32  ;;  %v529_v50 = vpop.f32.mrf.mxu3  ;;  %v385_v51 = vpop.f32.mrf.mxu0 }
  0xc1   :  { %v530_v52 = vadd.f32 %v529_v50, %v96_v32  ;;  %v386_v53 = vadd.f32 %v385_v51, %v101_v45  ;;  %v434_v54 = vpop.f32.mrf.mxu1 }
  0xc2   :  { %v576_v55 = vmax.f32 %v481_v49, 0.0  ;;  %v435_v56 = vadd.f32 %v434_v54, %v101_v45 }
  0xc3   :  { %v577_v57 = vmax.f32 %v530_v52, 0.0  ;;  %v578_v58 = vmax.f32 %v386_v53, 0.0 }
  0xc4   :  { %v579_v59 = vmax.f32 %v435_v56, 0.0 }
  0xc5   :  { %v633_v60 = vpack.c.bf16 %v577_v57, %v576_v55 }
  0xc6   :  { %v634_v61 = vpack.c.bf16 %v579_v59, %v578_v58  ;;  %v126_v59 = vpop.permute.xlu0 %125 }
  0xc7   :  { %668 = vst.msk [vmem:[%s1321_s3 + $0x38] sm:$0xff] %vm1189_vm2, %v633_v60  ;;  %v483_v63 = vpop.f32.mrf.mxu2 }
  0xc8   :  { %669 = vst [vmem:[%s1321_s3 + $0x40] sm:$0xff] %v634_v61  ;;  %v484_v0 = vadd.f32 %v483_v63, %v101_v45  ;;  %v532_v1 = vpop.f32.mrf.mxu3  ;;  %v387_v2 = vpop.f32.mrf.mxu0 }
  0xc9   :  { %v533_v3 = vadd.f32 %v532_v1, %v101_v45  ;;  %v388_v4 = vadd.f32 %v387_v2, %v106_v62  ;;  %v436_v5 = vpop.f32.mrf.mxu1 }
  0xca   :  { %v580_v6 = vmax.f32 %v484_v0, 0.0  ;;  %v437_v7 = vadd.f32 %v436_v5, %v106_v62 }
  0xcb   :  { %v581_v8 = vmax.f32 %v533_v3, 0.0  ;;  %v582_v9 = vmax.f32 %v388_v4, 0.0 }
  0xcc   :  { %v583_v10 = vmax.f32 %v437_v7, 0.0 }
  0xcd   :  { %v635_v11 = vpack.c.bf16 %v581_v8, %v580_v6 }
  0xce   :  { %v636_v12 = vpack.c.bf16 %v583_v10, %v582_v9  ;;  %v131_v10 = vpop.permute.xlu1 %130 }
  0xcf   :  { %670 = vst.msk [vmem:[%s1321_s3 + $0x48] sm:$0xff] %vm1189_vm2, %v635_v11  ;;  %v485_v15 = vpop.f32.mrf.mxu2 }
  0xd0   :  { %671 = vst [vmem:[%s1321_s3 + $0x50] sm:$0xff] %v636_v12  ;;  %v486_v16 = vadd.f32 %v485_v15, %v106_v62  ;;  %v534_v17 = vpop.f32.mrf.mxu3  ;;  %v390_v18 = vpop.f32.mrf.mxu0 }
  0xd1   :  { %v535_v19 = vadd.f32 %v534_v17, %v106_v62  ;;  %v439_v20 = vpop.f32.mrf.mxu1  ;;  %v391_v21 = vadd.f32 %v390_v18, %v111_v14 }
  0xd2   :  { %v584_v22 = vmax.f32 %v486_v16, 0.0  ;;  %v440_v23 = vadd.f32 %v439_v20, %v111_v14 }
  0xd3   :  { %v585_v24 = vmax.f32 %v535_v19, 0.0  ;;  %v586_v25 = vmax.f32 %v391_v21, 0.0 }
  0xd4   :  { %v587_v26 = vmax.f32 %v440_v23, 0.0 }
  0xd5   :  { %v637_v27 = vpack.c.bf16 %v585_v24, %v584_v22 }
  0xd6   :  { %v638_v28 = vpack.c.bf16 %v587_v26, %v586_v25  ;;  %v136_v26 = vpop.permute.xlu2 %135 }
  0xd7   :  { %672 = vst.msk [vmem:[%s1321_s3 + $0x58] sm:$0xff] %vm1189_vm2, %v637_v27  ;;  %v488_v30 = vpop.f32.mrf.mxu2 }
  0xd8   :  { %673 = vst [vmem:[%s1321_s3 + $0x60] sm:$0xff] %v638_v28  ;;  %v489_v31 = vadd.f32 %v488_v30, %v111_v14  ;;  %v537_v32 = vpop.f32.mrf.mxu3  ;;  %v392_v33 = vpop.f32.mrf.mxu0 }
  0xd9   :  { %v538_v34 = vadd.f32 %v537_v32, %v111_v14  ;;  %v393_v35 = vadd.f32 %v392_v33, %v116_v29  ;;  %v441_v36 = vpop.f32.mrf.mxu1 }
  0xda   :  { %v588_v37 = vmax.f32 %v489_v31, 0.0  ;;  %v442_v38 = vadd.f32 %v441_v36, %v116_v29 }
  0xdb   :  { %v589_v39 = vmax.f32 %v538_v34, 0.0  ;;  %v590_v40 = vmax.f32 %v393_v35, 0.0 }
  0xdc   :  { %v591_v41 = vmax.f32 %v442_v38, 0.0 }
  0xdd   :  { %v639_v42 = vpack.c.bf16 %v589_v39, %v588_v37 }
  0xde   :  { %v640_v43 = vpack.c.bf16 %v591_v41, %v590_v40  ;;  %v141_v41 = vpop.permute.xlu0 %140 }
  0xdf   :  { %674 = vst.msk [vmem:[%s1321_s3 + $0x68] sm:$0xff] %vm1189_vm2, %v639_v42  ;;  %v490_v45 = vpop.f32.mrf.mxu2 }
  0xe0   :  { %675 = vst [vmem:[%s1321_s3 + $0x70] sm:$0xff] %v640_v43  ;;  %v491_v46 = vadd.f32 %v490_v45, %v116_v29  ;;  %v539_v47 = vpop.f32.mrf.mxu3  ;;  %v395_v48 = vpop.f32.mrf.mxu0 }
  0xe1   :  { %v540_v49 = vadd.f32 %v539_v47, %v116_v29  ;;  %v444_v50 = vpop.f32.mrf.mxu1  ;;  %v396_v51 = vadd.f32 %v395_v48, %v121_v44 }
  0xe2   :  { %v592_v52 = vmax.f32 %v491_v46, 0.0  ;;  %v445_v53 = vadd.f32 %v444_v50, %v121_v44 }
  0xe3   :  { %v593_v54 = vmax.f32 %v540_v49, 0.0  ;;  %v594_v55 = vmax.f32 %v396_v51, 0.0 }
  0xe4   :  { %v595_v56 = vmax.f32 %v445_v53, 0.0 }
  0xe5   :  { %v641_v57 = vpack.c.bf16 %v593_v54, %v592_v52 }
  0xe6   :  { %v642_v58 = vpack.c.bf16 %v595_v56, %v594_v55  ;;  %v146_v56 = vpop.permute.xlu1 %145 }
  0xe7   :  { %676 = vst.msk [vmem:[%s1321_s3 + $0x78] sm:$0xff] %vm1189_vm2, %v641_v57  ;;  %v493_v60 = vpop.f32.mrf.mxu2 }
  0xe8   :  { %677 = vst [vmem:[%s1321_s3 + $0x80] sm:$0xff] %v642_v58  ;;  %v494_v61 = vadd.f32 %v493_v60, %v121_v44  ;;  %v542_v62 = vpop.f32.mrf.mxu3  ;;  %v397_v63 = vpop.f32.mrf.mxu0 }
  0xe9   :  { %v543_v0 = vadd.f32 %v542_v62, %v121_v44  ;;  %v398_v1 = vadd.f32 %v397_v63, %v126_v59  ;;  %v446_v2 = vpop.f32.mrf.mxu1 }
  0xea   :  { %v596_v3 = vmax.f32 %v494_v61, 0.0  ;;  %v447_v4 = vadd.f32 %v446_v2, %v126_v59 }
  0xeb   :  { %v597_v5 = vmax.f32 %v543_v0, 0.0  ;;  %v598_v6 = vmax.f32 %v398_v1, 0.0 }
  0xec   :  { %v599_v7 = vmax.f32 %v447_v4, 0.0 }
  0xed   :  { %v643_v8 = vpack.c.bf16 %v597_v5, %v596_v3 }
  0xee   :  { %v644_v9 = vpack.c.bf16 %v599_v7, %v598_v6  ;;  %v151_v7 = vpop.permute.xlu2 %150 }
  0xef   :  { %678 = vst.msk [vmem:[%s1321_s3 + $0x88] sm:$0xff] %vm1189_vm2, %v643_v8  ;;  %v495_v11 = vpop.f32.mrf.mxu2 }
  0xf0   :  { %679 = vst [vmem:[%s1321_s3 + $0x90] sm:$0xff] %v644_v9  ;;  %v496_v12 = vadd.f32 %v495_v11, %v126_v59  ;;  %v544_v14 = vpop.f32.mrf.mxu3  ;;  %v400_v15 = vpop.f32.mrf.mxu0 }
  0xf1   :  { %v545_v16 = vadd.f32 %v544_v14, %v126_v59  ;;  %v449_v17 = vpop.f32.mrf.mxu1  ;;  %v401_v18 = vadd.f32 %v400_v15, %v131_v10 }
  0xf2   :  { %v600_v19 = vmax.f32 %v496_v12, 0.0  ;;  %v450_v20 = vadd.f32 %v449_v17, %v131_v10 }
  0xf3   :  { %v601_v21 = vmax.f32 %v545_v16, 0.0  ;;  %v602_v22 = vmax.f32 %v401_v18, 0.0 }
  0xf4   :  { %v603_v23 = vmax.f32 %v450_v20, 0.0 }
  0xf5   :  { %v645_v24 = vpack.c.bf16 %v601_v21, %v600_v19 }
  0xf6   :  { %v646_v25 = vpack.c.bf16 %v603_v23, %v602_v22  ;;  %v156_v23 = vpop.permute.xlu0 %155 }
  0xf7   :  { %680 = vst.msk [vmem:[%s1321_s3 + $0x98] sm:$0xff] %vm1189_vm2, %v645_v24  ;;  %v498_v27 = vpop.f32.mrf.mxu2 }
  0xf8   :  { %681 = vst [vmem:[%s1321_s3 + $0xa0] sm:$0xff] %v646_v25  ;;  %v499_v28 = vadd.f32 %v498_v27, %v131_v10  ;;  %v547_v29 = vpop.f32.mrf.mxu3  ;;  %v402_v30 = vpop.f32.mrf.mxu0 }
  0xf9   :  { %v548_v31 = vadd.f32 %v547_v29, %v131_v10  ;;  %v403_v32 = vadd.f32 %v402_v30, %v136_v26  ;;  %v451_v33 = vpop.f32.mrf.mxu1 }
  0xfa   :  { %v604_v34 = vmax.f32 %v499_v28, 0.0  ;;  %v452_v35 = vadd.f32 %v451_v33, %v136_v26 }
  0xfb   :  { %v605_v36 = vmax.f32 %v548_v31, 0.0  ;;  %v606_v37 = vmax.f32 %v403_v32, 0.0 }
  0xfc   :  { %v607_v38 = vmax.f32 %v452_v35, 0.0 }
  0xfd   :  { %v647_v39 = vpack.c.bf16 %v605_v36, %v604_v34 }
  0xfe   :  { %v648_v40 = vpack.c.bf16 %v607_v38, %v606_v37 }
  0xff   :  { %682 = vst.msk [vmem:[%s1321_s3 + $0xa8] sm:$0xff] %vm1189_vm2, %v647_v39  ;;  %v500_v42 = vpop.f32.mrf.mxu2 }
 0x100   :  { %683 = vst [vmem:[%s1321_s3 + $0xb0] sm:$0xff] %v648_v40  ;;  %v501_v43 = vadd.f32 %v500_v42, %v136_v26  ;;  %v549_v44 = vpop.f32.mrf.mxu3  ;;  %v405_v45 = vpop.f32.mrf.mxu0 }
 0x101   :  { %v550_v46 = vadd.f32 %v549_v44, %v136_v26  ;;  %v406_v47 = vadd.f32 %v405_v45, %v141_v41  ;;  %v454_v48 = vpop.f32.mrf.mxu1 }
 0x102   :  { %v608_v49 = vmax.f32 %v501_v43, 0.0  ;;  %v455_v50 = vadd.f32 %v454_v48, %v141_v41 }
 0x103   :  { %v609_v51 = vmax.f32 %v550_v46, 0.0  ;;  %v610_v52 = vmax.f32 %v406_v47, 0.0 }
 0x104   :  { %v611_v53 = vmax.f32 %v455_v50, 0.0 }
 0x105   :  { %v649_v54 = vpack.c.bf16 %v609_v51, %v608_v49 }
 0x106   :  { %v650_v55 = vpack.c.bf16 %v611_v53, %v610_v52 }
 0x107   :  { %684 = vst.msk [vmem:[%s1321_s3 + $0xb8] sm:$0xff] %vm1189_vm2, %v649_v54  ;;  %v503_v57 = vpop.f32.mrf.mxu2 }
 0x108   :  { %685 = vst [vmem:[%s1321_s3 + $0xc0] sm:$0xff] %v650_v55  ;;  %v504_v58 = vadd.f32 %v503_v57, %v141_v41  ;;  %v552_v59 = vpop.f32.mrf.mxu3  ;;  %v407_v60 = vpop.f32.mrf.mxu0 }
 0x109   :  { %v553_v61 = vadd.f32 %v552_v59, %v141_v41  ;;  %v408_v62 = vadd.f32 %v407_v60, %v146_v56  ;;  %v456_v63 = vpop.f32.mrf.mxu1 }
 0x10a   :  { %v612_v0 = vmax.f32 %v504_v58, 0.0  ;;  %v457_v1 = vadd.f32 %v456_v63, %v146_v56 }
 0x10b   :  { %v613_v2 = vmax.f32 %v553_v61, 0.0  ;;  %v614_v3 = vmax.f32 %v408_v62, 0.0 }
 0x10c   :  { %v615_v4 = vmax.f32 %v457_v1, 0.0 }
 0x10d   :  { %v651_v5 = vpack.c.bf16 %v613_v2, %v612_v0 }
 0x10e   :  { %v652_v6 = vpack.c.bf16 %v615_v4, %v614_v3 }
 0x10f   :  { %686 = vst.msk [vmem:[%s1321_s3 + $0xc8] sm:$0xff] %vm1189_vm2, %v651_v5  ;;  %v505_v8 = vpop.f32.mrf.mxu2 }
 0x110   :  { %687 = vst [vmem:[%s1321_s3 + $0xd0] sm:$0xff] %v652_v6  ;;  %v506_v9 = vadd.f32 %v505_v8, %v146_v56  ;;  %v554_v10 = vpop.f32.mrf.mxu3  ;;  %v410_v11 = vpop.f32.mrf.mxu0 }
 0x111   :  { %v555_v12 = vadd.f32 %v554_v10, %v146_v56  ;;  %v411_v14 = vadd.f32 %v410_v11, %v151_v7  ;;  %v459_v15 = vpop.f32.mrf.mxu1 }
 0x112   :  { %v616_v16 = vmax.f32 %v506_v9, 0.0  ;;  %v460_v17 = vadd.f32 %v459_v15, %v151_v7 }
 0x113   :  { %v617_v18 = vmax.f32 %v555_v12, 0.0  ;;  %v618_v19 = vmax.f32 %v411_v14, 0.0 }
 0x114   :  { %v619_v20 = vmax.f32 %v460_v17, 0.0 }
 0x115   :  { %v653_v21 = vpack.c.bf16 %v617_v18, %v616_v16 }
 0x116   :  { %v654_v22 = vpack.c.bf16 %v619_v20, %v618_v19 }
 0x117   :  { %688 = vst.msk [vmem:[%s1321_s3 + $0xd8] sm:$0xff] %vm1189_vm2, %v653_v21  ;;  %v508_v24 = vpop.f32.mrf.mxu2 }
 0x118   :  { %689 = vst [vmem:[%s1321_s3 + $0xe0] sm:$0xff] %v654_v22  ;;  %v509_v25 = vadd.f32 %v508_v24, %v151_v7  ;;  %v557_v26 = vpop.f32.mrf.mxu3  ;;  %v412_v27 = vpop.f32.mrf.mxu0 }
 0x119   :  { %v558_v28 = vadd.f32 %v557_v26, %v151_v7  ;;  %v413_v29 = vadd.f32 %v412_v27, %v156_v23  ;;  %v461_v30 = vpop.f32.mrf.mxu1 }
 0x11a   :  { %v620_v31 = vmax.f32 %v509_v25, 0.0  ;;  %v462_v32 = vadd.f32 %v461_v30, %v156_v23 }
 0x11b   :  { %v621_v33 = vmax.f32 %v558_v28, 0.0  ;;  %v622_v34 = vmax.f32 %v413_v29, 0.0 }
 0x11c   :  { %v623_v35 = vmax.f32 %v462_v32, 0.0 }
 0x11d   :  { %v655_v36 = vpack.c.bf16 %v621_v33, %v620_v31 }
 0x11e   :  { %v656_v37 = vpack.c.bf16 %v623_v35, %v622_v34 }
 0x11f   :  { %690 = vst.msk [vmem:[%s1321_s3 + $0xe8] sm:$0xff] %vm1189_vm2, %v655_v36  ;;  %v510_v38 = vpop.f32.mrf.mxu2 }
 0x120   :  { %691 = vst [vmem:[%s1321_s3 + $0xf0] sm:$0xff] %v656_v37  ;;  %v511_v39 = vadd.f32 %v510_v38, %v156_v23  ;;  %v559_v40 = vpop.f32.mrf.mxu3 }
 0x121   :  { %v560_v41 = vadd.f32 %v559_v40, %v156_v23 }
 0x122   :  { %v624_v42 = vmax.f32 %v511_v39, 0.0 }
 0x123   :  { %v625_v43 = vmax.f32 %v560_v41, 0.0 }
 0x125   :  { %v657_v44 = vpack.c.bf16 %v625_v43, %v624_v42 }
 0x127   :  { %692 = vst.msk [vmem:[%s1321_s3 + $0xf8] sm:$0xff] %vm1189_vm2, %v657_v44 }

// kernel: beta_vae_forward.17
= control target key start
LH: loop header
LB: loop body
LE: loop exit
PB: predicated region body
PF: predicated region fallthrough
CT: control target
= control target key end

     0   :  { %s1371_s12 = smov 0   ;;  %s1373_s13 = smov 0   ;;  %s1753_s0 = inlined_call_operand.vmem [shape: bf16[12,128], index: 0, kind: input, shape index: {}]   ;;  %s1754_s1 = inlined_call_operand.vmem [shape: bf16[128,2048], index: 1, kind: input, shape index: {}]   ;;  %s1755_s2 = inlined_call_operand.vmem [shape: f32[12,1], index: 2, kind: input, shape index: {}]   ;;  %s1756_s3 = inlined_call_operand.vmem [shape: f32[12,2048], index: 3, kind: output, shape index: {}]  }
   0x1   :  { %s1375_s14 = smov 0  }
   0x2 LB: > { %s958_s15 = sadd.s32 4294967295, %s1348_s14   ;;  %s1388_s16 = sadd.s32 1, %s1348_s14   ;;  %s1348_s14 = sphi %s1375_s14, %s1760_s14   ;;  %s1344_s13 = sphi %s1373_s13, %s1759_s13   ;;  %s1340_s12 = sphi %s1371_s12, %s1758_s12  }
   0x3   : > { %s38_s17 = ssub.s32 %s1348_s14, %s1388_s16  ;;  %s41_s18 = sadd.s32 1, %s1344_s13 }
   0x4   : > { %p39_p0 = scmp.eq.s32.totalorder %s38_s17, 0  ;;  %p48_p1 = scmp.ne.s32.totalorder %s1344_s13, %s1340_s12 }
   0x5   : > { %p49_p2 = scmp.eq.s32.totalorder %s1348_s14, 0  ;;  %p99_p3 = scmp.eq.s32.totalorder %s958_s15, 1 }
   0x6   : > { %s1399_s19 = scalar_select %p39_p0, %s1344_s13, %s41_s18  }
   0x7   : > { %p50_p4 = por %p49_p2, %p48_p1  ;;  %p1401_p5 = por %p99_p3, %p48_p1 }
   0x8   : > { %p961_p6 = scmp.ge.s32.totalorder %s1348_s14, 2 }
   0xa   : > { %127 = sbr.rel (%p961_p6) target bundleno = 83 (0x53), region = 24 }
   0xf   : > { %130 = sbr.rel (!%p50_p4) target bundleno = 83 (0x53), region = 28  ;;  %s132_s21 = sand.u32 (%p50_p4), 1, %s1344_s13  }
  0x10   : > { %s1233_s22 = sshll.u32 (%p50_p4), %s1348_s14, 5  ;;  %s962_s23 = sshll.u32 (%p50_p4), %s132_s21, 9 }
  0x11   : > { %s1411_s26 = scalar_lea.vmem (%p50_p4), %s1754_s1, %s1233_s22  ;;  %s1416_s27 = scalar_lea.vmem (%p50_p4), [#allocation2], %s962_s23 }
  0x12   : > { %v150_v0 = vld [vmem:[%s1411_s26] sm:$0xff] (%p50_p4)  ;;  %v152_v1 = vld [vmem:[%s1411_s26 + $0x8] sm:$0xff] (%p50_p4)  ;;  %v154_v2 = vld [vmem:[%s1411_s26 + $0x10] sm:$0xff] (%p50_p4) }
  0x13   : > { %151 = vst [vmem:[%s1416_s27] sm:$0xff] (%p50_p4), %v150_v0  ;;  %v156_v3 = vld [vmem:[%s1411_s26 + $0x18] sm:$0xff] (%p50_p4)  ;;  %v158_v4 = vld [vmem:[%s1411_s26 + $0x40] sm:$0xff] (%p50_p4)  ;;  %v160_v5 = vld [vmem:[%s1411_s26 + $0x48] sm:$0xff] (%p50_p4) }
  0x14   : > { %153 = vst [vmem:[%s1416_s27 + $0x8] sm:$0xff] %v152_v1  ;;  %v162_v6 = vld [vmem:[%s1411_s26 + $0x50] sm:$0xff]  ;;  %v164_v7 = vld [vmem:[%s1411_s26 + $0x58] sm:$0xff]  ;;  %v166_v8 = vld [vmem:[%s1411_s26 + $0x80] sm:$0xff] }
  0x15   : > { %155 = vst [vmem:[%s1416_s27 + $0x10] sm:$0xff] %v154_v2  ;;  %v168_v9 = vld [vmem:[%s1411_s26 + $0x88] sm:$0xff]  ;;  %v170_v10 = vld [vmem:[%s1411_s26 + $0x90] sm:$0xff]  ;;  %v172_v11 = vld [vmem:[%s1411_s26 + $0x98] sm:$0xff] }
  0x16   : > { %157 = vst [vmem:[%s1416_s27 + $0x18] sm:$0xff] %v156_v3  ;;  %v174_v12 = vld [vmem:[%s1411_s26 + $0xc0] sm:$0xff]  ;;  %v176_v13 = vld [vmem:[%s1411_s26 + $0xc8] sm:$0xff]  ;;  %v178_v14 = vld [vmem:[%s1411_s26 + $0xd0] sm:$0xff] }
  0x17   : > { %159 = vst [vmem:[%s1416_s27 + $0x20] sm:$0xff] %v158_v4  ;;  %v180_v15 = vld [vmem:[%s1411_s26 + $0xd8] sm:$0xff]  ;;  %v182_v16 = vld [vmem:[%s1411_s26 + $0x100] sm:$0xff]  ;;  %v184_v17 = vld [vmem:[%s1411_s26 + $0x108] sm:$0xff] }
  0x18   : > { %161 = vst [vmem:[%s1416_s27 + $0x28] sm:$0xff] %v160_v5  ;;  %v186_v18 = vld [vmem:[%s1411_s26 + $0x110] sm:$0xff]  ;;  %v188_v19 = vld [vmem:[%s1411_s26 + $0x118] sm:$0xff]  ;;  %v190_v20 = vld [vmem:[%s1411_s26 + $0x140] sm:$0xff] }
  0x19   : > { %163 = vst [vmem:[%s1416_s27 + $0x30] sm:$0xff] %v162_v6  ;;  %v192_v21 = vld [vmem:[%s1411_s26 + $0x148] sm:$0xff]  ;;  %v194_v22 = vld [vmem:[%s1411_s26 + $0x150] sm:$0xff]  ;;  %v196_v23 = vld [vmem:[%s1411_s26 + $0x158] sm:$0xff] }
  0x1a   : > { %165 = vst [vmem:[%s1416_s27 + $0x38] sm:$0xff] %v164_v7  ;;  %v198_v24 = vld [vmem:[%s1411_s26 + $0x180] sm:$0xff]  ;;  %v200_v25 = vld [vmem:[%s1411_s26 + $0x188] sm:$0xff]  ;;  %v202_v26 = vld [vmem:[%s1411_s26 + $0x190] sm:$0xff] }
  0x1b   : > { %167 = vst [vmem:[%s1416_s27 + $0x40] sm:$0xff] %v166_v8  ;;  %v204_v27 = vld [vmem:[%s1411_s26 + $0x198] sm:$0xff]  ;;  %v206_v28 = vld [vmem:[%s1411_s26 + $0x1c0] sm:$0xff]  ;;  %v208_v29 = vld [vmem:[%s1411_s26 + $0x1c8] sm:$0xff] }
  0x1c   : > { %169 = vst [vmem:[%s1416_s27 + $0x48] sm:$0xff] %v168_v9  ;;  %v210_v30 = vld [vmem:[%s1411_s26 + $0x1d0] sm:$0xff]  ;;  %v212_v31 = vld [vmem:[%s1411_s26 + $0x1d8] sm:$0xff]  ;;  %v214_v32 = vld [vmem:[%s1411_s26 + $0x200] sm:$0xff] }
  0x1d   : > { %171 = vst [vmem:[%s1416_s27 + $0x50] sm:$0xff] %v170_v10  ;;  %v216_v33 = vld [vmem:[%s1411_s26 + $0x208] sm:$0xff]  ;;  %v218_v34 = vld [vmem:[%s1411_s26 + $0x210] sm:$0xff]  ;;  %v220_v35 = vld [vmem:[%s1411_s26 + $0x218] sm:$0xff] }
  0x1e   : > { %173 = vst [vmem:[%s1416_s27 + $0x58] sm:$0xff] %v172_v11  ;;  %v222_v36 = vld [vmem:[%s1411_s26 + $0x240] sm:$0xff]  ;;  %v224_v37 = vld [vmem:[%s1411_s26 + $0x248] sm:$0xff]  ;;  %v226_v38 = vld [vmem:[%s1411_s26 + $0x250] sm:$0xff] }
  0x1f   : > { %175 = vst [vmem:[%s1416_s27 + $0x60] sm:$0xff] %v174_v12  ;;  %v228_v39 = vld [vmem:[%s1411_s26 + $0x258] sm:$0xff]  ;;  %v230_v40 = vld [vmem:[%s1411_s26 + $0x280] sm:$0xff]  ;;  %v232_v41 = vld [vmem:[%s1411_s26 + $0x288] sm:$0xff] }
  0x20   : > { %177 = vst [vmem:[%s1416_s27 + $0x68] sm:$0xff] %v176_v13  ;;  %v234_v42 = vld [vmem:[%s1411_s26 + $0x290] sm:$0xff]  ;;  %v236_v43 = vld [vmem:[%s1411_s26 + $0x298] sm:$0xff]  ;;  %v238_v44 = vld [vmem:[%s1411_s26 + $0x2c0] sm:$0xff] }
  0x21   : > { %179 = vst [vmem:[%s1416_s27 + $0x70] sm:$0xff] %v178_v14  ;;  %v240_v45 = vld [vmem:[%s1411_s26 + $0x2c8] sm:$0xff]  ;;  %v242_v46 = vld [vmem:[%s1411_s26 + $0x2d0] sm:$0xff]  ;;  %v244_v47 = vld [vmem:[%s1411_s26 + $0x2d8] sm:$0xff] }
  0x22   : > { %181 = vst [vmem:[%s1416_s27 + $0x78] sm:$0xff] %v180_v15  ;;  %v246_v48 = vld [vmem:[%s1411_s26 + $0x300] sm:$0xff]  ;;  %v248_v49 = vld [vmem:[%s1411_s26 + $0x308] sm:$0xff]  ;;  %v250_v50 = vld [vmem:[%s1411_s26 + $0x310] sm:$0xff] }
  0x23   : > { %183 = vst [vmem:[%s1416_s27 + $0x80] sm:$0xff] %v182_v16  ;;  %v252_v51 = vld [vmem:[%s1411_s26 + $0x318] sm:$0xff]  ;;  %v254_v52 = vld [vmem:[%s1411_s26 + $0x340] sm:$0xff]  ;;  %v256_v53 = vld [vmem:[%s1411_s26 + $0x348] sm:$0xff] }
  0x24   : > { %185 = vst [vmem:[%s1416_s27 + $0x88] sm:$0xff] %v184_v17  ;;  %v258_v54 = vld [vmem:[%s1411_s26 + $0x350] sm:$0xff]  ;;  %v260_v55 = vld [vmem:[%s1411_s26 + $0x358] sm:$0xff]  ;;  %v262_v56 = vld [vmem:[%s1411_s26 + $0x380] sm:$0xff] }
  0x25   : > { %187 = vst [vmem:[%s1416_s27 + $0x90] sm:$0xff] %v186_v18  ;;  %v264_v57 = vld [vmem:[%s1411_s26 + $0x388] sm:$0xff]  ;;  %v266_v58 = vld [vmem:[%s1411_s26 + $0x390] sm:$0xff]  ;;  %v268_v59 = vld [vmem:[%s1411_s26 + $0x398] sm:$0xff] }
  0x26   : > { %189 = vst [vmem:[%s1416_s27 + $0x98] sm:$0xff] %v188_v19  ;;  %v270_v60 = vld [vmem:[%s1411_s26 + $0x3c0] sm:$0xff]  ;;  %v272_v61 = vld [vmem:[%s1411_s26 + $0x3c8] sm:$0xff]  ;;  %v274_v62 = vld [vmem:[%s1411_s26 + $0x3d0] sm:$0xff] }
  0x27   : > { %191 = vst [vmem:[%s1416_s27 + $0xa0] sm:$0xff] %v190_v20  ;;  %v276_v63 = vld [vmem:[%s1411_s26 + $0x3d8] sm:$0xff] }
  0x28   : > { %193 = vst [vmem:[%s1416_s27 + $0xa8] sm:$0xff] %v192_v21 }
  0x29   : > { %195 = vst [vmem:[%s1416_s27 + $0xb0] sm:$0xff] %v194_v22 }
  0x2a   : > { %197 = vst [vmem:[%s1416_s27 + $0xb8] sm:$0xff] %v196_v23 }
  0x2b   : > { %199 = vst [vmem:[%s1416_s27 + $0xc0] sm:$0xff] %v198_v24 }
  0x2c   : > { %201 = vst [vmem:[%s1416_s27 + $0xc8] sm:$0xff] %v200_v25 }
  0x2d   : > { %203 = vst [vmem:[%s1416_s27 + $0xd0] sm:$0xff] %v202_v26 }
  0x2e   : > { %205 = vst [vmem:[%s1416_s27 + $0xd8] sm:$0xff] %v204_v27 }
  0x2f   : > { %207 = vst [vmem:[%s1416_s27 + $0xe0] sm:$0xff] %v206_v28 }
  0x30   : > { %209 = vst [vmem:[%s1416_s27 + $0xe8] sm:$0xff] %v208_v29 }
  0x31   : > { %211 = vst [vmem:[%s1416_s27 + $0xf0] sm:$0xff] %v210_v30 }
  0x32   : > { %213 = vst [vmem:[%s1416_s27 + $0xf8] sm:$0xff] %v212_v31 }
  0x33   : > { %215 = vst [vmem:[%s1416_s27 + $0x100] sm:$0xff] %v214_v32 }
  0x34   : > { %217 = vst [vmem:[%s1416_s27 + $0x108] sm:$0xff] %v216_v33 }
  0x35   : > { %219 = vst [vmem:[%s1416_s27 + $0x110] sm:$0xff] %v218_v34 }
  0x36   : > { %221 = vst [vmem:[%s1416_s27 + $0x118] sm:$0xff] %v220_v35 }
  0x37   : > { %223 = vst [vmem:[%s1416_s27 + $0x120] sm:$0xff] %v222_v36 }
  0x38   : > { %225 = vst [vmem:[%s1416_s27 + $0x128] sm:$0xff] %v224_v37 }
  0x39   : > { %227 = vst [vmem:[%s1416_s27 + $0x130] sm:$0xff] %v226_v38 }
  0x3a   : > { %229 = vst [vmem:[%s1416_s27 + $0x138] sm:$0xff] %v228_v39 }
  0x3b   : > { %231 = vst [vmem:[%s1416_s27 + $0x140] sm:$0xff] %v230_v40 }
  0x3c   : > { %233 = vst [vmem:[%s1416_s27 + $0x148] sm:$0xff] %v232_v41 }
  0x3d   : > { %235 = vst [vmem:[%s1416_s27 + $0x150] sm:$0xff] %v234_v42 }
  0x3e   : > { %237 = vst [vmem:[%s1416_s27 + $0x158] sm:$0xff] %v236_v43 }
  0x3f   : > { %239 = vst [vmem:[%s1416_s27 + $0x160] sm:$0xff] %v238_v44 }
  0x40   : > { %241 = vst [vmem:[%s1416_s27 + $0x168] sm:$0xff] %v240_v45 }
  0x41   : > { %243 = vst [vmem:[%s1416_s27 + $0x170] sm:$0xff] %v242_v46 }
  0x42   : > { %245 = vst [vmem:[%s1416_s27 + $0x178] sm:$0xff] %v244_v47 }
  0x43   : > { %247 = vst [vmem:[%s1416_s27 + $0x180] sm:$0xff] %v246_v48 }
  0x44   : > { %249 = vst [vmem:[%s1416_s27 + $0x188] sm:$0xff] %v248_v49 }
  0x45   : > { %251 = vst [vmem:[%s1416_s27 + $0x190] sm:$0xff] %v250_v50 }
  0x46   : > { %253 = vst [vmem:[%s1416_s27 + $0x198] sm:$0xff] %v252_v51 }
  0x47   : > { %255 = vst [vmem:[%s1416_s27 + $0x1a0] sm:$0xff] %v254_v52 }
  0x48   : > { %257 = vst [vmem:[%s1416_s27 + $0x1a8] sm:$0xff] %v256_v53 }
  0x49   : > { %259 = vst [vmem:[%s1416_s27 + $0x1b0] sm:$0xff] %v258_v54 }
  0x4a   : > { %261 = vst [vmem:[%s1416_s27 + $0x1b8] sm:$0xff] %v260_v55 }
  0x4b   : > { %263 = vst [vmem:[%s1416_s27 + $0x1c0] sm:$0xff] %v262_v56 }
  0x4c   : > { %265 = vst [vmem:[%s1416_s27 + $0x1c8] sm:$0xff] %v264_v57 }
  0x4d   : > { %267 = vst [vmem:[%s1416_s27 + $0x1d0] sm:$0xff] %v266_v58 }
  0x4e   : > { %269 = vst [vmem:[%s1416_s27 + $0x1d8] sm:$0xff] %v268_v59 }
  0x4f   : > { %271 = vst [vmem:[%s1416_s27 + $0x1e0] sm:$0xff] %v270_v60 }
  0x50   : > { %273 = vst [vmem:[%s1416_s27 + $0x1e8] sm:$0xff] %v272_v61 }
  0x51   : > { %275 = vst [vmem:[%s1416_s27 + $0x1f0] sm:$0xff] %v274_v62 }
  0x52   : > { %277 = vst [vmem:[%s1416_s27 + $0x1f8] sm:$0xff] %v276_v63 }
  0x53 PF: > { %p965_p7 = scmp.ge.s32.totalorder %s1348_s14, 1  ;;  %p282_p8 = scmp.lt.s32.totalorder %s1348_s14, 3 }
  0x55   : > { %p283_p9 = pnand %p965_p7, %p282_p8 }
  0x56   : > { %s289_s28 = sand.u32 (!%p283_p9), 1, %s1340_s12  }
  0x57   : > { %286 = sbr.rel (%p283_p9) target bundleno = 312 (0x138), region = 51  ;;  %s966_s29 = sshll.u32 (!%p283_p9), %s289_s28, 9 }
  0x58   : > { %s1548_s30 = scalar_lea.vmem (!%p283_p9), [#allocation2], %s966_s29  ;;  %s967_s17 = sshll.u32 (!%p283_p9), %s289_s28, 7 }
  0x59   : > { %s1702_s18 = scalar_lea.vmem (!%p283_p9), [#allocation3], %s967_s17 }
  0x5c   : > { %v1198_v0 = vld [vmem:[%s1548_s30 + $0x1c0] sm:$0xf]  ;;  %v1291_v2 = vld [vmem:[%s1548_s30 + $0x1c4] sm:$0xf]  ;;  %v1206_v5 = vld [vmem:[%s1548_s30 + $0x1c8] sm:$0xf] }
  0x5d   : > { %v1295_v1 = vld [vmem:[%s1548_s30 + $0x1dc] sm:$0xf0]  ;;  %v1200_v4 = vld [vmem:[%s1548_s30 + $0x1e0] sm:$0xf0]  ;;  %v1296_v6 = vld [vmem:[%s1548_s30 + $0x1e4] sm:$0xf0] }
  0x5e   : > { %v1199_v3 = vor.u32 %v1295_v1, %v1198_v0  ;;  %v1203_v7 = vor.u32 %v1291_v2, %v1200_v4  ;;  %v1207_v8 = vor.u32 %v1296_v6, %v1206_v5  ;;  %v1292_v9 = vld [vmem:[%s1548_s30 + $0x1cc] sm:$0xf]  ;;  %v1166_v11 = vld [vmem:[%s1548_s30 + $0x180] sm:$0xf]  ;;  %v1283_v14 = vld [vmem:[%s1548_s30 + $0x184] sm:$0xf] }
  0x5f   : > { %v1208_v10 = vld [vmem:[%s1548_s30 + $0x1e8] sm:$0xf0]  ;;  %v1287_v13 = vld [vmem:[%s1548_s30 + $0x19c] sm:$0xf0]  ;;  %v1168_v15 = vld [vmem:[%s1548_s30 + $0x1a0] sm:$0xf0] }
  0x60   : > { %717 = vmatpush.bf16.msra.mxu0 %v1199_v3  ;;  %v1211_v12 = vor.u32 %v1292_v9, %v1208_v10  ;;  %731 = vmatpush.bf16.msra.mxu1 %v1203_v7  ;;  %v1167_v16 = vor.u32 %v1287_v13, %v1166_v11  ;;  %v1171_v17 = vor.u32 %v1283_v14, %v1168_v15  ;;  %v1174_v18 = vld [vmem:[%s1548_s30 + $0x188] sm:$0xf]  ;;  %v1284_v20 = vld [vmem:[%s1548_s30 + $0x18c] sm:$0xf]  ;;  %v1134_v23 = vld [vmem:[%s1548_s30 + $0x140] sm:$0xf] }
  0x61   : > { %745 = vmatpush.bf16.msra.mxu2 %v1207_v8  ;;  %v1288_v19 = vld [vmem:[%s1548_s30 + $0x1a4] sm:$0xf0]  ;;  %v1176_v22 = vld [vmem:[%s1548_s30 + $0x1a8] sm:$0xf0]  ;;  %v1279_v24 = vld [vmem:[%s1548_s30 + $0x15c] sm:$0xf0] }
  0x62   : > { %759 = vmatpush.bf16.msra.mxu3 %v1211_v12  ;;  %v1175_v21 = vor.u32 %v1288_v19, %v1174_v18  ;;  %v1179_v25 = vor.u32 %v1284_v20, %v1176_v22  ;;  %v1275_v26 = vld [vmem:[%s1548_s30 + $0x144] sm:$0xf]  ;;  %v1142_v28 = vld [vmem:[%s1548_s30 + $0x148] sm:$0xf]  ;;  %v1135_v29 = vor.u32 %v1279_v24, %v1134_v23  ;;  %v1276_v31 = vld [vmem:[%s1548_s30 + $0x14c] sm:$0xf] }
  0x63   : > { %v1136_v27 = vld [vmem:[%s1548_s30 + $0x160] sm:$0xf0]  ;;  %v1280_v30 = vld [vmem:[%s1548_s30 + $0x164] sm:$0xf0]  ;;  %v1144_v32 = vld [vmem:[%s1548_s30 + $0x168] sm:$0xf0] }
  0x64   : > { %718 = vmatpush.bf16.msra.mxu0 %v1167_v16  ;;  %732 = vmatpush.bf16.msra.mxu1 %v1171_v17  ;;  %v1139_v33 = vor.u32 %v1275_v26, %v1136_v27  ;;  %v1143_v34 = vor.u32 %v1280_v30, %v1142_v28  ;;  %v1102_v35 = vld [vmem:[%s1548_s30 + $0x100] sm:$0xf]  ;;  %v1267_v37 = vld [vmem:[%s1548_s30 + $0x104] sm:$0xf]  ;;  %v1147_v38 = vor.u32 %v1276_v31, %v1144_v32  ;;  %v1110_v40 = vld [vmem:[%s1548_s30 + $0x108] sm:$0xf] }
  0x65   : > { %746 = vmatpush.bf16.msra.mxu2 %v1175_v21  ;;  %v1271_v36 = vld [vmem:[%s1548_s30 + $0x11c] sm:$0xf0]  ;;  %v1104_v39 = vld [vmem:[%s1548_s30 + $0x120] sm:$0xf0]  ;;  %v1272_v41 = vld [vmem:[%s1548_s30 + $0x124] sm:$0xf0] }
  0x66   : > { %760 = vmatpush.bf16.msra.mxu3 %v1179_v25  ;;  %v1268_v42 = vld [vmem:[%s1548_s30 + $0x10c] sm:$0xf]  ;;  %v1103_v44 = vor.u32 %v1271_v36, %v1102_v35  ;;  %v1107_v45 = vor.u32 %v1267_v37, %v1104_v39  ;;  %v1111_v46 = vor.u32 %v1272_v41, %v1110_v40  ;;  %v1070_v47 = vld [vmem:[%s1548_s30 + $0xc0] sm:$0xf]  ;;  %v1259_v49 = vld [vmem:[%s1548_s30 + $0xc4] sm:$0xf] }
  0x67   : > { %v1112_v43 = vld [vmem:[%s1548_s30 + $0x128] sm:$0xf0]  ;;  %v1263_v48 = vld [vmem:[%s1548_s30 + $0xdc] sm:$0xf0]  ;;  %v1072_v51 = vld [vmem:[%s1548_s30 + $0xe0] sm:$0xf0] }
  0x68   : > { %719 = vmatpush.bf16.msra.mxu0 %v1135_v29  ;;  %733 = vmatpush.bf16.msra.mxu1 %v1139_v33  ;;  %v1115_v50 = vor.u32 %v1268_v42, %v1112_v43  ;;  %v1078_v52 = vld [vmem:[%s1548_s30 + $0xc8] sm:$0xf]  ;;  %v1260_v54 = vld [vmem:[%s1548_s30 + $0xcc] sm:$0xf]  ;;  %v1071_v56 = vor.u32 %v1263_v48, %v1070_v47  ;;  %v1075_v57 = vor.u32 %v1259_v49, %v1072_v51  ;;  %v1038_v59 = vld [vmem:[%s1548_s30 + $0x80] sm:$0xf] }
  0x69   : > { %747 = vmatpush.bf16.msra.mxu2 %v1143_v34  ;;  %v1264_v53 = vld [vmem:[%s1548_s30 + $0xe4] sm:$0xf0]  ;;  %v1080_v55 = vld [vmem:[%s1548_s30 + $0xe8] sm:$0xf0]  ;;  %v1255_v60 = vld [vmem:[%s1548_s30 + $0x9c] sm:$0xf0] }
  0x6a   : > { %761 = vmatpush.bf16.msra.mxu3 %v1147_v38  ;;  %v1079_v58 = vor.u32 %v1264_v53, %v1078_v52  ;;  %v1251_v61 = vld [vmem:[%s1548_s30 + $0x84] sm:$0xf]  ;;  %v1083_v62 = vor.u32 %v1260_v54, %v1080_v55  ;;  %v1046_v0 = vld [vmem:[%s1548_s30 + $0x88] sm:$0xf]  ;;  %v1252_v2 = vld [vmem:[%s1548_s30 + $0x8c] sm:$0xf]  ;;  %v1039_v4 = vor.u32 %v1255_v60, %v1038_v59 }
  0x6b   : > { %v1040_v63 = vld [vmem:[%s1548_s30 + $0xa0] sm:$0xf0]  ;;  %v1256_v1 = vld [vmem:[%s1548_s30 + $0xa4] sm:$0xf0]  ;;  %v1048_v3 = vld [vmem:[%s1548_s30 + $0xa8] sm:$0xf0] }
  0x6c   : > { %720 = vmatpush.bf16.msra.mxu0 %v1103_v44  ;;  %734 = vmatpush.bf16.msra.mxu1 %v1107_v45  ;;  %v1043_v5 = vor.u32 %v1251_v61, %v1040_v63  ;;  %v1047_v6 = vor.u32 %v1256_v1, %v1046_v0  ;;  %v1006_v7 = vld [vmem:[%s1548_s30 + $0x40] sm:$0xf]  ;;  %v1243_v9 = vld [vmem:[%s1548_s30 + $0x44] sm:$0xf]  ;;  %v1051_v10 = vor.u32 %v1252_v2, %v1048_v3  ;;  %v1014_v12 = vld [vmem:[%s1548_s30 + $0x48] sm:$0xf] }
  0x6d   : > { %748 = vmatpush.bf16.msra.mxu2 %v1111_v46  ;;  %v1247_v8 = vld [vmem:[%s1548_s30 + $0x5c] sm:$0xf0]  ;;  %v1008_v11 = vld [vmem:[%s1548_s30 + $0x60] sm:$0xf0]  ;;  %v1248_v13 = vld [vmem:[%s1548_s30 + $0x64] sm:$0xf0] }
  0x6e   : > { %762 = vmatpush.bf16.msra.mxu3 %v1115_v50  ;;  %v1244_v14 = vld [vmem:[%s1548_s30 + $0x4c] sm:$0xf]  ;;  %v1007_v16 = vor.u32 %v1247_v8, %v1006_v7  ;;  %v974_v17 = vld [vmem:[%s1548_s30] sm:$0xf]  ;;  %v1235_v19 = vld [vmem:[%s1548_s30 + $0x4] sm:$0xf]  ;;  %v1011_v20 = vor.u32 %v1243_v9, %v1008_v11  ;;  %v1015_v21 = vor.u32 %v1248_v13, %v1014_v12 }
  0x6f   : > { %v1016_v15 = vld [vmem:[%s1548_s30 + $0x68] sm:$0xf0]  ;;  %v1239_v18 = vld [vmem:[%s1548_s30 + $0x1c] sm:$0xf0]  ;;  %v976_v22 = vld [vmem:[%s1548_s30 + $0x20] sm:$0xf0] }
  0x70   : > { %721 = vmatpush.bf16.msra.mxu0 %v1071_v56  ;;  %735 = vmatpush.bf16.msra.mxu1 %v1075_v57  ;;  %v982_v23 = vld [vmem:[%s1548_s30 + $0x8] sm:$0xf]  ;;  %v1019_v25 = vor.u32 %v1244_v14, %v1016_v15  ;;  %v1236_v26 = vld [vmem:[%s1548_s30 + $0xc] sm:$0xf]  ;;  %v1214_v28 = vld [vmem:[%s1548_s30 + $0x1d0] sm:$0xf]  ;;  %v975_v32 = vor.u32 %v1239_v18, %v974_v17  ;;  %v979_v36 = vor.u32 %v1235_v19, %v976_v22 }
  0x71   : > { %749 = vmatpush.bf16.msra.mxu2 %v1079_v58  ;;  %v1240_v24 = vld [vmem:[%s1548_s30 + $0x24] sm:$0xf0]  ;;  %v984_v27 = vld [vmem:[%s1548_s30 + $0x28] sm:$0xf0]  ;;  %v1297_v29 = vld [vmem:[%s1548_s30 + $0x1ec] sm:$0xf0] }
  0x72   : > { %763 = vmatpush.bf16.msra.mxu3 %v1083_v62  ;;  %v1293_v30 = vld [vmem:[%s1548_s30 + $0x1d4] sm:$0xf]  ;;  %v1222_v33 = vld [vmem:[%s1548_s30 + $0x1d8] sm:$0xf]  ;;  %v1294_v35 = vld [vmem:[%s1548_s30 + $0x1dc] sm:$0xf]  ;;  %v983_v37 = vor.u32 %v1240_v24, %v982_v23  ;;  %v987_v41 = vor.u32 %v1236_v26, %v984_v27  ;;  %v1215_v42 = vor.u32 %v1297_v29, %v1214_v28 }
  0x73   : > { %v1216_v31 = vld [vmem:[%s1548_s30 + $0x1f0] sm:$0xf0]  ;;  %v1298_v34 = vld [vmem:[%s1548_s30 + $0x1f4] sm:$0xf0]  ;;  %v1224_v38 = vld [vmem:[%s1548_s30 + $0x1f8] sm:$0xf0] }
  0x74   : > { %722 = vmatpush.bf16.msra.mxu0 %v1039_v4  ;;  %736 = vmatpush.bf16.msra.mxu1 %v1043_v5  ;;  %v970_v39 = vld [vmem:[%s1753_s0] sm:$0xf]  ;;  %v1234_v40 = vld [vmem:[%s1753_s0] sm:$0x30]  ;;  %v1219_v43 = vor.u32 %v1293_v30, %v1216_v31  ;;  %v1223_v44 = vor.u32 %v1298_v34, %v1222_v33  ;;  %v1182_v45 = vld [vmem:[%s1548_s30 + $0x190] sm:$0xf]  ;;  %v1227_v48 = vor.u32 %v1294_v35, %v1224_v38 }
  0x75   : > { %750 = vmatpush.bf16.msra.mxu2 %v1047_v6  ;;  %v1289_v46 = vld [vmem:[%s1548_s30 + $0x1ac] sm:$0xf0]  ;;  %v1285_v47 = vld [vmem:[%s1548_s30 + $0x194] sm:$0xf]  ;;  %v1190_v50 = vld [vmem:[%s1548_s30 + $0x198] sm:$0xf]  ;;  %v1634_v52 = vor.u32 %v1234_v40, %v970_v39 }
  0x76   : > { %764 = vmatpush.bf16.msra.mxu3 %v1051_v10  ;;  %v1184_v49 = vld [vmem:[%s1548_s30 + $0x1b0] sm:$0xf0]  ;;  %v1290_v51 = vld [vmem:[%s1548_s30 + $0x1b4] sm:$0xf0]  ;;  %v1286_v53 = vld [vmem:[%s1548_s30 + $0x19c] sm:$0xf]  ;;  %v1183_v55 = vor.u32 %v1289_v46, %v1182_v45 }
  0x77   : > { %v1192_v54 = vld [vmem:[%s1548_s30 + $0x1b8] sm:$0xf0]  ;;  %v1187_v56 = vor.u32 %v1285_v47, %v1184_v49  ;;  %v1191_v57 = vor.u32 %v1290_v51, %v1190_v50  ;;  %v1150_v58 = vld [vmem:[%s1548_s30 + $0x150] sm:$0xf]  ;;  %v1277_v60 = vld [vmem:[%s1548_s30 + $0x154] sm:$0xf] }
  0x78   : > { %723 = vmatpush.bf16.msra.mxu0 %v1007_v16  ;;  %737 = vmatpush.bf16.msra.mxu1 %v1011_v20  ;;  %v1281_v59 = vld [vmem:[%s1548_s30 + $0x16c] sm:$0xf0]  ;;  %v1195_v61 = vor.u32 %v1286_v53, %v1192_v54  ;;  %v1152_v62 = vld [vmem:[%s1548_s30 + $0x170] sm:$0xf0]  ;;  %v1158_v63 = vld [vmem:[%s1548_s30 + $0x158] sm:$0xf] }
  0x79   : > { %751 = vmatpush.bf16.msra.mxu2 %v1015_v21  ;;  %v1282_v0 = vld [vmem:[%s1548_s30 + $0x174] sm:$0xf0]  ;;  %v1278_v1 = vld [vmem:[%s1548_s30 + $0x15c] sm:$0xf]  ;;  %v1151_v3 = vor.u32 %v1281_v59, %v1150_v58  ;;  %v1118_v4 = vld [vmem:[%s1548_s30 + $0x110] sm:$0xf]  ;;  %v1155_v5 = vor.u32 %v1277_v60, %v1152_v62 }
  0x7a   : > { %765 = vmatpush.bf16.msra.mxu3 %v1019_v25  ;;  %v1160_v2 = vld [vmem:[%s1548_s30 + $0x178] sm:$0xf0]  ;;  %v1159_v6 = vor.u32 %v1282_v0, %v1158_v63  ;;  %v1273_v7 = vld [vmem:[%s1548_s30 + $0x12c] sm:$0xf0]  ;;  %v1269_v8 = vld [vmem:[%s1548_s30 + $0x114] sm:$0xf] }
  0x7b   : > { %v379_v9 = vld [vmem:[%s1755_s2] sm:$0xff]  ;;  %v1163_v10 = vor.u32 %v1278_v1, %v1160_v2  ;;  %v1120_v11 = vld [vmem:[%s1548_s30 + $0x130] sm:$0xf0]  ;;  %v1126_v12 = vld [vmem:[%s1548_s30 + $0x118] sm:$0xf]  ;;  %v1350_v14 = vmov 0   ;;  %v1119_v17 = vor.u32 %v1273_v7, %v1118_v4 }
  0x7c   : > { %724 = vmatpush.bf16.msra.mxu0 %v975_v32  ;;  %738 = vmatpush.bf16.msra.mxu1 %v979_v36  ;;  %v1274_v13 = vld [vmem:[%s1548_s30 + $0x134] sm:$0xf0]  ;;  %v1270_v15 = vld [vmem:[%s1548_s30 + $0x11c] sm:$0xf]  ;;  %v1123_v18 = vor.u32 %v1269_v8, %v1120_v11  ;;  %v1086_v20 = vld [vmem:[%s1548_s30 + $0xd0] sm:$0xf] }
  0x7d   : > { %752 = vmatpush.bf16.msra.mxu2 %v983_v37  ;;  %1325 = vset.pattern.permute.xlu0 %v1350_v14  ;;  %v1128_v16 = vld [vmem:[%s1548_s30 + $0x138] sm:$0xf0]  ;;  %v1127_v19 = vor.u32 %v1274_v13, %v1126_v12  ;;  %v1265_v21 = vld [vmem:[%s1548_s30 + $0xec] sm:$0xf0]  ;;  %v1261_v22 = vld [vmem:[%s1548_s30 + $0xd4] sm:$0xf] }
  0x7e   : > { %766 = vmatpush.bf16.msra.mxu3 %v987_v41  ;;  %383 = vperm.xlu0 %1325, %v379_v9   ;;  %v1131_v23 = vor.u32 %v1270_v15, %v1128_v16  ;;  %v1088_v24 = vld [vmem:[%s1548_s30 + $0xf0] sm:$0xf0]  ;;  %v1094_v25 = vld [vmem:[%s1548_s30 + $0xd8] sm:$0xf]  ;;  %v1262_v27 = vld [vmem:[%s1548_s30 + $0xdc] sm:$0xf]  ;;  %v1087_v29 = vor.u32 %v1265_v21, %v1086_v20 }
  0x7f   : > { %725 = vmatmul.bf16.vlgmr.msra.gmra.mxu0 %v1634_v52  ;;  %739 = vmatmul.bf16.vlgmr.msra.gmra.mxu1 %v1634_v52  ;;  %v1266_v26 = vld [vmem:[%s1548_s30 + $0xf4] sm:$0xf0]  ;;  %v1096_v28 = vld [vmem:[%s1548_s30 + $0xf8] sm:$0xf0]  ;;  %v380_v30 = vld [vmem:[%s1755_s2 + $0x8] sm:$0xf]  ;;  %v1091_v31 = vor.u32 %v1261_v22, %v1088_v24 }
  0x80   : > { %773 = vmatpush.bf16.msrb.mxu0 %v1215_v42  ;;  %787 = vmatpush.bf16.msrb.mxu1 %v1219_v43  ;;  %v1095_v32 = vor.u32 %v1266_v26, %v1094_v25  ;;  %v1054_v33 = vld [vmem:[%s1548_s30 + $0x90] sm:$0xf]  ;;  %v1253_v35 = vld [vmem:[%s1548_s30 + $0x94] sm:$0xf]  ;;  %v1099_v36 = vor.u32 %v1262_v27, %v1096_v28  ;;  %v1062_v38 = vld [vmem:[%s1548_s30 + $0x98] sm:$0xf] }
  0x81   : > { %801 = vmatpush.bf16.msrb.mxu2 %v1223_v44  ;;  %767 = vmatmul.bf16.vlgmr.msra.gmra.mxu3 %v1634_v52  ;;  %v1257_v34 = vld [vmem:[%s1548_s30 + $0xac] sm:$0xf0]  ;;  %v1056_v37 = vld [vmem:[%s1548_s30 + $0xb0] sm:$0xf0]  ;;  %v1258_v39 = vld [vmem:[%s1548_s30 + $0xb4] sm:$0xf0] }
  0x82   : > { %815 = vmatpush.bf16.msrb.mxu3 %v1227_v48  ;;  %753 = vmatmul.bf16.vlgmr.msra.gmra.mxu2 %v1634_v52  ;;  %v1254_v40 = vld [vmem:[%s1548_s30 + $0x9c] sm:$0xf]  ;;  %v1055_v42 = vor.u32 %v1257_v34, %v1054_v33  ;;  %v1059_v43 = vor.u32 %v1253_v35, %v1056_v37  ;;  %v1063_v44 = vor.u32 %v1258_v39, %v1062_v38  ;;  %v1022_v45 = vld [vmem:[%s1548_s30 + $0x50] sm:$0xf]  ;;  %v1245_v47 = vld [vmem:[%s1548_s30 + $0x54] sm:$0xf] }
  0x83   : > { %v1064_v41 = vld [vmem:[%s1548_s30 + $0xb8] sm:$0xf0]  ;;  %v1249_v46 = vld [vmem:[%s1548_s30 + $0x6c] sm:$0xf0]  ;;  %v1024_v49 = vld [vmem:[%s1548_s30 + $0x70] sm:$0xf0] }
  0x84   : > { %774 = vmatpush.bf16.msrb.mxu0 %v1183_v55  ;;  %788 = vmatpush.bf16.msrb.mxu1 %v1187_v56  ;;  %v1067_v48 = vor.u32 %v1254_v40, %v1064_v41  ;;  %v1030_v50 = vld [vmem:[%s1548_s30 + $0x58] sm:$0xf]  ;;  %v1246_v53 = vld [vmem:[%s1548_s30 + $0x5c] sm:$0xf]  ;;  %v1023_v55 = vor.u32 %v1249_v46, %v1022_v45  ;;  %v1027_v56 = vor.u32 %v1245_v47, %v1024_v49  ;;  %v990_v58 = vld [vmem:[%s1548_s30 + $0x10] sm:$0xf] }
  0x85   : > { %802 = vmatpush.bf16.msrb.mxu2 %v1191_v57  ;;  %v1250_v51 = vld [vmem:[%s1548_s30 + $0x74] sm:$0xf0]  ;;  %v1032_v54 = vld [vmem:[%s1548_s30 + $0x78] sm:$0xf0]  ;;  %v1241_v59 = vld [vmem:[%s1548_s30 + $0x2c] sm:$0xf0] }
  0x86   : > { %816 = vmatpush.bf16.msrb.mxu3 %v1195_v61  ;;  %388 = vperm.xlu0 %1325, %v380_v30   ;;  %v1031_v57 = vor.u32 %v1250_v51, %v1030_v50  ;;  %v1237_v60 = vld [vmem:[%s1548_s30 + $0x14] sm:$0xf]  ;;  %v1035_v61 = vor.u32 %v1246_v53, %v1032_v54  ;;  %v998_v63 = vld [vmem:[%s1548_s30 + $0x18] sm:$0xf]  ;;  %v1238_v1 = vld [vmem:[%s1548_s30 + $0x1c] sm:$0xf] }
  0x87   : > { %v992_v62 = vld [vmem:[%s1548_s30 + $0x30] sm:$0xf0]  ;;  %v1242_v0 = vld [vmem:[%s1548_s30 + $0x34] sm:$0xf0]  ;;  %v1000_v2 = vld [vmem:[%s1548_s30 + $0x38] sm:$0xf0] }
  0x88   : > { %775 = vmatpush.bf16.msrb.mxu0 %v1151_v3  ;;  %789 = vmatpush.bf16.msrb.mxu1 %v1155_v5  ;;  %v991_v3 = vor.u32 %v1241_v59, %v990_v58  ;;  %v995_v4 = vor.u32 %v1237_v60, %v992_v62  ;;  %v999_v5 = vor.u32 %v1242_v0, %v998_v63  ;;  %s1299_s12 = sshll.u32 (%p1401_p5), %s958_s15, 6 }
  0x89   : > { %803 = vmatpush.bf16.msrb.mxu2 %v1159_v6  ;;  %v1003_v6 = vor.u32 %v1238_v1, %v1000_v2  ;;  %s854_s20 = scalar_lea.vmem (%p1401_p5), %s1756_s3, %s1299_s12 }
  0x8a   : > { %817 = vmatpush.bf16.msrb.mxu3 %v1163_v10 }
  0x8c   : > { %776 = vmatpush.bf16.msrb.mxu0 %v1119_v17  ;;  %790 = vmatpush.bf16.msrb.mxu1 %v1123_v18 }
  0x8d   : > { %804 = vmatpush.bf16.msrb.mxu2 %v1127_v19 }
  0x8e   : > { %818 = vmatpush.bf16.msrb.mxu3 %v1131_v23 }
  0x90   : > { %777 = vmatpush.bf16.msrb.mxu0 %v1087_v29  ;;  %791 = vmatpush.bf16.msrb.mxu1 %v1091_v31 }
  0x91   : > { %805 = vmatpush.bf16.msrb.mxu2 %v1095_v32 }
  0x92   : > { %819 = vmatpush.bf16.msrb.mxu3 %v1099_v36 }
  0x94   : > { %778 = vmatpush.bf16.msrb.mxu0 %v1055_v42  ;;  %792 = vmatpush.bf16.msrb.mxu1 %v1059_v43 }
  0x95   : > { %806 = vmatpush.bf16.msrb.mxu2 %v1063_v44 }
  0x96   : > { %820 = vmatpush.bf16.msrb.mxu3 %v1067_v48 }
  0x98   : > { %779 = vmatpush.bf16.msrb.mxu0 %v1023_v55  ;;  %793 = vmatpush.bf16.msrb.mxu1 %v1027_v56 }
  0x99   : > { %807 = vmatpush.bf16.msrb.mxu2 %v1031_v57 }
  0x9a   : > { %821 = vmatpush.bf16.msrb.mxu3 %v1035_v61 }
  0x9c   : > { %780 = vmatpush.bf16.msrb.mxu0 %v991_v3  ;;  %794 = vmatpush.bf16.msrb.mxu1 %v995_v4 }
  0x9d   : > { %808 = vmatpush.bf16.msrb.mxu2 %v999_v5 }
  0x9e   : > { %822 = vmatpush.bf16.msrb.mxu3 %v1003_v6 }
  0x9f   : > { %781 = vmatmul.bf16.vlgmr.msrb.gmra.mxu0 %v1634_v52  ;;  %795 = vmatmul.bf16.vlgmr.msrb.gmra.mxu1 %v1634_v52 }
  0xa0   : > { %809 = vmatmul.bf16.vlgmr.msrb.gmra.mxu2 %v1634_v52 }
  0xa1   : > { %823 = vmatmul.bf16.vlgmr.msrb.gmra.mxu3 %v1634_v52 }
  0xf0   : > { %v384_v7 = vpop.permute.xlu0 %383 }
  0xf8   : > { %v389_v14 = vpop.permute.xlu0 %388 }
  0xfc   : > { %v726_v8 = vpop.f32.mrf.mxu0  ;;  %v740_v10 = vpop.f32.mrf.mxu1 }
  0xfd   : > { %v727_v9 = vadd.f32 %v726_v8, %v384_v7  ;;  %v741_v11 = vadd.f32 %v740_v10, %v384_v7 }
  0xff   : > { %829 = vst [vmem:[%s1702_s18] sm:$0xff] %v727_v9 }
 0x100   : > { %830 = vst [vmem:[%s1702_s18 + $0x8] sm:$0xff] %v741_v11 }
 0x104   : > { %v768_v52 = vpop.f32.mrf.mxu3  ;;  %v728_v16 = vpop.f32.mrf.mxu0 }
 0x105   : > { %v754_v12 = vpop.f32.mrf.mxu2  ;;  %v769_v15 = vadd.f32 %v768_v52, %v384_v7  ;;  %v729_v17 = vadd.f32 %v728_v16, %v389_v14  ;;  %v742_v18 = vpop.f32.mrf.mxu1 }
 0x106   : > { %v755_v13 = vadd.f32 %v754_v12, %v384_v7  ;;  %v743_v19 = vadd.f32 %v742_v18, %v389_v14  ;;  %v867_v40 = vld [vmem:[%s1702_s18] sm:$0xff] (%p1401_p5) }
 0x107   : > { %832 = vst [vmem:[%s1702_s18 + $0x18] sm:$0xff] %v769_v15  ;;  %v869_v41 = vld [vmem:[%s1702_s18 + $0x8] sm:$0xff] (%p1401_p5) }
 0x108   : > { %831 = vst [vmem:[%s1702_s18 + $0x10] sm:$0xff] %v755_v13 }
 0x109   : > { %837 = vst [vmem:[%s1702_s18 + $0x40] sm:$0xf] %v729_v17 }
 0x10a   : > { %838 = vst [vmem:[%s1702_s18 + $0x48] sm:$0xf] %v743_v19 }
 0x10b   : > { %868 = vst [vmem:[%s854_s20] sm:$0xff] (%p1401_p5), %v867_v40 }
 0x10c   : > { %v770_v22 = vpop.f32.mrf.mxu3  ;;  %870 = vst [vmem:[%s854_s20 + $0x8] sm:$0xff] (%p1401_p5), %v869_v41 }
 0x10d   : > { %v756_v20 = vpop.f32.mrf.mxu2  ;;  %v771_v23 = vadd.f32 %v770_v22, %v389_v14 }
 0x10e   : > { %v757_v21 = vadd.f32 %v756_v20, %v389_v14  ;;  %v873_v43 = vld [vmem:[%s1702_s18 + $0x18] sm:$0xff] (%p1401_p5) }
 0x10f   : > { %840 = vst [vmem:[%s1702_s18 + $0x58] sm:$0xf] %v771_v23  ;;  %v871_v42 = vld [vmem:[%s1702_s18 + $0x10] sm:$0xff] (%p1401_p5) }
 0x110   : > { %839 = vst [vmem:[%s1702_s18 + $0x50] sm:$0xf] %v757_v21  ;;  %v883_v48 = vld [vmem:[%s1702_s18 + $0x40] sm:$0xff] (%p1401_p5) }
 0x111   : > { %872 = vst [vmem:[%s854_s20 + $0x10] sm:$0xff] (%p1401_p5), %v871_v42  ;;  %v885_v49 = vld [vmem:[%s1702_s18 + $0x48] sm:$0xff] (%p1401_p5) }
 0x112   : > { %874 = vst [vmem:[%s854_s20 + $0x18] sm:$0xff] (%p1401_p5), %v873_v43 }
 0x113   : > { %884 = vst [vmem:[%s854_s20 + $0x80] sm:$0xff] (%p1401_p5), %v883_v48 }
 0x114   : > { %886 = vst [vmem:[%s854_s20 + $0x88] sm:$0xff] (%p1401_p5), %v885_v49 }
 0x116   : > { %v889_v51 = vld [vmem:[%s1702_s18 + $0x58] sm:$0xff] (%p1401_p5) }
 0x117   : > { %v887_v50 = vld [vmem:[%s1702_s18 + $0x50] sm:$0xff] (%p1401_p5)  ;;  %890 = vst [vmem:[%s854_s20 + $0x98] sm:$0xff] (%p1401_p5), %v889_v51 }
 0x118   : > { %888 = vst [vmem:[%s854_s20 + $0x90] sm:$0xff] (%p1401_p5), %v887_v50 }
 0x11c   : > { %v782_v24 = vpop.f32.mrf.mxu0  ;;  %v796_v26 = vpop.f32.mrf.mxu1 }
 0x11d   : > { %v783_v25 = vadd.f32 %v782_v24, %v384_v7  ;;  %v797_v27 = vadd.f32 %v796_v26, %v384_v7 }
 0x11f   : > { %833 = vst [vmem:[%s1702_s18 + $0x20] sm:$0xff] %v783_v25 }
 0x120   : > { %834 = vst [vmem:[%s1702_s18 + $0x28] sm:$0xff] %v797_v27 }
 0x123   : > { %v810_v28 = vpop.f32.mrf.mxu2 }
 0x124   : > { %v811_v29 = vadd.f32 %v810_v28, %v384_v7  ;;  %v824_v30 = vpop.f32.mrf.mxu3  ;;  %v784_v31 = vpop.f32.mrf.mxu0 }
 0x125   : > { %v825_v32 = vadd.f32 %v824_v30, %v384_v7  ;;  %v785_v33 = vadd.f32 %v784_v31, %v389_v14  ;;  %v798_v34 = vpop.f32.mrf.mxu1 }
 0x126   : > { %835 = vst [vmem:[%s1702_s18 + $0x30] sm:$0xff] %v811_v29  ;;  %v799_v35 = vadd.f32 %v798_v34, %v389_v14  ;;  %v875_v44 = vld [vmem:[%s1702_s18 + $0x20] sm:$0xff] (%p1401_p5) }
 0x127   : > { %836 = vst [vmem:[%s1702_s18 + $0x38] sm:$0xff] %v825_v32  ;;  %v877_v45 = vld [vmem:[%s1702_s18 + $0x28] sm:$0xff] (%p1401_p5) }
 0x128   : > { %841 = vst [vmem:[%s1702_s18 + $0x60] sm:$0xf] %v785_v33 }
 0x129   : > { %842 = vst [vmem:[%s1702_s18 + $0x68] sm:$0xf] %v799_v35 }
 0x12a   : > { %876 = vst [vmem:[%s854_s20 + $0x20] sm:$0xff] (%p1401_p5), %v875_v44 }
 0x12b   : > { %v812_v36 = vpop.f32.mrf.mxu2  ;;  %851 = sbr.rel (!%p1401_p5) target bundleno = 312 (0x138), region = 59  ;;  %878 = vst [vmem:[%s854_s20 + $0x28] sm:$0xff] (%p1401_p5), %v877_v45 }
 0x12c   : > { %v813_v37 = vadd.f32 %v812_v36, %v389_v14  ;;  %v826_v38 = vpop.f32.mrf.mxu3 }
 0x12d   : > { %v827_v39 = vadd.f32 %v826_v38, %v389_v14  ;;  %v879_v46 = vld [vmem:[%s1702_s18 + $0x30] sm:$0xff] (%p1401_p5) }
 0x12e   : > { %843 = vst [vmem:[%s1702_s18 + $0x70] sm:$0xf] %v813_v37  ;;  %v881_v47 = vld [vmem:[%s1702_s18 + $0x38] sm:$0xff] (%p1401_p5) }
 0x12f   : > { %844 = vst [vmem:[%s1702_s18 + $0x78] sm:$0xf] %v827_v39  ;;  %v891_v53 = vld [vmem:[%s1702_s18 + $0x60] sm:$0xff] (%p1401_p5) }
 0x130   : > { %880 = vst [vmem:[%s854_s20 + $0x30] sm:$0xff] %v879_v46  ;;  %v893_v54 = vld [vmem:[%s1702_s18 + $0x68] sm:$0xff] }
 0x131   : > { %882 = vst [vmem:[%s854_s20 + $0x38] sm:$0xff] %v881_v47 }
 0x132   : > { %892 = vst [vmem:[%s854_s20 + $0xa0] sm:$0xff] %v891_v53 }
 0x133   : > { %894 = vst [vmem:[%s854_s20 + $0xa8] sm:$0xff] %v893_v54 }
 0x135   : > { %v895_v55 = vld [vmem:[%s1702_s18 + $0x70] sm:$0xff] }
 0x136   : > { %v897_v56 = vld [vmem:[%s1702_s18 + $0x78] sm:$0xff]  ;;  %896 = vst [vmem:[%s854_s20 + $0xb0] sm:$0xff] %v895_v55 }
 0x137   : > { %898 = vst [vmem:[%s854_s20 + $0xb8] sm:$0xff] %v897_v56 }
 0x138 PF: > { %p10_p10 = scmp.ge.s32.totalorder %s1388_s16, 4   ;;  %s1758_s12 = smov %s1344_s13 }
 0x139   : > { %s1759_s13 = smov %s1399_s19  ;;  %s1760_s14 = smov %s1388_s16 }
 0x13a   :  { %12 = sbr.rel (!%p10_p10) target bundleno = 2 (0x2), region = 113 }

</bundles_post_ra>
